<compile_context>
chip_gen: v5e
topology: v5e:2x2
jax: 0.10.0
libtpu: 0.0.40
codegen_flags: <defaults>
</compile_context>

<pallas_src>
import functools

import numpy as np
import jax
import jax.numpy as jnp
from jax import lax
from jax.experimental import pallas as pl
from jax.experimental.pallas import tpu as pltpu


# ----------------------------------------------------------------------------
# helpers
# ----------------------------------------------------------------------------
def bilinear_matrix(out_size, in_size):
    """PyTorch F.interpolate(mode='bilinear', align_corners=False) weights."""
    A = np.zeros((out_size, in_size), np.float32)
    scale = in_size / out_size
    for i in range(out_size):
        src = max((i + 0.5) * scale - 0.5, 0.0)
        i0 = min(int(np.floor(src)), in_size - 1)
        i1 = min(i0 + 1, in_size - 1)
        lam = src - i0
        A[i, i0] += 1.0 - lam
        A[i, i1] += lam
    return A


def _pick_tile(L, max_tile=8192):
    """Largest lane-dense tile (multiple of 128) dividing L, else the full L."""
    for t in (max_tile, 4096, 2048, 1024, 512, 256, 128):
        if L >= t and L % t == 0:
            return t
    return L


def _pick_row_tile(H, W, max_elems=8192, max_rows=32):
    """Rows per gate-kernel step: rt | H, lane tile rt*W 128-aligned (or full)."""
    for rt in range(min(H, max_rows), 0, -1):
        if H % rt:
            continue
        t = rt * W
        if t > max_elems:
            continue
        if (rt % 8 == 0 or rt == H) and (t % 128 == 0 or rt == H):
            return rt
    return H          # whole image per step (block == full dims, always legal)


# ----------------------------------------------------------------------------
# conv1 (1x1, channel-major, lane-dense over H*W)
# ----------------------------------------------------------------------------
def _conv1x1_kernel(x_ref, w_ref, b_ref, o_ref):
    y = jnp.dot(w_ref[...], x_ref[...], preferred_element_type=jnp.float32)
    o_ref[...] = (y + b_ref[...]).astype(o_ref.dtype)


def conv1x1_cm(x_cm, w, b):
    """Channel-major 1x1 conv: (N, Cin, L) -> (N, Cout, L)."""
    N, Cin, L = x_cm.shape
    Cout = w.shape[0]
    t = _pick_tile(L)
    return pl.pallas_call(
        _conv1x1_kernel,
        out_shape=jax.ShapeDtypeStruct((N, Cout, L), jnp.float32),
        grid=(N, L // t),
        in_specs=[
            pl.BlockSpec((None, Cin, t), lambda n, i: (n, 0, i)),
            pl.BlockSpec((Cout, Cin), lambda n, i: (0, 0)),
            pl.BlockSpec((Cout, 1), lambda n, i: (0, 0)),
        ],
        out_specs=pl.BlockSpec((None, Cout, t), lambda n, i: (n, 0, i)),
        compiler_params=pltpu.CompilerParams(
            dimension_semantics=("parallel", "parallel"),
            vmem_limit_bytes=32 * 1024 * 1024),
    )(x_cm, w, b)


# ----------------------------------------------------------------------------
# fused low-resolution branch (one pallas_call per image, all scratch in VMEM)
#   conv2 (3x3/s2/valid) -> maxpool 7x7/s3 -> relu(conv_max) -> relu(conv3)
#   -> conv3_ -> xw = c3 @ Aw^T      output: (hin, f, W)
# ----------------------------------------------------------------------------
def _lowres_kernel(c1_ref, w2_ref, b2_ref, s_ref, wch_ref, bch_ref, awt_ref,
                   o_ref, c2_scr, pad_a, pad_b, *, Ho2, Wo2, hp, wp):
    fch = c1_ref.shape[0]

    # ---- conv2: 3x3, stride 2, VALID (channel-major, per output row) ------
    b2 = b2_ref[...]

    def conv2_row(i, carry):
        acc = jnp.zeros((fch, Wo2), jnp.float32)
        for kh in range(3):
            xrow = c1_ref[:, 2 * i + kh, :]                       # (f, W)
            for kw in range(3):
                # exact 0/1 column selection: picks cols 2j + kw
                sel = jnp.dot(xrow, s_ref[kw],
                              preferred_element_type=jnp.float32)  # (f, Wo2)
                acc = acc + jnp.dot(w2_ref[kh, kw], sel,
                                    preferred_element_type=jnp.float32)
        c2_scr[:, i, :] = acc + b2
        return carry

    lax.fori_loop(0, Ho2, conv2_row, 0)

    # ---- 7x7 / stride-3 max pool -> zero-padded pad_a interior -------------
    pad_a[...] = jnp.zeros(pad_a.shape, jnp.float32)
    pad_b[...] = jnp.zeros(pad_b.shape, jnp.float32)

    def pool_row(i, carry):
        hmax = c2_scr[:, 3 * i, :]                                # (f, Wo2)
        for k in range(1, 7):
            hmax = jnp.maximum(hmax, c2_scr[:, 3 * i + k, :])
        for j in range(wp):
            m = jnp.max(hmax[:, 3 * j:3 * j + 7], axis=1, keepdims=True)
            pad_a[:, i + 1, pl.ds(1 + j, 1)] = m
        return carry

    lax.fori_loop(0, hp, pool_row, 0)

    # ---- relu(conv_max) then relu(conv3): 3x3 / stride 1 / pad 1 -----------
    def conv_chain(layer, src, dst):
        b = bch_ref[layer]

        def row(i, carry):
            acc = b
            for kh in range(3):
                for kw in range(3):
                    acc = acc + jnp.dot(wch_ref[layer, kh, kw],
                                        src[:, i + kh, pl.ds(kw, wp)],
                                        preferred_element_type=jnp.float32)
            dst[:, i + 1, pl.ds(1, wp)] = jnp.maximum(acc, 0.0)
            return carry

        lax.fori_loop(0, hp, row, 0)

    conv_chain(0, pad_a, pad_b)           # conv_max
    conv_chain(1, pad_b, pad_a)           # conv3

    # ---- conv3_ (no act) fused with the W-direction bilinear matmul --------
    awt = awt_ref[...]
    b3b = bch_ref[2]

    def final_row(i, carry):
        acc = b3b
        for kh in range(3):
            for kw in range(3):
                acc = acc + jnp.dot(wch_ref[2, kh, kw],
                                    pad_a[:, i + kh, pl.ds(kw, wp)],
                                    preferred_element_type=jnp.float32)
        # xw[p=i, c, :] = c3[c, i, :] @ Aw^T
        o_ref[i] = jnp.dot(acc, awt, preferred_element_type=jnp.float32)
        return carry

    lax.fori_loop(0, hp, final_row, 0)


def lowres_branch(c1_4d, w2, b2, S, wch, bch, awt, Ho2, Wo2, hp, wp):
    N, f, H, W = c1_4d.shape
    kern = functools.partial(_lowres_kernel, Ho2=Ho2, Wo2=Wo2, hp=hp, wp=wp)
    return pl.pallas_call(
        kern,
        out_shape=jax.ShapeDtypeStruct((N, hp, f, W), jnp.float32),
        grid=(N,),
        in_specs=[
            pl.BlockSpec((None, f, H, W), lambda n: (n, 0, 0, 0)),
            pl.BlockSpec((3, 3, f, f), lambda n: (0, 0, 0, 0)),
            pl.BlockSpec((f, 1), lambda n: (0, 0)),
            pl.BlockSpec((3, W, Wo2), lambda n: (0, 0, 0)),
            pl.BlockSpec((3, 3, 3, f, f), lambda n: (0, 0, 0, 0, 0)),
            pl.BlockSpec((3, f, 1), lambda n: (0, 0, 0)),
            pl.BlockSpec((wp, W), lambda n: (0, 0)),
        ],
        out_specs=pl.BlockSpec((None, hp, f, W), lambda n: (n, 0, 0, 0)),
        scratch_shapes=[
            pltpu.VMEM((f, Ho2, Wo2), jnp.float32),
            pltpu.VMEM((f, hp + 2, wp + 2), jnp.float32),
            pltpu.VMEM((f, hp + 2, wp + 2), jnp.float32),
        ],
        compiler_params=pltpu.CompilerParams(
            dimension_semantics=("parallel",),
            vmem_limit_bytes=32 * 1024 * 1024),
    )(c1_4d, w2, b2, S, wch, bch, awt)


# ----------------------------------------------------------------------------
# fused gate kernel (full resolution, channel-major, lane-dense over H*W):
#   c3u rows (H-direction bilinear) + conv_f + conv4 + sigmoid + x * m
# ----------------------------------------------------------------------------
def _gate_kernel(ah_ref, xw_ref, x_ref, c1_ref, wf_ref, bf_ref, w4_ref, b4_ref,
                 o_ref, c3u_scr):
    rt, hin = ah_ref.shape
    W = xw_ref.shape[2]

    # Reconstruct the bilinear-upsampled c3 rows for this row tile in VMEM:
    #   c3u[c, r*W + w] = sum_p Ah[row, p] * xw[p, c, w]
    for r in range(rt):
        acc = ah_ref[r, 0] * xw_ref[0]                            # (f, W)
        for p in range(1, hin):
            acc = acc + ah_ref[r, p] * xw_ref[p]
        c3u_scr[:, r * W:(r + 1) * W] = acc

    # conv_f fused in: cf = wf @ c1_ + bf
    cf = jnp.dot(wf_ref[...], c1_ref[...],
                 preferred_element_type=jnp.float32) + bf_ref[...]
    z = c3u_scr[...] + cf                                         # (f, t)
    c4 = jnp.dot(w4_ref[...], z,
                 preferred_element_type=jnp.float32) + b4_ref[...]
    o_ref[...] = (x_ref[...] * jax.nn.sigmoid(c4)).astype(o_ref.dtype)


def fused_gate(x_flat, c1_flat, xw, ah, wf, bf, w4, b4, H, W):
    N, C, L = x_flat.shape
    f = c1_flat.shape[1]
    hin = xw.shape[1]
    rt = _pick_row_tile(H, W)
    t = rt * W
    return pl.pallas_call(
        _gate_kernel,
        out_shape=jax.ShapeDtypeStruct((N, C, L), jnp.float32),
        grid=(N, H // rt),
        in_specs=[
            pl.BlockSpec((rt, hin), lambda n, i: (i, 0)),
            pl.BlockSpec((None, hin, f, W), lambda n, i: (n, 0, 0, 0)),
            pl.BlockSpec((None, C, t), lambda n, i: (n, 0, i)),
            pl.BlockSpec((None, f, t), lambda n, i: (n, 0, i)),
            pl.BlockSpec((f, f), lambda n, i: (0, 0)),
            pl.BlockSpec((f, 1), lambda n, i: (0, 0)),
            pl.BlockSpec((C, f), lambda n, i: (0, 0)),
            pl.BlockSpec((C, 1), lambda n, i: (0, 0)),
        ],
        out_specs=pl.BlockSpec((None, C, t), lambda n, i: (n, 0, i)),
        scratch_shapes=[pltpu.VMEM((f, t), jnp.float32)],
        compiler_params=pltpu.CompilerParams(
            dimension_semantics=("parallel", "parallel"),
            vmem_limit_bytes=32 * 1024 * 1024),
    )(ah, xw, x_flat, c1_flat, wf, bf, w4, b4)


# ----------------------------------------------------------------------------
# ESA forward (Pallas) and pure-JAX reference
# ----------------------------------------------------------------------------
def esa_forward(x_nchw, params):
    N, C, H, W = x_nchw.shape
    f = C // 4
    assert H >= 15 and W >= 15, "ESA needs H, W >= 15 (pool after stride-2 conv)"
    x = x_nchw.astype(jnp.float32)
    L = H * W
    x_flat = x.reshape(N, C, L)                       # NCHW view, free

    def mat1x1(name):
        w, b = params[name]
        return w[:, :, 0, 0], b.reshape(-1, 1)        # (Cout, Cin), (Cout, 1)

    def taps(name):
        w, b = params[name]
        return jnp.transpose(w, (2, 3, 0, 1)), b.reshape(-1, 1)   # (3,3,O,I)

    w1, b1 = mat1x1("conv1")
    wf, bf = mat1x1("conv_f")
    w4, b4 = mat1x1("conv4")
    w2, b2 = taps("conv2")
    wm, bm = taps("conv_max")
    w3, b3 = taps("conv3")
    w3b, b3b = taps("conv3_")
    wch = jnp.stack([wm, w3, w3b])                    # (3, 3, 3, f, f)
    bch = jnp.stack([bm, b3, b3b])                    # (3, f, 1)

    Ho2 = (H - 3) // 2 + 1
    Wo2 = (W - 3) // 2 + 1
    hp = (Ho2 - 7) // 3 + 1
    wp = (Wo2 - 7) // 3 + 1

    # exact 0/1 column-selection matrices for the stride-2 conv taps
    S = np.zeros((3, W, Wo2), np.float32)
    for k in range(3):
        for j in range(Wo2):
            S[k, 2 * j + k, j] = 1.0
    S = jnp.asarray(S)
    Ah = jnp.asarray(bilinear_matrix(H, hp))          # (H, hp)
    AwT = jnp.asarray(bilinear_matrix(W, wp).T)       # (wp, W)

    # conv1: 1x1, channel-major, lane-dense
    c1_flat = conv1x1_cm(x_flat, w1, b1)              # (N, f, H*W)
    c1_4d = c1_flat.reshape(N, f, H, W)               # metadata only

    # fused low-resolution branch -> xw (N, hp, f, W)
    xw = lowres_branch(c1_4d, w2, b2, S, wch, bch, AwT, Ho2, Wo2, hp, wp)

    # fused: H-upsample + conv_f + conv4 + sigmoid + x * m   (NCHW-flat out)
    out = fused_gate(x_flat, c1_flat, xw, Ah, wf, bf, w4, b4, H, W)
    return out.reshape(N, C, H, W)


def esa_reference(x, params):
    """Pure-JAX (XLA) reference for sanity checking."""
    _, _, H, W = x.shape

    def conv(h, name, stride=1, pad=0):
        w, b = params[name]
        out = lax.conv_general_dilated(
            h, w, (stride, stride), [(pad, pad), (pad, pad)],
            dimension_numbers=("NCHW", "OIHW", "NCHW"))
        return out + b.reshape(1, -1, 1, 1)

    c1_ = conv(x, "conv1")
    c1 = conv(c1_, "conv2", stride=2, pad=0)
    v_max = lax.reduce_window(c1, -jnp.inf, lax.max,
                              (1, 1, 7, 7), (1, 1, 3, 3), "VALID")
    v_range = jax.nn.relu(conv(v_max, "conv_max", pad=1))
    c3 = jax.nn.relu(conv(v_range, "conv3", pad=1))
    c3 = conv(c3, "conv3_", pad=1)
    Ah = jnp.asarray(bilinear_matrix(H, c3.shape[2]))
    Aw = jnp.asarray(bilinear_matrix(W, c3.shape[3]))
    c3 = jnp.einsum("IP,JQ,ncPQ->ncIJ", Ah, Aw, c3)
    cf = conv(c1_, "conv_f")
    c4 = conv(c3 + cf, "conv4")
    return x * jax.nn.sigmoid(c4)


def init_params(key, n_feats):
    f = n_feats // 4
    shapes = {
        "conv1": (f, n_feats, 1, 1),
        "conv_f": (f, f, 1, 1),
        "conv_max": (f, f, 3, 3),
        "conv2": (f, f, 3, 3),
        "conv3": (f, f, 3, 3),
        "conv3_": (f, f, 3, 3),
        "conv4": (n_feats, f, 1, 1),
    }
    params = {}
    keys = jax.random.split(key, 2 * len(shapes))
    for i, (name, shp) in enumerate(shapes.items()):
        fan_in = shp[1] * shp[2] * shp[3]
        w = jax.random.normal(keys[2 * i], shp, jnp.float32) / np.sqrt(fan_in)
        b = 0.1 * jax.random.normal(keys[2 * i + 1], (shp[0],), jnp.float32)
        params[name] = (w, b)
    return params


if __name__ == "__main__":
    key = jax.random.PRNGKey(0)
    kx, kp = jax.random.split(key)
    N, n_feats, H, W = 2, 16, 32, 32          # f = n_feats // 4 = 4
    x = jax.random.normal(kx, (N, n_feats, H, W), jnp.float32)
    params = init_params(kp, n_feats)

    esa_fwd = jax.jit(esa_forward)
    out = jax.block_until_ready(esa_fwd(x, params))
    assert out.shape == x.shape and out.dtype == jnp.float32

    ref = esa_reference(x, params)
    err = float(jnp.max(jnp.abs(out - ref)))
    assert err < 5e-2, f"mismatch vs pure-JAX reference: {err}"
    print("KERNEL_OK")
</pallas_src>

<mosaic_0001>
module attributes {stable_mosaic.version = 11 : i64} {
  func.func @_conv1x1_kernel(%arg0: i32, %arg1: i32, %arg2: memref<1x16x1024xf32, #tpu.memory_space<vmem>>, %arg3: memref<4x16xf32, #tpu.memory_space<vmem>>, %arg4: memref<4x1xf32, #tpu.memory_space<vmem>>, %arg5: memref<1x4x1024xf32, #tpu.memory_space<vmem>>) attributes {dimension_semantics = [#tpu.dimension_semantics<parallel>, #tpu.dimension_semantics<parallel>], iteration_bounds = array<i64: 2, 1>, scalar_prefetch = 0 : i64, scratch_operands = 0 : i64, tpu.core_type = #tpu.core_type<tc>, window_params = [{transform_indices = @transform_0, window_bounds = array<i64: 1, 16, 1024>}, {pipeline_mode = #tpu.pipeline_mode<synchronous>, transform_indices = @transform_1, window_bounds = array<i64: 4, 16>}, {pipeline_mode = #tpu.pipeline_mode<synchronous>, transform_indices = @transform_2, window_bounds = array<i64: 4, 1>}, {transform_indices = @transform_3, window_bounds = array<i64: 1, 4, 1024>}]} {
    %c0 = arith.constant 0 : index
    %c0_0 = arith.constant 0 : index
    %0 = vector.load %arg3[%c0, %c0_0] : memref<4x16xf32, #tpu.memory_space<vmem>>, vector<4x16xf32>
    %c0_1 = arith.constant 0 : index
    %c0_2 = arith.constant 0 : index
    %c0_3 = arith.constant 0 : index
    %1 = vector.load %arg2[%c0_1, %c0_2, %c0_3] : memref<1x16x1024xf32, #tpu.memory_space<vmem>>, vector<1x16x1024xf32>
    %2 = vector.shape_cast %1 : vector<1x16x1024xf32> to vector<16x1024xf32>
    %cst = arith.constant dense<0.000000e+00> : vector<4x1024xf32>
    %3 = tpu.matmul %0, %2, %cst {dimension_numbers = #tpu.dot_dimension_numbers<[1], [0], [0], [1], [0, 0, 1, 1], [], []>} : vector<4x16xf32>, vector<16x1024xf32>, vector<4x1024xf32> -> vector<4x1024xf32>
    %c0_4 = arith.constant 0 : index
    %c0_5 = arith.constant 0 : index
    %4 = vector.load %arg4[%c0_4, %c0_5] : memref<4x1xf32, #tpu.memory_space<vmem>>, vector<4x1xf32>
    %5 = vector.broadcast %4 : vector<4x1xf32> to vector<4x1024xf32>
    %6 = arith.addf %3, %5 : vector<4x1024xf32>
    %c0_6 = arith.constant 0 : index
    %c0_7 = arith.constant 0 : index
    %c0_8 = arith.constant 0 : index
    %7 = vector.load %arg5[%c0_6, %c0_7, %c0_8] : memref<1x4x1024xf32, #tpu.memory_space<vmem>>, vector<1x4x1024xf32>
    %8 = vector.shape_cast %7 : vector<1x4x1024xf32> to vector<4x1024xf32>
    %9 = vector.shape_cast %6 : vector<4x1024xf32> to vector<1x4x1024xf32>
    tpu.vector_store %arg5[%c0_6, %c0_7, %c0_8], %9 {strides = array<i32>} : memref<1x4x1024xf32, #tpu.memory_space<vmem>>, vector<1x4x1024xf32>,
    return
  }
  func.func @transform_0(%arg0: i32, %arg1: i32) -> (i32, i32, i32) {
    %c0_i32 = arith.constant 0 : i32
    %c0_i32_0 = arith.constant 0 : i32
    return %arg0, %c0_i32, %arg1 : i32, i32, i32
  }
  func.func @transform_1(%arg0: i32, %arg1: i32) -> (i32, i32) {
    %c0_i32 = arith.constant 0 : i32
    %c0_i32_0 = arith.constant 0 : i32
    %c0_i32_1 = arith.constant 0 : i32
    return %c0_i32, %c0_i32_0 : i32, i32
  }
  func.func @transform_2(%arg0: i32, %arg1: i32) -> (i32, i32) {
    %c0_i32 = arith.constant 0 : i32
    %c0_i32_0 = arith.constant 0 : i32
    %c0_i32_1 = arith.constant 0 : i32
    return %c0_i32, %c0_i32_0 : i32, i32
  }
  func.func @transform_3(%arg0: i32, %arg1: i32) -> (i32, i32, i32) {
    %c0_i32 = arith.constant 0 : i32
    %c0_i32_0 = arith.constant 0 : i32
    return %arg0, %c0_i32, %arg1 : i32, i32, i32
  }
}

module attributes {stable_mosaic.version = 11 : i64} {
  func.func @_lowres_kernel(%arg0: i32, %arg1: memref<1x4x32x32xf32, #tpu.memory_space<vmem>>, %arg2: memref<3x3x4x4xf32, #tpu.memory_space<vmem>>, %arg3: memref<4x1xf32, #tpu.memory_space<vmem>>, %arg4: memref<3x32x15xf32, #tpu.memory_space<vmem>>, %arg5: memref<3x3x3x4x4xf32, #tpu.memory_space<vmem>>, %arg6: memref<3x4x1xf32, #tpu.memory_space<vmem>>, %arg7: memref<3x32xf32, #tpu.memory_space<vmem>>, %arg8: memref<1x3x4x32xf32, #tpu.memory_space<vmem>>, %arg9: memref<4x15x15xf32, #tpu.memory_space<vmem>>, %arg10: memref<4x5x5xf32, #tpu.memory_space<vmem>>, %arg11: memref<4x5x5xf32, #tpu.memory_space<vmem>>) attributes {dimension_semantics = [#tpu.dimension_semantics<parallel>], iteration_bounds = array<i64: 2>, scalar_prefetch = 0 : i64, scratch_operands = 3 : i64, tpu.core_type = #tpu.core_type<tc>, window_params = [{transform_indices = @transform_0, window_bounds = array<i64: 1, 4, 32, 32>}, {pipeline_mode = #tpu.pipeline_mode<synchronous>, transform_indices = @transform_1, window_bounds = array<i64: 3, 3, 4, 4>}, {pipeline_mode = #tpu.pipeline_mode<synchronous>, transform_indices = @transform_2, window_bounds = array<i64: 4, 1>}, {pipeline_mode = #tpu.pipeline_mode<synchronous>, transform_indices = @transform_3, window_bounds = array<i64: 3, 32, 15>}, {pipeline_mode = #tpu.pipeline_mode<synchronous>, transform_indices = @transform_4, window_bounds = array<i64: 3, 3, 3, 4, 4>}, {pipeline_mode = #tpu.pipeline_mode<synchronous>, transform_indices = @transform_5, window_bounds = array<i64: 3, 4, 1>}, {pipeline_mode = #tpu.pipeline_mode<synchronous>, transform_indices = @transform_6, window_bounds = array<i64: 3, 32>}, {transform_indices = @transform_7, window_bounds = array<i64: 1, 3, 4, 32>}]} {
    %c0 = arith.constant 0 : index
    %c0_0 = arith.constant 0 : index
    %0 = vector.load %arg3[%c0, %c0_0] : memref<4x1xf32, #tpu.memory_space<vmem>>, vector<4x1xf32>
    %c0_i32 = arith.constant 0 : i32
    %c15_i32 = arith.constant 15 : i32
    %1 = arith.addi %c0_i32, %c15_i32 : i32
    %c1_i32 = arith.constant 1 : i32
    scf.for %arg12 = %c0_i32 to %1 step %c1_i32  : i32 {
      %cst_33 = arith.constant 0.000000e+00 : f32
      %17 = vector.broadcast %cst_33 : f32 to vector<4x15xf32>
      %c2_i32 = arith.constant 2 : i32
      %18 = arith.muli %c2_i32, %arg12 : i32
      %c0_i32_34 = arith.constant 0 : i32
      %19 = arith.addi %18, %c0_i32_34 : i32
      %c0_35 = arith.constant 0 : index
      %c0_36 = arith.constant 0 : index
      %20 = arith.index_cast %19 : i32 to index
      %c0_37 = arith.constant 0 : index
      %21 = vector.load %arg1[%c0_35, %c0_36, %20, %c0_37] : memref<1x4x32x32xf32, #tpu.memory_space<vmem>>, vector<1x4x1x32xf32>
      %22 = vector.shape_cast %21 : vector<1x4x1x32xf32> to vector<4x32xf32>
      %c0_38 = arith.constant 0 : index
      %c0_39 = arith.constant 0 : index
      %c0_40 = arith.constant 0 : index
      %23 = vector.load %arg4[%c0_38, %c0_39, %c0_40] : memref<3x32x15xf32, #tpu.memory_space<vmem>>, vector<1x32x15xf32>
      %24 = vector.shape_cast %23 : vector<1x32x15xf32> to vector<32x15xf32>
      %cst_41 = arith.constant dense<0.000000e+00> : vector<4x15xf32>
      %25 = tpu.matmul %22, %24, %cst_41 {dimension_numbers = #tpu.dot_dimension_numbers<[1], [0], [0], [1], [0, 0, 1, 1], [], []>} : vector<4x32xf32>, vector<32x15xf32>, vector<4x15xf32> -> vector<4x15xf32>
      %c0_42 = arith.constant 0 : index
      %c0_43 = arith.constant 0 : index
      %c0_44 = arith.constant 0 : index
      %c0_45 = arith.constant 0 : index
      %26 = vector.load %arg2[%c0_42, %c0_43, %c0_44, %c0_45] : memref<3x3x4x4xf32, #tpu.memory_space<vmem>>, vector<1x1x4x4xf32>
      %27 = vector.shape_cast %26 : vector<1x1x4x4xf32> to vector<4x4xf32>
      %cst_46 = arith.constant dense<0.000000e+00> : vector<4x15xf32>
      %28 = tpu.matmul %27, %25, %cst_46 {dimension_numbers = #tpu.dot_dimension_numbers<[1], [0], [0], [1], [0, 0, 1, 1], [], []>} : vector<4x4xf32>, vector<4x15xf32>, vector<4x15xf32> -> vector<4x15xf32>
      %29 = arith.addf %17, %28 : vector<4x15xf32>
      %c1_47 = arith.constant 1 : index
      %c0_48 = arith.constant 0 : index
      %c0_49 = arith.constant 0 : index
      %30 = vector.load %arg4[%c1_47, %c0_48, %c0_49] : memref<3x32x15xf32, #tpu.memory_space<vmem>>, vector<1x32x15xf32>
      %31 = vector.shape_cast %30 : vector<1x32x15xf32> to vector<32x15xf32>
      %cst_50 = arith.constant dense<0.000000e+00> : vector<4x15xf32>
      %32 = tpu.matmul %22, %31, %cst_50 {dimension_numbers = #tpu.dot_dimension_numbers<[1], [0], [0], [1], [0, 0, 1, 1], [], []>} : vector<4x32xf32>, vector<32x15xf32>, vector<4x15xf32> -> vector<4x15xf32>
      %c0_51 = arith.constant 0 : index
      %c1_52 = arith.constant 1 : index
      %c0_53 = arith.constant 0 : index
      %c0_54 = arith.constant 0 : index
      %33 = vector.load %arg2[%c0_51, %c1_52, %c0_53, %c0_54] : memref<3x3x4x4xf32, #tpu.memory_space<vmem>>, vector<1x1x4x4xf32>
      %34 = vector.shape_cast %33 : vector<1x1x4x4xf32> to vector<4x4xf32>
      %cst_55 = arith.constant dense<0.000000e+00> : vector<4x15xf32>
      %35 = tpu.matmul %34, %32, %cst_55 {dimension_numbers = #tpu.dot_dimension_numbers<[1], [0], [0], [1], [0, 0, 1, 1], [], []>} : vector<4x4xf32>, vector<4x15xf32>, vector<4x15xf32> -> vector<4x15xf32>
      %36 = arith.addf %29, %35 : vector<4x15xf32>
      %c2_56 = arith.constant 2 : index
      %c0_57 = arith.constant 0 : index
      %c0_58 = arith.constant 0 : index
      %37 = vector.load %arg4[%c2_56, %c0_57, %c0_58] : memref<3x32x15xf32, #tpu.memory_space<vmem>>, vector<1x32x15xf32>
      %38 = vector.shape_cast %37 : vector<1x32x15xf32> to vector<32x15xf32>
      %cst_59 = arith.constant dense<0.000000e+00> : vector<4x15xf32>
      %39 = tpu.matmul %22, %38, %cst_59 {dimension_numbers = #tpu.dot_dimension_numbers<[1], [0], [0], [1], [0, 0, 1, 1], [], []>} : vector<4x32xf32>, vector<32x15xf32>, vector<4x15xf32> -> vector<4x15xf32>
      %c0_60 = arith.constant 0 : index
      %c2_61 = arith.constant 2 : index
      %c0_62 = arith.constant 0 : index
      %c0_63 = arith.constant 0 : index
      %40 = vector.load %arg2[%c0_60, %c2_61, %c0_62, %c0_63] : memref<3x3x4x4xf32, #tpu.memory_space<vmem>>, vector<1x1x4x4xf32>
      %41 = vector.shape_cast %40 : vector<1x1x4x4xf32> to vector<4x4xf32>
      %cst_64 = arith.constant dense<0.000000e+00> : vector<4x15xf32>
      %42 = tpu.matmul %41, %39, %cst_64 {dimension_numbers = #tpu.dot_dimension_numbers<[1], [0], [0], [1], [0, 0, 1, 1], [], []>} : vector<4x4xf32>, vector<4x15xf32>, vector<4x15xf32> -> vector<4x15xf32>
      %43 = arith.addf %36, %42 : vector<4x15xf32>
      %c2_i32_65 = arith.constant 2 : i32
      %44 = arith.muli %c2_i32_65, %arg12 : i32
      %c1_i32_66 = arith.constant 1 : i32
      %45 = arith.addi %44, %c1_i32_66 : i32
      %c0_67 = arith.constant 0 : index
      %c0_68 = arith.constant 0 : index
      %46 = arith.index_cast %45 : i32 to index
      %c0_69 = arith.constant 0 : index
      %47 = vector.load %arg1[%c0_67, %c0_68, %46, %c0_69] : memref<1x4x32x32xf32, #tpu.memory_space<vmem>>, vector<1x4x1x32xf32>
      %48 = vector.shape_cast %47 : vector<1x4x1x32xf32> to vector<4x32xf32>
      %c0_70 = arith.constant 0 : index
      %c0_71 = arith.constant 0 : index
      %c0_72 = arith.constant 0 : index
      %49 = vector.load %arg4[%c0_70, %c0_71, %c0_72] : memref<3x32x15xf32, #tpu.memory_space<vmem>>, vector<1x32x15xf32>
      %50 = vector.shape_cast %49 : vector<1x32x15xf32> to vector<32x15xf32>
      %cst_73 = arith.constant dense<0.000000e+00> : vector<4x15xf32>
      %51 = tpu.matmul %48, %50, %cst_73 {dimension_numbers = #tpu.dot_dimension_numbers<[1], [0], [0], [1], [0, 0, 1, 1], [], []>} : vector<4x32xf32>, vector<32x15xf32>, vector<4x15xf32> -> vector<4x15xf32>
      %c1_74 = arith.constant 1 : index
      %c0_75 = arith.constant 0 : index
      %c0_76 = arith.constant 0 : index
      %c0_77 = arith.constant 0 : index
      %52 = vector.load %arg2[%c1_74, %c0_75, %c0_76, %c0_77] : memref<3x3x4x4xf32, #tpu.memory_space<vmem>>, vector<1x1x4x4xf32>
      %53 = vector.shape_cast %52 : vector<1x1x4x4xf32> to vector<4x4xf32>
      %cst_78 = arith.constant dense<0.000000e+00> : vector<4x15xf32>
      %54 = tpu.matmul %53, %51, %cst_78 {dimension_numbers = #tpu.dot_dimension_numbers<[1], [0], [0], [1], [0, 0, 1, 1], [], []>} : vector<4x4xf32>, vector<4x15xf32>, vector<4x15xf32> -> vector<4x15xf32>
      %55 = arith.addf %43, %54 : vector<4x15xf32>
      %c1_79 = arith.constant 1 : index
      %c0_80 = arith.constant 0 : index
      %c0_81 = arith.constant 0 : index
      %56 = vector.load %arg4[%c1_79, %c0_80, %c0_81] : memref<3x32x15xf32, #tpu.memory_space<vmem>>, vector<1x32x15xf32>
      %57 = vector.shape_cast %56 : vector<1x32x15xf32> to vector<32x15xf32>
      %cst_82 = arith.constant dense<0.000000e+00> : vector<4x15xf32>
      %58 = tpu.matmul %48, %57, %cst_82 {dimension_numbers = #tpu.dot_dimension_numbers<[1], [0], [0], [1], [0, 0, 1, 1], [], []>} : vector<4x32xf32>, vector<32x15xf32>, vector<4x15xf32> -> vector<4x15xf32>
      %c1_83 = arith.constant 1 : index
      %c1_84 = arith.constant 1 : index
      %c0_85 = arith.constant 0 : index
      %c0_86 = arith.constant 0 : index
      %59 = vector.load %arg2[%c1_83, %c1_84, %c0_85, %c0_86] : memref<3x3x4x4xf32, #tpu.memory_space<vmem>>, vector<1x1x4x4xf32>
      %60 = vector.shape_cast %59 : vector<1x1x4x4xf32> to vector<4x4xf32>
      %cst_87 = arith.constant dense<0.000000e+00> : vector<4x15xf32>
      %61 = tpu.matmul %60, %58, %cst_87 {dimension_numbers = #tpu.dot_dimension_numbers<[1], [0], [0], [1], [0, 0, 1, 1], [], []>} : vector<4x4xf32>, vector<4x15xf32>, vector<4x15xf32> -> vector<4x15xf32>
      %62 = arith.addf %55, %61 : vector<4x15xf32>
      %c2_88 = arith.constant 2 : index
      %c0_89 = arith.constant 0 : index
      %c0_90 = arith.constant 0 : index
      %63 = vector.load %arg4[%c2_88, %c0_89, %c0_90] : memref<3x32x15xf32, #tpu.memory_space<vmem>>, vector<1x32x15xf32>
      %64 = vector.shape_cast %63 : vector<1x32x15xf32> to vector<32x15xf32>
      %cst_91 = arith.constant dense<0.000000e+00> : vector<4x15xf32>
      %65 = tpu.matmul %48, %64, %cst_91 {dimension_numbers = #tpu.dot_dimension_numbers<[1], [0], [0], [1], [0, 0, 1, 1], [], []>} : vector<4x32xf32>, vector<32x15xf32>, vector<4x15xf32> -> vector<4x15xf32>
      %c1_92 = arith.constant 1 : index
      %c2_93 = arith.constant 2 : index
      %c0_94 = arith.constant 0 : index
      %c0_95 = arith.constant 0 : index
      %66 = vector.load %arg2[%c1_92, %c2_93, %c0_94, %c0_95] : memref<3x3x4x4xf32, #tpu.memory_space<vmem>>, vector<1x1x4x4xf32>
      %67 = vector.shape_cast %66 : vector<1x1x4x4xf32> to vector<4x4xf32>
      %cst_96 = arith.constant dense<0.000000e+00> : vector<4x15xf32>
      %68 = tpu.matmul %67, %65, %cst_96 {dimension_numbers = #tpu.dot_dimension_numbers<[1], [0], [0], [1], [0, 0, 1, 1], [], []>} : vector<4x4xf32>, vector<4x15xf32>, vector<4x15xf32> -> vector<4x15xf32>
      %69 = arith.addf %62, %68 : vector<4x15xf32>
      %c2_i32_97 = arith.constant 2 : i32
      %70 = arith.muli %c2_i32_97, %arg12 : i32
      %c2_i32_98 = arith.constant 2 : i32
      %71 = arith.addi %70, %c2_i32_98 : i32
      %c0_99 = arith.constant 0 : index
      %c0_100 = arith.constant 0 : index
      %72 = arith.index_cast %71 : i32 to index
      %c0_101 = arith.constant 0 : index
      %73 = vector.load %arg1[%c0_99, %c0_100, %72, %c0_101] : memref<1x4x32x32xf32, #tpu.memory_space<vmem>>, vector<1x4x1x32xf32>
      %74 = vector.shape_cast %73 : vector<1x4x1x32xf32> to vector<4x32xf32>
      %c0_102 = arith.constant 0 : index
      %c0_103 = arith.constant 0 : index
      %c0_104 = arith.constant 0 : index
      %75 = vector.load %arg4[%c0_102, %c0_103, %c0_104] : memref<3x32x15xf32, #tpu.memory_space<vmem>>, vector<1x32x15xf32>
      %76 = vector.shape_cast %75 : vector<1x32x15xf32> to vector<32x15xf32>
      %cst_105 = arith.constant dense<0.000000e+00> : vector<4x15xf32>
      %77 = tpu.matmul %74, %76, %cst_105 {dimension_numbers = #tpu.dot_dimension_numbers<[1], [0], [0], [1], [0, 0, 1, 1], [], []>} : vector<4x32xf32>, vector<32x15xf32>, vector<4x15xf32> -> vector<4x15xf32>
      %c2_106 = arith.constant 2 : index
      %c0_107 = arith.constant 0 : index
      %c0_108 = arith.constant 0 : index
      %c0_109 = arith.constant 0 : index
      %78 = vector.load %arg2[%c2_106, %c0_107, %c0_108, %c0_109] : memref<3x3x4x4xf32, #tpu.memory_space<vmem>>, vector<1x1x4x4xf32>
      %79 = vector.shape_cast %78 : vector<1x1x4x4xf32> to vector<4x4xf32>
      %cst_110 = arith.constant dense<0.000000e+00> : vector<4x15xf32>
      %80 = tpu.matmul %79, %77, %cst_110 {dimension_numbers = #tpu.dot_dimension_numbers<[1], [0], [0], [1], [0, 0, 1, 1], [], []>} : vector<4x4xf32>, vector<4x15xf32>, vector<4x15xf32> -> vector<4x15xf32>
      %81 = arith.addf %69, %80 : vector<4x15xf32>
      %c1_111 = arith.constant 1 : index
      %c0_112 = arith.constant 0 : index
      %c0_113 = arith.constant 0 : index
      %82 = vector.load %arg4[%c1_111, %c0_112, %c0_113] : memref<3x32x15xf32, #tpu.memory_space<vmem>>, vector<1x32x15xf32>
      %83 = vector.shape_cast %82 : vector<1x32x15xf32> to vector<32x15xf32>
      %cst_114 = arith.constant dense<0.000000e+00> : vector<4x15xf32>
      %84 = tpu.matmul %74, %83, %cst_114 {dimension_numbers = #tpu.dot_dimension_numbers<[1], [0], [0], [1], [0, 0, 1, 1], [], []>} : vector<4x32xf32>, vector<32x15xf32>, vector<4x15xf32> -> vector<4x15xf32>
      %c2_115 = arith.constant 2 : index
      %c1_116 = arith.constant 1 : index
      %c0_117 = arith.constant 0 : index
      %c0_118 = arith.constant 0 : index
      %85 = vector.load %arg2[%c2_115, %c1_116, %c0_117, %c0_118] : memref<3x3x4x4xf32, #tpu.memory_space<vmem>>, vector<1x1x4x4xf32>
      %86 = vector.shape_cast %85 : vector<1x1x4x4xf32> to vector<4x4xf32>
      %cst_119 = arith.constant dense<0.000000e+00> : vector<4x15xf32>
      %87 = tpu.matmul %86, %84, %cst_119 {dimension_numbers = #tpu.dot_dimension_numbers<[1], [0], [0], [1], [0, 0, 1, 1], [], []>} : vector<4x4xf32>, vector<4x15xf32>, vector<4x15xf32> -> vector<4x15xf32>
      %88 = arith.addf %81, %87 : vector<4x15xf32>
      %c2_120 = arith.constant 2 : index
      %c0_121 = arith.constant 0 : index
      %c0_122 = arith.constant 0 : index
      %89 = vector.load %arg4[%c2_120, %c0_121, %c0_122] : memref<3x32x15xf32, #tpu.memory_space<vmem>>, vector<1x32x15xf32>
      %90 = vector.shape_cast %89 : vector<1x32x15xf32> to vector<32x15xf32>
      %cst_123 = arith.constant dense<0.000000e+00> : vector<4x15xf32>
      %91 = tpu.matmul %74, %90, %cst_123 {dimension_numbers = #tpu.dot_dimension_numbers<[1], [0], [0], [1], [0, 0, 1, 1], [], []>} : vector<4x32xf32>, vector<32x15xf32>, vector<4x15xf32> -> vector<4x15xf32>
      %c2_124 = arith.constant 2 : index
      %c2_125 = arith.constant 2 : index
      %c0_126 = arith.constant 0 : index
      %c0_127 = arith.constant 0 : index
      %92 = vector.load %arg2[%c2_124, %c2_125, %c0_126, %c0_127] : memref<3x3x4x4xf32, #tpu.memory_space<vmem>>, vector<1x1x4x4xf32>
      %93 = vector.shape_cast %92 : vector<1x1x4x4xf32> to vector<4x4xf32>
      %cst_128 = arith.constant dense<0.000000e+00> : vector<4x15xf32>
      %94 = tpu.matmul %93, %91, %cst_128 {dimension_numbers = #tpu.dot_dimension_numbers<[1], [0], [0], [1], [0, 0, 1, 1], [], []>} : vector<4x4xf32>, vector<4x15xf32>, vector<4x15xf32> -> vector<4x15xf32>
      %95 = arith.addf %88, %94 : vector<4x15xf32>
      %96 = vector.broadcast %0 : vector<4x1xf32> to vector<4x15xf32>
      %97 = arith.addf %95, %96 : vector<4x15xf32>
      %c0_129 = arith.constant 0 : index
      %98 = arith.index_cast %arg12 : i32 to index
      %c0_130 = arith.constant 0 : index
      %99 = vector.load %arg9[%c0_129, %98, %c0_130] : memref<4x15x15xf32, #tpu.memory_space<vmem>>, vector<4x1x15xf32>
      %100 = vector.shape_cast %99 : vector<4x1x15xf32> to vector<4x15xf32>
      %101 = vector.shape_cast %97 : vector<4x15xf32> to vector<4x1x15xf32>
      tpu.vector_store %arg9[%c0_129, %98, %c0_130], %101 {strides = array<i32>} : memref<4x15x15xf32, #tpu.memory_space<vmem>>, vector<4x1x15xf32>,
    }
    %c15_i32_1 = arith.constant 15 : i32
    %cst = arith.constant 0.000000e+00 : f32
    %2 = vector.broadcast %cst : f32 to vector<4x5x5xf32>
    %c0_2 = arith.constant 0 : index
    %c0_3 = arith.constant 0 : index
    %c0_4 = arith.constant 0 : index
    %3 = vector.load %arg10[%c0_2, %c0_3, %c0_4] : memref<4x5x5xf32, #tpu.memory_space<vmem>>, vector<4x5x5xf32>
    tpu.vector_store %arg10[%c0_2, %c0_3, %c0_4], %2 {strides = array<i32>} : memref<4x5x5xf32, #tpu.memory_space<vmem>>, vector<4x5x5xf32>,
    %cst_5 = arith.constant 0.000000e+00 : f32
    %4 = vector.broadcast %cst_5 : f32 to vector<4x5x5xf32>
    %c0_6 = arith.constant 0 : index
    %c0_7 = arith.constant 0 : index
    %c0_8 = arith.constant 0 : index
    %5 = vector.load %arg11[%c0_6, %c0_7, %c0_8] : memref<4x5x5xf32, #tpu.memory_space<vmem>>, vector<4x5x5xf32>
    tpu.vector_store %arg11[%c0_6, %c0_7, %c0_8], %4 {strides = array<i32>} : memref<4x5x5xf32, #tpu.memory_space<vmem>>, vector<4x5x5xf32>,
    %c0_i32_9 = arith.constant 0 : i32
    %c3_i32 = arith.constant 3 : i32
    %6 = arith.addi %c0_i32_9, %c3_i32 : i32
    %c1_i32_10 = arith.constant 1 : i32
    scf.for %arg12 = %c0_i32_9 to %6 step %c1_i32_10  : i32 {
      %c3_i32_33 = arith.constant 3 : i32
      %17 = arith.muli %c3_i32_33, %arg12 : i32
      %c0_34 = arith.constant 0 : index
      %18 = arith.index_cast %17 : i32 to index
      %c0_35 = arith.constant 0 : index
      %19 = vector.load %arg9[%c0_34, %18, %c0_35] : memref<4x15x15xf32, #tpu.memory_space<vmem>>, vector<4x1x15xf32>
      %20 = vector.shape_cast %19 : vector<4x1x15xf32> to vector<4x15xf32>
      %c3_i32_36 = arith.constant 3 : i32
      %21 = arith.muli %c3_i32_36, %arg12 : i32
      %c1_i32_37 = arith.constant 1 : i32
      %22 = arith.addi %21, %c1_i32_37 : i32
      %c0_38 = arith.constant 0 : index
      %23 = arith.index_cast %22 : i32 to index
      %c0_39 = arith.constant 0 : index
      %24 = vector.load %arg9[%c0_38, %23, %c0_39] : memref<4x15x15xf32, #tpu.memory_space<vmem>>, vector<4x1x15xf32>
      %25 = vector.shape_cast %24 : vector<4x1x15xf32> to vector<4x15xf32>
      %26 = arith.maximumf %20, %25 : vector<4x15xf32>
      %c3_i32_40 = arith.constant 3 : i32
      %27 = arith.muli %c3_i32_40, %arg12 : i32
      %c2_i32 = arith.constant 2 : i32
      %28 = arith.addi %27, %c2_i32 : i32
      %c0_41 = arith.constant 0 : index
      %29 = arith.index_cast %28 : i32 to index
      %c0_42 = arith.constant 0 : index
      %30 = vector.load %arg9[%c0_41, %29, %c0_42] : memref<4x15x15xf32, #tpu.memory_space<vmem>>, vector<4x1x15xf32>
      %31 = vector.shape_cast %30 : vector<4x1x15xf32> to vector<4x15xf32>
      %32 = arith.maximumf %26, %31 : vector<4x15xf32>
      %c3_i32_43 = arith.constant 3 : i32
      %33 = arith.muli %c3_i32_43, %arg12 : i32
      %c3_i32_44 = arith.constant 3 : i32
      %34 = arith.addi %33, %c3_i32_44 : i32
      %c0_45 = arith.constant 0 : index
      %35 = arith.index_cast %34 : i32 to index
      %c0_46 = arith.constant 0 : index
      %36 = vector.load %arg9[%c0_45, %35, %c0_46] : memref<4x15x15xf32, #tpu.memory_space<vmem>>, vector<4x1x15xf32>
      %37 = vector.shape_cast %36 : vector<4x1x15xf32> to vector<4x15xf32>
      %38 = arith.maximumf %32, %37 : vector<4x15xf32>
      %c3_i32_47 = arith.constant 3 : i32
      %39 = arith.muli %c3_i32_47, %arg12 : i32
      %c4_i32 = arith.constant 4 : i32
      %40 = arith.addi %39, %c4_i32 : i32
      %c0_48 = arith.constant 0 : index
      %41 = arith.index_cast %40 : i32 to index
      %c0_49 = arith.constant 0 : index
      %42 = vector.load %arg9[%c0_48, %41, %c0_49] : memref<4x15x15xf32, #tpu.memory_space<vmem>>, vector<4x1x15xf32>
      %43 = vector.shape_cast %42 : vector<4x1x15xf32> to vector<4x15xf32>
      %44 = arith.maximumf %38, %43 : vector<4x15xf32>
      %c3_i32_50 = arith.constant 3 : i32
      %45 = arith.muli %c3_i32_50, %arg12 : i32
      %c5_i32 = arith.constant 5 : i32
      %46 = arith.addi %45, %c5_i32 : i32
      %c0_51 = arith.constant 0 : index
      %47 = arith.index_cast %46 : i32 to index
      %c0_52 = arith.constant 0 : index
      %48 = vector.load %arg9[%c0_51, %47, %c0_52] : memref<4x15x15xf32, #tpu.memory_space<vmem>>, vector<4x1x15xf32>
      %49 = vector.shape_cast %48 : vector<4x1x15xf32> to vector<4x15xf32>
      %50 = arith.maximumf %44, %49 : vector<4x15xf32>
      %c3_i32_53 = arith.constant 3 : i32
      %51 = arith.muli %c3_i32_53, %arg12 : i32
      %c6_i32 = arith.constant 6 : i32
      %52 = arith.addi %51, %c6_i32 : i32
      %c0_54 = arith.constant 0 : index
      %53 = arith.index_cast %52 : i32 to index
      %c0_55 = arith.constant 0 : index
      %54 = vector.load %arg9[%c0_54, %53, %c0_55] : memref<4x15x15xf32, #tpu.memory_space<vmem>>, vector<4x1x15xf32>
      %55 = vector.shape_cast %54 : vector<4x1x15xf32> to vector<4x15xf32>
      %56 = arith.maximumf %50, %55 : vector<4x15xf32>
      %57 = vector.extract_strided_slice %56 {offsets = [0, 0], sizes = [4, 7], strides = [1, 1]} : vector<4x15xf32> to vector<4x7xf32>
      %cst_56 = arith.constant dense<0xFF800000> : vector<4xf32>
      %58 = vector.multi_reduction <maximumf>, %57, %cst_56 [1] : vector<4x7xf32> to vector<4xf32>
      %59 = vector.shape_cast %58 : vector<4xf32> to vector<4x1xf32>
      %c1_i32_57 = arith.constant 1 : i32
      %60 = arith.addi %arg12, %c1_i32_57 : i32
      %c0_58 = arith.constant 0 : index
      %61 = arith.index_cast %60 : i32 to index
      %c1_59 = arith.constant 1 : index
      %62 = vector.load %arg10[%c0_58, %61, %c1_59] : memref<4x5x5xf32, #tpu.memory_space<vmem>>, vector<4x1x1xf32>
      %63 = vector.shape_cast %62 : vector<4x1x1xf32> to vector<4x1xf32>
      %64 = vector.shape_cast %59 : vector<4x1xf32> to vector<4x1x1xf32>
      tpu.vector_store %arg10[%c0_58, %61, %c1_59], %64 {strides = array<i32>} : memref<4x5x5xf32, #tpu.memory_space<vmem>>, vector<4x1x1xf32>,
      %65 = vector.extract_strided_slice %56 {offsets = [0, 3], sizes = [4, 7], strides = [1, 1]} : vector<4x15xf32> to vector<4x7xf32>
      %cst_60 = arith.constant dense<0xFF800000> : vector<4xf32>
      %66 = vector.multi_reduction <maximumf>, %65, %cst_60 [1] : vector<4x7xf32> to vector<4xf32>
      %67 = vector.shape_cast %66 : vector<4xf32> to vector<4x1xf32>
      %c1_i32_61 = arith.constant 1 : i32
      %68 = arith.addi %arg12, %c1_i32_61 : i32
      %c0_62 = arith.constant 0 : index
      %69 = arith.index_cast %68 : i32 to index
      %c2_63 = arith.constant 2 : index
      %70 = vector.load %arg10[%c0_62, %69, %c2_63] : memref<4x5x5xf32, #tpu.memory_space<vmem>>, vector<4x1x1xf32>
      %71 = vector.shape_cast %70 : vector<4x1x1xf32> to vector<4x1xf32>
      %72 = vector.shape_cast %67 : vector<4x1xf32> to vector<4x1x1xf32>
      tpu.vector_store %arg10[%c0_62, %69, %c2_63], %72 {strides = array<i32>} : memref<4x5x5xf32, #tpu.memory_space<vmem>>, vector<4x1x1xf32>,
      %73 = vector.extract_strided_slice %56 {offsets = [0, 6], sizes = [4, 7], strides = [1, 1]} : vector<4x15xf32> to vector<4x7xf32>
      %cst_64 = arith.constant dense<0xFF800000> : vector<4xf32>
      %74 = vector.multi_reduction <maximumf>, %73, %cst_64 [1] : vector<4x7xf32> to vector<4xf32>
      %75 = vector.shape_cast %74 : vector<4xf32> to vector<4x1xf32>
      %c1_i32_65 = arith.constant 1 : i32
      %76 = arith.addi %arg12, %c1_i32_65 : i32
      %c0_66 = arith.constant 0 : index
      %77 = arith.index_cast %76 : i32 to index
      %c3 = arith.constant 3 : index
      %78 = vector.load %arg10[%c0_66, %77, %c3] : memref<4x5x5xf32, #tpu.memory_space<vmem>>, vector<4x1x1xf32>
      %79 = vector.shape_cast %78 : vector<4x1x1xf32> to vector<4x1xf32>
      %80 = vector.shape_cast %75 : vector<4x1xf32> to vector<4x1x1xf32>
      tpu.vector_store %arg10[%c0_66, %77, %c3], %80 {strides = array<i32>} : memref<4x5x5xf32, #tpu.memory_space<vmem>>, vector<4x1x1xf32>,
    }
    %c3_i32_11 = arith.constant 3 : i32
    %c0_12 = arith.constant 0 : index
    %c0_13 = arith.constant 0 : index
    %c0_14 = arith.constant 0 : index
    %7 = vector.load %arg6[%c0_12, %c0_13, %c0_14] : memref<3x4x1xf32, #tpu.memory_space<vmem>>, vector<1x4x1xf32>
    %8 = vector.shape_cast %7 : vector<1x4x1xf32> to vector<4x1xf32>
    %c0_i32_15 = arith.constant 0 : i32
    %c3_i32_16 = arith.constant 3 : i32
    %9 = arith.addi %c0_i32_15, %c3_i32_16 : i32
    %c1_i32_17 = arith.constant 1 : i32
    scf.for %arg12 = %c0_i32_15 to %9 step %c1_i32_17  : i32 {
      %c0_33 = arith.constant 0 : index
      %c0_34 = arith.constant 0 : index
      %c0_35 = arith.constant 0 : index
      %c0_36 = arith.constant 0 : index
      %c0_37 = arith.constant 0 : index
      %17 = vector.load %arg5[%c0_33, %c0_34, %c0_35, %c0_36, %c0_37] : memref<3x3x3x4x4xf32, #tpu.memory_space<vmem>>, vector<1x1x1x4x4xf32>
      %18 = vector.shape_cast %17 : vector<1x1x1x4x4xf32> to vector<4x4xf32>
      %c0_i32_38 = arith.constant 0 : i32
      %19 = arith.addi %arg12, %c0_i32_38 : i32
      %c0_39 = arith.constant 0 : index
      %20 = arith.index_cast %19 : i32 to index
      %c0_40 = arith.constant 0 : index
      %21 = vector.load %arg10[%c0_39, %20, %c0_40] : memref<4x5x5xf32, #tpu.memory_space<vmem>>, vector<4x1x3xf32>
      %22 = vector.shape_cast %21 : vector<4x1x3xf32> to vector<4x3xf32>
      %cst_41 = arith.constant dense<0.000000e+00> : vector<4x3xf32>
      %23 = tpu.matmul %18, %22, %cst_41 {dimension_numbers = #tpu.dot_dimension_numbers<[1], [0], [0], [1], [0, 0, 1, 1], [], []>} : vector<4x4xf32>, vector<4x3xf32>, vector<4x3xf32> -> vector<4x3xf32>
      %24 = vector.broadcast %8 : vector<4x1xf32> to vector<4x3xf32>
      %25 = arith.addf %24, %23 : vector<4x3xf32>
      %c0_42 = arith.constant 0 : index
      %c0_43 = arith.constant 0 : index
      %c1_44 = arith.constant 1 : index
      %c0_45 = arith.constant 0 : index
      %c0_46 = arith.constant 0 : index
      %26 = vector.load %arg5[%c0_42, %c0_43, %c1_44, %c0_45, %c0_46] : memref<3x3x3x4x4xf32, #tpu.memory_space<vmem>>, vector<1x1x1x4x4xf32>
      %27 = vector.shape_cast %26 : vector<1x1x1x4x4xf32> to vector<4x4xf32>
      %c0_i32_47 = arith.constant 0 : i32
      %28 = arith.addi %arg12, %c0_i32_47 : i32
      %c0_48 = arith.constant 0 : index
      %29 = arith.index_cast %28 : i32 to index
      %c1_49 = arith.constant 1 : index
      %30 = vector.load %arg10[%c0_48, %29, %c1_49] : memref<4x5x5xf32, #tpu.memory_space<vmem>>, vector<4x1x3xf32>
      %31 = vector.shape_cast %30 : vector<4x1x3xf32> to vector<4x3xf32>
      %cst_50 = arith.constant dense<0.000000e+00> : vector<4x3xf32>
      %32 = tpu.matmul %27, %31, %cst_50 {dimension_numbers = #tpu.dot_dimension_numbers<[1], [0], [0], [1], [0, 0, 1, 1], [], []>} : vector<4x4xf32>, vector<4x3xf32>, vector<4x3xf32> -> vector<4x3xf32>
      %33 = arith.addf %25, %32 : vector<4x3xf32>
      %c0_51 = arith.constant 0 : index
      %c0_52 = arith.constant 0 : index
      %c2_53 = arith.constant 2 : index
      %c0_54 = arith.constant 0 : index
      %c0_55 = arith.constant 0 : index
      %34 = vector.load %arg5[%c0_51, %c0_52, %c2_53, %c0_54, %c0_55] : memref<3x3x3x4x4xf32, #tpu.memory_space<vmem>>, vector<1x1x1x4x4xf32>
      %35 = vector.shape_cast %34 : vector<1x1x1x4x4xf32> to vector<4x4xf32>
      %c0_i32_56 = arith.constant 0 : i32
      %36 = arith.addi %arg12, %c0_i32_56 : i32
      %c0_57 = arith.constant 0 : index
      %37 = arith.index_cast %36 : i32 to index
      %c2_58 = arith.constant 2 : index
      %38 = vector.load %arg10[%c0_57, %37, %c2_58] : memref<4x5x5xf32, #tpu.memory_space<vmem>>, vector<4x1x3xf32>
      %39 = vector.shape_cast %38 : vector<4x1x3xf32> to vector<4x3xf32>
      %cst_59 = arith.constant dense<0.000000e+00> : vector<4x3xf32>
      %40 = tpu.matmul %35, %39, %cst_59 {dimension_numbers = #tpu.dot_dimension_numbers<[1], [0], [0], [1], [0, 0, 1, 1], [], []>} : vector<4x4xf32>, vector<4x3xf32>, vector<4x3xf32> -> vector<4x3xf32>
      %41 = arith.addf %33, %40 : vector<4x3xf32>
      %c0_60 = arith.constant 0 : index
      %c1_61 = arith.constant 1 : index
      %c0_62 = arith.constant 0 : index
      %c0_63 = arith.constant 0 : index
      %c0_64 = arith.constant 0 : index
      %42 = vector.load %arg5[%c0_60, %c1_61, %c0_62, %c0_63, %c0_64] : memref<3x3x3x4x4xf32, #tpu.memory_space<vmem>>, vector<1x1x1x4x4xf32>
      %43 = vector.shape_cast %42 : vector<1x1x1x4x4xf32> to vector<4x4xf32>
      %c1_i32_65 = arith.constant 1 : i32
      %44 = arith.addi %arg12, %c1_i32_65 : i32
      %c0_66 = arith.constant 0 : index
      %45 = arith.index_cast %44 : i32 to index
      %c0_67 = arith.constant 0 : index
      %46 = vector.load %arg10[%c0_66, %45, %c0_67] : memref<4x5x5xf32, #tpu.memory_space<vmem>>, vector<4x1x3xf32>
      %47 = vector.shape_cast %46 : vector<4x1x3xf32> to vector<4x3xf32>
      %cst_68 = arith.constant dense<0.000000e+00> : vector<4x3xf32>
      %48 = tpu.matmul %43, %47, %cst_68 {dimension_numbers = #tpu.dot_dimension_numbers<[1], [0], [0], [1], [0, 0, 1, 1], [], []>} : vector<4x4xf32>, vector<4x3xf32>, vector<4x3xf32> -> vector<4x3xf32>
      %49 = arith.addf %41, %48 : vector<4x3xf32>
      %c0_69 = arith.constant 0 : index
      %c1_70 = arith.constant 1 : index
      %c1_71 = arith.constant 1 : index
      %c0_72 = arith.constant 0 : index
      %c0_73 = arith.constant 0 : index
      %50 = vector.load %arg5[%c0_69, %c1_70, %c1_71, %c0_72, %c0_73] : memref<3x3x3x4x4xf32, #tpu.memory_space<vmem>>, vector<1x1x1x4x4xf32>
      %51 = vector.shape_cast %50 : vector<1x1x1x4x4xf32> to vector<4x4xf32>
      %c1_i32_74 = arith.constant 1 : i32
      %52 = arith.addi %arg12, %c1_i32_74 : i32
      %c0_75 = arith.constant 0 : index
      %53 = arith.index_cast %52 : i32 to index
      %c1_76 = arith.constant 1 : index
      %54 = vector.load %arg10[%c0_75, %53, %c1_76] : memref<4x5x5xf32, #tpu.memory_space<vmem>>, vector<4x1x3xf32>
      %55 = vector.shape_cast %54 : vector<4x1x3xf32> to vector<4x3xf32>
      %cst_77 = arith.constant dense<0.000000e+00> : vector<4x3xf32>
      %56 = tpu.matmul %51, %55, %cst_77 {dimension_numbers = #tpu.dot_dimension_numbers<[1], [0], [0], [1], [0, 0, 1, 1], [], []>} : vector<4x4xf32>, vector<4x3xf32>, vector<4x3xf32> -> vector<4x3xf32>
      %57 = arith.addf %49, %56 : vector<4x3xf32>
      %c0_78 = arith.constant 0 : index
      %c1_79 = arith.constant 1 : index
      %c2_80 = arith.constant 2 : index
      %c0_81 = arith.constant 0 : index
      %c0_82 = arith.constant 0 : index
      %58 = vector.load %arg5[%c0_78, %c1_79, %c2_80, %c0_81, %c0_82] : memref<3x3x3x4x4xf32, #tpu.memory_space<vmem>>, vector<1x1x1x4x4xf32>
      %59 = vector.shape_cast %58 : vector<1x1x1x4x4xf32> to vector<4x4xf32>
      %c1_i32_83 = arith.constant 1 : i32
      %60 = arith.addi %arg12, %c1_i32_83 : i32
      %c0_84 = arith.constant 0 : index
      %61 = arith.index_cast %60 : i32 to index
      %c2_85 = arith.constant 2 : index
      %62 = vector.load %arg10[%c0_84, %61, %c2_85] : memref<4x5x5xf32, #tpu.memory_space<vmem>>, vector<4x1x3xf32>
      %63 = vector.shape_cast %62 : vector<4x1x3xf32> to vector<4x3xf32>
      %cst_86 = arith.constant dense<0.000000e+00> : vector<4x3xf32>
      %64 = tpu.matmul %59, %63, %cst_86 {dimension_numbers = #tpu.dot_dimension_numbers<[1], [0], [0], [1], [0, 0, 1, 1], [], []>} : vector<4x4xf32>, vector<4x3xf32>, vector<4x3xf32> -> vector<4x3xf32>
      %65 = arith.addf %57, %64 : vector<4x3xf32>
      %c0_87 = arith.constant 0 : index
      %c2_88 = arith.constant 2 : index
      %c0_89 = arith.constant 0 : index
      %c0_90 = arith.constant 0 : index
      %c0_91 = arith.constant 0 : index
      %66 = vector.load %arg5[%c0_87, %c2_88, %c0_89, %c0_90, %c0_91] : memref<3x3x3x4x4xf32, #tpu.memory_space<vmem>>, vector<1x1x1x4x4xf32>
      %67 = vector.shape_cast %66 : vector<1x1x1x4x4xf32> to vector<4x4xf32>
      %c2_i32 = arith.constant 2 : i32
      %68 = arith.addi %arg12, %c2_i32 : i32
      %c0_92 = arith.constant 0 : index
      %69 = arith.index_cast %68 : i32 to index
      %c0_93 = arith.constant 0 : index
      %70 = vector.load %arg10[%c0_92, %69, %c0_93] : memref<4x5x5xf32, #tpu.memory_space<vmem>>, vector<4x1x3xf32>
      %71 = vector.shape_cast %70 : vector<4x1x3xf32> to vector<4x3xf32>
      %cst_94 = arith.constant dense<0.000000e+00> : vector<4x3xf32>
      %72 = tpu.matmul %67, %71, %cst_94 {dimension_numbers = #tpu.dot_dimension_numbers<[1], [0], [0], [1], [0, 0, 1, 1], [], []>} : vector<4x4xf32>, vector<4x3xf32>, vector<4x3xf32> -> vector<4x3xf32>
      %73 = arith.addf %65, %72 : vector<4x3xf32>
      %c0_95 = arith.constant 0 : index
      %c2_96 = arith.constant 2 : index
      %c1_97 = arith.constant 1 : index
      %c0_98 = arith.constant 0 : index
      %c0_99 = arith.constant 0 : index
      %74 = vector.load %arg5[%c0_95, %c2_96, %c1_97, %c0_98, %c0_99] : memref<3x3x3x4x4xf32, #tpu.memory_space<vmem>>, vector<1x1x1x4x4xf32>
      %75 = vector.shape_cast %74 : vector<1x1x1x4x4xf32> to vector<4x4xf32>
      %c2_i32_100 = arith.constant 2 : i32
      %76 = arith.addi %arg12, %c2_i32_100 : i32
      %c0_101 = arith.constant 0 : index
      %77 = arith.index_cast %76 : i32 to index
      %c1_102 = arith.constant 1 : index
      %78 = vector.load %arg10[%c0_101, %77, %c1_102] : memref<4x5x5xf32, #tpu.memory_space<vmem>>, vector<4x1x3xf32>
      %79 = vector.shape_cast %78 : vector<4x1x3xf32> to vector<4x3xf32>
      %cst_103 = arith.constant dense<0.000000e+00> : vector<4x3xf32>
      %80 = tpu.matmul %75, %79, %cst_103 {dimension_numbers = #tpu.dot_dimension_numbers<[1], [0], [0], [1], [0, 0, 1, 1], [], []>} : vector<4x4xf32>, vector<4x3xf32>, vector<4x3xf32> -> vector<4x3xf32>
      %81 = arith.addf %73, %80 : vector<4x3xf32>
      %c0_104 = arith.constant 0 : index
      %c2_105 = arith.constant 2 : index
      %c2_106 = arith.constant 2 : index
      %c0_107 = arith.constant 0 : index
      %c0_108 = arith.constant 0 : index
      %82 = vector.load %arg5[%c0_104, %c2_105, %c2_106, %c0_107, %c0_108] : memref<3x3x3x4x4xf32, #tpu.memory_space<vmem>>, vector<1x1x1x4x4xf32>
      %83 = vector.shape_cast %82 : vector<1x1x1x4x4xf32> to vector<4x4xf32>
      %c2_i32_109 = arith.constant 2 : i32
      %84 = arith.addi %arg12, %c2_i32_109 : i32
      %c0_110 = arith.constant 0 : index
      %85 = arith.index_cast %84 : i32 to index
      %c2_111 = arith.constant 2 : index
      %86 = vector.load %arg10[%c0_110, %85, %c2_111] : memref<4x5x5xf32, #tpu.memory_space<vmem>>, vector<4x1x3xf32>
      %87 = vector.shape_cast %86 : vector<4x1x3xf32> to vector<4x3xf32>
      %cst_112 = arith.constant dense<0.000000e+00> : vector<4x3xf32>
      %88 = tpu.matmul %83, %87, %cst_112 {dimension_numbers = #tpu.dot_dimension_numbers<[1], [0], [0], [1], [0, 0, 1, 1], [], []>} : vector<4x4xf32>, vector<4x3xf32>, vector<4x3xf32> -> vector<4x3xf32>
      %89 = arith.addf %81, %88 : vector<4x3xf32>
      %cst_113 = arith.constant 0.000000e+00 : f32
      %90 = vector.broadcast %cst_113 : f32 to vector<4x3xf32>
      %91 = arith.maximumf %89, %90 : vector<4x3xf32>
      %c1_i32_114 = arith.constant 1 : i32
      %92 = arith.addi %arg12, %c1_i32_114 : i32
      %c0_115 = arith.constant 0 : index
      %93 = arith.index_cast %92 : i32 to index
      %c1_116 = arith.constant 1 : index
      %94 = vector.load %arg11[%c0_115, %93, %c1_116] : memref<4x5x5xf32, #tpu.memory_space<vmem>>, vector<4x1x3xf32>
      %95 = vector.shape_cast %94 : vector<4x1x3xf32> to vector<4x3xf32>
      %96 = vector.shape_cast %91 : vector<4x3xf32> to vector<4x1x3xf32>
      tpu.vector_store %arg11[%c0_115, %93, %c1_116], %96 {strides = array<i32>} : memref<4x5x5xf32, #tpu.memory_space<vmem>>, vector<4x1x3xf32>,
    }
    %c3_i32_18 = arith.constant 3 : i32
    %c1 = arith.constant 1 : index
    %c0_19 = arith.constant 0 : index
    %c0_20 = arith.constant 0 : index
    %10 = vector.load %arg6[%c1, %c0_19, %c0_20] : memref<3x4x1xf32, #tpu.memory_space<vmem>>, vector<1x4x1xf32>
    %11 = vector.shape_cast %10 : vector<1x4x1xf32> to vector<4x1xf32>
    %c0_i32_21 = arith.constant 0 : i32
    %c3_i32_22 = arith.constant 3 : i32
    %12 = arith.addi %c0_i32_21, %c3_i32_22 : i32
    %c1_i32_23 = arith.constant 1 : i32
    scf.for %arg12 = %c0_i32_21 to %12 step %c1_i32_23  : i32 {
      %c1_33 = arith.constant 1 : index
      %c0_34 = arith.constant 0 : index
      %c0_35 = arith.constant 0 : index
      %c0_36 = arith.constant 0 : index
      %c0_37 = arith.constant 0 : index
      %17 = vector.load %arg5[%c1_33, %c0_34, %c0_35, %c0_36, %c0_37] : memref<3x3x3x4x4xf32, #tpu.memory_space<vmem>>, vector<1x1x1x4x4xf32>
      %18 = vector.shape_cast %17 : vector<1x1x1x4x4xf32> to vector<4x4xf32>
      %c0_i32_38 = arith.constant 0 : i32
      %19 = arith.addi %arg12, %c0_i32_38 : i32
      %c0_39 = arith.constant 0 : index
      %20 = arith.index_cast %19 : i32 to index
      %c0_40 = arith.constant 0 : index
      %21 = vector.load %arg11[%c0_39, %20, %c0_40] : memref<4x5x5xf32, #tpu.memory_space<vmem>>, vector<4x1x3xf32>
      %22 = vector.shape_cast %21 : vector<4x1x3xf32> to vector<4x3xf32>
      %cst_41 = arith.constant dense<0.000000e+00> : vector<4x3xf32>
      %23 = tpu.matmul %18, %22, %cst_41 {dimension_numbers = #tpu.dot_dimension_numbers<[1], [0], [0], [1], [0, 0, 1, 1], [], []>} : vector<4x4xf32>, vector<4x3xf32>, vector<4x3xf32> -> vector<4x3xf32>
      %24 = vector.broadcast %11 : vector<4x1xf32> to vector<4x3xf32>
      %25 = arith.addf %24, %23 : vector<4x3xf32>
      %c1_42 = arith.constant 1 : index
      %c0_43 = arith.constant 0 : index
      %c1_44 = arith.constant 1 : index
      %c0_45 = arith.constant 0 : index
      %c0_46 = arith.constant 0 : index
      %26 = vector.load %arg5[%c1_42, %c0_43, %c1_44, %c0_45, %c0_46] : memref<3x3x3x4x4xf32, #tpu.memory_space<vmem>>, vector<1x1x1x4x4xf32>
      %27 = vector.shape_cast %26 : vector<1x1x1x4x4xf32> to vector<4x4xf32>
      %c0_i32_47 = arith.constant 0 : i32
      %28 = arith.addi %arg12, %c0_i32_47 : i32
      %c0_48 = arith.constant 0 : index
      %29 = arith.index_cast %28 : i32 to index
      %c1_49 = arith.constant 1 : index
      %30 = vector.load %arg11[%c0_48, %29, %c1_49] : memref<4x5x5xf32, #tpu.memory_space<vmem>>, vector<4x1x3xf32>
      %31 = vector.shape_cast %30 : vector<4x1x3xf32> to vector<4x3xf32>
      %cst_50 = arith.constant dense<0.000000e+00> : vector<4x3xf32>
      %32 = tpu.matmul %27, %31, %cst_50 {dimension_numbers = #tpu.dot_dimension_numbers<[1], [0], [0], [1], [0, 0, 1, 1], [], []>} : vector<4x4xf32>, vector<4x3xf32>, vector<4x3xf32> -> vector<4x3xf32>
      %33 = arith.addf %25, %32 : vector<4x3xf32>
      %c1_51 = arith.constant 1 : index
      %c0_52 = arith.constant 0 : index
      %c2_53 = arith.constant 2 : index
      %c0_54 = arith.constant 0 : index
      %c0_55 = arith.constant 0 : index
      %34 = vector.load %arg5[%c1_51, %c0_52, %c2_53, %c0_54, %c0_55] : memref<3x3x3x4x4xf32, #tpu.memory_space<vmem>>, vector<1x1x1x4x4xf32>
      %35 = vector.shape_cast %34 : vector<1x1x1x4x4xf32> to vector<4x4xf32>
      %c0_i32_56 = arith.constant 0 : i32
      %36 = arith.addi %arg12, %c0_i32_56 : i32
      %c0_57 = arith.constant 0 : index
      %37 = arith.index_cast %36 : i32 to index
      %c2_58 = arith.constant 2 : index
      %38 = vector.load %arg11[%c0_57, %37, %c2_58] : memref<4x5x5xf32, #tpu.memory_space<vmem>>, vector<4x1x3xf32>
      %39 = vector.shape_cast %38 : vector<4x1x3xf32> to vector<4x3xf32>
      %cst_59 = arith.constant dense<0.000000e+00> : vector<4x3xf32>
      %40 = tpu.matmul %35, %39, %cst_59 {dimension_numbers = #tpu.dot_dimension_numbers<[1], [0], [0], [1], [0, 0, 1, 1], [], []>} : vector<4x4xf32>, vector<4x3xf32>, vector<4x3xf32> -> vector<4x3xf32>
      %41 = arith.addf %33, %40 : vector<4x3xf32>
      %c1_60 = arith.constant 1 : index
      %c1_61 = arith.constant 1 : index
      %c0_62 = arith.constant 0 : index
      %c0_63 = arith.constant 0 : index
      %c0_64 = arith.constant 0 : index
      %42 = vector.load %arg5[%c1_60, %c1_61, %c0_62, %c0_63, %c0_64] : memref<3x3x3x4x4xf32, #tpu.memory_space<vmem>>, vector<1x1x1x4x4xf32>
      %43 = vector.shape_cast %42 : vector<1x1x1x4x4xf32> to vector<4x4xf32>
      %c1_i32_65 = arith.constant 1 : i32
      %44 = arith.addi %arg12, %c1_i32_65 : i32
      %c0_66 = arith.constant 0 : index
      %45 = arith.index_cast %44 : i32 to index
      %c0_67 = arith.constant 0 : index
      %46 = vector.load %arg11[%c0_66, %45, %c0_67] : memref<4x5x5xf32, #tpu.memory_space<vmem>>, vector<4x1x3xf32>
      %47 = vector.shape_cast %46 : vector<4x1x3xf32> to vector<4x3xf32>
      %cst_68 = arith.constant dense<0.000000e+00> : vector<4x3xf32>
      %48 = tpu.matmul %43, %47, %cst_68 {dimension_numbers = #tpu.dot_dimension_numbers<[1], [0], [0], [1], [0, 0, 1, 1], [], []>} : vector<4x4xf32>, vector<4x3xf32>, vector<4x3xf32> -> vector<4x3xf32>
      %49 = arith.addf %41, %48 : vector<4x3xf32>
      %c1_69 = arith.constant 1 : index
      %c1_70 = arith.constant 1 : index
      %c1_71 = arith.constant 1 : index
      %c0_72 = arith.constant 0 : index
      %c0_73 = arith.constant 0 : index
      %50 = vector.load %arg5[%c1_69, %c1_70, %c1_71, %c0_72, %c0_73] : memref<3x3x3x4x4xf32, #tpu.memory_space<vmem>>, vector<1x1x1x4x4xf32>
      %51 = vector.shape_cast %50 : vector<1x1x1x4x4xf32> to vector<4x4xf32>
      %c1_i32_74 = arith.constant 1 : i32
      %52 = arith.addi %arg12, %c1_i32_74 : i32
      %c0_75 = arith.constant 0 : index
      %53 = arith.index_cast %52 : i32 to index
      %c1_76 = arith.constant 1 : index
      %54 = vector.load %arg11[%c0_75, %53, %c1_76] : memref<4x5x5xf32, #tpu.memory_space<vmem>>, vector<4x1x3xf32>
      %55 = vector.shape_cast %54 : vector<4x1x3xf32> to vector<4x3xf32>
      %cst_77 = arith.constant dense<0.000000e+00> : vector<4x3xf32>
      %56 = tpu.matmul %51, %55, %cst_77 {dimension_numbers = #tpu.dot_dimension_numbers<[1], [0], [0], [1], [0, 0, 1, 1], [], []>} : vector<4x4xf32>, vector<4x3xf32>, vector<4x3xf32> -> vector<4x3xf32>
      %57 = arith.addf %49, %56 : vector<4x3xf32>
      %c1_78 = arith.constant 1 : index
      %c1_79 = arith.constant 1 : index
      %c2_80 = arith.constant 2 : index
      %c0_81 = arith.constant 0 : index
      %c0_82 = arith.constant 0 : index
      %58 = vector.load %arg5[%c1_78, %c1_79, %c2_80, %c0_81, %c0_82] : memref<3x3x3x4x4xf32, #tpu.memory_space<vmem>>, vector<1x1x1x4x4xf32>
      %59 = vector.shape_cast %58 : vector<1x1x1x4x4xf32> to vector<4x4xf32>
      %c1_i32_83 = arith.constant 1 : i32
      %60 = arith.addi %arg12, %c1_i32_83 : i32
      %c0_84 = arith.constant 0 : index
      %61 = arith.index_cast %60 : i32 to index
      %c2_85 = arith.constant 2 : index
      %62 = vector.load %arg11[%c0_84, %61, %c2_85] : memref<4x5x5xf32, #tpu.memory_space<vmem>>, vector<4x1x3xf32>
      %63 = vector.shape_cast %62 : vector<4x1x3xf32> to vector<4x3xf32>
      %cst_86 = arith.constant dense<0.000000e+00> : vector<4x3xf32>
      %64 = tpu.matmul %59, %63, %cst_86 {dimension_numbers = #tpu.dot_dimension_numbers<[1], [0], [0], [1], [0, 0, 1, 1], [], []>} : vector<4x4xf32>, vector<4x3xf32>, vector<4x3xf32> -> vector<4x3xf32>
      %65 = arith.addf %57, %64 : vector<4x3xf32>
      %c1_87 = arith.constant 1 : index
      %c2_88 = arith.constant 2 : index
      %c0_89 = arith.constant 0 : index
      %c0_90 = arith.constant 0 : index
      %c0_91 = arith.constant 0 : index
      %66 = vector.load %arg5[%c1_87, %c2_88, %c0_89, %c0_90, %c0_91] : memref<3x3x3x4x4xf32, #tpu.memory_space<vmem>>, vector<1x1x1x4x4xf32>
      %67 = vector.shape_cast %66 : vector<1x1x1x4x4xf32> to vector<4x4xf32>
      %c2_i32 = arith.constant 2 : i32
      %68 = arith.addi %arg12, %c2_i32 : i32
      %c0_92 = arith.constant 0 : index
      %69 = arith.index_cast %68 : i32 to index
      %c0_93 = arith.constant 0 : index
      %70 = vector.load %arg11[%c0_92, %69, %c0_93] : memref<4x5x5xf32, #tpu.memory_space<vmem>>, vector<4x1x3xf32>
      %71 = vector.shape_cast %70 : vector<4x1x3xf32> to vector<4x3xf32>
      %cst_94 = arith.constant dense<0.000000e+00> : vector<4x3xf32>
      %72 = tpu.matmul %67, %71, %cst_94 {dimension_numbers = #tpu.dot_dimension_numbers<[1], [0], [0], [1], [0, 0, 1, 1], [], []>} : vector<4x4xf32>, vector<4x3xf32>, vector<4x3xf32> -> vector<4x3xf32>
      %73 = arith.addf %65, %72 : vector<4x3xf32>
      %c1_95 = arith.constant 1 : index
      %c2_96 = arith.constant 2 : index
      %c1_97 = arith.constant 1 : index
      %c0_98 = arith.constant 0 : index
      %c0_99 = arith.constant 0 : index
      %74 = vector.load %arg5[%c1_95, %c2_96, %c1_97, %c0_98, %c0_99] : memref<3x3x3x4x4xf32, #tpu.memory_space<vmem>>, vector<1x1x1x4x4xf32>
      %75 = vector.shape_cast %74 : vector<1x1x1x4x4xf32> to vector<4x4xf32>
      %c2_i32_100 = arith.constant 2 : i32
      %76 = arith.addi %arg12, %c2_i32_100 : i32
      %c0_101 = arith.constant 0 : index
      %77 = arith.index_cast %76 : i32 to index
      %c1_102 = arith.constant 1 : index
      %78 = vector.load %arg11[%c0_101, %77, %c1_102] : memref<4x5x5xf32, #tpu.memory_space<vmem>>, vector<4x1x3xf32>
      %79 = vector.shape_cast %78 : vector<4x1x3xf32> to vector<4x3xf32>
      %cst_103 = arith.constant dense<0.000000e+00> : vector<4x3xf32>
      %80 = tpu.matmul %75, %79, %cst_103 {dimension_numbers = #tpu.dot_dimension_numbers<[1], [0], [0], [1], [0, 0, 1, 1], [], []>} : vector<4x4xf32>, vector<4x3xf32>, vector<4x3xf32> -> vector<4x3xf32>
      %81 = arith.addf %73, %80 : vector<4x3xf32>
      %c1_104 = arith.constant 1 : index
      %c2_105 = arith.constant 2 : index
      %c2_106 = arith.constant 2 : index
      %c0_107 = arith.constant 0 : index
      %c0_108 = arith.constant 0 : index
      %82 = vector.load %arg5[%c1_104, %c2_105, %c2_106, %c0_107, %c0_108] : memref<3x3x3x4x4xf32, #tpu.memory_space<vmem>>, vector<1x1x1x4x4xf32>
      %83 = vector.shape_cast %82 : vector<1x1x1x4x4xf32> to vector<4x4xf32>
      %c2_i32_109 = arith.constant 2 : i32
      %84 = arith.addi %arg12, %c2_i32_109 : i32
      %c0_110 = arith.constant 0 : index
      %85 = arith.index_cast %84 : i32 to index
      %c2_111 = arith.constant 2 : index
      %86 = vector.load %arg11[%c0_110, %85, %c2_111] : memref<4x5x5xf32, #tpu.memory_space<vmem>>, vector<4x1x3xf32>
      %87 = vector.shape_cast %86 : vector<4x1x3xf32> to vector<4x3xf32>
      %cst_112 = arith.constant dense<0.000000e+00> : vector<4x3xf32>
      %88 = tpu.matmul %83, %87, %cst_112 {dimension_numbers = #tpu.dot_dimension_numbers<[1], [0], [0], [1], [0, 0, 1, 1], [], []>} : vector<4x4xf32>, vector<4x3xf32>, vector<4x3xf32> -> vector<4x3xf32>
      %89 = arith.addf %81, %88 : vector<4x3xf32>
      %cst_113 = arith.constant 0.000000e+00 : f32
      %90 = vector.broadcast %cst_113 : f32 to vector<4x3xf32>
      %91 = arith.maximumf %89, %90 : vector<4x3xf32>
      %c1_i32_114 = arith.constant 1 : i32
      %92 = arith.addi %arg12, %c1_i32_114 : i32
      %c0_115 = arith.constant 0 : index
      %93 = arith.index_cast %92 : i32 to index
      %c1_116 = arith.constant 1 : index
      %94 = vector.load %arg10[%c0_115, %93, %c1_116] : memref<4x5x5xf32, #tpu.memory_space<vmem>>, vector<4x1x3xf32>
      %95 = vector.shape_cast %94 : vector<4x1x3xf32> to vector<4x3xf32>
      %96 = vector.shape_cast %91 : vector<4x3xf32> to vector<4x1x3xf32>
      tpu.vector_store %arg10[%c0_115, %93, %c1_116], %96 {strides = array<i32>} : memref<4x5x5xf32, #tpu.memory_space<vmem>>, vector<4x1x3xf32>,
    }
    %c3_i32_24 = arith.constant 3 : i32
    %c0_25 = arith.constant 0 : index
    %c0_26 = arith.constant 0 : index
    %13 = vector.load %arg7[%c0_25, %c0_26] : memref<3x32xf32, #tpu.memory_space<vmem>>, vector<3x32xf32>
    %c2 = arith.constant 2 : index
    %c0_27 = arith.constant 0 : index
    %c0_28 = arith.constant 0 : index
    %14 = vector.load %arg6[%c2, %c0_27, %c0_28] : memref<3x4x1xf32, #tpu.memory_space<vmem>>, vector<1x4x1xf32>
    %15 = vector.shape_cast %14 : vector<1x4x1xf32> to vector<4x1xf32>
    %c0_i32_29 = arith.constant 0 : i32
    %c3_i32_30 = arith.constant 3 : i32
    %16 = arith.addi %c0_i32_29, %c3_i32_30 : i32
    %c1_i32_31 = arith.constant 1 : i32
    scf.for %arg12 = %c0_i32_29 to %16 step %c1_i32_31  : i32 {
      %c2_33 = arith.constant 2 : index
      %c0_34 = arith.constant 0 : index
      %c0_35 = arith.constant 0 : index
      %c0_36 = arith.constant 0 : index
      %c0_37 = arith.constant 0 : index
      %17 = vector.load %arg5[%c2_33, %c0_34, %c0_35, %c0_36, %c0_37] : memref<3x3x3x4x4xf32, #tpu.memory_space<vmem>>, vector<1x1x1x4x4xf32>
      %18 = vector.shape_cast %17 : vector<1x1x1x4x4xf32> to vector<4x4xf32>
      %c0_i32_38 = arith.constant 0 : i32
      %19 = arith.addi %arg12, %c0_i32_38 : i32
      %c0_39 = arith.constant 0 : index
      %20 = arith.index_cast %19 : i32 to index
      %c0_40 = arith.constant 0 : index
      %21 = vector.load %arg10[%c0_39, %20, %c0_40] : memref<4x5x5xf32, #tpu.memory_space<vmem>>, vector<4x1x3xf32>
      %22 = vector.shape_cast %21 : vector<4x1x3xf32> to vector<4x3xf32>
      %cst_41 = arith.constant dense<0.000000e+00> : vector<4x3xf32>
      %23 = tpu.matmul %18, %22, %cst_41 {dimension_numbers = #tpu.dot_dimension_numbers<[1], [0], [0], [1], [0, 0, 1, 1], [], []>} : vector<4x4xf32>, vector<4x3xf32>, vector<4x3xf32> -> vector<4x3xf32>
      %24 = vector.broadcast %15 : vector<4x1xf32> to vector<4x3xf32>
      %25 = arith.addf %24, %23 : vector<4x3xf32>
      %c2_42 = arith.constant 2 : index
      %c0_43 = arith.constant 0 : index
      %c1_44 = arith.constant 1 : index
      %c0_45 = arith.constant 0 : index
      %c0_46 = arith.constant 0 : index
      %26 = vector.load %arg5[%c2_42, %c0_43, %c1_44, %c0_45, %c0_46] : memref<3x3x3x4x4xf32, #tpu.memory_space<vmem>>, vector<1x1x1x4x4xf32>
      %27 = vector.shape_cast %26 : vector<1x1x1x4x4xf32> to vector<4x4xf32>
      %c0_i32_47 = arith.constant 0 : i32
      %28 = arith.addi %arg12, %c0_i32_47 : i32
      %c0_48 = arith.constant 0 : index
      %29 = arith.index_cast %28 : i32 to index
      %c1_49 = arith.constant 1 : index
      %30 = vector.load %arg10[%c0_48, %29, %c1_49] : memref<4x5x5xf32, #tpu.memory_space<vmem>>, vector<4x1x3xf32>
      %31 = vector.shape_cast %30 : vector<4x1x3xf32> to vector<4x3xf32>
      %cst_50 = arith.constant dense<0.000000e+00> : vector<4x3xf32>
      %32 = tpu.matmul %27, %31, %cst_50 {dimension_numbers = #tpu.dot_dimension_numbers<[1], [0], [0], [1], [0, 0, 1, 1], [], []>} : vector<4x4xf32>, vector<4x3xf32>, vector<4x3xf32> -> vector<4x3xf32>
      %33 = arith.addf %25, %32 : vector<4x3xf32>
      %c2_51 = arith.constant 2 : index
      %c0_52 = arith.constant 0 : index
      %c2_53 = arith.constant 2 : index
      %c0_54 = arith.constant 0 : index
      %c0_55 = arith.constant 0 : index
      %34 = vector.load %arg5[%c2_51, %c0_52, %c2_53, %c0_54, %c0_55] : memref<3x3x3x4x4xf32, #tpu.memory_space<vmem>>, vector<1x1x1x4x4xf32>
      %35 = vector.shape_cast %34 : vector<1x1x1x4x4xf32> to vector<4x4xf32>
      %c0_i32_56 = arith.constant 0 : i32
      %36 = arith.addi %arg12, %c0_i32_56 : i32
      %c0_57 = arith.constant 0 : index
      %37 = arith.index_cast %36 : i32 to index
      %c2_58 = arith.constant 2 : index
      %38 = vector.load %arg10[%c0_57, %37, %c2_58] : memref<4x5x5xf32, #tpu.memory_space<vmem>>, vector<4x1x3xf32>
      %39 = vector.shape_cast %38 : vector<4x1x3xf32> to vector<4x3xf32>
      %cst_59 = arith.constant dense<0.000000e+00> : vector<4x3xf32>
      %40 = tpu.matmul %35, %39, %cst_59 {dimension_numbers = #tpu.dot_dimension_numbers<[1], [0], [0], [1], [0, 0, 1, 1], [], []>} : vector<4x4xf32>, vector<4x3xf32>, vector<4x3xf32> -> vector<4x3xf32>
      %41 = arith.addf %33, %40 : vector<4x3xf32>
      %c2_60 = arith.constant 2 : index
      %c1_61 = arith.constant 1 : index
      %c0_62 = arith.constant 0 : index
      %c0_63 = arith.constant 0 : index
      %c0_64 = arith.constant 0 : index
      %42 = vector.load %arg5[%c2_60, %c1_61, %c0_62, %c0_63, %c0_64] : memref<3x3x3x4x4xf32, #tpu.memory_space<vmem>>, vector<1x1x1x4x4xf32>
      %43 = vector.shape_cast %42 : vector<1x1x1x4x4xf32> to vector<4x4xf32>
      %c1_i32_65 = arith.constant 1 : i32
      %44 = arith.addi %arg12, %c1_i32_65 : i32
      %c0_66 = arith.constant 0 : index
      %45 = arith.index_cast %44 : i32 to index
      %c0_67 = arith.constant 0 : index
      %46 = vector.load %arg10[%c0_66, %45, %c0_67] : memref<4x5x5xf32, #tpu.memory_space<vmem>>, vector<4x1x3xf32>
      %47 = vector.shape_cast %46 : vector<4x1x3xf32> to vector<4x3xf32>
      %cst_68 = arith.constant dense<0.000000e+00> : vector<4x3xf32>
      %48 = tpu.matmul %43, %47, %cst_68 {dimension_numbers = #tpu.dot_dimension_numbers<[1], [0], [0], [1], [0, 0, 1, 1], [], []>} : vector<4x4xf32>, vector<4x3xf32>, vector<4x3xf32> -> vector<4x3xf32>
      %49 = arith.addf %41, %48 : vector<4x3xf32>
      %c2_69 = arith.constant 2 : index
      %c1_70 = arith.constant 1 : index
      %c1_71 = arith.constant 1 : index
      %c0_72 = arith.constant 0 : index
      %c0_73 = arith.constant 0 : index
      %50 = vector.load %arg5[%c2_69, %c1_70, %c1_71, %c0_72, %c0_73] : memref<3x3x3x4x4xf32, #tpu.memory_space<vmem>>, vector<1x1x1x4x4xf32>
      %51 = vector.shape_cast %50 : vector<1x1x1x4x4xf32> to vector<4x4xf32>
      %c1_i32_74 = arith.constant 1 : i32
      %52 = arith.addi %arg12, %c1_i32_74 : i32
      %c0_75 = arith.constant 0 : index
      %53 = arith.index_cast %52 : i32 to index
      %c1_76 = arith.constant 1 : index
      %54 = vector.load %arg10[%c0_75, %53, %c1_76] : memref<4x5x5xf32, #tpu.memory_space<vmem>>, vector<4x1x3xf32>
      %55 = vector.shape_cast %54 : vector<4x1x3xf32> to vector<4x3xf32>
      %cst_77 = arith.constant dense<0.000000e+00> : vector<4x3xf32>
      %56 = tpu.matmul %51, %55, %cst_77 {dimension_numbers = #tpu.dot_dimension_numbers<[1], [0], [0], [1], [0, 0, 1, 1], [], []>} : vector<4x4xf32>, vector<4x3xf32>, vector<4x3xf32> -> vector<4x3xf32>
      %57 = arith.addf %49, %56 : vector<4x3xf32>
      %c2_78 = arith.constant 2 : index
      %c1_79 = arith.constant 1 : index
      %c2_80 = arith.constant 2 : index
      %c0_81 = arith.constant 0 : index
      %c0_82 = arith.constant 0 : index
      %58 = vector.load %arg5[%c2_78, %c1_79, %c2_80, %c0_81, %c0_82] : memref<3x3x3x4x4xf32, #tpu.memory_space<vmem>>, vector<1x1x1x4x4xf32>
      %59 = vector.shape_cast %58 : vector<1x1x1x4x4xf32> to vector<4x4xf32>
      %c1_i32_83 = arith.constant 1 : i32
      %60 = arith.addi %arg12, %c1_i32_83 : i32
      %c0_84 = arith.constant 0 : index
      %61 = arith.index_cast %60 : i32 to index
      %c2_85 = arith.constant 2 : index
      %62 = vector.load %arg10[%c0_84, %61, %c2_85] : memref<4x5x5xf32, #tpu.memory_space<vmem>>, vector<4x1x3xf32>
      %63 = vector.shape_cast %62 : vector<4x1x3xf32> to vector<4x3xf32>
      %cst_86 = arith.constant dense<0.000000e+00> : vector<4x3xf32>
      %64 = tpu.matmul %59, %63, %cst_86 {dimension_numbers = #tpu.dot_dimension_numbers<[1], [0], [0], [1], [0, 0, 1, 1], [], []>} : vector<4x4xf32>, vector<4x3xf32>, vector<4x3xf32> -> vector<4x3xf32>
      %65 = arith.addf %57, %64 : vector<4x3xf32>
      %c2_87 = arith.constant 2 : index
      %c2_88 = arith.constant 2 : index
      %c0_89 = arith.constant 0 : index
      %c0_90 = arith.constant 0 : index
      %c0_91 = arith.constant 0 : index
      %66 = vector.load %arg5[%c2_87, %c2_88, %c0_89, %c0_90, %c0_91] : memref<3x3x3x4x4xf32, #tpu.memory_space<vmem>>, vector<1x1x1x4x4xf32>
      %67 = vector.shape_cast %66 : vector<1x1x1x4x4xf32> to vector<4x4xf32>
      %c2_i32 = arith.constant 2 : i32
      %68 = arith.addi %arg12, %c2_i32 : i32
      %c0_92 = arith.constant 0 : index
      %69 = arith.index_cast %68 : i32 to index
      %c0_93 = arith.constant 0 : index
      %70 = vector.load %arg10[%c0_92, %69, %c0_93] : memref<4x5x5xf32, #tpu.memory_space<vmem>>, vector<4x1x3xf32>
      %71 = vector.shape_cast %70 : vector<4x1x3xf32> to vector<4x3xf32>
      %cst_94 = arith.constant dense<0.000000e+00> : vector<4x3xf32>
      %72 = tpu.matmul %67, %71, %cst_94 {dimension_numbers = #tpu.dot_dimension_numbers<[1], [0], [0], [1], [0, 0, 1, 1], [], []>} : vector<4x4xf32>, vector<4x3xf32>, vector<4x3xf32> -> vector<4x3xf32>
      %73 = arith.addf %65, %72 : vector<4x3xf32>
      %c2_95 = arith.constant 2 : index
      %c2_96 = arith.constant 2 : index
      %c1_97 = arith.constant 1 : index
      %c0_98 = arith.constant 0 : index
      %c0_99 = arith.constant 0 : index
      %74 = vector.load %arg5[%c2_95, %c2_96, %c1_97, %c0_98, %c0_99] : memref<3x3x3x4x4xf32, #tpu.memory_space<vmem>>, vector<1x1x1x4x4xf32>
      %75 = vector.shape_cast %74 : vector<1x1x1x4x4xf32> to vector<4x4xf32>
      %c2_i32_100 = arith.constant 2 : i32
      %76 = arith.addi %arg12, %c2_i32_100 : i32
      %c0_101 = arith.constant 0 : index
      %77 = arith.index_cast %76 : i32 to index
      %c1_102 = arith.constant 1 : index
      %78 = vector.load %arg10[%c0_101, %77, %c1_102] : memref<4x5x5xf32, #tpu.memory_space<vmem>>, vector<4x1x3xf32>
      %79 = vector.shape_cast %78 : vector<4x1x3xf32> to vector<4x3xf32>
      %cst_103 = arith.constant dense<0.000000e+00> : vector<4x3xf32>
      %80 = tpu.matmul %75, %79, %cst_103 {dimension_numbers = #tpu.dot_dimension_numbers<[1], [0], [0], [1], [0, 0, 1, 1], [], []>} : vector<4x4xf32>, vector<4x3xf32>, vector<4x3xf32> -> vector<4x3xf32>
      %81 = arith.addf %73, %80 : vector<4x3xf32>
      %c2_104 = arith.constant 2 : index
      %c2_105 = arith.constant 2 : index
      %c2_106 = arith.constant 2 : index
      %c0_107 = arith.constant 0 : index
      %c0_108 = arith.constant 0 : index
      %82 = vector.load %arg5[%c2_104, %c2_105, %c2_106, %c0_107, %c0_108] : memref<3x3x3x4x4xf32, #tpu.memory_space<vmem>>, vector<1x1x1x4x4xf32>
      %83 = vector.shape_cast %82 : vector<1x1x1x4x4xf32> to vector<4x4xf32>
      %c2_i32_109 = arith.constant 2 : i32
      %84 = arith.addi %arg12, %c2_i32_109 : i32
      %c0_110 = arith.constant 0 : index
      %85 = arith.index_cast %84 : i32 to index
      %c2_111 = arith.constant 2 : index
      %86 = vector.load %arg10[%c0_110, %85, %c2_111] : memref<4x5x5xf32, #tpu.memory_space<vmem>>, vector<4x1x3xf32>
      %87 = vector.shape_cast %86 : vector<4x1x3xf32> to vector<4x3xf32>
      %cst_112 = arith.constant dense<0.000000e+00> : vector<4x3xf32>
      %88 = tpu.matmul %83, %87, %cst_112 {dimension_numbers = #tpu.dot_dimension_numbers<[1], [0], [0], [1], [0, 0, 1, 1], [], []>} : vector<4x4xf32>, vector<4x3xf32>, vector<4x3xf32> -> vector<4x3xf32>
      %89 = arith.addf %81, %88 : vector<4x3xf32>
      %cst_113 = arith.constant dense<0.000000e+00> : vector<4x32xf32>
      %90 = tpu.matmul %89, %13, %cst_113 {dimension_numbers = #tpu.dot_dimension_numbers<[1], [0], [0], [1], [0, 0, 1, 1], [], []>} : vector<4x3xf32>, vector<3x32xf32>, vector<4x32xf32> -> vector<4x32xf32>
      %c0_114 = arith.constant 0 : index
      %91 = arith.index_cast %arg12 : i32 to index
      %c0_115 = arith.constant 0 : index
      %c0_116 = arith.constant 0 : index
      %92 = vector.load %arg8[%c0_114, %91, %c0_115, %c0_116] : memref<1x3x4x32xf32, #tpu.memory_space<vmem>>, vector<1x1x4x32xf32>
      %93 = vector.shape_cast %92 : vector<1x1x4x32xf32> to vector<4x32xf32>
      %94 = vector.shape_cast %90 : vector<4x32xf32> to vector<1x1x4x32xf32>
      tpu.vector_store %arg8[%c0_114, %91, %c0_115, %c0_116], %94 {strides = array<i32>} : memref<1x3x4x32xf32, #tpu.memory_space<vmem>>, vector<1x1x4x32xf32>,
    }
    %c3_i32_32 = arith.constant 3 : i32
    return
  }
  func.func @transform_0(%arg0: i32) -> (i32, i32, i32, i32) {
    %c0_i32 = arith.constant 0 : i32
    %c0_i32_0 = arith.constant 0 : i32
    %c0_i32_1 = arith.constant 0 : i32
    %c0_i32_2 = arith.constant 0 : i32
    return %arg0, %c0_i32, %c0_i32_0, %c0_i32_1 : i32, i32, i32, i32
  }
  func.func @transform_1(%arg0: i32) -> (i32, i32, i32, i32) {
    %c0_i32 = arith.constant 0 : i32
    %c0_i32_0 = arith.constant 0 : i32
    %c0_i32_1 = arith.constant 0 : i32
    %c0_i32_2 = arith.constant 0 : i32
    %c0_i32_3 = arith.constant 0 : i32
    return %c0_i32, %c0_i32_0, %c0_i32_1, %c0_i32_2 : i32, i32, i32, i32
  }
  func.func @transform_2(%arg0: i32) -> (i32, i32) {
    %c0_i32 = arith.constant 0 : i32
    %c0_i32_0 = arith.constant 0 : i32
    %c0_i32_1 = arith.constant 0 : i32
    return %c0_i32, %c0_i32_0 : i32, i32
  }
  func.func @transform_3(%arg0: i32) -> (i32, i32, i32) {
    %c0_i32 = arith.constant 0 : i32
    %c0_i32_0 = arith.constant 0 : i32
    %c0_i32_1 = arith.constant 0 : i32
    %c0_i32_2 = arith.constant 0 : i32
    return %c0_i32, %c0_i32_0, %c0_i32_1 : i32, i32, i32
  }
  func.func @transform_4(%arg0: i32) -> (i32, i32, i32, i32, i32) {
    %c0_i32 = arith.constant 0 : i32
    %c0_i32_0 = arith.constant 0 : i32
    %c0_i32_1 = arith.constant 0 : i32
    %c0_i32_2 = arith.constant 0 : i32
    %c0_i32_3 = arith.constant 0 : i32
    %c0_i32_4 = arith.constant 0 : i32
    return %c0_i32, %c0_i32_0, %c0_i32_1, %c0_i32_2, %c0_i32_3 : i32, i32, i32, i32, i32
  }
  func.func @transform_5(%arg0: i32) -> (i32, i32, i32) {
    %c0_i32 = arith.constant 0 : i32
    %c0_i32_0 = arith.constant 0 : i32
    %c0_i32_1 = arith.constant 0 : i32
    %c0_i32_2 = arith.constant 0 : i32
    return %c0_i32, %c0_i32_0, %c0_i32_1 : i32, i32, i32
  }
  func.func @transform_6(%arg0: i32) -> (i32, i32) {
    %c0_i32 = arith.constant 0 : i32
    %c0_i32_0 = arith.constant 0 : i32
    %c0_i32_1 = arith.constant 0 : i32
    return %c0_i32, %c0_i32_0 : i32, i32
  }
  func.func @transform_7(%arg0: i32) -> (i32, i32, i32, i32) {
    %c0_i32 = arith.constant 0 : i32
    %c0_i32_0 = arith.constant 0 : i32
    %c0_i32_1 = arith.constant 0 : i32
    %c0_i32_2 = arith.constant 0 : i32
    return %arg0, %c0_i32, %c0_i32_0, %c0_i32_1 : i32, i32, i32, i32
  }
}

module attributes {stable_mosaic.version = 11 : i64} {
  func.func @_gate_kernel(%arg0: i32, %arg1: i32, %arg2: memref<32x3xf32, #tpu.memory_space<vmem>>, %arg3: memref<1x3x4x32xf32, #tpu.memory_space<vmem>>, %arg4: memref<1x16x1024xf32, #tpu.memory_space<vmem>>, %arg5: memref<1x4x1024xf32, #tpu.memory_space<vmem>>, %arg6: memref<4x4xf32, #tpu.memory_space<vmem>>, %arg7: memref<4x1xf32, #tpu.memory_space<vmem>>, %arg8: memref<16x4xf32, #tpu.memory_space<vmem>>, %arg9: memref<16x1xf32, #tpu.memory_space<vmem>>, %arg10: memref<1x16x1024xf32, #tpu.memory_space<vmem>>, %arg11: memref<4x1024xf32, #tpu.memory_space<vmem>>) attributes {dimension_semantics = [#tpu.dimension_semantics<parallel>, #tpu.dimension_semantics<parallel>], iteration_bounds = array<i64: 2, 1>, scalar_prefetch = 0 : i64, scratch_operands = 1 : i64, tpu.core_type = #tpu.core_type<tc>, window_params = [{transform_indices = @transform_0, window_bounds = array<i64: 32, 3>}, {transform_indices = @transform_1, window_bounds = array<i64: 1, 3, 4, 32>}, {transform_indices = @transform_2, window_bounds = array<i64: 1, 16, 1024>}, {transform_indices = @transform_3, window_bounds = array<i64: 1, 4, 1024>}, {pipeline_mode = #tpu.pipeline_mode<synchronous>, transform_indices = @transform_4, window_bounds = array<i64: 4, 4>}, {pipeline_mode = #tpu.pipeline_mode<synchronous>, transform_indices = @transform_5, window_bounds = array<i64: 4, 1>}, {pipeline_mode = #tpu.pipeline_mode<synchronous>, transform_indices = @transform_6, window_bounds = array<i64: 16, 4>}, {pipeline_mode = #tpu.pipeline_mode<synchronous>, transform_indices = @transform_7, window_bounds = array<i64: 16, 1>}, {transform_indices = @transform_8, window_bounds = array<i64: 1, 16, 1024>}]} {
    %c0 = arith.constant 0 : index
    %c0_0 = arith.constant 0 : index
    %0 = vector.load %arg2[%c0, %c0_0] : memref<32x3xf32, #tpu.memory_space<vmem>>, vector<1x1xf32>
    %1 = vector.extract %0[0, 0] : f32 from vector<1x1xf32>
    %c0_1 = arith.constant 0 : index
    %c0_2 = arith.constant 0 : index
    %c0_3 = arith.constant 0 : index
    %c0_4 = arith.constant 0 : index
    %2 = vector.load %arg3[%c0_1, %c0_2, %c0_3, %c0_4] : memref<1x3x4x32xf32, #tpu.memory_space<vmem>>, vector<1x1x4x32xf32>
    %3 = vector.shape_cast %2 : vector<1x1x4x32xf32> to vector<4x32xf32>
    %4 = vector.broadcast %1 : f32 to vector<4x32xf32>
    %5 = arith.mulf %4, %3 : vector<4x32xf32>
    %c0_5 = arith.constant 0 : index
    %c1 = arith.constant 1 : index
    %6 = vector.load %arg2[%c0_5, %c1] : memref<32x3xf32, #tpu.memory_space<vmem>>, vector<1x1xf32>
    %7 = vector.extract %6[0, 0] : f32 from vector<1x1xf32>
    %c0_6 = arith.constant 0 : index
    %c1_7 = arith.constant 1 : index
    %c0_8 = arith.constant 0 : index
    %c0_9 = arith.constant 0 : index
    %8 = vector.load %arg3[%c0_6, %c1_7, %c0_8, %c0_9] : memref<1x3x4x32xf32, #tpu.memory_space<vmem>>, vector<1x1x4x32xf32>
    %9 = vector.shape_cast %8 : vector<1x1x4x32xf32> to vector<4x32xf32>
    %10 = vector.broadcast %7 : f32 to vector<4x32xf32>
    %11 = arith.mulf %10, %9 : vector<4x32xf32>
    %12 = arith.addf %5, %11 : vector<4x32xf32>
    %c0_10 = arith.constant 0 : index
    %c2 = arith.constant 2 : index
    %13 = vector.load %arg2[%c0_10, %c2] : memref<32x3xf32, #tpu.memory_space<vmem>>, vector<1x1xf32>
    %14 = vector.extract %13[0, 0] : f32 from vector<1x1xf32>
    %c0_11 = arith.constant 0 : index
    %c2_12 = arith.constant 2 : index
    %c0_13 = arith.constant 0 : index
    %c0_14 = arith.constant 0 : index
    %15 = vector.load %arg3[%c0_11, %c2_12, %c0_13, %c0_14] : memref<1x3x4x32xf32, #tpu.memory_space<vmem>>, vector<1x1x4x32xf32>
    %16 = vector.shape_cast %15 : vector<1x1x4x32xf32> to vector<4x32xf32>
    %17 = vector.broadcast %14 : f32 to vector<4x32xf32>
    %18 = arith.mulf %17, %16 : vector<4x32xf32>
    %19 = arith.addf %12, %18 : vector<4x32xf32>
    %c0_15 = arith.constant 0 : index
    %c0_16 = arith.constant 0 : index
    %20 = vector.load %arg11[%c0_15, %c0_16] : memref<4x1024xf32, #tpu.memory_space<vmem>>, vector<4x32xf32>
    tpu.vector_store %arg11[%c0_15, %c0_16], %19 {strides = array<i32>} : memref<4x1024xf32, #tpu.memory_space<vmem>>, vector<4x32xf32>,
    %c1_17 = arith.constant 1 : index
    %c0_18 = arith.constant 0 : index
    %21 = vector.load %arg2[%c1_17, %c0_18] : memref<32x3xf32, #tpu.memory_space<vmem>>, vector<1x1xf32>
    %22 = vector.extract %21[0, 0] : f32 from vector<1x1xf32>
    %c0_19 = arith.constant 0 : index
    %c0_20 = arith.constant 0 : index
    %c0_21 = arith.constant 0 : index
    %c0_22 = arith.constant 0 : index
    %23 = vector.load %arg3[%c0_19, %c0_20, %c0_21, %c0_22] : memref<1x3x4x32xf32, #tpu.memory_space<vmem>>, vector<1x1x4x32xf32>
    %24 = vector.shape_cast %23 : vector<1x1x4x32xf32> to vector<4x32xf32>
    %25 = vector.broadcast %22 : f32 to vector<4x32xf32>
    %26 = arith.mulf %25, %24 : vector<4x32xf32>
    %c1_23 = arith.constant 1 : index
    %c1_24 = arith.constant 1 : index
    %27 = vector.load %arg2[%c1_23, %c1_24] : memref<32x3xf32, #tpu.memory_space<vmem>>, vector<1x1xf32>
    %28 = vector.extract %27[0, 0] : f32 from vector<1x1xf32>
    %c0_25 = arith.constant 0 : index
    %c1_26 = arith.constant 1 : index
    %c0_27 = arith.constant 0 : index
    %c0_28 = arith.constant 0 : index
    %29 = vector.load %arg3[%c0_25, %c1_26, %c0_27, %c0_28] : memref<1x3x4x32xf32, #tpu.memory_space<vmem>>, vector<1x1x4x32xf32>
    %30 = vector.shape_cast %29 : vector<1x1x4x32xf32> to vector<4x32xf32>
    %31 = vector.broadcast %28 : f32 to vector<4x32xf32>
    %32 = arith.mulf %31, %30 : vector<4x32xf32>
    %33 = arith.addf %26, %32 : vector<4x32xf32>
    %c1_29 = arith.constant 1 : index
    %c2_30 = arith.constant 2 : index
    %34 = vector.load %arg2[%c1_29, %c2_30] : memref<32x3xf32, #tpu.memory_space<vmem>>, vector<1x1xf32>
    %35 = vector.extract %34[0, 0] : f32 from vector<1x1xf32>
    %c0_31 = arith.constant 0 : index
    %c2_32 = arith.constant 2 : index
    %c0_33 = arith.constant 0 : index
    %c0_34 = arith.constant 0 : index
    %36 = vector.load %arg3[%c0_31, %c2_32, %c0_33, %c0_34] : memref<1x3x4x32xf32, #tpu.memory_space<vmem>>, vector<1x1x4x32xf32>
    %37 = vector.shape_cast %36 : vector<1x1x4x32xf32> to vector<4x32xf32>
    %38 = vector.broadcast %35 : f32 to vector<4x32xf32>
    %39 = arith.mulf %38, %37 : vector<4x32xf32>
    %40 = arith.addf %33, %39 : vector<4x32xf32>
    %c0_35 = arith.constant 0 : index
    %c32 = arith.constant 32 : index
    %41 = vector.load %arg11[%c0_35, %c32] : memref<4x1024xf32, #tpu.memory_space<vmem>>, vector<4x32xf32>
    tpu.vector_store %arg11[%c0_35, %c32], %40 {strides = array<i32>} : memref<4x1024xf32, #tpu.memory_space<vmem>>, vector<4x32xf32>,
    %c2_36 = arith.constant 2 : index
    %c0_37 = arith.constant 0 : index
    %42 = vector.load %arg2[%c2_36, %c0_37] : memref<32x3xf32, #tpu.memory_space<vmem>>, vector<1x1xf32>
    %43 = vector.extract %42[0, 0] : f32 from vector<1x1xf32>
    %c0_38 = arith.constant 0 : index
    %c0_39 = arith.constant 0 : index
    %c0_40 = arith.constant 0 : index
    %c0_41 = arith.constant 0 : index
    %44 = vector.load %arg3[%c0_38, %c0_39, %c0_40, %c0_41] : memref<1x3x4x32xf32, #tpu.memory_space<vmem>>, vector<1x1x4x32xf32>
    %45 = vector.shape_cast %44 : vector<1x1x4x32xf32> to vector<4x32xf32>
    %46 = vector.broadcast %43 : f32 to vector<4x32xf32>
    %47 = arith.mulf %46, %45 : vector<4x32xf32>
    %c2_42 = arith.constant 2 : index
    %c1_43 = arith.constant 1 : index
    %48 = vector.load %arg2[%c2_42, %c1_43] : memref<32x3xf32, #tpu.memory_space<vmem>>, vector<1x1xf32>
    %49 = vector.extract %48[0, 0] : f32 from vector<1x1xf32>
    %c0_44 = arith.constant 0 : index
    %c1_45 = arith.constant 1 : index
    %c0_46 = arith.constant 0 : index
    %c0_47 = arith.constant 0 : index
    %50 = vector.load %arg3[%c0_44, %c1_45, %c0_46, %c0_47] : memref<1x3x4x32xf32, #tpu.memory_space<vmem>>, vector<1x1x4x32xf32>
    %51 = vector.shape_cast %50 : vector<1x1x4x32xf32> to vector<4x32xf32>
    %52 = vector.broadcast %49 : f32 to vector<4x32xf32>
    %53 = arith.mulf %52, %51 : vector<4x32xf32>
    %54 = arith.addf %47, %53 : vector<4x32xf32>
    %c2_48 = arith.constant 2 : index
    %c2_49 = arith.constant 2 : index
    %55 = vector.load %arg2[%c2_48, %c2_49] : memref<32x3xf32, #tpu.memory_space<vmem>>, vector<1x1xf32>
    %56 = vector.extract %55[0, 0] : f32 from vector<1x1xf32>
    %c0_50 = arith.constant 0 : index
    %c2_51 = arith.constant 2 : index
    %c0_52 = arith.constant 0 : index
    %c0_53 = arith.constant 0 : index
    %57 = vector.load %arg3[%c0_50, %c2_51, %c0_52, %c0_53] : memref<1x3x4x32xf32, #tpu.memory_space<vmem>>, vector<1x1x4x32xf32>
    %58 = vector.shape_cast %57 : vector<1x1x4x32xf32> to vector<4x32xf32>
    %59 = vector.broadcast %56 : f32 to vector<4x32xf32>
    %60 = arith.mulf %59, %58 : vector<4x32xf32>
    %61 = arith.addf %54, %60 : vector<4x32xf32>
    %c0_54 = arith.constant 0 : index
    %c64 = arith.constant 64 : index
    %62 = vector.load %arg11[%c0_54, %c64] : memref<4x1024xf32, #tpu.memory_space<vmem>>, vector<4x32xf32>
    tpu.vector_store %arg11[%c0_54, %c64], %61 {strides = array<i32>} : memref<4x1024xf32, #tpu.memory_space<vmem>>, vector<4x32xf32>,
    %c3 = arith.constant 3 : index
    %c0_55 = arith.constant 0 : index
    %63 = vector.load %arg2[%c3, %c0_55] : memref<32x3xf32, #tpu.memory_space<vmem>>, vector<1x1xf32>
    %64 = vector.extract %63[0, 0] : f32 from vector<1x1xf32>
    %c0_56 = arith.constant 0 : index
    %c0_57 = arith.constant 0 : index
    %c0_58 = arith.constant 0 : index
    %c0_59 = arith.constant 0 : index
    %65 = vector.load %arg3[%c0_56, %c0_57, %c0_58, %c0_59] : memref<1x3x4x32xf32, #tpu.memory_space<vmem>>, vector<1x1x4x32xf32>
    %66 = vector.shape_cast %65 : vector<1x1x4x32xf32> to vector<4x32xf32>
    %67 = vector.broadcast %64 : f32 to vector<4x32xf32>
    %68 = arith.mulf %67, %66 : vector<4x32xf32>
    %c3_60 = arith.constant 3 : index
    %c1_61 = arith.constant 1 : index
    %69 = vector.load %arg2[%c3_60, %c1_61] : memref<32x3xf32, #tpu.memory_space<vmem>>, vector<1x1xf32>
    %70 = vector.extract %69[0, 0] : f32 from vector<1x1xf32>
    %c0_62 = arith.constant 0 : index
    %c1_63 = arith.constant 1 : index
    %c0_64 = arith.constant 0 : index
    %c0_65 = arith.constant 0 : index
    %71 = vector.load %arg3[%c0_62, %c1_63, %c0_64, %c0_65] : memref<1x3x4x32xf32, #tpu.memory_space<vmem>>, vector<1x1x4x32xf32>
    %72 = vector.shape_cast %71 : vector<1x1x4x32xf32> to vector<4x32xf32>
    %73 = vector.broadcast %70 : f32 to vector<4x32xf32>
    %74 = arith.mulf %73, %72 : vector<4x32xf32>
    %75 = arith.addf %68, %74 : vector<4x32xf32>
    %c3_66 = arith.constant 3 : index
    %c2_67 = arith.constant 2 : index
    %76 = vector.load %arg2[%c3_66, %c2_67] : memref<32x3xf32, #tpu.memory_space<vmem>>, vector<1x1xf32>
    %77 = vector.extract %76[0, 0] : f32 from vector<1x1xf32>
    %c0_68 = arith.constant 0 : index
    %c2_69 = arith.constant 2 : index
    %c0_70 = arith.constant 0 : index
    %c0_71 = arith.constant 0 : index
    %78 = vector.load %arg3[%c0_68, %c2_69, %c0_70, %c0_71] : memref<1x3x4x32xf32, #tpu.memory_space<vmem>>, vector<1x1x4x32xf32>
    %79 = vector.shape_cast %78 : vector<1x1x4x32xf32> to vector<4x32xf32>
    %80 = vector.broadcast %77 : f32 to vector<4x32xf32>
    %81 = arith.mulf %80, %79 : vector<4x32xf32>
    %82 = arith.addf %75, %81 : vector<4x32xf32>
    %c0_72 = arith.constant 0 : index
    %c96 = arith.constant 96 : index
    %83 = vector.load %arg11[%c0_72, %c96] : memref<4x1024xf32, #tpu.memory_space<vmem>>, vector<4x32xf32>
    tpu.vector_store %arg11[%c0_72, %c96], %82 {strides = array<i32>} : memref<4x1024xf32, #tpu.memory_space<vmem>>, vector<4x32xf32>,
    %c4 = arith.constant 4 : index
    %c0_73 = arith.constant 0 : index
    %84 = vector.load %arg2[%c4, %c0_73] : memref<32x3xf32, #tpu.memory_space<vmem>>, vector<1x1xf32>
    %85 = vector.extract %84[0, 0] : f32 from vector<1x1xf32>
    %c0_74 = arith.constant 0 : index
    %c0_75 = arith.constant 0 : index
    %c0_76 = arith.constant 0 : index
    %c0_77 = arith.constant 0 : index
    %86 = vector.load %arg3[%c0_74, %c0_75, %c0_76, %c0_77] : memref<1x3x4x32xf32, #tpu.memory_space<vmem>>, vector<1x1x4x32xf32>
    %87 = vector.shape_cast %86 : vector<1x1x4x32xf32> to vector<4x32xf32>
    %88 = vector.broadcast %85 : f32 to vector<4x32xf32>
    %89 = arith.mulf %88, %87 : vector<4x32xf32>
    %c4_78 = arith.constant 4 : index
    %c1_79 = arith.constant 1 : index
    %90 = vector.load %arg2[%c4_78, %c1_79] : memref<32x3xf32, #tpu.memory_space<vmem>>, vector<1x1xf32>
    %91 = vector.extract %90[0, 0] : f32 from vector<1x1xf32>
    %c0_80 = arith.constant 0 : index
    %c1_81 = arith.constant 1 : index
    %c0_82 = arith.constant 0 : index
    %c0_83 = arith.constant 0 : index
    %92 = vector.load %arg3[%c0_80, %c1_81, %c0_82, %c0_83] : memref<1x3x4x32xf32, #tpu.memory_space<vmem>>, vector<1x1x4x32xf32>
    %93 = vector.shape_cast %92 : vector<1x1x4x32xf32> to vector<4x32xf32>
    %94 = vector.broadcast %91 : f32 to vector<4x32xf32>
    %95 = arith.mulf %94, %93 : vector<4x32xf32>
    %96 = arith.addf %89, %95 : vector<4x32xf32>
    %c4_84 = arith.constant 4 : index
    %c2_85 = arith.constant 2 : index
    %97 = vector.load %arg2[%c4_84, %c2_85] : memref<32x3xf32, #tpu.memory_space<vmem>>, vector<1x1xf32>
    %98 = vector.extract %97[0, 0] : f32 from vector<1x1xf32>
    %c0_86 = arith.constant 0 : index
    %c2_87 = arith.constant 2 : index
    %c0_88 = arith.constant 0 : index
    %c0_89 = arith.constant 0 : index
    %99 = vector.load %arg3[%c0_86, %c2_87, %c0_88, %c0_89] : memref<1x3x4x32xf32, #tpu.memory_space<vmem>>, vector<1x1x4x32xf32>
    %100 = vector.shape_cast %99 : vector<1x1x4x32xf32> to vector<4x32xf32>
    %101 = vector.broadcast %98 : f32 to vector<4x32xf32>
    %102 = arith.mulf %101, %100 : vector<4x32xf32>
    %103 = arith.addf %96, %102 : vector<4x32xf32>
    %c0_90 = arith.constant 0 : index
    %c128 = arith.constant 128 : index
    %104 = vector.load %arg11[%c0_90, %c128] : memref<4x1024xf32, #tpu.memory_space<vmem>>, vector<4x32xf32>
    tpu.vector_store %arg11[%c0_90, %c128], %103 {strides = array<i32>} : memref<4x1024xf32, #tpu.memory_space<vmem>>, vector<4x32xf32>,
    %c5 = arith.constant 5 : index
    %c0_91 = arith.constant 0 : index
    %105 = vector.load %arg2[%c5, %c0_91] : memref<32x3xf32, #tpu.memory_space<vmem>>, vector<1x1xf32>
    %106 = vector.extract %105[0, 0] : f32 from vector<1x1xf32>
    %c0_92 = arith.constant 0 : index
    %c0_93 = arith.constant 0 : index
    %c0_94 = arith.constant 0 : index
    %c0_95 = arith.constant 0 : index
    %107 = vector.load %arg3[%c0_92, %c0_93, %c0_94, %c0_95] : memref<1x3x4x32xf32, #tpu.memory_space<vmem>>, vector<1x1x4x32xf32>
    %108 = vector.shape_cast %107 : vector<1x1x4x32xf32> to vector<4x32xf32>
    %109 = vector.broadcast %106 : f32 to vector<4x32xf32>
    %110 = arith.mulf %109, %108 : vector<4x32xf32>
    %c5_96 = arith.constant 5 : index
    %c1_97 = arith.constant 1 : index
    %111 = vector.load %arg2[%c5_96, %c1_97] : memref<32x3xf32, #tpu.memory_space<vmem>>, vector<1x1xf32>
    %112 = vector.extract %111[0, 0] : f32 from vector<1x1xf32>
    %c0_98 = arith.constant 0 : index
    %c1_99 = arith.constant 1 : index
    %c0_100 = arith.constant 0 : index
    %c0_101 = arith.constant 0 : index
    %113 = vector.load %arg3[%c0_98, %c1_99, %c0_100, %c0_101] : memref<1x3x4x32xf32, #tpu.memory_space<vmem>>, vector<1x1x4x32xf32>
    %114 = vector.shape_cast %113 : vector<1x1x4x32xf32> to vector<4x32xf32>
    %115 = vector.broadcast %112 : f32 to vector<4x32xf32>
    %116 = arith.mulf %115, %114 : vector<4x32xf32>
    %117 = arith.addf %110, %116 : vector<4x32xf32>
    %c5_102 = arith.constant 5 : index
    %c2_103 = arith.constant 2 : index
    %118 = vector.load %arg2[%c5_102, %c2_103] : memref<32x3xf32, #tpu.memory_space<vmem>>, vector<1x1xf32>
    %119 = vector.extract %118[0, 0] : f32 from vector<1x1xf32>
    %c0_104 = arith.constant 0 : index
    %c2_105 = arith.constant 2 : index
    %c0_106 = arith.constant 0 : index
    %c0_107 = arith.constant 0 : index
    %120 = vector.load %arg3[%c0_104, %c2_105, %c0_106, %c0_107] : memref<1x3x4x32xf32, #tpu.memory_space<vmem>>, vector<1x1x4x32xf32>
    %121 = vector.shape_cast %120 : vector<1x1x4x32xf32> to vector<4x32xf32>
    %122 = vector.broadcast %119 : f32 to vector<4x32xf32>
    %123 = arith.mulf %122, %121 : vector<4x32xf32>
    %124 = arith.addf %117, %123 : vector<4x32xf32>
    %c0_108 = arith.constant 0 : index
    %c160 = arith.constant 160 : index
    %125 = vector.load %arg11[%c0_108, %c160] : memref<4x1024xf32, #tpu.memory_space<vmem>>, vector<4x32xf32>
    tpu.vector_store %arg11[%c0_108, %c160], %124 {strides = array<i32>} : memref<4x1024xf32, #tpu.memory_space<vmem>>, vector<4x32xf32>,
    %c6 = arith.constant 6 : index
    %c0_109 = arith.constant 0 : index
    %126 = vector.load %arg2[%c6, %c0_109] : memref<32x3xf32, #tpu.memory_space<vmem>>, vector<1x1xf32>
    %127 = vector.extract %126[0, 0] : f32 from vector<1x1xf32>
    %c0_110 = arith.constant 0 : index
    %c0_111 = arith.constant 0 : index
    %c0_112 = arith.constant 0 : index
    %c0_113 = arith.constant 0 : index
    %128 = vector.load %arg3[%c0_110, %c0_111, %c0_112, %c0_113] : memref<1x3x4x32xf32, #tpu.memory_space<vmem>>, vector<1x1x4x32xf32>
    %129 = vector.shape_cast %128 : vector<1x1x4x32xf32> to vector<4x32xf32>
    %130 = vector.broadcast %127 : f32 to vector<4x32xf32>
    %131 = arith.mulf %130, %129 : vector<4x32xf32>
    %c6_114 = arith.constant 6 : index
    %c1_115 = arith.constant 1 : index
    %132 = vector.load %arg2[%c6_114, %c1_115] : memref<32x3xf32, #tpu.memory_space<vmem>>, vector<1x1xf32>
    %133 = vector.extract %132[0, 0] : f32 from vector<1x1xf32>
    %c0_116 = arith.constant 0 : index
    %c1_117 = arith.constant 1 : index
    %c0_118 = arith.constant 0 : index
    %c0_119 = arith.constant 0 : index
    %134 = vector.load %arg3[%c0_116, %c1_117, %c0_118, %c0_119] : memref<1x3x4x32xf32, #tpu.memory_space<vmem>>, vector<1x1x4x32xf32>
    %135 = vector.shape_cast %134 : vector<1x1x4x32xf32> to vector<4x32xf32>
    %136 = vector.broadcast %133 : f32 to vector<4x32xf32>
    %137 = arith.mulf %136, %135 : vector<4x32xf32>
    %138 = arith.addf %131, %137 : vector<4x32xf32>
    %c6_120 = arith.constant 6 : index
    %c2_121 = arith.constant 2 : index
    %139 = vector.load %arg2[%c6_120, %c2_121] : memref<32x3xf32, #tpu.memory_space<vmem>>, vector<1x1xf32>
    %140 = vector.extract %139[0, 0] : f32 from vector<1x1xf32>
    %c0_122 = arith.constant 0 : index
    %c2_123 = arith.constant 2 : index
    %c0_124 = arith.constant 0 : index
    %c0_125 = arith.constant 0 : index
    %141 = vector.load %arg3[%c0_122, %c2_123, %c0_124, %c0_125] : memref<1x3x4x32xf32, #tpu.memory_space<vmem>>, vector<1x1x4x32xf32>
    %142 = vector.shape_cast %141 : vector<1x1x4x32xf32> to vector<4x32xf32>
    %143 = vector.broadcast %140 : f32 to vector<4x32xf32>
    %144 = arith.mulf %143, %142 : vector<4x32xf32>
    %145 = arith.addf %138, %144 : vector<4x32xf32>
    %c0_126 = arith.constant 0 : index
    %c192 = arith.constant 192 : index
    %146 = vector.load %arg11[%c0_126, %c192] : memref<4x1024xf32, #tpu.memory_space<vmem>>, vector<4x32xf32>
    tpu.vector_store %arg11[%c0_126, %c192], %145 {strides = array<i32>} : memref<4x1024xf32, #tpu.memory_space<vmem>>, vector<4x32xf32>,
    %c7 = arith.constant 7 : index
    %c0_127 = arith.constant 0 : index
    %147 = vector.load %arg2[%c7, %c0_127] : memref<32x3xf32, #tpu.memory_space<vmem>>, vector<1x1xf32>
    %148 = vector.extract %147[0, 0] : f32 from vector<1x1xf32>
    %c0_128 = arith.constant 0 : index
    %c0_129 = arith.constant 0 : index
    %c0_130 = arith.constant 0 : index
    %c0_131 = arith.constant 0 : index
    %149 = vector.load %arg3[%c0_128, %c0_129, %c0_130, %c0_131] : memref<1x3x4x32xf32, #tpu.memory_space<vmem>>, vector<1x1x4x32xf32>
    %150 = vector.shape_cast %149 : vector<1x1x4x32xf32> to vector<4x32xf32>
    %151 = vector.broadcast %148 : f32 to vector<4x32xf32>
    %152 = arith.mulf %151, %150 : vector<4x32xf32>
    %c7_132 = arith.constant 7 : index
    %c1_133 = arith.constant 1 : index
    %153 = vector.load %arg2[%c7_132, %c1_133] : memref<32x3xf32, #tpu.memory_space<vmem>>, vector<1x1xf32>
    %154 = vector.extract %153[0, 0] : f32 from vector<1x1xf32>
    %c0_134 = arith.constant 0 : index
    %c1_135 = arith.constant 1 : index
    %c0_136 = arith.constant 0 : index
    %c0_137 = arith.constant 0 : index
    %155 = vector.load %arg3[%c0_134, %c1_135, %c0_136, %c0_137] : memref<1x3x4x32xf32, #tpu.memory_space<vmem>>, vector<1x1x4x32xf32>
    %156 = vector.shape_cast %155 : vector<1x1x4x32xf32> to vector<4x32xf32>
    %157 = vector.broadcast %154 : f32 to vector<4x32xf32>
    %158 = arith.mulf %157, %156 : vector<4x32xf32>
    %159 = arith.addf %152, %158 : vector<4x32xf32>
    %c7_138 = arith.constant 7 : index
    %c2_139 = arith.constant 2 : index
    %160 = vector.load %arg2[%c7_138, %c2_139] : memref<32x3xf32, #tpu.memory_space<vmem>>, vector<1x1xf32>
    %161 = vector.extract %160[0, 0] : f32 from vector<1x1xf32>
    %c0_140 = arith.constant 0 : index
    %c2_141 = arith.constant 2 : index
    %c0_142 = arith.constant 0 : index
    %c0_143 = arith.constant 0 : index
    %162 = vector.load %arg3[%c0_140, %c2_141, %c0_142, %c0_143] : memref<1x3x4x32xf32, #tpu.memory_space<vmem>>, vector<1x1x4x32xf32>
    %163 = vector.shape_cast %162 : vector<1x1x4x32xf32> to vector<4x32xf32>
    %164 = vector.broadcast %161 : f32 to vector<4x32xf32>
    %165 = arith.mulf %164, %163 : vector<4x32xf32>
    %166 = arith.addf %159, %165 : vector<4x32xf32>
    %c0_144 = arith.constant 0 : index
    %c224 = arith.constant 224 : index
    %167 = vector.load %arg11[%c0_144, %c224] : memref<4x1024xf32, #tpu.memory_space<vmem>>, vector<4x32xf32>
    tpu.vector_store %arg11[%c0_144, %c224], %166 {strides = array<i32>} : memref<4x1024xf32, #tpu.memory_space<vmem>>, vector<4x32xf32>,
    %c8 = arith.constant 8 : index
    %c0_145 = arith.constant 0 : index
    %168 = vector.load %arg2[%c8, %c0_145] : memref<32x3xf32, #tpu.memory_space<vmem>>, vector<1x1xf32>
    %169 = vector.extract %168[0, 0] : f32 from vector<1x1xf32>
    %c0_146 = arith.constant 0 : index
    %c0_147 = arith.constant 0 : index
    %c0_148 = arith.constant 0 : index
    %c0_149 = arith.constant 0 : index
    %170 = vector.load %arg3[%c0_146, %c0_147, %c0_148, %c0_149] : memref<1x3x4x32xf32, #tpu.memory_space<vmem>>, vector<1x1x4x32xf32>
    %171 = vector.shape_cast %170 : vector<1x1x4x32xf32> to vector<4x32xf32>
    %172 = vector.broadcast %169 : f32 to vector<4x32xf32>
    %173 = arith.mulf %172, %171 : vector<4x32xf32>
    %c8_150 = arith.constant 8 : index
    %c1_151 = arith.constant 1 : index
    %174 = vector.load %arg2[%c8_150, %c1_151] : memref<32x3xf32, #tpu.memory_space<vmem>>, vector<1x1xf32>
    %175 = vector.extract %174[0, 0] : f32 from vector<1x1xf32>
    %c0_152 = arith.constant 0 : index
    %c1_153 = arith.constant 1 : index
    %c0_154 = arith.constant 0 : index
    %c0_155 = arith.constant 0 : index
    %176 = vector.load %arg3[%c0_152, %c1_153, %c0_154, %c0_155] : memref<1x3x4x32xf32, #tpu.memory_space<vmem>>, vector<1x1x4x32xf32>
    %177 = vector.shape_cast %176 : vector<1x1x4x32xf32> to vector<4x32xf32>
    %178 = vector.broadcast %175 : f32 to vector<4x32xf32>
    %179 = arith.mulf %178, %177 : vector<4x32xf32>
    %180 = arith.addf %173, %179 : vector<4x32xf32>
    %c8_156 = arith.constant 8 : index
    %c2_157 = arith.constant 2 : index
    %181 = vector.load %arg2[%c8_156, %c2_157] : memref<32x3xf32, #tpu.memory_space<vmem>>, vector<1x1xf32>
    %182 = vector.extract %181[0, 0] : f32 from vector<1x1xf32>
    %c0_158 = arith.constant 0 : index
    %c2_159 = arith.constant 2 : index
    %c0_160 = arith.constant 0 : index
    %c0_161 = arith.constant 0 : index
    %183 = vector.load %arg3[%c0_158, %c2_159, %c0_160, %c0_161] : memref<1x3x4x32xf32, #tpu.memory_space<vmem>>, vector<1x1x4x32xf32>
    %184 = vector.shape_cast %183 : vector<1x1x4x32xf32> to vector<4x32xf32>
    %185 = vector.broadcast %182 : f32 to vector<4x32xf32>
    %186 = arith.mulf %185, %184 : vector<4x32xf32>
    %187 = arith.addf %180, %186 : vector<4x32xf32>
    %c0_162 = arith.constant 0 : index
    %c256 = arith.constant 256 : index
    %188 = vector.load %arg11[%c0_162, %c256] : memref<4x1024xf32, #tpu.memory_space<vmem>>, vector<4x32xf32>
    tpu.vector_store %arg11[%c0_162, %c256], %187 {strides = array<i32>} : memref<4x1024xf32, #tpu.memory_space<vmem>>, vector<4x32xf32>,
    %c9 = arith.constant 9 : index
    %c0_163 = arith.constant 0 : index
    %189 = vector.load %arg2[%c9, %c0_163] : memref<32x3xf32, #tpu.memory_space<vmem>>, vector<1x1xf32>
    %190 = vector.extract %189[0, 0] : f32 from vector<1x1xf32>
    %c0_164 = arith.constant 0 : index
    %c0_165 = arith.constant 0 : index
    %c0_166 = arith.constant 0 : index
    %c0_167 = arith.constant 0 : index
    %191 = vector.load %arg3[%c0_164, %c0_165, %c0_166, %c0_167] : memref<1x3x4x32xf32, #tpu.memory_space<vmem>>, vector<1x1x4x32xf32>
    %192 = vector.shape_cast %191 : vector<1x1x4x32xf32> to vector<4x32xf32>
    %193 = vector.broadcast %190 : f32 to vector<4x32xf32>
    %194 = arith.mulf %193, %192 : vector<4x32xf32>
    %c9_168 = arith.constant 9 : index
    %c1_169 = arith.constant 1 : index
    %195 = vector.load %arg2[%c9_168, %c1_169] : memref<32x3xf32, #tpu.memory_space<vmem>>, vector<1x1xf32>
    %196 = vector.extract %195[0, 0] : f32 from vector<1x1xf32>
    %c0_170 = arith.constant 0 : index
    %c1_171 = arith.constant 1 : index
    %c0_172 = arith.constant 0 : index
    %c0_173 = arith.constant 0 : index
    %197 = vector.load %arg3[%c0_170, %c1_171, %c0_172, %c0_173] : memref<1x3x4x32xf32, #tpu.memory_space<vmem>>, vector<1x1x4x32xf32>
    %198 = vector.shape_cast %197 : vector<1x1x4x32xf32> to vector<4x32xf32>
    %199 = vector.broadcast %196 : f32 to vector<4x32xf32>
    %200 = arith.mulf %199, %198 : vector<4x32xf32>
    %201 = arith.addf %194, %200 : vector<4x32xf32>
    %c9_174 = arith.constant 9 : index
    %c2_175 = arith.constant 2 : index
    %202 = vector.load %arg2[%c9_174, %c2_175] : memref<32x3xf32, #tpu.memory_space<vmem>>, vector<1x1xf32>
    %203 = vector.extract %202[0, 0] : f32 from vector<1x1xf32>
    %c0_176 = arith.constant 0 : index
    %c2_177 = arith.constant 2 : index
    %c0_178 = arith.constant 0 : index
    %c0_179 = arith.constant 0 : index
    %204 = vector.load %arg3[%c0_176, %c2_177, %c0_178, %c0_179] : memref<1x3x4x32xf32, #tpu.memory_space<vmem>>, vector<1x1x4x32xf32>
    %205 = vector.shape_cast %204 : vector<1x1x4x32xf32> to vector<4x32xf32>
    %206 = vector.broadcast %203 : f32 to vector<4x32xf32>
    %207 = arith.mulf %206, %205 : vector<4x32xf32>
    %208 = arith.addf %201, %207 : vector<4x32xf32>
    %c0_180 = arith.constant 0 : index
    %c288 = arith.constant 288 : index
    %209 = vector.load %arg11[%c0_180, %c288] : memref<4x1024xf32, #tpu.memory_space<vmem>>, vector<4x32xf32>
    tpu.vector_store %arg11[%c0_180, %c288], %208 {strides = array<i32>} : memref<4x1024xf32, #tpu.memory_space<vmem>>, vector<4x32xf32>,
    %c10 = arith.constant 10 : index
    %c0_181 = arith.constant 0 : index
    %210 = vector.load %arg2[%c10, %c0_181] : memref<32x3xf32, #tpu.memory_space<vmem>>, vector<1x1xf32>
    %211 = vector.extract %210[0, 0] : f32 from vector<1x1xf32>
    %c0_182 = arith.constant 0 : index
    %c0_183 = arith.constant 0 : index
    %c0_184 = arith.constant 0 : index
    %c0_185 = arith.constant 0 : index
    %212 = vector.load %arg3[%c0_182, %c0_183, %c0_184, %c0_185] : memref<1x3x4x32xf32, #tpu.memory_space<vmem>>, vector<1x1x4x32xf32>
    %213 = vector.shape_cast %212 : vector<1x1x4x32xf32> to vector<4x32xf32>
    %214 = vector.broadcast %211 : f32 to vector<4x32xf32>
    %215 = arith.mulf %214, %213 : vector<4x32xf32>
    %c10_186 = arith.constant 10 : index
    %c1_187 = arith.constant 1 : index
    %216 = vector.load %arg2[%c10_186, %c1_187] : memref<32x3xf32, #tpu.memory_space<vmem>>, vector<1x1xf32>
    %217 = vector.extract %216[0, 0] : f32 from vector<1x1xf32>
    %c0_188 = arith.constant 0 : index
    %c1_189 = arith.constant 1 : index
    %c0_190 = arith.constant 0 : index
    %c0_191 = arith.constant 0 : index
    %218 = vector.load %arg3[%c0_188, %c1_189, %c0_190, %c0_191] : memref<1x3x4x32xf32, #tpu.memory_space<vmem>>, vector<1x1x4x32xf32>
    %219 = vector.shape_cast %218 : vector<1x1x4x32xf32> to vector<4x32xf32>
    %220 = vector.broadcast %217 : f32 to vector<4x32xf32>
    %221 = arith.mulf %220, %219 : vector<4x32xf32>
    %222 = arith.addf %215, %221 : vector<4x32xf32>
    %c10_192 = arith.constant 10 : index
    %c2_193 = arith.constant 2 : index
    %223 = vector.load %arg2[%c10_192, %c2_193] : memref<32x3xf32, #tpu.memory_space<vmem>>, vector<1x1xf32>
    %224 = vector.extract %223[0, 0] : f32 from vector<1x1xf32>
    %c0_194 = arith.constant 0 : index
    %c2_195 = arith.constant 2 : index
    %c0_196 = arith.constant 0 : index
    %c0_197 = arith.constant 0 : index
    %225 = vector.load %arg3[%c0_194, %c2_195, %c0_196, %c0_197] : memref<1x3x4x32xf32, #tpu.memory_space<vmem>>, vector<1x1x4x32xf32>
    %226 = vector.shape_cast %225 : vector<1x1x4x32xf32> to vector<4x32xf32>
    %227 = vector.broadcast %224 : f32 to vector<4x32xf32>
    %228 = arith.mulf %227, %226 : vector<4x32xf32>
    %229 = arith.addf %222, %228 : vector<4x32xf32>
    %c0_198 = arith.constant 0 : index
    %c320 = arith.constant 320 : index
    %230 = vector.load %arg11[%c0_198, %c320] : memref<4x1024xf32, #tpu.memory_space<vmem>>, vector<4x32xf32>
    tpu.vector_store %arg11[%c0_198, %c320], %229 {strides = array<i32>} : memref<4x1024xf32, #tpu.memory_space<vmem>>, vector<4x32xf32>,
    %c11 = arith.constant 11 : index
    %c0_199 = arith.constant 0 : index
    %231 = vector.load %arg2[%c11, %c0_199] : memref<32x3xf32, #tpu.memory_space<vmem>>, vector<1x1xf32>
    %232 = vector.extract %231[0, 0] : f32 from vector<1x1xf32>
    %c0_200 = arith.constant 0 : index
    %c0_201 = arith.constant 0 : index
    %c0_202 = arith.constant 0 : index
    %c0_203 = arith.constant 0 : index
    %233 = vector.load %arg3[%c0_200, %c0_201, %c0_202, %c0_203] : memref<1x3x4x32xf32, #tpu.memory_space<vmem>>, vector<1x1x4x32xf32>
    %234 = vector.shape_cast %233 : vector<1x1x4x32xf32> to vector<4x32xf32>
    %235 = vector.broadcast %232 : f32 to vector<4x32xf32>
    %236 = arith.mulf %235, %234 : vector<4x32xf32>
    %c11_204 = arith.constant 11 : index
    %c1_205 = arith.constant 1 : index
    %237 = vector.load %arg2[%c11_204, %c1_205] : memref<32x3xf32, #tpu.memory_space<vmem>>, vector<1x1xf32>
    %238 = vector.extract %237[0, 0] : f32 from vector<1x1xf32>
    %c0_206 = arith.constant 0 : index
    %c1_207 = arith.constant 1 : index
    %c0_208 = arith.constant 0 : index
    %c0_209 = arith.constant 0 : index
    %239 = vector.load %arg3[%c0_206, %c1_207, %c0_208, %c0_209] : memref<1x3x4x32xf32, #tpu.memory_space<vmem>>, vector<1x1x4x32xf32>
    %240 = vector.shape_cast %239 : vector<1x1x4x32xf32> to vector<4x32xf32>
    %241 = vector.broadcast %238 : f32 to vector<4x32xf32>
    %242 = arith.mulf %241, %240 : vector<4x32xf32>
    %243 = arith.addf %236, %242 : vector<4x32xf32>
    %c11_210 = arith.constant 11 : index
    %c2_211 = arith.constant 2 : index
    %244 = vector.load %arg2[%c11_210, %c2_211] : memref<32x3xf32, #tpu.memory_space<vmem>>, vector<1x1xf32>
    %245 = vector.extract %244[0, 0] : f32 from vector<1x1xf32>
    %c0_212 = arith.constant 0 : index
    %c2_213 = arith.constant 2 : index
    %c0_214 = arith.constant 0 : index
    %c0_215 = arith.constant 0 : index
    %246 = vector.load %arg3[%c0_212, %c2_213, %c0_214, %c0_215] : memref<1x3x4x32xf32, #tpu.memory_space<vmem>>, vector<1x1x4x32xf32>
    %247 = vector.shape_cast %246 : vector<1x1x4x32xf32> to vector<4x32xf32>
    %248 = vector.broadcast %245 : f32 to vector<4x32xf32>
    %249 = arith.mulf %248, %247 : vector<4x32xf32>
    %250 = arith.addf %243, %249 : vector<4x32xf32>
    %c0_216 = arith.constant 0 : index
    %c352 = arith.constant 352 : index
    %251 = vector.load %arg11[%c0_216, %c352] : memref<4x1024xf32, #tpu.memory_space<vmem>>, vector<4x32xf32>
    tpu.vector_store %arg11[%c0_216, %c352], %250 {strides = array<i32>} : memref<4x1024xf32, #tpu.memory_space<vmem>>, vector<4x32xf32>,
    %c12 = arith.constant 12 : index
    %c0_217 = arith.constant 0 : index
    %252 = vector.load %arg2[%c12, %c0_217] : memref<32x3xf32, #tpu.memory_space<vmem>>, vector<1x1xf32>
    %253 = vector.extract %252[0, 0] : f32 from vector<1x1xf32>
    %c0_218 = arith.constant 0 : index
    %c0_219 = arith.constant 0 : index
    %c0_220 = arith.constant 0 : index
    %c0_221 = arith.constant 0 : index
    %254 = vector.load %arg3[%c0_218, %c0_219, %c0_220, %c0_221] : memref<1x3x4x32xf32, #tpu.memory_space<vmem>>, vector<1x1x4x32xf32>
    %255 = vector.shape_cast %254 : vector<1x1x4x32xf32> to vector<4x32xf32>
    %256 = vector.broadcast %253 : f32 to vector<4x32xf32>
    %257 = arith.mulf %256, %255 : vector<4x32xf32>
    %c12_222 = arith.constant 12 : index
    %c1_223 = arith.constant 1 : index
    %258 = vector.load %arg2[%c12_222, %c1_223] : memref<32x3xf32, #tpu.memory_space<vmem>>, vector<1x1xf32>
    %259 = vector.extract %258[0, 0] : f32 from vector<1x1xf32>
    %c0_224 = arith.constant 0 : index
    %c1_225 = arith.constant 1 : index
    %c0_226 = arith.constant 0 : index
    %c0_227 = arith.constant 0 : index
    %260 = vector.load %arg3[%c0_224, %c1_225, %c0_226, %c0_227] : memref<1x3x4x32xf32, #tpu.memory_space<vmem>>, vector<1x1x4x32xf32>
    %261 = vector.shape_cast %260 : vector<1x1x4x32xf32> to vector<4x32xf32>
    %262 = vector.broadcast %259 : f32 to vector<4x32xf32>
    %263 = arith.mulf %262, %261 : vector<4x32xf32>
    %264 = arith.addf %257, %263 : vector<4x32xf32>
    %c12_228 = arith.constant 12 : index
    %c2_229 = arith.constant 2 : index
    %265 = vector.load %arg2[%c12_228, %c2_229] : memref<32x3xf32, #tpu.memory_space<vmem>>, vector<1x1xf32>
    %266 = vector.extract %265[0, 0] : f32 from vector<1x1xf32>
    %c0_230 = arith.constant 0 : index
    %c2_231 = arith.constant 2 : index
    %c0_232 = arith.constant 0 : index
    %c0_233 = arith.constant 0 : index
    %267 = vector.load %arg3[%c0_230, %c2_231, %c0_232, %c0_233] : memref<1x3x4x32xf32, #tpu.memory_space<vmem>>, vector<1x1x4x32xf32>
    %268 = vector.shape_cast %267 : vector<1x1x4x32xf32> to vector<4x32xf32>
    %269 = vector.broadcast %266 : f32 to vector<4x32xf32>
    %270 = arith.mulf %269, %268 : vector<4x32xf32>
    %271 = arith.addf %264, %270 : vector<4x32xf32>
    %c0_234 = arith.constant 0 : index
    %c384 = arith.constant 384 : index
    %272 = vector.load %arg11[%c0_234, %c384] : memref<4x1024xf32, #tpu.memory_space<vmem>>, vector<4x32xf32>
    tpu.vector_store %arg11[%c0_234, %c384], %271 {strides = array<i32>} : memref<4x1024xf32, #tpu.memory_space<vmem>>, vector<4x32xf32>,
    %c13 = arith.constant 13 : index
    %c0_235 = arith.constant 0 : index
    %273 = vector.load %arg2[%c13, %c0_235] : memref<32x3xf32, #tpu.memory_space<vmem>>, vector<1x1xf32>
    %274 = vector.extract %273[0, 0] : f32 from vector<1x1xf32>
    %c0_236 = arith.constant 0 : index
    %c0_237 = arith.constant 0 : index
    %c0_238 = arith.constant 0 : index
    %c0_239 = arith.constant 0 : index
    %275 = vector.load %arg3[%c0_236, %c0_237, %c0_238, %c0_239] : memref<1x3x4x32xf32, #tpu.memory_space<vmem>>, vector<1x1x4x32xf32>
    %276 = vector.shape_cast %275 : vector<1x1x4x32xf32> to vector<4x32xf32>
    %277 = vector.broadcast %274 : f32 to vector<4x32xf32>
    %278 = arith.mulf %277, %276 : vector<4x32xf32>
    %c13_240 = arith.constant 13 : index
    %c1_241 = arith.constant 1 : index
    %279 = vector.load %arg2[%c13_240, %c1_241] : memref<32x3xf32, #tpu.memory_space<vmem>>, vector<1x1xf32>
    %280 = vector.extract %279[0, 0] : f32 from vector<1x1xf32>
    %c0_242 = arith.constant 0 : index
    %c1_243 = arith.constant 1 : index
    %c0_244 = arith.constant 0 : index
    %c0_245 = arith.constant 0 : index
    %281 = vector.load %arg3[%c0_242, %c1_243, %c0_244, %c0_245] : memref<1x3x4x32xf32, #tpu.memory_space<vmem>>, vector<1x1x4x32xf32>
    %282 = vector.shape_cast %281 : vector<1x1x4x32xf32> to vector<4x32xf32>
    %283 = vector.broadcast %280 : f32 to vector<4x32xf32>
    %284 = arith.mulf %283, %282 : vector<4x32xf32>
    %285 = arith.addf %278, %284 : vector<4x32xf32>
    %c13_246 = arith.constant 13 : index
    %c2_247 = arith.constant 2 : index
    %286 = vector.load %arg2[%c13_246, %c2_247] : memref<32x3xf32, #tpu.memory_space<vmem>>, vector<1x1xf32>
    %287 = vector.extract %286[0, 0] : f32 from vector<1x1xf32>
    %c0_248 = arith.constant 0 : index
    %c2_249 = arith.constant 2 : index
    %c0_250 = arith.constant 0 : index
    %c0_251 = arith.constant 0 : index
    %288 = vector.load %arg3[%c0_248, %c2_249, %c0_250, %c0_251] : memref<1x3x4x32xf32, #tpu.memory_space<vmem>>, vector<1x1x4x32xf32>
    %289 = vector.shape_cast %288 : vector<1x1x4x32xf32> to vector<4x32xf32>
    %290 = vector.broadcast %287 : f32 to vector<4x32xf32>
    %291 = arith.mulf %290, %289 : vector<4x32xf32>
    %292 = arith.addf %285, %291 : vector<4x32xf32>
    %c0_252 = arith.constant 0 : index
    %c416 = arith.constant 416 : index
    %293 = vector.load %arg11[%c0_252, %c416] : memref<4x1024xf32, #tpu.memory_space<vmem>>, vector<4x32xf32>
    tpu.vector_store %arg11[%c0_252, %c416], %292 {strides = array<i32>} : memref<4x1024xf32, #tpu.memory_space<vmem>>, vector<4x32xf32>,
    %c14 = arith.constant 14 : index
    %c0_253 = arith.constant 0 : index
    %294 = vector.load %arg2[%c14, %c0_253] : memref<32x3xf32, #tpu.memory_space<vmem>>, vector<1x1xf32>
    %295 = vector.extract %294[0, 0] : f32 from vector<1x1xf32>
    %c0_254 = arith.constant 0 : index
    %c0_255 = arith.constant 0 : index
    %c0_256 = arith.constant 0 : index
    %c0_257 = arith.constant 0 : index
    %296 = vector.load %arg3[%c0_254, %c0_255, %c0_256, %c0_257] : memref<1x3x4x32xf32, #tpu.memory_space<vmem>>, vector<1x1x4x32xf32>
    %297 = vector.shape_cast %296 : vector<1x1x4x32xf32> to vector<4x32xf32>
    %298 = vector.broadcast %295 : f32 to vector<4x32xf32>
    %299 = arith.mulf %298, %297 : vector<4x32xf32>
    %c14_258 = arith.constant 14 : index
    %c1_259 = arith.constant 1 : index
    %300 = vector.load %arg2[%c14_258, %c1_259] : memref<32x3xf32, #tpu.memory_space<vmem>>, vector<1x1xf32>
    %301 = vector.extract %300[0, 0] : f32 from vector<1x1xf32>
    %c0_260 = arith.constant 0 : index
    %c1_261 = arith.constant 1 : index
    %c0_262 = arith.constant 0 : index
    %c0_263 = arith.constant 0 : index
    %302 = vector.load %arg3[%c0_260, %c1_261, %c0_262, %c0_263] : memref<1x3x4x32xf32, #tpu.memory_space<vmem>>, vector<1x1x4x32xf32>
    %303 = vector.shape_cast %302 : vector<1x1x4x32xf32> to vector<4x32xf32>
    %304 = vector.broadcast %301 : f32 to vector<4x32xf32>
    %305 = arith.mulf %304, %303 : vector<4x32xf32>
    %306 = arith.addf %299, %305 : vector<4x32xf32>
    %c14_264 = arith.constant 14 : index
    %c2_265 = arith.constant 2 : index
    %307 = vector.load %arg2[%c14_264, %c2_265] : memref<32x3xf32, #tpu.memory_space<vmem>>, vector<1x1xf32>
    %308 = vector.extract %307[0, 0] : f32 from vector<1x1xf32>
    %c0_266 = arith.constant 0 : index
    %c2_267 = arith.constant 2 : index
    %c0_268 = arith.constant 0 : index
    %c0_269 = arith.constant 0 : index
    %309 = vector.load %arg3[%c0_266, %c2_267, %c0_268, %c0_269] : memref<1x3x4x32xf32, #tpu.memory_space<vmem>>, vector<1x1x4x32xf32>
    %310 = vector.shape_cast %309 : vector<1x1x4x32xf32> to vector<4x32xf32>
    %311 = vector.broadcast %308 : f32 to vector<4x32xf32>
    %312 = arith.mulf %311, %310 : vector<4x32xf32>
    %313 = arith.addf %306, %312 : vector<4x32xf32>
    %c0_270 = arith.constant 0 : index
    %c448 = arith.constant 448 : index
    %314 = vector.load %arg11[%c0_270, %c448] : memref<4x1024xf32, #tpu.memory_space<vmem>>, vector<4x32xf32>
    tpu.vector_store %arg11[%c0_270, %c448], %313 {strides = array<i32>} : memref<4x1024xf32, #tpu.memory_space<vmem>>, vector<4x32xf32>,
    %c15 = arith.constant 15 : index
    %c0_271 = arith.constant 0 : index
    %315 = vector.load %arg2[%c15, %c0_271] : memref<32x3xf32, #tpu.memory_space<vmem>>, vector<1x1xf32>
    %316 = vector.extract %315[0, 0] : f32 from vector<1x1xf32>
    %c0_272 = arith.constant 0 : index
    %c0_273 = arith.constant 0 : index
    %c0_274 = arith.constant 0 : index
    %c0_275 = arith.constant 0 : index
    %317 = vector.load %arg3[%c0_272, %c0_273, %c0_274, %c0_275] : memref<1x3x4x32xf32, #tpu.memory_space<vmem>>, vector<1x1x4x32xf32>
    %318 = vector.shape_cast %317 : vector<1x1x4x32xf32> to vector<4x32xf32>
    %319 = vector.broadcast %316 : f32 to vector<4x32xf32>
    %320 = arith.mulf %319, %318 : vector<4x32xf32>
    %c15_276 = arith.constant 15 : index
    %c1_277 = arith.constant 1 : index
    %321 = vector.load %arg2[%c15_276, %c1_277] : memref<32x3xf32, #tpu.memory_space<vmem>>, vector<1x1xf32>
    %322 = vector.extract %321[0, 0] : f32 from vector<1x1xf32>
    %c0_278 = arith.constant 0 : index
    %c1_279 = arith.constant 1 : index
    %c0_280 = arith.constant 0 : index
    %c0_281 = arith.constant 0 : index
    %323 = vector.load %arg3[%c0_278, %c1_279, %c0_280, %c0_281] : memref<1x3x4x32xf32, #tpu.memory_space<vmem>>, vector<1x1x4x32xf32>
    %324 = vector.shape_cast %323 : vector<1x1x4x32xf32> to vector<4x32xf32>
    %325 = vector.broadcast %322 : f32 to vector<4x32xf32>
    %326 = arith.mulf %325, %324 : vector<4x32xf32>
    %327 = arith.addf %320, %326 : vector<4x32xf32>
    %c15_282 = arith.constant 15 : index
    %c2_283 = arith.constant 2 : index
    %328 = vector.load %arg2[%c15_282, %c2_283] : memref<32x3xf32, #tpu.memory_space<vmem>>, vector<1x1xf32>
    %329 = vector.extract %328[0, 0] : f32 from vector<1x1xf32>
    %c0_284 = arith.constant 0 : index
    %c2_285 = arith.constant 2 : index
    %c0_286 = arith.constant 0 : index
    %c0_287 = arith.constant 0 : index
    %330 = vector.load %arg3[%c0_284, %c2_285, %c0_286, %c0_287] : memref<1x3x4x32xf32, #tpu.memory_space<vmem>>, vector<1x1x4x32xf32>
    %331 = vector.shape_cast %330 : vector<1x1x4x32xf32> to vector<4x32xf32>
    %332 = vector.broadcast %329 : f32 to vector<4x32xf32>
    %333 = arith.mulf %332, %331 : vector<4x32xf32>
    %334 = arith.addf %327, %333 : vector<4x32xf32>
    %c0_288 = arith.constant 0 : index
    %c480 = arith.constant 480 : index
    %335 = vector.load %arg11[%c0_288, %c480] : memref<4x1024xf32, #tpu.memory_space<vmem>>, vector<4x32xf32>
    tpu.vector_store %arg11[%c0_288, %c480], %334 {strides = array<i32>} : memref<4x1024xf32, #tpu.memory_space<vmem>>, vector<4x32xf32>,
    %c16 = arith.constant 16 : index
    %c0_289 = arith.constant 0 : index
    %336 = vector.load %arg2[%c16, %c0_289] : memref<32x3xf32, #tpu.memory_space<vmem>>, vector<1x1xf32>
    %337 = vector.extract %336[0, 0] : f32 from vector<1x1xf32>
    %c0_290 = arith.constant 0 : index
    %c0_291 = arith.constant 0 : index
    %c0_292 = arith.constant 0 : index
    %c0_293 = arith.constant 0 : index
    %338 = vector.load %arg3[%c0_290, %c0_291, %c0_292, %c0_293] : memref<1x3x4x32xf32, #tpu.memory_space<vmem>>, vector<1x1x4x32xf32>
    %339 = vector.shape_cast %338 : vector<1x1x4x32xf32> to vector<4x32xf32>
    %340 = vector.broadcast %337 : f32 to vector<4x32xf32>
    %341 = arith.mulf %340, %339 : vector<4x32xf32>
    %c16_294 = arith.constant 16 : index
    %c1_295 = arith.constant 1 : index
    %342 = vector.load %arg2[%c16_294, %c1_295] : memref<32x3xf32, #tpu.memory_space<vmem>>, vector<1x1xf32>
    %343 = vector.extract %342[0, 0] : f32 from vector<1x1xf32>
    %c0_296 = arith.constant 0 : index
    %c1_297 = arith.constant 1 : index
    %c0_298 = arith.constant 0 : index
    %c0_299 = arith.constant 0 : index
    %344 = vector.load %arg3[%c0_296, %c1_297, %c0_298, %c0_299] : memref<1x3x4x32xf32, #tpu.memory_space<vmem>>, vector<1x1x4x32xf32>
    %345 = vector.shape_cast %344 : vector<1x1x4x32xf32> to vector<4x32xf32>
    %346 = vector.broadcast %343 : f32 to vector<4x32xf32>
    %347 = arith.mulf %346, %345 : vector<4x32xf32>
    %348 = arith.addf %341, %347 : vector<4x32xf32>
    %c16_300 = arith.constant 16 : index
    %c2_301 = arith.constant 2 : index
    %349 = vector.load %arg2[%c16_300, %c2_301] : memref<32x3xf32, #tpu.memory_space<vmem>>, vector<1x1xf32>
    %350 = vector.extract %349[0, 0] : f32 from vector<1x1xf32>
    %c0_302 = arith.constant 0 : index
    %c2_303 = arith.constant 2 : index
    %c0_304 = arith.constant 0 : index
    %c0_305 = arith.constant 0 : index
    %351 = vector.load %arg3[%c0_302, %c2_303, %c0_304, %c0_305] : memref<1x3x4x32xf32, #tpu.memory_space<vmem>>, vector<1x1x4x32xf32>
    %352 = vector.shape_cast %351 : vector<1x1x4x32xf32> to vector<4x32xf32>
    %353 = vector.broadcast %350 : f32 to vector<4x32xf32>
    %354 = arith.mulf %353, %352 : vector<4x32xf32>
    %355 = arith.addf %348, %354 : vector<4x32xf32>
    %c0_306 = arith.constant 0 : index
    %c512 = arith.constant 512 : index
    %356 = vector.load %arg11[%c0_306, %c512] : memref<4x1024xf32, #tpu.memory_space<vmem>>, vector<4x32xf32>
    tpu.vector_store %arg11[%c0_306, %c512], %355 {strides = array<i32>} : memref<4x1024xf32, #tpu.memory_space<vmem>>, vector<4x32xf32>,
    %c17 = arith.constant 17 : index
    %c0_307 = arith.constant 0 : index
    %357 = vector.load %arg2[%c17, %c0_307] : memref<32x3xf32, #tpu.memory_space<vmem>>, vector<1x1xf32>
    %358 = vector.extract %357[0, 0] : f32 from vector<1x1xf32>
    %c0_308 = arith.constant 0 : index
    %c0_309 = arith.constant 0 : index
    %c0_310 = arith.constant 0 : index
    %c0_311 = arith.constant 0 : index
    %359 = vector.load %arg3[%c0_308, %c0_309, %c0_310, %c0_311] : memref<1x3x4x32xf32, #tpu.memory_space<vmem>>, vector<1x1x4x32xf32>
    %360 = vector.shape_cast %359 : vector<1x1x4x32xf32> to vector<4x32xf32>
    %361 = vector.broadcast %358 : f32 to vector<4x32xf32>
    %362 = arith.mulf %361, %360 : vector<4x32xf32>
    %c17_312 = arith.constant 17 : index
    %c1_313 = arith.constant 1 : index
    %363 = vector.load %arg2[%c17_312, %c1_313] : memref<32x3xf32, #tpu.memory_space<vmem>>, vector<1x1xf32>
    %364 = vector.extract %363[0, 0] : f32 from vector<1x1xf32>
    %c0_314 = arith.constant 0 : index
    %c1_315 = arith.constant 1 : index
    %c0_316 = arith.constant 0 : index
    %c0_317 = arith.constant 0 : index
    %365 = vector.load %arg3[%c0_314, %c1_315, %c0_316, %c0_317] : memref<1x3x4x32xf32, #tpu.memory_space<vmem>>, vector<1x1x4x32xf32>
    %366 = vector.shape_cast %365 : vector<1x1x4x32xf32> to vector<4x32xf32>
    %367 = vector.broadcast %364 : f32 to vector<4x32xf32>
    %368 = arith.mulf %367, %366 : vector<4x32xf32>
    %369 = arith.addf %362, %368 : vector<4x32xf32>
    %c17_318 = arith.constant 17 : index
    %c2_319 = arith.constant 2 : index
    %370 = vector.load %arg2[%c17_318, %c2_319] : memref<32x3xf32, #tpu.memory_space<vmem>>, vector<1x1xf32>
    %371 = vector.extract %370[0, 0] : f32 from vector<1x1xf32>
    %c0_320 = arith.constant 0 : index
    %c2_321 = arith.constant 2 : index
    %c0_322 = arith.constant 0 : index
    %c0_323 = arith.constant 0 : index
    %372 = vector.load %arg3[%c0_320, %c2_321, %c0_322, %c0_323] : memref<1x3x4x32xf32, #tpu.memory_space<vmem>>, vector<1x1x4x32xf32>
    %373 = vector.shape_cast %372 : vector<1x1x4x32xf32> to vector<4x32xf32>
    %374 = vector.broadcast %371 : f32 to vector<4x32xf32>
    %375 = arith.mulf %374, %373 : vector<4x32xf32>
    %376 = arith.addf %369, %375 : vector<4x32xf32>
    %c0_324 = arith.constant 0 : index
    %c544 = arith.constant 544 : index
    %377 = vector.load %arg11[%c0_324, %c544] : memref<4x1024xf32, #tpu.memory_space<vmem>>, vector<4x32xf32>
    tpu.vector_store %arg11[%c0_324, %c544], %376 {strides = array<i32>} : memref<4x1024xf32, #tpu.memory_space<vmem>>, vector<4x32xf32>,
    %c18 = arith.constant 18 : index
    %c0_325 = arith.constant 0 : index
    %378 = vector.load %arg2[%c18, %c0_325] : memref<32x3xf32, #tpu.memory_space<vmem>>, vector<1x1xf32>
    %379 = vector.extract %378[0, 0] : f32 from vector<1x1xf32>
    %c0_326 = arith.constant 0 : index
    %c0_327 = arith.constant 0 : index
    %c0_328 = arith.constant 0 : index
    %c0_329 = arith.constant 0 : index
    %380 = vector.load %arg3[%c0_326, %c0_327, %c0_328, %c0_329] : memref<1x3x4x32xf32, #tpu.memory_space<vmem>>, vector<1x1x4x32xf32>
    %381 = vector.shape_cast %380 : vector<1x1x4x32xf32> to vector<4x32xf32>
    %382 = vector.broadcast %379 : f32 to vector<4x32xf32>
    %383 = arith.mulf %382, %381 : vector<4x32xf32>
    %c18_330 = arith.constant 18 : index
    %c1_331 = arith.constant 1 : index
    %384 = vector.load %arg2[%c18_330, %c1_331] : memref<32x3xf32, #tpu.memory_space<vmem>>, vector<1x1xf32>
    %385 = vector.extract %384[0, 0] : f32 from vector<1x1xf32>
    %c0_332 = arith.constant 0 : index
    %c1_333 = arith.constant 1 : index
    %c0_334 = arith.constant 0 : index
    %c0_335 = arith.constant 0 : index
    %386 = vector.load %arg3[%c0_332, %c1_333, %c0_334, %c0_335] : memref<1x3x4x32xf32, #tpu.memory_space<vmem>>, vector<1x1x4x32xf32>
    %387 = vector.shape_cast %386 : vector<1x1x4x32xf32> to vector<4x32xf32>
    %388 = vector.broadcast %385 : f32 to vector<4x32xf32>
    %389 = arith.mulf %388, %387 : vector<4x32xf32>
    %390 = arith.addf %383, %389 : vector<4x32xf32>
    %c18_336 = arith.constant 18 : index
    %c2_337 = arith.constant 2 : index
    %391 = vector.load %arg2[%c18_336, %c2_337] : memref<32x3xf32, #tpu.memory_space<vmem>>, vector<1x1xf32>
    %392 = vector.extract %391[0, 0] : f32 from vector<1x1xf32>
    %c0_338 = arith.constant 0 : index
    %c2_339 = arith.constant 2 : index
    %c0_340 = arith.constant 0 : index
    %c0_341 = arith.constant 0 : index
    %393 = vector.load %arg3[%c0_338, %c2_339, %c0_340, %c0_341] : memref<1x3x4x32xf32, #tpu.memory_space<vmem>>, vector<1x1x4x32xf32>
    %394 = vector.shape_cast %393 : vector<1x1x4x32xf32> to vector<4x32xf32>
    %395 = vector.broadcast %392 : f32 to vector<4x32xf32>
    %396 = arith.mulf %395, %394 : vector<4x32xf32>
    %397 = arith.addf %390, %396 : vector<4x32xf32>
    %c0_342 = arith.constant 0 : index
    %c576 = arith.constant 576 : index
    %398 = vector.load %arg11[%c0_342, %c576] : memref<4x1024xf32, #tpu.memory_space<vmem>>, vector<4x32xf32>
    tpu.vector_store %arg11[%c0_342, %c576], %397 {strides = array<i32>} : memref<4x1024xf32, #tpu.memory_space<vmem>>, vector<4x32xf32>,
    %c19 = arith.constant 19 : index
    %c0_343 = arith.constant 0 : index
    %399 = vector.load %arg2[%c19, %c0_343] : memref<32x3xf32, #tpu.memory_space<vmem>>, vector<1x1xf32>
    %400 = vector.extract %399[0, 0] : f32 from vector<1x1xf32>
    %c0_344 = arith.constant 0 : index
    %c0_345 = arith.constant 0 : index
    %c0_346 = arith.constant 0 : index
    %c0_347 = arith.constant 0 : index
    %401 = vector.load %arg3[%c0_344, %c0_345, %c0_346, %c0_347] : memref<1x3x4x32xf32, #tpu.memory_space<vmem>>, vector<1x1x4x32xf32>
    %402 = vector.shape_cast %401 : vector<1x1x4x32xf32> to vector<4x32xf32>
    %403 = vector.broadcast %400 : f32 to vector<4x32xf32>
    %404 = arith.mulf %403, %402 : vector<4x32xf32>
    %c19_348 = arith.constant 19 : index
    %c1_349 = arith.constant 1 : index
    %405 = vector.load %arg2[%c19_348, %c1_349] : memref<32x3xf32, #tpu.memory_space<vmem>>, vector<1x1xf32>
    %406 = vector.extract %405[0, 0] : f32 from vector<1x1xf32>
    %c0_350 = arith.constant 0 : index
    %c1_351 = arith.constant 1 : index
    %c0_352 = arith.constant 0 : index
    %c0_353 = arith.constant 0 : index
    %407 = vector.load %arg3[%c0_350, %c1_351, %c0_352, %c0_353] : memref<1x3x4x32xf32, #tpu.memory_space<vmem>>, vector<1x1x4x32xf32>
    %408 = vector.shape_cast %407 : vector<1x1x4x32xf32> to vector<4x32xf32>
    %409 = vector.broadcast %406 : f32 to vector<4x32xf32>
    %410 = arith.mulf %409, %408 : vector<4x32xf32>
    %411 = arith.addf %404, %410 : vector<4x32xf32>
    %c19_354 = arith.constant 19 : index
    %c2_355 = arith.constant 2 : index
    %412 = vector.load %arg2[%c19_354, %c2_355] : memref<32x3xf32, #tpu.memory_space<vmem>>, vector<1x1xf32>
    %413 = vector.extract %412[0, 0] : f32 from vector<1x1xf32>
    %c0_356 = arith.constant 0 : index
    %c2_357 = arith.constant 2 : index
    %c0_358 = arith.constant 0 : index
    %c0_359 = arith.constant 0 : index
    %414 = vector.load %arg3[%c0_356, %c2_357, %c0_358, %c0_359] : memref<1x3x4x32xf32, #tpu.memory_space<vmem>>, vector<1x1x4x32xf32>
    %415 = vector.shape_cast %414 : vector<1x1x4x32xf32> to vector<4x32xf32>
    %416 = vector.broadcast %413 : f32 to vector<4x32xf32>
    %417 = arith.mulf %416, %415 : vector<4x32xf32>
    %418 = arith.addf %411, %417 : vector<4x32xf32>
    %c0_360 = arith.constant 0 : index
    %c608 = arith.constant 608 : index
    %419 = vector.load %arg11[%c0_360, %c608] : memref<4x1024xf32, #tpu.memory_space<vmem>>, vector<4x32xf32>
    tpu.vector_store %arg11[%c0_360, %c608], %418 {strides = array<i32>} : memref<4x1024xf32, #tpu.memory_space<vmem>>, vector<4x32xf32>,
    %c20 = arith.constant 20 : index
    %c0_361 = arith.constant 0 : index
    %420 = vector.load %arg2[%c20, %c0_361] : memref<32x3xf32, #tpu.memory_space<vmem>>, vector<1x1xf32>
    %421 = vector.extract %420[0, 0] : f32 from vector<1x1xf32>
    %c0_362 = arith.constant 0 : index
    %c0_363 = arith.constant 0 : index
    %c0_364 = arith.constant 0 : index
    %c0_365 = arith.constant 0 : index
    %422 = vector.load %arg3[%c0_362, %c0_363, %c0_364, %c0_365] : memref<1x3x4x32xf32, #tpu.memory_space<vmem>>, vector<1x1x4x32xf32>
    %423 = vector.shape_cast %422 : vector<1x1x4x32xf32> to vector<4x32xf32>
    %424 = vector.broadcast %421 : f32 to vector<4x32xf32>
    %425 = arith.mulf %424, %423 : vector<4x32xf32>
    %c20_366 = arith.constant 20 : index
    %c1_367 = arith.constant 1 : index
    %426 = vector.load %arg2[%c20_366, %c1_367] : memref<32x3xf32, #tpu.memory_space<vmem>>, vector<1x1xf32>
    %427 = vector.extract %426[0, 0] : f32 from vector<1x1xf32>
    %c0_368 = arith.constant 0 : index
    %c1_369 = arith.constant 1 : index
    %c0_370 = arith.constant 0 : index
    %c0_371 = arith.constant 0 : index
    %428 = vector.load %arg3[%c0_368, %c1_369, %c0_370, %c0_371] : memref<1x3x4x32xf32, #tpu.memory_space<vmem>>, vector<1x1x4x32xf32>
    %429 = vector.shape_cast %428 : vector<1x1x4x32xf32> to vector<4x32xf32>
    %430 = vector.broadcast %427 : f32 to vector<4x32xf32>
    %431 = arith.mulf %430, %429 : vector<4x32xf32>
    %432 = arith.addf %425, %431 : vector<4x32xf32>
    %c20_372 = arith.constant 20 : index
    %c2_373 = arith.constant 2 : index
    %433 = vector.load %arg2[%c20_372, %c2_373] : memref<32x3xf32, #tpu.memory_space<vmem>>, vector<1x1xf32>
    %434 = vector.extract %433[0, 0] : f32 from vector<1x1xf32>
    %c0_374 = arith.constant 0 : index
    %c2_375 = arith.constant 2 : index
    %c0_376 = arith.constant 0 : index
    %c0_377 = arith.constant 0 : index
    %435 = vector.load %arg3[%c0_374, %c2_375, %c0_376, %c0_377] : memref<1x3x4x32xf32, #tpu.memory_space<vmem>>, vector<1x1x4x32xf32>
    %436 = vector.shape_cast %435 : vector<1x1x4x32xf32> to vector<4x32xf32>
    %437 = vector.broadcast %434 : f32 to vector<4x32xf32>
    %438 = arith.mulf %437, %436 : vector<4x32xf32>
    %439 = arith.addf %432, %438 : vector<4x32xf32>
    %c0_378 = arith.constant 0 : index
    %c640 = arith.constant 640 : index
    %440 = vector.load %arg11[%c0_378, %c640] : memref<4x1024xf32, #tpu.memory_space<vmem>>, vector<4x32xf32>
    tpu.vector_store %arg11[%c0_378, %c640], %439 {strides = array<i32>} : memref<4x1024xf32, #tpu.memory_space<vmem>>, vector<4x32xf32>,
    %c21 = arith.constant 21 : index
    %c0_379 = arith.constant 0 : index
    %441 = vector.load %arg2[%c21, %c0_379] : memref<32x3xf32, #tpu.memory_space<vmem>>, vector<1x1xf32>
    %442 = vector.extract %441[0, 0] : f32 from vector<1x1xf32>
    %c0_380 = arith.constant 0 : index
    %c0_381 = arith.constant 0 : index
    %c0_382 = arith.constant 0 : index
    %c0_383 = arith.constant 0 : index
    %443 = vector.load %arg3[%c0_380, %c0_381, %c0_382, %c0_383] : memref<1x3x4x32xf32, #tpu.memory_space<vmem>>, vector<1x1x4x32xf32>
    %444 = vector.shape_cast %443 : vector<1x1x4x32xf32> to vector<4x32xf32>
    %445 = vector.broadcast %442 : f32 to vector<4x32xf32>
    %446 = arith.mulf %445, %444 : vector<4x32xf32>
    %c21_384 = arith.constant 21 : index
    %c1_385 = arith.constant 1 : index
    %447 = vector.load %arg2[%c21_384, %c1_385] : memref<32x3xf32, #tpu.memory_space<vmem>>, vector<1x1xf32>
    %448 = vector.extract %447[0, 0] : f32 from vector<1x1xf32>
    %c0_386 = arith.constant 0 : index
    %c1_387 = arith.constant 1 : index
    %c0_388 = arith.constant 0 : index
    %c0_389 = arith.constant 0 : index
    %449 = vector.load %arg3[%c0_386, %c1_387, %c0_388, %c0_389] : memref<1x3x4x32xf32, #tpu.memory_space<vmem>>, vector<1x1x4x32xf32>
    %450 = vector.shape_cast %449 : vector<1x1x4x32xf32> to vector<4x32xf32>
    %451 = vector.broadcast %448 : f32 to vector<4x32xf32>
    %452 = arith.mulf %451, %450 : vector<4x32xf32>
    %453 = arith.addf %446, %452 : vector<4x32xf32>
    %c21_390 = arith.constant 21 : index
    %c2_391 = arith.constant 2 : index
    %454 = vector.load %arg2[%c21_390, %c2_391] : memref<32x3xf32, #tpu.memory_space<vmem>>, vector<1x1xf32>
    %455 = vector.extract %454[0, 0] : f32 from vector<1x1xf32>
    %c0_392 = arith.constant 0 : index
    %c2_393 = arith.constant 2 : index
    %c0_394 = arith.constant 0 : index
    %c0_395 = arith.constant 0 : index
    %456 = vector.load %arg3[%c0_392, %c2_393, %c0_394, %c0_395] : memref<1x3x4x32xf32, #tpu.memory_space<vmem>>, vector<1x1x4x32xf32>
    %457 = vector.shape_cast %456 : vector<1x1x4x32xf32> to vector<4x32xf32>
    %458 = vector.broadcast %455 : f32 to vector<4x32xf32>
    %459 = arith.mulf %458, %457 : vector<4x32xf32>
    %460 = arith.addf %453, %459 : vector<4x32xf32>
    %c0_396 = arith.constant 0 : index
    %c672 = arith.constant 672 : index
    %461 = vector.load %arg11[%c0_396, %c672] : memref<4x1024xf32, #tpu.memory_space<vmem>>, vector<4x32xf32>
    tpu.vector_store %arg11[%c0_396, %c672], %460 {strides = array<i32>} : memref<4x1024xf32, #tpu.memory_space<vmem>>, vector<4x32xf32>,
    %c22 = arith.constant 22 : index
    %c0_397 = arith.constant 0 : index
    %462 = vector.load %arg2[%c22, %c0_397] : memref<32x3xf32, #tpu.memory_space<vmem>>, vector<1x1xf32>
    %463 = vector.extract %462[0, 0] : f32 from vector<1x1xf32>
    %c0_398 = arith.constant 0 : index
    %c0_399 = arith.constant 0 : index
    %c0_400 = arith.constant 0 : index
    %c0_401 = arith.constant 0 : index
    %464 = vector.load %arg3[%c0_398, %c0_399, %c0_400, %c0_401] : memref<1x3x4x32xf32, #tpu.memory_space<vmem>>, vector<1x1x4x32xf32>
    %465 = vector.shape_cast %464 : vector<1x1x4x32xf32> to vector<4x32xf32>
    %466 = vector.broadcast %463 : f32 to vector<4x32xf32>
    %467 = arith.mulf %466, %465 : vector<4x32xf32>
    %c22_402 = arith.constant 22 : index
    %c1_403 = arith.constant 1 : index
    %468 = vector.load %arg2[%c22_402, %c1_403] : memref<32x3xf32, #tpu.memory_space<vmem>>, vector<1x1xf32>
    %469 = vector.extract %468[0, 0] : f32 from vector<1x1xf32>
    %c0_404 = arith.constant 0 : index
    %c1_405 = arith.constant 1 : index
    %c0_406 = arith.constant 0 : index
    %c0_407 = arith.constant 0 : index
    %470 = vector.load %arg3[%c0_404, %c1_405, %c0_406, %c0_407] : memref<1x3x4x32xf32, #tpu.memory_space<vmem>>, vector<1x1x4x32xf32>
    %471 = vector.shape_cast %470 : vector<1x1x4x32xf32> to vector<4x32xf32>
    %472 = vector.broadcast %469 : f32 to vector<4x32xf32>
    %473 = arith.mulf %472, %471 : vector<4x32xf32>
    %474 = arith.addf %467, %473 : vector<4x32xf32>
    %c22_408 = arith.constant 22 : index
    %c2_409 = arith.constant 2 : index
    %475 = vector.load %arg2[%c22_408, %c2_409] : memref<32x3xf32, #tpu.memory_space<vmem>>, vector<1x1xf32>
    %476 = vector.extract %475[0, 0] : f32 from vector<1x1xf32>
    %c0_410 = arith.constant 0 : index
    %c2_411 = arith.constant 2 : index
    %c0_412 = arith.constant 0 : index
    %c0_413 = arith.constant 0 : index
    %477 = vector.load %arg3[%c0_410, %c2_411, %c0_412, %c0_413] : memref<1x3x4x32xf32, #tpu.memory_space<vmem>>, vector<1x1x4x32xf32>
    %478 = vector.shape_cast %477 : vector<1x1x4x32xf32> to vector<4x32xf32>
    %479 = vector.broadcast %476 : f32 to vector<4x32xf32>
    %480 = arith.mulf %479, %478 : vector<4x32xf32>
    %481 = arith.addf %474, %480 : vector<4x32xf32>
    %c0_414 = arith.constant 0 : index
    %c704 = arith.constant 704 : index
    %482 = vector.load %arg11[%c0_414, %c704] : memref<4x1024xf32, #tpu.memory_space<vmem>>, vector<4x32xf32>
    tpu.vector_store %arg11[%c0_414, %c704], %481 {strides = array<i32>} : memref<4x1024xf32, #tpu.memory_space<vmem>>, vector<4x32xf32>,
    %c23 = arith.constant 23 : index
    %c0_415 = arith.constant 0 : index
    %483 = vector.load %arg2[%c23, %c0_415] : memref<32x3xf32, #tpu.memory_space<vmem>>, vector<1x1xf32>
    %484 = vector.extract %483[0, 0] : f32 from vector<1x1xf32>
    %c0_416 = arith.constant 0 : index
    %c0_417 = arith.constant 0 : index
    %c0_418 = arith.constant 0 : index
    %c0_419 = arith.constant 0 : index
    %485 = vector.load %arg3[%c0_416, %c0_417, %c0_418, %c0_419] : memref<1x3x4x32xf32, #tpu.memory_space<vmem>>, vector<1x1x4x32xf32>
    %486 = vector.shape_cast %485 : vector<1x1x4x32xf32> to vector<4x32xf32>
    %487 = vector.broadcast %484 : f32 to vector<4x32xf32>
    %488 = arith.mulf %487, %486 : vector<4x32xf32>
    %c23_420 = arith.constant 23 : index
    %c1_421 = arith.constant 1 : index
    %489 = vector.load %arg2[%c23_420, %c1_421] : memref<32x3xf32, #tpu.memory_space<vmem>>, vector<1x1xf32>
    %490 = vector.extract %489[0, 0] : f32 from vector<1x1xf32>
    %c0_422 = arith.constant 0 : index
    %c1_423 = arith.constant 1 : index
    %c0_424 = arith.constant 0 : index
    %c0_425 = arith.constant 0 : index
    %491 = vector.load %arg3[%c0_422, %c1_423, %c0_424, %c0_425] : memref<1x3x4x32xf32, #tpu.memory_space<vmem>>, vector<1x1x4x32xf32>
    %492 = vector.shape_cast %491 : vector<1x1x4x32xf32> to vector<4x32xf32>
    %493 = vector.broadcast %490 : f32 to vector<4x32xf32>
    %494 = arith.mulf %493, %492 : vector<4x32xf32>
    %495 = arith.addf %488, %494 : vector<4x32xf32>
    %c23_426 = arith.constant 23 : index
    %c2_427 = arith.constant 2 : index
    %496 = vector.load %arg2[%c23_426, %c2_427] : memref<32x3xf32, #tpu.memory_space<vmem>>, vector<1x1xf32>
    %497 = vector.extract %496[0, 0] : f32 from vector<1x1xf32>
    %c0_428 = arith.constant 0 : index
    %c2_429 = arith.constant 2 : index
    %c0_430 = arith.constant 0 : index
    %c0_431 = arith.constant 0 : index
    %498 = vector.load %arg3[%c0_428, %c2_429, %c0_430, %c0_431] : memref<1x3x4x32xf32, #tpu.memory_space<vmem>>, vector<1x1x4x32xf32>
    %499 = vector.shape_cast %498 : vector<1x1x4x32xf32> to vector<4x32xf32>
    %500 = vector.broadcast %497 : f32 to vector<4x32xf32>
    %501 = arith.mulf %500, %499 : vector<4x32xf32>
    %502 = arith.addf %495, %501 : vector<4x32xf32>
    %c0_432 = arith.constant 0 : index
    %c736 = arith.constant 736 : index
    %503 = vector.load %arg11[%c0_432, %c736] : memref<4x1024xf32, #tpu.memory_space<vmem>>, vector<4x32xf32>
    tpu.vector_store %arg11[%c0_432, %c736], %502 {strides = array<i32>} : memref<4x1024xf32, #tpu.memory_space<vmem>>, vector<4x32xf32>,
    %c24 = arith.constant 24 : index
    %c0_433 = arith.constant 0 : index
    %504 = vector.load %arg2[%c24, %c0_433] : memref<32x3xf32, #tpu.memory_space<vmem>>, vector<1x1xf32>
    %505 = vector.extract %504[0, 0] : f32 from vector<1x1xf32>
    %c0_434 = arith.constant 0 : index
    %c0_435 = arith.constant 0 : index
    %c0_436 = arith.constant 0 : index
    %c0_437 = arith.constant 0 : index
    %506 = vector.load %arg3[%c0_434, %c0_435, %c0_436, %c0_437] : memref<1x3x4x32xf32, #tpu.memory_space<vmem>>, vector<1x1x4x32xf32>
    %507 = vector.shape_cast %506 : vector<1x1x4x32xf32> to vector<4x32xf32>
    %508 = vector.broadcast %505 : f32 to vector<4x32xf32>
    %509 = arith.mulf %508, %507 : vector<4x32xf32>
    %c24_438 = arith.constant 24 : index
    %c1_439 = arith.constant 1 : index
    %510 = vector.load %arg2[%c24_438, %c1_439] : memref<32x3xf32, #tpu.memory_space<vmem>>, vector<1x1xf32>
    %511 = vector.extract %510[0, 0] : f32 from vector<1x1xf32>
    %c0_440 = arith.constant 0 : index
    %c1_441 = arith.constant 1 : index
    %c0_442 = arith.constant 0 : index
    %c0_443 = arith.constant 0 : index
    %512 = vector.load %arg3[%c0_440, %c1_441, %c0_442, %c0_443] : memref<1x3x4x32xf32, #tpu.memory_space<vmem>>, vector<1x1x4x32xf32>
    %513 = vector.shape_cast %512 : vector<1x1x4x32xf32> to vector<4x32xf32>
    %514 = vector.broadcast %511 : f32 to vector<4x32xf32>
    %515 = arith.mulf %514, %513 : vector<4x32xf32>
    %516 = arith.addf %509, %515 : vector<4x32xf32>
    %c24_444 = arith.constant 24 : index
    %c2_445 = arith.constant 2 : index
    %517 = vector.load %arg2[%c24_444, %c2_445] : memref<32x3xf32, #tpu.memory_space<vmem>>, vector<1x1xf32>
    %518 = vector.extract %517[0, 0] : f32 from vector<1x1xf32>
    %c0_446 = arith.constant 0 : index
    %c2_447 = arith.constant 2 : index
    %c0_448 = arith.constant 0 : index
    %c0_449 = arith.constant 0 : index
    %519 = vector.load %arg3[%c0_446, %c2_447, %c0_448, %c0_449] : memref<1x3x4x32xf32, #tpu.memory_space<vmem>>, vector<1x1x4x32xf32>
    %520 = vector.shape_cast %519 : vector<1x1x4x32xf32> to vector<4x32xf32>
    %521 = vector.broadcast %518 : f32 to vector<4x32xf32>
    %522 = arith.mulf %521, %520 : vector<4x32xf32>
    %523 = arith.addf %516, %522 : vector<4x32xf32>
    %c0_450 = arith.constant 0 : index
    %c768 = arith.constant 768 : index
    %524 = vector.load %arg11[%c0_450, %c768] : memref<4x1024xf32, #tpu.memory_space<vmem>>, vector<4x32xf32>
    tpu.vector_store %arg11[%c0_450, %c768], %523 {strides = array<i32>} : memref<4x1024xf32, #tpu.memory_space<vmem>>, vector<4x32xf32>,
    %c25 = arith.constant 25 : index
    %c0_451 = arith.constant 0 : index
    %525 = vector.load %arg2[%c25, %c0_451] : memref<32x3xf32, #tpu.memory_space<vmem>>, vector<1x1xf32>
    %526 = vector.extract %525[0, 0] : f32 from vector<1x1xf32>
    %c0_452 = arith.constant 0 : index
    %c0_453 = arith.constant 0 : index
    %c0_454 = arith.constant 0 : index
    %c0_455 = arith.constant 0 : index
    %527 = vector.load %arg3[%c0_452, %c0_453, %c0_454, %c0_455] : memref<1x3x4x32xf32, #tpu.memory_space<vmem>>, vector<1x1x4x32xf32>
    %528 = vector.shape_cast %527 : vector<1x1x4x32xf32> to vector<4x32xf32>
    %529 = vector.broadcast %526 : f32 to vector<4x32xf32>
    %530 = arith.mulf %529, %528 : vector<4x32xf32>
    %c25_456 = arith.constant 25 : index
    %c1_457 = arith.constant 1 : index
    %531 = vector.load %arg2[%c25_456, %c1_457] : memref<32x3xf32, #tpu.memory_space<vmem>>, vector<1x1xf32>
    %532 = vector.extract %531[0, 0] : f32 from vector<1x1xf32>
    %c0_458 = arith.constant 0 : index
    %c1_459 = arith.constant 1 : index
    %c0_460 = arith.constant 0 : index
    %c0_461 = arith.constant 0 : index
    %533 = vector.load %arg3[%c0_458, %c1_459, %c0_460, %c0_461] : memref<1x3x4x32xf32, #tpu.memory_space<vmem>>, vector<1x1x4x32xf32>
    %534 = vector.shape_cast %533 : vector<1x1x4x32xf32> to vector<4x32xf32>
    %535 = vector.broadcast %532 : f32 to vector<4x32xf32>
    %536 = arith.mulf %535, %534 : vector<4x32xf32>
    %537 = arith.addf %530, %536 : vector<4x32xf32>
    %c25_462 = arith.constant 25 : index
    %c2_463 = arith.constant 2 : index
    %538 = vector.load %arg2[%c25_462, %c2_463] : memref<32x3xf32, #tpu.memory_space<vmem>>, vector<1x1xf32>
    %539 = vector.extract %538[0, 0] : f32 from vector<1x1xf32>
    %c0_464 = arith.constant 0 : index
    %c2_465 = arith.constant 2 : index
    %c0_466 = arith.constant 0 : index
    %c0_467 = arith.constant 0 : index
    %540 = vector.load %arg3[%c0_464, %c2_465, %c0_466, %c0_467] : memref<1x3x4x32xf32, #tpu.memory_space<vmem>>, vector<1x1x4x32xf32>
    %541 = vector.shape_cast %540 : vector<1x1x4x32xf32> to vector<4x32xf32>
    %542 = vector.broadcast %539 : f32 to vector<4x32xf32>
    %543 = arith.mulf %542, %541 : vector<4x32xf32>
    %544 = arith.addf %537, %543 : vector<4x32xf32>
    %c0_468 = arith.constant 0 : index
    %c800 = arith.constant 800 : index
    %545 = vector.load %arg11[%c0_468, %c800] : memref<4x1024xf32, #tpu.memory_space<vmem>>, vector<4x32xf32>
    tpu.vector_store %arg11[%c0_468, %c800], %544 {strides = array<i32>} : memref<4x1024xf32, #tpu.memory_space<vmem>>, vector<4x32xf32>,
    %c26 = arith.constant 26 : index
    %c0_469 = arith.constant 0 : index
    %546 = vector.load %arg2[%c26, %c0_469] : memref<32x3xf32, #tpu.memory_space<vmem>>, vector<1x1xf32>
    %547 = vector.extract %546[0, 0] : f32 from vector<1x1xf32>
    %c0_470 = arith.constant 0 : index
    %c0_471 = arith.constant 0 : index
    %c0_472 = arith.constant 0 : index
    %c0_473 = arith.constant 0 : index
    %548 = vector.load %arg3[%c0_470, %c0_471, %c0_472, %c0_473] : memref<1x3x4x32xf32, #tpu.memory_space<vmem>>, vector<1x1x4x32xf32>
    %549 = vector.shape_cast %548 : vector<1x1x4x32xf32> to vector<4x32xf32>
    %550 = vector.broadcast %547 : f32 to vector<4x32xf32>
    %551 = arith.mulf %550, %549 : vector<4x32xf32>
    %c26_474 = arith.constant 26 : index
    %c1_475 = arith.constant 1 : index
    %552 = vector.load %arg2[%c26_474, %c1_475] : memref<32x3xf32, #tpu.memory_space<vmem>>, vector<1x1xf32>
    %553 = vector.extract %552[0, 0] : f32 from vector<1x1xf32>
    %c0_476 = arith.constant 0 : index
    %c1_477 = arith.constant 1 : index
    %c0_478 = arith.constant 0 : index
    %c0_479 = arith.constant 0 : index
    %554 = vector.load %arg3[%c0_476, %c1_477, %c0_478, %c0_479] : memref<1x3x4x32xf32, #tpu.memory_space<vmem>>, vector<1x1x4x32xf32>
    %555 = vector.shape_cast %554 : vector<1x1x4x32xf32> to vector<4x32xf32>
    %556 = vector.broadcast %553 : f32 to vector<4x32xf32>
    %557 = arith.mulf %556, %555 : vector<4x32xf32>
    %558 = arith.addf %551, %557 : vector<4x32xf32>
    %c26_480 = arith.constant 26 : index
    %c2_481 = arith.constant 2 : index
    %559 = vector.load %arg2[%c26_480, %c2_481] : memref<32x3xf32, #tpu.memory_space<vmem>>, vector<1x1xf32>
    %560 = vector.extract %559[0, 0] : f32 from vector<1x1xf32>
    %c0_482 = arith.constant 0 : index
    %c2_483 = arith.constant 2 : index
    %c0_484 = arith.constant 0 : index
    %c0_485 = arith.constant 0 : index
    %561 = vector.load %arg3[%c0_482, %c2_483, %c0_484, %c0_485] : memref<1x3x4x32xf32, #tpu.memory_space<vmem>>, vector<1x1x4x32xf32>
    %562 = vector.shape_cast %561 : vector<1x1x4x32xf32> to vector<4x32xf32>
    %563 = vector.broadcast %560 : f32 to vector<4x32xf32>
    %564 = arith.mulf %563, %562 : vector<4x32xf32>
    %565 = arith.addf %558, %564 : vector<4x32xf32>
    %c0_486 = arith.constant 0 : index
    %c832 = arith.constant 832 : index
    %566 = vector.load %arg11[%c0_486, %c832] : memref<4x1024xf32, #tpu.memory_space<vmem>>, vector<4x32xf32>
    tpu.vector_store %arg11[%c0_486, %c832], %565 {strides = array<i32>} : memref<4x1024xf32, #tpu.memory_space<vmem>>, vector<4x32xf32>,
    %c27 = arith.constant 27 : index
    %c0_487 = arith.constant 0 : index
    %567 = vector.load %arg2[%c27, %c0_487] : memref<32x3xf32, #tpu.memory_space<vmem>>, vector<1x1xf32>
    %568 = vector.extract %567[0, 0] : f32 from vector<1x1xf32>
    %c0_488 = arith.constant 0 : index
    %c0_489 = arith.constant 0 : index
    %c0_490 = arith.constant 0 : index
    %c0_491 = arith.constant 0 : index
    %569 = vector.load %arg3[%c0_488, %c0_489, %c0_490, %c0_491] : memref<1x3x4x32xf32, #tpu.memory_space<vmem>>, vector<1x1x4x32xf32>
    %570 = vector.shape_cast %569 : vector<1x1x4x32xf32> to vector<4x32xf32>
    %571 = vector.broadcast %568 : f32 to vector<4x32xf32>
    %572 = arith.mulf %571, %570 : vector<4x32xf32>
    %c27_492 = arith.constant 27 : index
    %c1_493 = arith.constant 1 : index
    %573 = vector.load %arg2[%c27_492, %c1_493] : memref<32x3xf32, #tpu.memory_space<vmem>>, vector<1x1xf32>
    %574 = vector.extract %573[0, 0] : f32 from vector<1x1xf32>
    %c0_494 = arith.constant 0 : index
    %c1_495 = arith.constant 1 : index
    %c0_496 = arith.constant 0 : index
    %c0_497 = arith.constant 0 : index
    %575 = vector.load %arg3[%c0_494, %c1_495, %c0_496, %c0_497] : memref<1x3x4x32xf32, #tpu.memory_space<vmem>>, vector<1x1x4x32xf32>
    %576 = vector.shape_cast %575 : vector<1x1x4x32xf32> to vector<4x32xf32>
    %577 = vector.broadcast %574 : f32 to vector<4x32xf32>
    %578 = arith.mulf %577, %576 : vector<4x32xf32>
    %579 = arith.addf %572, %578 : vector<4x32xf32>
    %c27_498 = arith.constant 27 : index
    %c2_499 = arith.constant 2 : index
    %580 = vector.load %arg2[%c27_498, %c2_499] : memref<32x3xf32, #tpu.memory_space<vmem>>, vector<1x1xf32>
    %581 = vector.extract %580[0, 0] : f32 from vector<1x1xf32>
    %c0_500 = arith.constant 0 : index
    %c2_501 = arith.constant 2 : index
    %c0_502 = arith.constant 0 : index
    %c0_503 = arith.constant 0 : index
    %582 = vector.load %arg3[%c0_500, %c2_501, %c0_502, %c0_503] : memref<1x3x4x32xf32, #tpu.memory_space<vmem>>, vector<1x1x4x32xf32>
    %583 = vector.shape_cast %582 : vector<1x1x4x32xf32> to vector<4x32xf32>
    %584 = vector.broadcast %581 : f32 to vector<4x32xf32>
    %585 = arith.mulf %584, %583 : vector<4x32xf32>
    %586 = arith.addf %579, %585 : vector<4x32xf32>
    %c0_504 = arith.constant 0 : index
    %c864 = arith.constant 864 : index
    %587 = vector.load %arg11[%c0_504, %c864] : memref<4x1024xf32, #tpu.memory_space<vmem>>, vector<4x32xf32>
    tpu.vector_store %arg11[%c0_504, %c864], %586 {strides = array<i32>} : memref<4x1024xf32, #tpu.memory_space<vmem>>, vector<4x32xf32>,
    %c28 = arith.constant 28 : index
    %c0_505 = arith.constant 0 : index
    %588 = vector.load %arg2[%c28, %c0_505] : memref<32x3xf32, #tpu.memory_space<vmem>>, vector<1x1xf32>
    %589 = vector.extract %588[0, 0] : f32 from vector<1x1xf32>
    %c0_506 = arith.constant 0 : index
    %c0_507 = arith.constant 0 : index
    %c0_508 = arith.constant 0 : index
    %c0_509 = arith.constant 0 : index
    %590 = vector.load %arg3[%c0_506, %c0_507, %c0_508, %c0_509] : memref<1x3x4x32xf32, #tpu.memory_space<vmem>>, vector<1x1x4x32xf32>
    %591 = vector.shape_cast %590 : vector<1x1x4x32xf32> to vector<4x32xf32>
    %592 = vector.broadcast %589 : f32 to vector<4x32xf32>
    %593 = arith.mulf %592, %591 : vector<4x32xf32>
    %c28_510 = arith.constant 28 : index
    %c1_511 = arith.constant 1 : index
    %594 = vector.load %arg2[%c28_510, %c1_511] : memref<32x3xf32, #tpu.memory_space<vmem>>, vector<1x1xf32>
    %595 = vector.extract %594[0, 0] : f32 from vector<1x1xf32>
    %c0_512 = arith.constant 0 : index
    %c1_513 = arith.constant 1 : index
    %c0_514 = arith.constant 0 : index
    %c0_515 = arith.constant 0 : index
    %596 = vector.load %arg3[%c0_512, %c1_513, %c0_514, %c0_515] : memref<1x3x4x32xf32, #tpu.memory_space<vmem>>, vector<1x1x4x32xf32>
    %597 = vector.shape_cast %596 : vector<1x1x4x32xf32> to vector<4x32xf32>
    %598 = vector.broadcast %595 : f32 to vector<4x32xf32>
    %599 = arith.mulf %598, %597 : vector<4x32xf32>
    %600 = arith.addf %593, %599 : vector<4x32xf32>
    %c28_516 = arith.constant 28 : index
    %c2_517 = arith.constant 2 : index
    %601 = vector.load %arg2[%c28_516, %c2_517] : memref<32x3xf32, #tpu.memory_space<vmem>>, vector<1x1xf32>
    %602 = vector.extract %601[0, 0] : f32 from vector<1x1xf32>
    %c0_518 = arith.constant 0 : index
    %c2_519 = arith.constant 2 : index
    %c0_520 = arith.constant 0 : index
    %c0_521 = arith.constant 0 : index
    %603 = vector.load %arg3[%c0_518, %c2_519, %c0_520, %c0_521] : memref<1x3x4x32xf32, #tpu.memory_space<vmem>>, vector<1x1x4x32xf32>
    %604 = vector.shape_cast %603 : vector<1x1x4x32xf32> to vector<4x32xf32>
    %605 = vector.broadcast %602 : f32 to vector<4x32xf32>
    %606 = arith.mulf %605, %604 : vector<4x32xf32>
    %607 = arith.addf %600, %606 : vector<4x32xf32>
    %c0_522 = arith.constant 0 : index
    %c896 = arith.constant 896 : index
    %608 = vector.load %arg11[%c0_522, %c896] : memref<4x1024xf32, #tpu.memory_space<vmem>>, vector<4x32xf32>
    tpu.vector_store %arg11[%c0_522, %c896], %607 {strides = array<i32>} : memref<4x1024xf32, #tpu.memory_space<vmem>>, vector<4x32xf32>,
    %c29 = arith.constant 29 : index
    %c0_523 = arith.constant 0 : index
    %609 = vector.load %arg2[%c29, %c0_523] : memref<32x3xf32, #tpu.memory_space<vmem>>, vector<1x1xf32>
    %610 = vector.extract %609[0, 0] : f32 from vector<1x1xf32>
    %c0_524 = arith.constant 0 : index
    %c0_525 = arith.constant 0 : index
    %c0_526 = arith.constant 0 : index
    %c0_527 = arith.constant 0 : index
    %611 = vector.load %arg3[%c0_524, %c0_525, %c0_526, %c0_527] : memref<1x3x4x32xf32, #tpu.memory_space<vmem>>, vector<1x1x4x32xf32>
    %612 = vector.shape_cast %611 : vector<1x1x4x32xf32> to vector<4x32xf32>
    %613 = vector.broadcast %610 : f32 to vector<4x32xf32>
    %614 = arith.mulf %613, %612 : vector<4x32xf32>
    %c29_528 = arith.constant 29 : index
    %c1_529 = arith.constant 1 : index
    %615 = vector.load %arg2[%c29_528, %c1_529] : memref<32x3xf32, #tpu.memory_space<vmem>>, vector<1x1xf32>
    %616 = vector.extract %615[0, 0] : f32 from vector<1x1xf32>
    %c0_530 = arith.constant 0 : index
    %c1_531 = arith.constant 1 : index
    %c0_532 = arith.constant 0 : index
    %c0_533 = arith.constant 0 : index
    %617 = vector.load %arg3[%c0_530, %c1_531, %c0_532, %c0_533] : memref<1x3x4x32xf32, #tpu.memory_space<vmem>>, vector<1x1x4x32xf32>
    %618 = vector.shape_cast %617 : vector<1x1x4x32xf32> to vector<4x32xf32>
    %619 = vector.broadcast %616 : f32 to vector<4x32xf32>
    %620 = arith.mulf %619, %618 : vector<4x32xf32>
    %621 = arith.addf %614, %620 : vector<4x32xf32>
    %c29_534 = arith.constant 29 : index
    %c2_535 = arith.constant 2 : index
    %622 = vector.load %arg2[%c29_534, %c2_535] : memref<32x3xf32, #tpu.memory_space<vmem>>, vector<1x1xf32>
    %623 = vector.extract %622[0, 0] : f32 from vector<1x1xf32>
    %c0_536 = arith.constant 0 : index
    %c2_537 = arith.constant 2 : index
    %c0_538 = arith.constant 0 : index
    %c0_539 = arith.constant 0 : index
    %624 = vector.load %arg3[%c0_536, %c2_537, %c0_538, %c0_539] : memref<1x3x4x32xf32, #tpu.memory_space<vmem>>, vector<1x1x4x32xf32>
    %625 = vector.shape_cast %624 : vector<1x1x4x32xf32> to vector<4x32xf32>
    %626 = vector.broadcast %623 : f32 to vector<4x32xf32>
    %627 = arith.mulf %626, %625 : vector<4x32xf32>
    %628 = arith.addf %621, %627 : vector<4x32xf32>
    %c0_540 = arith.constant 0 : index
    %c928 = arith.constant 928 : index
    %629 = vector.load %arg11[%c0_540, %c928] : memref<4x1024xf32, #tpu.memory_space<vmem>>, vector<4x32xf32>
    tpu.vector_store %arg11[%c0_540, %c928], %628 {strides = array<i32>} : memref<4x1024xf32, #tpu.memory_space<vmem>>, vector<4x32xf32>,
    %c30 = arith.constant 30 : index
    %c0_541 = arith.constant 0 : index
    %630 = vector.load %arg2[%c30, %c0_541] : memref<32x3xf32, #tpu.memory_space<vmem>>, vector<1x1xf32>
    %631 = vector.extract %630[0, 0] : f32 from vector<1x1xf32>
    %c0_542 = arith.constant 0 : index
    %c0_543 = arith.constant 0 : index
    %c0_544 = arith.constant 0 : index
    %c0_545 = arith.constant 0 : index
    %632 = vector.load %arg3[%c0_542, %c0_543, %c0_544, %c0_545] : memref<1x3x4x32xf32, #tpu.memory_space<vmem>>, vector<1x1x4x32xf32>
    %633 = vector.shape_cast %632 : vector<1x1x4x32xf32> to vector<4x32xf32>
    %634 = vector.broadcast %631 : f32 to vector<4x32xf32>
    %635 = arith.mulf %634, %633 : vector<4x32xf32>
    %c30_546 = arith.constant 30 : index
    %c1_547 = arith.constant 1 : index
    %636 = vector.load %arg2[%c30_546, %c1_547] : memref<32x3xf32, #tpu.memory_space<vmem>>, vector<1x1xf32>
    %637 = vector.extract %636[0, 0] : f32 from vector<1x1xf32>
    %c0_548 = arith.constant 0 : index
    %c1_549 = arith.constant 1 : index
    %c0_550 = arith.constant 0 : index
    %c0_551 = arith.constant 0 : index
    %638 = vector.load %arg3[%c0_548, %c1_549, %c0_550, %c0_551] : memref<1x3x4x32xf32, #tpu.memory_space<vmem>>, vector<1x1x4x32xf32>
    %639 = vector.shape_cast %638 : vector<1x1x4x32xf32> to vector<4x32xf32>
    %640 = vector.broadcast %637 : f32 to vector<4x32xf32>
    %641 = arith.mulf %640, %639 : vector<4x32xf32>
    %642 = arith.addf %635, %641 : vector<4x32xf32>
    %c30_552 = arith.constant 30 : index
    %c2_553 = arith.constant 2 : index
    %643 = vector.load %arg2[%c30_552, %c2_553] : memref<32x3xf32, #tpu.memory_space<vmem>>, vector<1x1xf32>
    %644 = vector.extract %643[0, 0] : f32 from vector<1x1xf32>
    %c0_554 = arith.constant 0 : index
    %c2_555 = arith.constant 2 : index
    %c0_556 = arith.constant 0 : index
    %c0_557 = arith.constant 0 : index
    %645 = vector.load %arg3[%c0_554, %c2_555, %c0_556, %c0_557] : memref<1x3x4x32xf32, #tpu.memory_space<vmem>>, vector<1x1x4x32xf32>
    %646 = vector.shape_cast %645 : vector<1x1x4x32xf32> to vector<4x32xf32>
    %647 = vector.broadcast %644 : f32 to vector<4x32xf32>
    %648 = arith.mulf %647, %646 : vector<4x32xf32>
    %649 = arith.addf %642, %648 : vector<4x32xf32>
    %c0_558 = arith.constant 0 : index
    %c960 = arith.constant 960 : index
    %650 = vector.load %arg11[%c0_558, %c960] : memref<4x1024xf32, #tpu.memory_space<vmem>>, vector<4x32xf32>
    tpu.vector_store %arg11[%c0_558, %c960], %649 {strides = array<i32>} : memref<4x1024xf32, #tpu.memory_space<vmem>>, vector<4x32xf32>,
    %c31 = arith.constant 31 : index
    %c0_559 = arith.constant 0 : index
    %651 = vector.load %arg2[%c31, %c0_559] : memref<32x3xf32, #tpu.memory_space<vmem>>, vector<1x1xf32>
    %652 = vector.extract %651[0, 0] : f32 from vector<1x1xf32>
    %c0_560 = arith.constant 0 : index
    %c0_561 = arith.constant 0 : index
    %c0_562 = arith.constant 0 : index
    %c0_563 = arith.constant 0 : index
    %653 = vector.load %arg3[%c0_560, %c0_561, %c0_562, %c0_563] : memref<1x3x4x32xf32, #tpu.memory_space<vmem>>, vector<1x1x4x32xf32>
    %654 = vector.shape_cast %653 : vector<1x1x4x32xf32> to vector<4x32xf32>
    %655 = vector.broadcast %652 : f32 to vector<4x32xf32>
    %656 = arith.mulf %655, %654 : vector<4x32xf32>
    %c31_564 = arith.constant 31 : index
    %c1_565 = arith.constant 1 : index
    %657 = vector.load %arg2[%c31_564, %c1_565] : memref<32x3xf32, #tpu.memory_space<vmem>>, vector<1x1xf32>
    %658 = vector.extract %657[0, 0] : f32 from vector<1x1xf32>
    %c0_566 = arith.constant 0 : index
    %c1_567 = arith.constant 1 : index
    %c0_568 = arith.constant 0 : index
    %c0_569 = arith.constant 0 : index
    %659 = vector.load %arg3[%c0_566, %c1_567, %c0_568, %c0_569] : memref<1x3x4x32xf32, #tpu.memory_space<vmem>>, vector<1x1x4x32xf32>
    %660 = vector.shape_cast %659 : vector<1x1x4x32xf32> to vector<4x32xf32>
    %661 = vector.broadcast %658 : f32 to vector<4x32xf32>
    %662 = arith.mulf %661, %660 : vector<4x32xf32>
    %663 = arith.addf %656, %662 : vector<4x32xf32>
    %c31_570 = arith.constant 31 : index
    %c2_571 = arith.constant 2 : index
    %664 = vector.load %arg2[%c31_570, %c2_571] : memref<32x3xf32, #tpu.memory_space<vmem>>, vector<1x1xf32>
    %665 = vector.extract %664[0, 0] : f32 from vector<1x1xf32>
    %c0_572 = arith.constant 0 : index
    %c2_573 = arith.constant 2 : index
    %c0_574 = arith.constant 0 : index
    %c0_575 = arith.constant 0 : index
    %666 = vector.load %arg3[%c0_572, %c2_573, %c0_574, %c0_575] : memref<1x3x4x32xf32, #tpu.memory_space<vmem>>, vector<1x1x4x32xf32>
    %667 = vector.shape_cast %666 : vector<1x1x4x32xf32> to vector<4x32xf32>
    %668 = vector.broadcast %665 : f32 to vector<4x32xf32>
    %669 = arith.mulf %668, %667 : vector<4x32xf32>
    %670 = arith.addf %663, %669 : vector<4x32xf32>
    %c0_576 = arith.constant 0 : index
    %c992 = arith.constant 992 : index
    %671 = vector.load %arg11[%c0_576, %c992] : memref<4x1024xf32, #tpu.memory_space<vmem>>, vector<4x32xf32>
    tpu.vector_store %arg11[%c0_576, %c992], %670 {strides = array<i32>} : memref<4x1024xf32, #tpu.memory_space<vmem>>, vector<4x32xf32>,
    %c0_577 = arith.constant 0 : index
    %c0_578 = arith.constant 0 : index
    %672 = vector.load %arg6[%c0_577, %c0_578] : memref<4x4xf32, #tpu.memory_space<vmem>>, vector<4x4xf32>
    %c0_579 = arith.constant 0 : index
    %c0_580 = arith.constant 0 : index
    %c0_581 = arith.constant 0 : index
    %673 = vector.load %arg5[%c0_579, %c0_580, %c0_581] : memref<1x4x1024xf32, #tpu.memory_space<vmem>>, vector<1x4x1024xf32>
    %674 = vector.shape_cast %673 : vector<1x4x1024xf32> to vector<4x1024xf32>
    %cst = arith.constant dense<0.000000e+00> : vector<4x1024xf32>
    %675 = tpu.matmul %672, %674, %cst {dimension_numbers = #tpu.dot_dimension_numbers<[1], [0], [0], [1], [0, 0, 1, 1], [], []>} : vector<4x4xf32>, vector<4x1024xf32>, vector<4x1024xf32> -> vector<4x1024xf32>
    %c0_582 = arith.constant 0 : index
    %c0_583 = arith.constant 0 : index
    %676 = vector.load %arg7[%c0_582, %c0_583] : memref<4x1xf32, #tpu.memory_space<vmem>>, vector<4x1xf32>
    %677 = vector.broadcast %676 : vector<4x1xf32> to vector<4x1024xf32>
    %678 = arith.addf %675, %677 : vector<4x1024xf32>
    %c0_584 = arith.constant 0 : index
    %c0_585 = arith.constant 0 : index
    %679 = vector.load %arg11[%c0_584, %c0_585] : memref<4x1024xf32, #tpu.memory_space<vmem>>, vector<4x1024xf32>
    %680 = arith.addf %679, %678 : vector<4x1024xf32>
    %c0_586 = arith.constant 0 : index
    %c0_587 = arith.constant 0 : index
    %681 = vector.load %arg8[%c0_586, %c0_587] : memref<16x4xf32, #tpu.memory_space<vmem>>, vector<16x4xf32>
    %cst_588 = arith.constant dense<0.000000e+00> : vector<16x1024xf32>
    %682 = tpu.matmul %681, %680, %cst_588 {dimension_numbers = #tpu.dot_dimension_numbers<[1], [0], [0], [1], [0, 0, 1, 1], [], []>} : vector<16x4xf32>, vector<4x1024xf32>, vector<16x1024xf32> -> vector<16x1024xf32>
    %c0_589 = arith.constant 0 : index
    %c0_590 = arith.constant 0 : index
    %683 = vector.load %arg9[%c0_589, %c0_590] : memref<16x1xf32, #tpu.memory_space<vmem>>, vector<16x1xf32>
    %684 = vector.broadcast %683 : vector<16x1xf32> to vector<16x1024xf32>
    %685 = arith.addf %682, %684 : vector<16x1024xf32>
    %c0_591 = arith.constant 0 : index
    %c0_592 = arith.constant 0 : index
    %c0_593 = arith.constant 0 : index
    %686 = vector.load %arg4[%c0_591, %c0_592, %c0_593] : memref<1x16x1024xf32, #tpu.memory_space<vmem>>, vector<1x16x1024xf32>
    %687 = vector.shape_cast %686 : vector<1x16x1024xf32> to vector<16x1024xf32>
    %688 = arith.negf %685 : vector<16x1024xf32>
    %689 = math.exp %688 : vector<16x1024xf32>
    %cst_594 = arith.constant 1.000000e+00 : f32
    %690 = vector.broadcast %cst_594 : f32 to vector<16x1024xf32>
    %691 = arith.addf %690, %689 : vector<16x1024xf32>
    %692 = arith.divf %690, %691 : vector<16x1024xf32>
    %693 = arith.mulf %687, %692 : vector<16x1024xf32>
    %c0_595 = arith.constant 0 : index
    %c0_596 = arith.constant 0 : index
    %c0_597 = arith.constant 0 : index
    %694 = vector.load %arg10[%c0_595, %c0_596, %c0_597] : memref<1x16x1024xf32, #tpu.memory_space<vmem>>, vector<1x16x1024xf32>
    %695 = vector.shape_cast %694 : vector<1x16x1024xf32> to vector<16x1024xf32>
    %696 = vector.shape_cast %693 : vector<16x1024xf32> to vector<1x16x1024xf32>
    tpu.vector_store %arg10[%c0_595, %c0_596, %c0_597], %696 {strides = array<i32>} : memref<1x16x1024xf32, #tpu.memory_space<vmem>>, vector<1x16x1024xf32>,
    return
  }
  func.func @transform_0(%arg0: i32, %arg1: i32) -> (i32, i32) {
    %c0_i32 = arith.constant 0 : i32
    %c0_i32_0 = arith.constant 0 : i32
    return %arg1, %c0_i32 : i32, i32
  }
  func.func @transform_1(%arg0: i32, %arg1: i32) -> (i32, i32, i32, i32) {
    %c0_i32 = arith.constant 0 : i32
    %c0_i32_0 = arith.constant 0 : i32
    %c0_i32_1 = arith.constant 0 : i32
    %c0_i32_2 = arith.constant 0 : i32
    return %arg0, %c0_i32, %c0_i32_0, %c0_i32_1 : i32, i32, i32, i32
  }
  func.func @transform_2(%arg0: i32, %arg1: i32) -> (i32, i32, i32) {
    %c0_i32 = arith.constant 0 : i32
    %c0_i32_0 = arith.constant 0 : i32
    return %arg0, %c0_i32, %arg1 : i32, i32, i32
  }
  func.func @transform_3(%arg0: i32, %arg1: i32) -> (i32, i32, i32) {
    %c0_i32 = arith.constant 0 : i32
    %c0_i32_0 = arith.constant 0 : i32
    return %arg0, %c0_i32, %arg1 : i32, i32, i32
  }
  func.func @transform_4(%arg0: i32, %arg1: i32) -> (i32, i32) {
    %c0_i32 = arith.constant 0 : i32
    %c0_i32_0 = arith.constant 0 : i32
    %c0_i32_1 = arith.constant 0 : i32
    return %c0_i32, %c0_i32_0 : i32, i32
  }
  func.func @transform_5(%arg0: i32, %arg1: i32) -> (i32, i32) {
    %c0_i32 = arith.constant 0 : i32
    %c0_i32_0 = arith.constant 0 : i32
    %c0_i32_1 = arith.constant 0 : i32
    return %c0_i32, %c0_i32_0 : i32, i32
  }
  func.func @transform_6(%arg0: i32, %arg1: i32) -> (i32, i32) {
    %c0_i32 = arith.constant 0 : i32
    %c0_i32_0 = arith.constant 0 : i32
    %c0_i32_1 = arith.constant 0 : i32
    return %c0_i32, %c0_i32_0 : i32, i32
  }
  func.func @transform_7(%arg0: i32, %arg1: i32) -> (i32, i32) {
    %c0_i32 = arith.constant 0 : i32
    %c0_i32_0 = arith.constant 0 : i32
    %c0_i32_1 = arith.constant 0 : i32
    return %c0_i32, %c0_i32_0 : i32, i32
  }
  func.func @transform_8(%arg0: i32, %arg1: i32) -> (i32, i32, i32) {
    %c0_i32 = arith.constant 0 : i32
    %c0_i32_0 = arith.constant 0 : i32
    return %arg0, %c0_i32, %arg1 : i32, i32, i32
  }
}

</mosaic_0001>

<bundles_post_ra>
// kernel: esa_forward.3
= control target key start
LH: loop header
LB: loop body
LE: loop exit
PB: predicated region body
PF: predicated region fallthrough
CT: control target
= control target key end

     0   :  { %s601_s12 = smov 0   ;;  %s603_s13 = smov 0   ;;  %s674_s0 = inlined_call_operand.vmem [shape: f32[2,16,1024], index: 0, kind: input, shape index: {}]   ;;  %s675_s1 = inlined_call_operand.vmem [shape: f32[4,16], index: 1, kind: input, shape index: {}]   ;;  %s676_s2 = inlined_call_operand.vmem [shape: f32[4,1], index: 2, kind: input, shape index: {}]   ;;  %s677_s3 = inlined_call_operand.vmem [shape: f32[2,4,1024], index: 3, kind: output, shape index: {}]  }
   0x1   :  { %s605_s14 = smov 0  }
   0x2 LB: > { %s25_s15 = sadd.s32 1, %s574_s13  ;;  %p513_p0 = scmp.ge.s32.totalorder %s578_s14, 1  ;;  %s578_s14 = sphi %s605_s14, %s13_s14   ;;  %s574_s13 = sphi %s603_s13, %s679_s13   ;;  %s570_s12 = sphi %s601_s12, %s678_s12  }
   0x3   : > { %p27_p1 = scmp.ge.s32.totalorder %s25_s15, 2  ;;  %p158_p2 = scmp.lt.s32.totalorder %s578_s14, 3 }
   0x5   : > { %s681_s15 = smov (%p27_p1, %s25_s15), 0  ;;  %p159_p3 = pnand %p513_p0, %p158_p2 }
   0x6   : > { %p191_p4 = scmp.lt.s32.totalorder (!%p159_p3), %s570_s12, 1 }
   0x7   : > { %162 = sbr.rel (%p159_p3) target bundleno = 165 (0xa5), region = 32 }
   0xc   : > { %v580_v0 = vmov 0   ;;  %v227_v1 = vld [vmem:[%s676_s2] sm:$0xf]  ;;  %s683_s12 = smov (!%p191_p4, %s570_s12), 1  ;;  %vm233_vm0 = vcmask 130048   ;;  %vm409_vm1 = vcmask 1043456  }
   0xd   : > { %555 = vset.pattern.permute.xlu0 %v580_v0  ;;  %s528_s18 = sshll.u32 %s683_s12, 7  ;;  %v210_v6 = vld [vmem:[%s675_s1] sm:$0xf]  ;;  %s529_s24 = sshll.u32 %s683_s12, 5 }
   0xe   : > { %230 = vperm.xlu0 %555, %v227_v1   ;;  %s628_s21 = scalar_lea.vmem %s674_s0, %s528_s18  ;;  %s208_s27 = scalar_lea.vmem %s677_s3, %s529_s24 }
   0xf   : > { %v221_v2 = vld [vmem:[%s628_s21 + $0x50] sm:$0xff]  ;;  %v222_v3 = vld [vmem:[%s628_s21 + $0x58] sm:$0xff]  ;;  %v220_v7 = vld [vmem:[%s628_s21 + $0x48] sm:$0xff] }
  0x10   : > { %v213_v4 = vld [vmem:[%s628_s21 + $0x10] sm:$0xff]  ;;  %291 = vmatpush.msra.mxu2 %v221_v2  ;;  %311 = vmatpush.msra.mxu3 %v222_v3  ;;  %v214_v5 = vld [vmem:[%s628_s21 + $0x18] sm:$0xff]  ;;  %v219_v10 = vld [vmem:[%s628_s21 + $0x40] sm:$0xff] }
  0x11   : > { %v226_v8 = vld [vmem:[%s628_s21 + $0x78] sm:$0xff]  ;;  %271 = vmatpush.msra.mxu1 %v220_v7  ;;  %v225_v9 = vld [vmem:[%s628_s21 + $0x70] sm:$0xff]  ;;  %v212_v11 = vld [vmem:[%s628_s21 + $0x8] sm:$0xff]  ;;  %251 = vmatpush.msra.mxu0 %v219_v10 }
  0x12   : > { %292 = vmatpush.msra.mxu2 %v213_v4  ;;  %312 = vmatpush.msra.mxu3 %v214_v5  ;;  %v218_v12 = vld [vmem:[%s628_s21 + $0x38] sm:$0xff]  ;;  %v211_v13 = vld [vmem:[%s628_s21] sm:$0xff]  ;;  %v224_v14 = vld [vmem:[%s628_s21 + $0x68] sm:$0xff] }
  0x13   : > { %520 = vmatmul.msk.f32.vlgmr.msra.gmra.mxu2 %vm233_vm0, %v210_v6  ;;  %521 = vmatmul.msk.f32.vlgmr.msra.gmra.mxu3 %vm233_vm0, %v210_v6  ;;  %v217_v15 = vld [vmem:[%s628_s21 + $0x30] sm:$0xff]  ;;  %v223_v16 = vld [vmem:[%s628_s21 + $0x60] sm:$0xff]  ;;  %v216_v17 = vld [vmem:[%s628_s21 + $0x28] sm:$0xff] }
  0x14   : > { %391 = vmatpush.msrb.mxu3 %v226_v8  ;;  %371 = vmatpush.msrb.mxu2 %v225_v9  ;;  %v215_v18 = vld [vmem:[%s628_s21 + $0x20] sm:$0xff] }
  0x15   : > { %272 = vmatpush.msra.mxu1 %v212_v11  ;;  %252 = vmatpush.msra.mxu0 %v211_v13 }
  0x16   : > { %519 = vmatmul.msk.f32.vlgmr.msra.gmra.mxu1 %vm233_vm0, %v210_v6  ;;  %392 = vmatpush.msrb.mxu3 %v218_v12 }
  0x17   : > { %351 = vmatpush.msrb.mxu1 %v224_v14  ;;  %518 = vmatmul.msk.f32.vlgmr.msra.gmra.mxu0 %vm233_vm0, %v210_v6 }
  0x18   : > { %372 = vmatpush.msrb.mxu2 %v217_v15  ;;  %331 = vmatpush.msrb.mxu0 %v223_v16 }
  0x19   : > { %352 = vmatpush.msrb.mxu1 %v216_v17 }
  0x1a   : > { %332 = vmatpush.msrb.mxu0 %v215_v18 }
  0x1b   : > { %524 = vmatmul.msk.f32.vlgmr.msrb.gmra.mxu2 %vm233_vm0, %v210_v6  ;;  %525 = vmatmul.msk.f32.vlgmr.msrb.gmra.mxu3 %vm233_vm0, %v210_v6 }
  0x1e   : > { %523 = vmatmul.msk.f32.vlgmr.msrb.gmra.mxu1 %vm233_vm0, %v210_v6 }
  0x1f   : > { %522 = vmatmul.msk.f32.vlgmr.msrb.gmra.mxu0 %vm233_vm0, %v210_v6 }
  0x80   : > { %v231_v19 = vpop.permute.xlu0 %230 }
  0x93   : > { %v274_v20 = vpop.f32.mrf.mxu1 }
  0x94   : > { %v275_v21 = vadd.f32 %v274_v20, %v231_v19  ;;  %v254_v22 = vpop.f32.mrf.mxu0 }
  0x95   : > { %v255_v23 = vadd.f32 %v254_v22, %v231_v19 }
  0x96   : > { %v405_v24 = vrot.slane %v275_v21, 4  ;;  %v294_v25 = vpop.f32.mrf.mxu2  ;;  %v314_v26 = vpop.f32.mrf.mxu3 }
  0x97   : > { %v295_v27 = vadd.f32 %v294_v25, %v231_v19  ;;  %v315_v28 = vadd.f32 %v314_v26, %v231_v19 }
  0x98   : > { %v410_v29 = vsel %vm409_vm1, %v255_v23, %v405_v24 }
  0x99   : > { %418 = vst [vmem:[%s208_s27] sm:$0xff] %v410_v29  ;;  %v406_v30 = vrot.slane %v315_v28, 4 }
  0x9b   : > { %v411_v31 = vsel %vm409_vm1, %v295_v27, %v406_v30  ;;  %v354_v32 = vpop.f32.mrf.mxu1 }
  0x9c   : > { %419 = vst [vmem:[%s208_s27 + $0x8] sm:$0xff] %v411_v31  ;;  %v355_v33 = vadd.f32 %v354_v32, %v231_v19  ;;  %v334_v34 = vpop.f32.mrf.mxu0 }
  0x9d   : > { %v335_v36 = vadd.f32 %v334_v34, %v231_v19 }
  0x9e   : > { %v407_v35 = vrot.slane %v355_v33, 4  ;;  %v374_v37 = vpop.f32.mrf.mxu2  ;;  %v394_v38 = vpop.f32.mrf.mxu3 }
  0x9f   : > { %v395_v39 = vadd.f32 %v394_v38, %v231_v19  ;;  %v375_v41 = vadd.f32 %v374_v37, %v231_v19 }
  0xa0   : > { %v412_v40 = vsel %vm409_vm1, %v335_v36, %v407_v35 }
  0xa1   : > { %420 = vst [vmem:[%s208_s27 + $0x10] sm:$0xff] %v412_v40  ;;  %v408_v42 = vrot.slane %v395_v39, 4 }
  0xa3   : > { %v413_v43 = vsel %vm409_vm1, %v375_v41, %v408_v42 }
  0xa4   : > { %421 = vst [vmem:[%s208_s27 + $0x18] sm:$0xff] %v413_v43 }
  0xa5 PF: > { %s13_s14 = sadd.s32 1, %s578_s14   ;;  %s678_s12 = smov %s574_s13 }
  0xa6   : > { %p10_p5 = scmp.ge.s32.totalorder %s13_s14, 4   ;;  %s679_s13 = smov %s681_s15 }
  0xa8   :  { %12 = sbr.rel (!%p10_p5) target bundleno = 2 (0x2), region = 62 }

// kernel: esa_forward.4
= control target key start
LH: loop header
LB: loop body
LE: loop exit
PB: predicated region body
PF: predicated region fallthrough
CT: control target
= control target key end

     0   :  { %s2557_s24 = smov 0   ;;  %s3016_s0 = inlined_call_operand.vmem [shape: f32[2,4,32,32], index: 0, kind: input, shape index: {}]   ;;  %s3017_s1 = inlined_call_operand.vmem [shape: f32[3,3,4,4], index: 1, kind: input, shape index: {}]   ;;  %s3018_s2 = inlined_call_operand.vmem [shape: f32[4,1], index: 2, kind: input, shape index: {}]   ;;  %s3019_s3 = inlined_call_operand.vmem [shape: f32[3,32,15], index: 3, kind: input, shape index: {}]   ;;  %s3020_s4 = inlined_call_operand.vmem [shape: f32[3,3,3,4,4], index: 4, kind: input, shape index: {}]   ;;  %s3021_s5 = inlined_call_operand.vmem [shape: f32[3,4,1], index: 5, kind: input, shape index: {}]   ;;  %s3022_s6 = inlined_call_operand.vmem [shape: f32[3,32], index: 6, kind: input, shape index: {}]   ;;  %s3023_s7 = inlined_call_operand.vmem [shape: f32[2,3,4,32], index: 7, kind: output, shape index: {}]  }
   0x1 LB: > { %s2172_s25 = sadd.s32 4294967295, %s2482_s24   ;;  %p2176_p0 = scmp.ge.s32.totalorder %s2482_s24, 1  ;;  %s2482_s24 = sphi %s2557_s24, %s17_s24  }
   0x2   : > { %p237_p1 = scmp.lt.s32.totalorder %s2482_s24, 3 }
   0x4   : > { %p238_p2 = pnand %p2176_p0, %p237_p1 }
   0x5   : > { %p269_p3 = scmp.lt.s32.totalorder (!%p238_p2), %s2172_s25, 1  ;;  %s2580_s13 = smov (!%p238_p2), 0  }
   0x6   : > { %241 = sbr.rel (%p238_p2) target bundleno = 1842 (0x732), region = 48 }
   0xb   : > { %v2568_v0 = vld [vmem:[%s3018_s2] sm:$0xf]  ;;  %s3025_s25 = smov (!%p269_p3, %s2172_s25), 1 }
   0xc   : > { %s2389_s28 = sshll.u32 %s3025_s25, 7  ;;  %s2390_s29 = smul.u32 12, %s3025_s25 }
   0xd   : > { %s2573_s9 = scalar_lea.vmem %s3016_s0, %s2389_s28 }
   0xe   : > { %s2578_s12 = scalar_lea.vmem %s3023_s7, %s2390_s29 }
   0xf LB: >> { %v2588_v1 = vld [vmem:[%s3019_s3 + $0x18] sm:$0xff]  ;;  %v2598_v3 = vld [vmem:[%s3019_s3 + $0x10] sm:$0xff]  ;;  %v2610_v5 = vld [vmem:[%s3019_s3 + $0x8] sm:$0xff]  ;;  %s2180_s27 = sshll.u32 %s2486_s13, 1  ;;  %vm301_vm0 = vcmask 1041409   ;;  %vm304_vm1 = vcmask 1042434   ;;  %s2486_s13 = sphi %s2580_s13, %s285_s13  }
  0x10   : >> { %v2593_v2 = vld [vmem:[%s3019_s3 + $0x38] sm:$0xff]  ;;  %324 = vmatpush.msra.mxu0 %v2588_v1  ;;  %v2605_v4 = vld [vmem:[%s3019_s3 + $0x30] sm:$0xff]  ;;  %v2615_v6 = vld [vmem:[%s3019_s3 + $0x28] sm:$0xff]  ;;  %s2631_s10 = scalar_lea.vmem %s2573_s9, %s2180_s27  ;;  %vm307_vm2 = vcmask 1043459   ;;  %vm309_vm3 = vcmask 261120   ;;  %vm364_vm4 = vcmask 1043456  }
  0x11   : >> { %350 = vmatpush.msra.mxu1 %v2593_v2  ;;  %v2623_v7 = vld [vmem:[%s3019_s3] sm:$0xff]  ;;  %v2195_v19 = vld [vmem:[%s3019_s3 + $0x58] sm:$0xff]  ;;  %v2194_v20 = vld [vmem:[%s3019_s3 + $0x50] sm:$0xff]  ;;  %vm360_vm5 = vcmask 31744   ;;  %v2504_v54 = vmov 0   ;;  %vm812_vm6 = vcmask 114688  }
  0x12   : >> { %325 = vmatpush.msra.mxu0 %v2598_v3  ;;  %v2628_v8 = vld [vmem:[%s3019_s3 + $0x20] sm:$0xff]  ;;  %v2193_v21 = vld [vmem:[%s3019_s3 + $0x48] sm:$0xff]  ;;  %v2214_v50 = vld [vmem:[%s3017_s1 + $0x14] sm:$0xf]  ;;  %2452 = vset.pattern.permute.xlu0 %v2504_v54  ;;  %s811_s20 = scalar_lea.vmem [#allocation2], %s2486_s13  ;;  %s285_s13 = sadd.s32 1, %s2486_s13  }
  0x13   : >> { %351 = vmatpush.msra.mxu1 %v2605_v4  ;;  %v288_v9 = vld [vmem:[%s2631_s10] sm:$0x1]  ;;  %v2202_v23 = vld [vmem:[%s2631_s10 + $0x21] sm:$0x1]  ;;  %v2219_v33 = vld [vmem:[%s2631_s10 + $0x22] sm:$0x1]  ;;  %800 = vperm.xlu0 %2452, %v2568_v0  }
  0x14   : >> { %v289_v10 = vld [vmem:[%s2631_s10 + $0x20] sm:$0x1]  ;;  %326 = vmatpush.msra.mxu0 %v2610_v5  ;;  %v2203_v24 = vld [vmem:[%s2631_s10 + $0x41] sm:$0x1]  ;;  %v478_v25 = vrot.slane %v2202_v23, 7  ;;  %v643_v35 = vrot.slane %v2219_v33, 7 }
  0x15   : >> { %v290_v11 = vld [vmem:[%s2631_s10 + $0x40] sm:$0x1]  ;;  %352 = vmatpush.msra.mxu1 %v2615_v6  ;;  %v300_v13 = vrot.slane %v289_v10, 7  ;;  %v2201_v26 = vld [vmem:[%s2631_s10 + $0x1] sm:$0x1]  ;;  %v480_v28 = vrot.slane %v2203_v24, 6 }
  0x16   : >> { %v291_v12 = vld [vmem:[%s2631_s10 + $0x60] sm:$0x1]  ;;  %v303_v14 = vrot.slane %v290_v11, 6  ;;  %327 = vmatpush.msra.mxu0 %v2623_v7  ;;  %v2204_v27 = vld [vmem:[%s2631_s10 + $0x61] sm:$0x1]  ;;  %v479_v29 = vsel %vm301_vm0, %v478_v25, %v2201_v26  ;;  %p282_p4 = scmp.ge.s32.totalorder %s285_s13, 15  }
  0x17   : >> { %v306_v15 = vrot.slane %v291_v12, 5  ;;  %353 = vmatpush.msra.mxu1 %v2628_v8  ;;  %v302_v16 = vsel %vm301_vm0, %v300_v13, %v288_v9  ;;  %v2192_v22 = vld [vmem:[%s3019_s3 + $0x40] sm:$0xff]  ;;  %v482_v30 = vrot.slane %v2204_v27, 5  ;;  %v481_v31 = vsel %vm304_vm1, %v480_v28, %v479_v29  ;;  %v2206_v48 = vld [vmem:[%s3017_s1 + $0xc] sm:$0xf]  ;;  %s2745_s21 = smov (%p282_p4), 0  }
  0x18   : >> { %v305_v17 = vsel %vm304_vm1, %v303_v14, %v302_v16  ;;  %498 = vmatpush.msrb.mxu0 %v2588_v1  ;;  %v2220_v34 = vld [vmem:[%s2631_s10 + $0x42] sm:$0x1]  ;;  %v2187_v41 = vld [vmem:[%s3017_s1 + $0x4] sm:$0xf]  ;;  %v2227_v53 = vld [vmem:[%s3017_s1 + $0x1c] sm:$0xf] }
  0x19   : >> { %v308_v18 = vsel %vm307_vm2, %v306_v15, %v305_v17  ;;  %v483_v32 = vsel %vm307_vm2, %v482_v30, %v481_v31  ;;  %v2218_v36 = vld [vmem:[%s2631_s10 + $0x2] sm:$0x1]  ;;  %v645_v38 = vrot.slane %v2220_v34, 6  ;;  %v2197_v55 = vld [vmem:[%s3017_s1 + $0x8] sm:$0xf]  ;;  %vm817_vm7 = vcmask (%p282_p4), 36864  }
  0x1a   : >> { %2181 = vmatmul.msk.f32.vlgmr.msra.gmra.mxu0 %vm309_vm3, %v308_v18  ;;  %2186 = vmatmul.msk.f32.vlgmr.msra.gmra.mxu1 %vm309_vm3, %v308_v18  ;;  %v2221_v37 = vld [vmem:[%s2631_s10 + $0x62] sm:$0x1]  ;;  %v644_v39 = vsel %vm301_vm0, %v643_v35, %v2218_v36  ;;  %v2210_v57 = vld [vmem:[%s3017_s1 + $0x10] sm:$0xf]  ;;  %v2223_v59 = vld [vmem:[%s3017_s1 + $0x18] sm:$0xf] }
  0x1b   : >> { %499 = vmatpush.msrb.mxu0 %v2598_v3  ;;  %v647_v40 = vrot.slane %v2221_v37, 5  ;;  %v332_v42 = vld [vmem:[%s3017_s1] sm:$0xf]  ;;  %v646_v43 = vsel %vm304_vm1, %v645_v38, %v644_v39 }
  0x1c   : >> { %v2231_v61 = vld [vmem:[%s3017_s1 + $0x20] sm:$0xf] }
  0x1d   : >> { %500 = vmatpush.msrb.mxu0 %v2610_v5  ;;  %v648_v46 = vsel %vm307_vm2, %v647_v40, %v646_v43 }
  0x1f   : >> { %501 = vmatpush.msrb.mxu0 %v2623_v7 }
  0x21   : >> { %596 = vmatpush.msra.mxu0 %v2195_v19 }
  0x22   : >> { %2205 = vmatmul.msk.f32.vlgmr.msrb.gmra.mxu0 %vm309_vm3, %v483_v32 }
  0x23   : >> { %597 = vmatpush.msra.mxu0 %v2194_v20 }
  0x25   : >> { %598 = vmatpush.msra.mxu0 %v2193_v21 }
  0x27   : >> { %599 = vmatpush.msra.mxu0 %v2192_v22 }
  0x29   : >> { %712 = vmatpush.msrb.mxu0 %v2593_v2 }
  0x2a   : >> { %2213 = vmatmul.msk.f32.vlgmr.msra.gmra.mxu0 %vm309_vm3, %v483_v32 }
  0x2b   : >> { %713 = vmatpush.msrb.mxu0 %v2605_v4 }
  0x2d   : >> { %714 = vmatpush.msrb.mxu0 %v2615_v6 }
  0x2f   : >> { %715 = vmatpush.msrb.mxu0 %v2628_v8 }
  0x32   : >> { %2226 = vmatmul.msk.f32.vlgmr.msrb.gmra.mxu0 %vm309_vm3, %v648_v46 }
  0x85   : >> { %v801_v15 = vpop.permute.xlu0 %800 }
  0x97   : >> { %v329_v44 = vpop.f32.mrf.mxu0  ;;  %v355_v45 = vpop.f32.mrf.mxu1 }
  0x98   : >> { %2188 = vmatpush.msk.msra.mxu2 %vm364_vm4, %v355_v45  ;;  %2190 = vmatpush.msk.msra.mxu3 %vm364_vm4, %v329_v44 }
  0x99   : >> { %2189 = vmatmul.msk.f32.vlgmr.msra.gmra.mxu2 %vm360_vm5, %v2187_v41  ;;  %2191 = vmatmul.msk.f32.vlgmr.msra.gmra.mxu3 %vm360_vm5, %v332_v42 }
  0x9a   : >> { %431 = vmatpush.msrb.mxu2 %v2195_v19 }
  0x9c   : >> { %432 = vmatpush.msrb.mxu2 %v2194_v20 }
  0x9e   : >> { %433 = vmatpush.msrb.mxu2 %v2193_v21 }
  0x9f   : >> { %v503_v47 = vpop.f32.mrf.mxu0 }
  0xa0   : >> { %434 = vmatpush.msrb.mxu2 %v2192_v22  ;;  %2207 = vmatpush.msk.msrb.mxu1 %vm364_vm4, %v503_v47 }
  0xa1   : >> { %2196 = vmatmul.msk.f32.vlgmr.msrb.gmra.mxu2 %vm309_vm3, %v308_v18  ;;  %2208 = vmatmul.msk.f32.vlgmr.msrb.gmra.mxu1 %vm360_vm5, %v2206_v48 }
  0xa2   : >> { %547 = vmatpush.msra.mxu2 %v2593_v2 }
  0xa4   : >> { %548 = vmatpush.msra.mxu2 %v2605_v4 }
  0xa6   : >> { %549 = vmatpush.msra.mxu2 %v2615_v6 }
  0xa7   : >> { %v601_v49 = vpop.f32.mrf.mxu0 }
  0xa8   : >> { %550 = vmatpush.msra.mxu2 %v2628_v8  ;;  %2215 = vmatpush.msk.msra.mxu1 %vm364_vm4, %v601_v49 }
  0xa9   : >> { %2209 = vmatmul.msk.f32.vlgmr.msra.gmra.mxu2 %vm309_vm3, %v483_v32  ;;  %2216 = vmatmul.msk.f32.vlgmr.msra.gmra.mxu1 %vm360_vm5, %v2214_v50 }
  0xaa   : >> { %663 = vmatpush.msrb.mxu2 %v2588_v1 }
  0xac   : >> { %664 = vmatpush.msrb.mxu2 %v2598_v3 }
  0xae   : >> { %665 = vmatpush.msrb.mxu2 %v2610_v5 }
  0xaf   : >> { %v717_v51 = vpop.f32.mrf.mxu0 }
  0xb0   : >> { %666 = vmatpush.msrb.mxu2 %v2623_v7  ;;  %2228 = vmatpush.msk.msrb.mxu1 %vm364_vm4, %v717_v51 }
  0xb1   : >> { %2222 = vmatmul.msk.f32.vlgmr.msrb.gmra.mxu2 %vm309_vm3, %v648_v46  ;;  %2229 = vmatmul.msk.f32.vlgmr.msrb.gmra.mxu1 %vm360_vm5, %v2227_v53 }
  0xb2   : >> { %761 = vmatpush.msra.mxu2 %v2195_v19 }
  0xb4   : >> { %762 = vmatpush.msra.mxu2 %v2194_v20 }
  0xb6   : >> { %763 = vmatpush.msra.mxu2 %v2193_v21  ;;  %v2505_v21 = vmov (%p282_p4), 0.0  }
  0xb7   : > { %818 = vst.msk [vmem:[#allocation3] sm:$0x1f] (%p282_p4), %vm817_vm7, %v2505_v21 }
  0xb8   : >> { %764 = vmatpush.msra.mxu2 %v2192_v22  ;;  %819 = vst.msk [vmem:[#allocation3 + $0x8] sm:$0x1f] (%p282_p4), %vm817_vm7, %v2505_v21 }
  0xb9   : >> { %2230 = vmatmul.msk.f32.vlgmr.msra.gmra.mxu2 %vm309_vm3, %v648_v46  ;;  %820 = vst.msk [vmem:[#allocation3 + $0x10] sm:$0x1f] (%p282_p4), %vm817_vm7, %v2505_v21 }
  0xba   : > { %821 = vst.msk [vmem:[#allocation3 + $0x18] sm:$0x1f] (%p282_p4), %vm817_vm7, %v2505_v21 }
  0xbb   : > { %822 = vst.msk [vmem:[#allocation4] sm:$0x1f] (%p282_p4), %vm817_vm7, %v2505_v21 }
  0xbc   : > { %823 = vst.msk [vmem:[#allocation4 + $0x8] sm:$0x1f] (%p282_p4), %vm817_vm7, %v2505_v21 }
  0xbd   : > { %824 = vst.msk [vmem:[#allocation4 + $0x10] sm:$0x1f] (%p282_p4), %vm817_vm7, %v2505_v21 }
  0xbe   : > { %825 = vst.msk [vmem:[#allocation4 + $0x18] sm:$0x1f] (%p282_p4), %vm817_vm7, %v2505_v21 }
 0x11c   : >> { %v385_v52 = vpop.f32.mrf.mxu2  ;;  %v411_v63 = vpop.f32.mrf.mxu3 }
 0x11d   : >> { %v412_v3 = vadd.f32 %v411_v63, %v385_v52 }
 0x11e   : >> { %v531_v2 = vpop.f32.mrf.mxu1 }
 0x124   : >> { %v436_v56 = vpop.f32.mrf.mxu2 }
 0x125   : >> { %2198 = vmatpush.msk.msrb.mxu3 %vm364_vm4, %v436_v56 }
 0x126   : >> { %2199 = vmatmul.msk.f32.vlgmr.msrb.gmra.mxu3 %vm360_vm5, %v2197_v55  ;;  %v629_v6 = vpop.f32.mrf.mxu1 }
 0x12c   : >> { %v552_v58 = vpop.f32.mrf.mxu2 }
 0x12d   : >> { %2211 = vmatpush.msk.msra.mxu3 %vm364_vm4, %v552_v58 }
 0x12e   : >> { %2212 = vmatmul.msk.f32.vlgmr.msra.gmra.mxu3 %vm360_vm5, %v2210_v57  ;;  %v745_v12 = vpop.f32.mrf.mxu1 }
 0x134   : >> { %v668_v60 = vpop.f32.mrf.mxu2 }
 0x135   : >> { %2224 = vmatpush.msk.msrb.mxu3 %vm364_vm4, %v668_v60 }
 0x136   : >> { %2225 = vmatmul.msk.f32.vlgmr.msrb.gmra.mxu3 %vm360_vm5, %v2223_v59 }
 0x13c   : >> { %v766_v62 = vpop.f32.mrf.mxu2 }
 0x13d   : >> { %2232 = vmatpush.msk.msra.mxu3 %vm364_vm4, %v766_v62 }
 0x13e   : >> { %2233 = vmatmul.msk.f32.vlgmr.msra.gmra.mxu3 %vm360_vm5, %v2231_v61 }
 0x1a9   : >> { %v464_v1 = vpop.f32.mrf.mxu3 }
 0x1aa   : >> { %v467_v4 = vadd.f32 %v464_v1, %v412_v3 }
 0x1ac   : >> { %v534_v7 = vadd.f32 %v531_v2, %v467_v4 }
 0x1b1   : >> { %v580_v5 = vpop.f32.mrf.mxu3 }
 0x1b2   : >> { %v583_v8 = vadd.f32 %v580_v5, %v534_v7 }
 0x1b4   : >> { %v632_v10 = vadd.f32 %v629_v6, %v583_v8 }
 0x1b9   : >> { %v696_v9 = vpop.f32.mrf.mxu3 }
 0x1ba   : >> { %v699_v11 = vadd.f32 %v696_v9, %v632_v10 }
 0x1bc   : >> { %v748_v13 = vadd.f32 %v745_v12, %v699_v11 }
 0x1c1   : >> { %v794_v14 = vpop.f32.mrf.mxu3 }
 0x1c2   : >> { %v797_v16 = vadd.f32 %v794_v14, %v748_v13 }
 0x1c4   : >> { %v803_v17 = vadd.f32 %v801_v15, %v797_v16 }
 0x1c6   : >> { %v805_v18 = vrot.slane %v803_v17, 1  ;;  %v806_v19 = vrot.slane %v803_v17, 2  ;;  %v807_v20 = vrot.slane %v803_v17, 3  ;;  %813 = vst.msk [vmem:[%s811_s20] sm:$0x1] %vm812_vm6, %v803_v17  ;;  %284 = sbr.rel (!%p282_p4) target bundleno = 15 (0xf), region = 175 }
 0x1c8   : >> { %814 = vst.msk [vmem:[%s811_s20 + $0x10] sm:$0x1] %vm812_vm6, %v805_v18 }
 0x1c9   : >> { %815 = vst.msk [vmem:[%s811_s20 + $0x20] sm:$0x1] %vm812_vm6, %v806_v19 }
 0x1ca   : >> { %816 = vst.msk [vmem:[%s811_s20 + $0x30] sm:$0x1] %vm812_vm6, %v807_v20 }
 0x1cb LB: >> { %s832_s13 = smul.u32 3, %s2490_s21  ;;  %vm912_vm8 = vcmask 52224   ;;  %vm950_vm9 = vcmask 101424   ;;  %vm932_vm10 = vcmask 76824   ;;  %vm927_vm11 = vcmask 8200   ;;  %s2100_s9 = scalar_lea.vmem [#allocation3], %s2490_s21  ;;  %s2490_s21 = sphi %s2745_s21, %s831_s21  }
 0x1cc   : >> { %vm945_vm12 = vcmask 16400   ;;  %vm963_vm13 = vcmask 24600   ;;  %s831_s21 = sadd.s32 1, %s2490_s21  }
 0x1cd   : >> { %s2751_s22 = scalar_lea.vmem [#allocation2], %s832_s13  ;;  %p828_p5 = scmp.ge.s32.totalorder %s831_s21, 3  }
 0x1ce   : > { %s2793_s26 = smov (%p828_p5), 0  }
 0x1d1   : >> { %v834_v0 = vld [vmem:[%s2751_s22] sm:$0x1]  ;;  %v835_v22 = vld [vmem:[%s2751_s22 + $0x10] sm:$0x1]  ;;  %v2234_v25 = vld [vmem:[%s2751_s22 + $0x1] sm:$0x1] }
 0x1d2   : >> { %v836_v23 = vld [vmem:[%s2751_s22 + $0x20] sm:$0x1]  ;;  %v837_v24 = vld [vmem:[%s2751_s22 + $0x30] sm:$0x1]  ;;  %v2235_v26 = vld [vmem:[%s2751_s22 + $0x11] sm:$0x1]  ;;  %v844_v29 = vmax.f32 %v834_v0, %v2234_v25 }
 0x1d3   : >> { %v2236_v27 = vld [vmem:[%s2751_s22 + $0x21] sm:$0x1]  ;;  %v2237_v28 = vld [vmem:[%s2751_s22 + $0x31] sm:$0x1]  ;;  %v845_v30 = vmax.f32 %v835_v22, %v2235_v26  ;;  %v2238_v31 = vld [vmem:[%s2751_s22 + $0x2] sm:$0x1] }
 0x1d4   : >> { %v846_v32 = vmax.f32 %v836_v23, %v2236_v27  ;;  %v847_v33 = vmax.f32 %v837_v24, %v2237_v28  ;;  %v2239_v34 = vld [vmem:[%s2751_s22 + $0x12] sm:$0x1]  ;;  %v2240_v35 = vld [vmem:[%s2751_s22 + $0x22] sm:$0x1]  ;;  %v854_v37 = vmax.f32 %v844_v29, %v2238_v31  ;;  %v2242_v39 = vld [vmem:[%s2751_s22 + $0x3] sm:$0x1] }
 0x1d5   : >> { %v2241_v36 = vld [vmem:[%s2751_s22 + $0x32] sm:$0x1]  ;;  %v855_v38 = vmax.f32 %v845_v30, %v2239_v34  ;;  %v2243_v40 = vld [vmem:[%s2751_s22 + $0x13] sm:$0x1]  ;;  %v2244_v41 = vld [vmem:[%s2751_s22 + $0x23] sm:$0x1] }
 0x1d6   : >> { %v856_v42 = vmax.f32 %v846_v32, %v2240_v35  ;;  %v857_v43 = vmax.f32 %v847_v33, %v2241_v36  ;;  %v2245_v44 = vld [vmem:[%s2751_s22 + $0x33] sm:$0x1]  ;;  %v2246_v45 = vld [vmem:[%s2751_s22 + $0x4] sm:$0x1]  ;;  %v2247_v46 = vld [vmem:[%s2751_s22 + $0x14] sm:$0x1]  ;;  %v864_v47 = vmax.f32 %v854_v37, %v2242_v39 }
 0x1d7   : >> { %v865_v48 = vmax.f32 %v855_v38, %v2243_v40  ;;  %v2248_v49 = vld [vmem:[%s2751_s22 + $0x24] sm:$0x1]  ;;  %v2249_v50 = vld [vmem:[%s2751_s22 + $0x34] sm:$0x1]  ;;  %v2250_v53 = vld [vmem:[%s2751_s22 + $0x5] sm:$0x1] }
 0x1d8   : >> { %v866_v51 = vmax.f32 %v856_v42, %v2244_v41  ;;  %v867_v52 = vmax.f32 %v857_v43, %v2245_v44  ;;  %v2251_v54 = vld [vmem:[%s2751_s22 + $0x15] sm:$0x1]  ;;  %v874_v55 = vmax.f32 %v864_v47, %v2246_v45  ;;  %v2252_v57 = vld [vmem:[%s2751_s22 + $0x25] sm:$0x1]  ;;  %v2254_v61 = vld [vmem:[%s2751_s22 + $0x6] sm:$0x1] }
 0x1d9   : >> { %v875_v56 = vmax.f32 %v865_v48, %v2247_v46  ;;  %v2253_v58 = vld [vmem:[%s2751_s22 + $0x35] sm:$0x1]  ;;  %v2255_v62 = vld [vmem:[%s2751_s22 + $0x16] sm:$0x1]  ;;  %v2256_v2 = vld [vmem:[%s2751_s22 + $0x26] sm:$0x1] }
 0x1da   : >> { %v876_v59 = vmax.f32 %v866_v51, %v2248_v49  ;;  %v877_v60 = vmax.f32 %v867_v52, %v2249_v50  ;;  %v884_v63 = vmax.f32 %v874_v55, %v2250_v53  ;;  %v2257_v3 = vld [vmem:[%s2751_s22 + $0x36] sm:$0x1]  ;;  %v2791_v33 = vld [vmem:[%s3021_s5] sm:$0xf] (%p828_p5) }
 0x1db   : >> { %v885_v1 = vmax.f32 %v875_v56, %v2251_v54 }
 0x1dc   : >> { %v886_v4 = vmax.f32 %v876_v59, %v2252_v57  ;;  %v887_v5 = vmax.f32 %v877_v60, %v2253_v58  ;;  %v894_v6 = vmax.f32 %v884_v63, %v2254_v61 }
 0x1dd   : >> { %v895_v7 = vmax.f32 %v885_v1, %v2255_v62 }
 0x1de   : >> { %v896_v8 = vmax.f32 %v886_v4, %v2256_v2  ;;  %v897_v9 = vmax.f32 %v887_v5, %v2257_v3 }
 0x1df   : >> { %v902_v10 = vrot.slane %v895_v7, 7 }
 0x1e0   : >> { %v905_v11 = vrot.slane %v896_v8, 6  ;;  %v908_v12 = vrot.slane %v897_v9, 5 }
 0x1e1   : >> { %v904_v13 = vsel %vm301_vm0, %v902_v10, %v894_v6 }
 0x1e2   : >> { %v907_v14 = vsel %vm304_vm1, %v905_v11, %v904_v13 }
 0x1e3   : >> { %v910_v15 = vsel %vm307_vm2, %v908_v12, %v907_v14 }
 0x1e4   : >> { %v913_v16 = vsel %vm912_vm8, %v910_v15, -inf  ;;  %v951_v17 = vsel %vm950_vm9, %v910_v15, -inf  ;;  %v933_v18 = vsel %vm932_vm10, %v910_v15, -inf }
 0x1e5   : >> { %914 = vmax.xlane.f32.xlu0 %v913_v16  ;;  %952 = vmax.xlane.f32.xlu1 %v951_v17 }
 0x1ed   : >> { %934 = vmax.xlane.f32.xlu0 %v933_v18 }
 0x258   : >> { %v915_v19 = vpop.xlane.xlu0 %914  ;;  %v953_v24 = vpop.xlane.xlu1 %952 }
 0x259   : >> { %v918_v20 = vperm.slane %v915_v19, 0  ;;  %v919_v21 = vperm.slane %v915_v19, 1  ;;  %v920_v0 = vperm.slane %v915_v19, 2  ;;  %v921_v22 = vperm.slane %v915_v19, 3 }
 0x25a   : >> { %v955_v29 = vperm.slane %v953_v24, 0  ;;  %v956_v30 = vperm.slane %v953_v24, 1  ;;  %v957_v31 = vperm.slane %v953_v24, 2  ;;  %v958_v32 = vperm.slane %v953_v24, 3 }
 0x25b   : >> { %2258 = vst.msk [vmem:[%s2100_s9 + $0x1] sm:$0x1] %vm927_vm11, %v918_v20 }
 0x25c   : >> { %2259 = vst.msk [vmem:[%s2100_s9 + $0x9] sm:$0x1] %vm927_vm11, %v919_v21 }
 0x25d   : >> { %2260 = vst.msk [vmem:[%s2100_s9 + $0x11] sm:$0x1] %vm927_vm11, %v920_v0 }
 0x25e   : >> { %2261 = vst.msk [vmem:[%s2100_s9 + $0x19] sm:$0x1] %vm927_vm11, %v921_v22 }
 0x260   : >> { %v935_v23 = vpop.xlane.xlu0 %934 }
 0x261   : >> { %v937_v25 = vperm.slane %v935_v23, 0  ;;  %v938_v26 = vperm.slane %v935_v23, 1  ;;  %v939_v27 = vperm.slane %v935_v23, 2  ;;  %v940_v28 = vperm.slane %v935_v23, 3 }
 0x263   : >> { %2262 = vst.msk [vmem:[%s2100_s9 + $0x1] sm:$0x1] %vm945_vm12, %v937_v25 }
 0x264   : >> { %2263 = vst.msk [vmem:[%s2100_s9 + $0x9] sm:$0x1] %vm945_vm12, %v938_v26 }
 0x265   : >> { %2264 = vst.msk [vmem:[%s2100_s9 + $0x11] sm:$0x1] %vm945_vm12, %v939_v27 }
 0x266   : >> { %2265 = vst.msk [vmem:[%s2100_s9 + $0x19] sm:$0x1] %vm945_vm12, %v940_v28  ;;  %830 = sbr.rel (!%p828_p5) target bundleno = 459 (0x1cb), region = 186 }
 0x267   : >> { %2266 = vst.msk [vmem:[%s2100_s9 + $0x1] sm:$0x1] %vm963_vm13, %v955_v29 }
 0x268   : >> { %2267 = vst.msk [vmem:[%s2100_s9 + $0x9] sm:$0x1] %vm963_vm13, %v956_v30 }
 0x269   : >> { %2268 = vst.msk [vmem:[%s2100_s9 + $0x11] sm:$0x1] %vm963_vm13, %v957_v31 }
 0x26a   : >> { %2269 = vst.msk [vmem:[%s2100_s9 + $0x19] sm:$0x1] %vm963_vm13, %v958_v32 }
 0x26b LB: >> { %s976_s27 = scalar_lea.vmem [#allocation3], %s2494_s26  ;;  %s2506_s28 = smov 127   ;;  %v2278_v1 = vld [vmem:[%s3020_s4 + $0xc] sm:$0xf]  ;;  %v975_v2 = vld [vmem:[%s3020_s4] sm:$0xf]  ;;  %s2494_s26 = sphi %s2793_s26, %s974_s26  }
 0x26c   : >> { %s2507_s29 = smov 126   ;;  %v2508_v3 = vmov 0   ;;  %v2285_v5 = vld [vmem:[%s3020_s4 + $0x10] sm:$0xf]  ;;  %v2275_v8 = vld [vmem:[%s3020_s4 + $0x8] sm:$0xf] }
 0x26d   : >> { %2453 = vset.pattern.permute.xlu0 %v2508_v3  ;;  %v2298_v10 = vld [vmem:[%s3020_s4 + $0x1c] sm:$0xf]  ;;  %v2301_v11 = vld [vmem:[%s3020_s4 + $0x20] sm:$0xf]  ;;  %v2272_v13 = vld [vmem:[%s3020_s4 + $0x4] sm:$0xf] }
 0x26e   : >> { %v2291_v14 = vld [vmem:[%s3020_s4 + $0x18] sm:$0xf]  ;;  %v2288_v16 = vld [vmem:[%s3020_s4 + $0x14] sm:$0xf]  ;;  %vm1317_vm14 = vcmask 24584  }
 0x271   : >> { %v2279_v34 = vld [vmem:[%s976_s27 + $0x1] sm:$0x1]  ;;  %v2280_v35 = vld [vmem:[%s976_s27 + $0x9] sm:$0x1]  ;;  %v2281_v36 = vld [vmem:[%s976_s27 + $0x11] sm:$0x1] }
 0x272   : >> { %v2282_v37 = vld [vmem:[%s976_s27 + $0x19] sm:$0x1]  ;;  %v1099_v38 = vrot.slane %v2280_v35, 7  ;;  %v1101_v39 = vrot.slane %v2281_v36, 6  ;;  %v977_v40 = vld [vmem:[%s976_s27] sm:$0x1] }
 0x273   : >> { %v1103_v41 = vrot.slane %v2282_v37, 5  ;;  %v978_v42 = vld [vmem:[%s976_s27 + $0x8] sm:$0x1]  ;;  %v979_v43 = vld [vmem:[%s976_s27 + $0x10] sm:$0x1] }
 0x274   : >> { %v1100_v44 = vsel %vm301_vm0, %v1099_v38, %v2279_v34  ;;  %v980_v45 = vld [vmem:[%s976_s27 + $0x18] sm:$0x1]  ;;  %v985_v46 = vrot.slane %v978_v42, 7  ;;  %v988_v47 = vrot.slane %v979_v43, 6  ;;  %v2292_v48 = vld [vmem:[%s976_s27 + $0x2] sm:$0x1] }
 0x275   : >> { %v1102_v49 = vsel %vm304_vm1, %v1101_v39, %v1100_v44  ;;  %v991_v50 = vrot.slane %v980_v45, 5  ;;  %v2293_v51 = vld [vmem:[%s976_s27 + $0xa] sm:$0x1]  ;;  %v2294_v52 = vld [vmem:[%s976_s27 + $0x12] sm:$0x1] }
 0x276   : >> { %v1104_v53 = vsel %vm307_vm2, %v1103_v41, %v1102_v49  ;;  %v987_v54 = vsel %vm301_vm0, %v985_v46, %v977_v40  ;;  %v2295_v55 = vld [vmem:[%s976_s27 + $0x1a] sm:$0x1]  ;;  %v1203_v56 = vrot.slane %v2293_v51, 7  ;;  %v1205_v57 = vrot.slane %v2294_v52, 6 }
 0x277   : >> { %1133 = vrot.lane.b32.xlu1 %v1104_v53, %s2506_s28  ;;  %v990_v58 = vsel %vm304_vm1, %v988_v47, %v987_v54  ;;  %1163 = vrot.lane.b32.xlu2 %v1104_v53, %s2507_s29  ;;  %v1207_v61 = vrot.slane %v2295_v55, 5 }
 0x278   : >> { %v993_v59 = vsel %vm307_vm2, %v991_v50, %v990_v58  ;;  %v1204_v60 = vsel %vm301_vm0, %v1203_v56, %v2292_v48  ;;  %2283 = vmatpush.msk.msra.mxu3 %vm364_vm4, %v1104_v53 }
 0x279   : >> { %1059 = vrot.lane.b32.xlu0 %v993_v59, %s2507_s29  ;;  %v1206_v62 = vsel %vm304_vm1, %v1205_v57, %v1204_v60  ;;  %2270 = vmatpush.msk.msra.mxu0 %vm364_vm4, %v993_v59 }
 0x27a   : >> { %v1208_v63 = vsel %vm307_vm2, %v1207_v61, %v1206_v62  ;;  %2284 = vmatmul.msk.f32.vlgmr.msra.gmra.mxu3 %vm360_vm5, %v2278_v1  ;;  %2271 = vmatmul.msk.f32.vlgmr.msra.gmra.mxu0 %vm360_vm5, %v975_v2 }
 0x27f   : >> { %1237 = vrot.lane.b32.xlu1 %v1208_v63, %s2506_s28  ;;  %1267 = vrot.lane.b32.xlu2 %v1208_v63, %s2507_s29  ;;  %s2107_s29 = scalar_lea.vmem [#allocation4], %s2494_s26  ;;  %s974_s26 = sadd.s32 1, %s2494_s26  }
 0x280   : >> { %p971_p6 = scmp.ge.s32.totalorder %s974_s26, 3  }
 0x281   : >> { %1029 = vrot.lane.b32.xlu0 %v993_v59, %s2506_s28  ;;  %s2509_s28 = smov 1   ;;  %v2865_v48 = vld [vmem:[%s3021_s5 + $0x4] sm:$0xf] (%p971_p6)  ;;  %s2867_s10 = smov (%p971_p6), 0  }
 0x289   : >> { %1023 = vperm.xlu0 %2453, %v2791_v33  }
 0x2d1   : >> { %v1164_v4 = vpop.permute.xlu2 %1163 }
 0x2d9   : >> { %v1268_v7 = vpop.permute.xlu2 %1267 }
 0x2e9   : >> { %v1134_v6 = vpop.permute.xlu1 %1133 }
 0x2ea   : >> { %2286 = vmatpush.msk.msrb.mxu0 %vm364_vm4, %v1134_v6 }
 0x2eb   : >> { %v1060_v9 = vpop.permute.xlu0 %1059  ;;  %2287 = vmatmul.msk.f32.vlgmr.msrb.gmra.mxu0 %vm360_vm5, %v2285_v5 }
 0x2ec   : >> { %2276 = vmatpush.msk.msra.mxu2 %vm364_vm4, %v1060_v9  ;;  %2302 = vmatpush.msk.msra.mxu0 %vm364_vm4, %v1268_v7 }
 0x2ed   : >> { %2277 = vmatmul.msk.f32.vlgmr.msra.gmra.mxu2 %vm360_vm5, %v2275_v8 }
 0x2ee   : >> { %2296 = vmatpush.msk.msrb.mxu2 %vm364_vm4, %v1208_v63 }
 0x2f1   : >> { %v1238_v12 = vpop.permute.xlu1 %1237 }
 0x2f2   : >> { %2299 = vmatpush.msk.msrb.mxu3 %vm364_vm4, %v1238_v12 }
 0x2f3   : >> { %v1030_v15 = vpop.permute.xlu0 %1029  ;;  %2300 = vmatmul.msk.f32.vlgmr.msrb.gmra.mxu3 %vm360_vm5, %v2298_v10  ;;  %2303 = vmatmul.msk.f32.vlgmr.msra.gmra.mxu0 %vm360_vm5, %v2301_v11 }
 0x2f4   : >> { %2273 = vmatpush.msk.msra.mxu1 %vm364_vm4, %v1030_v15 }
 0x2f5   : >> { %2274 = vmatmul.msk.f32.vlgmr.msra.gmra.mxu1 %vm360_vm5, %v2272_v13  ;;  %2297 = vmatmul.msk.f32.vlgmr.msrb.gmra.mxu2 %vm360_vm5, %v2291_v14 }
 0x2f6   : >> { %2289 = vmatpush.msk.msrb.mxu1 %vm364_vm4, %v1164_v4 }
 0x2f7   : >> { %v1018_v17 = vpop.f32.mrf.mxu0 }
 0x2fb   : >> { %v1024_v18 = vpop.permute.xlu0 %1023 }
 0x2fc   : >> { %v1026_v19 = vadd.f32 %v1024_v18, %v1018_v17 }
 0x2fd   : >> { %2290 = vmatmul.msk.f32.vlgmr.msrb.gmra.mxu1 %vm360_vm5, %v2288_v16  ;;  %v1127_v0 = vpop.f32.mrf.mxu3 }
 0x368   : >> { %v1157_v23 = vpop.f32.mrf.mxu0 }
 0x370   : >> { %v1083_v20 = vpop.f32.mrf.mxu2  ;;  %v1291_v32 = vpop.f32.mrf.mxu0 }
 0x372   : >> { %v1053_v21 = vpop.f32.mrf.mxu1 }
 0x373   : >> { %v1056_v22 = vadd.f32 %v1053_v21, %v1026_v19 }
 0x375   : >> { %v1086_v24 = vadd.f32 %v1083_v20, %v1056_v22 }
 0x376   : >> { %v1261_v30 = vpop.f32.mrf.mxu3 }
 0x377   : >> { %v1130_v25 = vadd.f32 %v1127_v0, %v1086_v24 }
 0x378   : >> { %v1231_v28 = vpop.f32.mrf.mxu2 }
 0x379   : >> { %v1160_v26 = vadd.f32 %v1157_v23, %v1130_v25 }
 0x37a   : >> { %v1187_v27 = vpop.f32.mrf.mxu1 }
 0x37b   : >> { %v1190_v29 = vadd.f32 %v1187_v27, %v1160_v26 }
 0x37d   : >> { %v1234_v31 = vadd.f32 %v1231_v28, %v1190_v29 }
 0x37f   : >> { %v1264_v34 = vadd.f32 %v1261_v30, %v1234_v31 }
 0x381   : >> { %v1294_v35 = vadd.f32 %v1291_v32, %v1264_v34 }
 0x383   : >> { %v1295_v36 = vmax.f32 %v1294_v35, 0.0 }
 0x385   : >> { %v1300_v37 = vperm.slane %v1295_v36, 0  ;;  %v1297_v38 = vrot.slane %v1295_v36, 1  ;;  %v1298_v40 = vrot.slane %v1295_v36, 2  ;;  %v1299_v41 = vrot.slane %v1295_v36, 3 }
 0x387   : >> { %1304 = vrot.lane.b32.xlu1 %v1300_v37, %s2509_s28  ;;  %v1301_v39 = vperm.slane %v1297_v38, 0  ;;  %v1302_v42 = vperm.slane %v1298_v40, 0  ;;  %v1303_v43 = vperm.slane %v1299_v41, 0 }
 0x389   : >> { %1306 = vrot.lane.b32.xlu2 %v1301_v39, %s2509_s28 }
 0x38f   : >> { %1308 = vrot.lane.b32.xlu1 %v1302_v42, %s2509_s28 }
 0x391   : >> { %1310 = vrot.lane.b32.xlu2 %v1303_v43, %s2509_s28 }
 0x3e3   : >> { %v1307_v44 = vpop.permute.xlu2 %1306 }
 0x3e4   : >> { %2305 = vst.msk [vmem:[%s2107_s29 + $0x9] sm:$0x1] %vm1317_vm14, %v1307_v44 }
 0x3eb   : >> { %v1311_v45 = vpop.permute.xlu2 %1310 }
 0x3ec   : >> { %2307 = vst.msk [vmem:[%s2107_s29 + $0x19] sm:$0x1] %vm1317_vm14, %v1311_v45 }
 0x3f9   : >> { %v1305_v46 = vpop.permute.xlu1 %1304 }
 0x3fa   : >> { %2304 = vst.msk [vmem:[%s2107_s29 + $0x1] sm:$0x1] %vm1317_vm14, %v1305_v46 }
 0x3fe   : > { %973 = sbr.rel (!%p971_p6) target bundleno = 619 (0x26b), region = 197 }
 0x401   : >> { %v1309_v47 = vpop.permute.xlu1 %1308 }
 0x402   : >> { %2306 = vst.msk [vmem:[%s2107_s29 + $0x11] sm:$0x1] %vm1317_vm14, %v1309_v47 }
 0x403 LB: >> { %s1332_s11 = scalar_lea.vmem [#allocation4], %s2498_s10  ;;  %s2510_s26 = smov 127   ;;  %v2318_v15 = vld [vmem:[%s3020_s4 + $0x30] sm:$0xf]  ;;  %v2309_v16 = vld [vmem:[%s3020_s4 + $0x24] sm:$0xf]  ;;  %s2498_s10 = sphi %s2867_s10, %s1329_s10  }
 0x404   : >> { %s2511_s14 = smov 126   ;;  %v2512_v17 = vmov 0   ;;  %v2325_v19 = vld [vmem:[%s3020_s4 + $0x34] sm:$0xf]  ;;  %v2315_v0 = vld [vmem:[%s3020_s4 + $0x2c] sm:$0xf] }
 0x405   : >> { %2454 = vset.pattern.permute.xlu0 %v2512_v17  ;;  %v2338_v23 = vld [vmem:[%s3020_s4 + $0x40] sm:$0xf]  ;;  %v2341_v24 = vld [vmem:[%s3020_s4 + $0x44] sm:$0xf]  ;;  %v2312_v26 = vld [vmem:[%s3020_s4 + $0x28] sm:$0xf] }
 0x406   : >> { %v2331_v27 = vld [vmem:[%s3020_s4 + $0x3c] sm:$0xf]  ;;  %v2328_v29 = vld [vmem:[%s3020_s4 + $0x38] sm:$0xf] }
 0x409   : >> { %v2319_v49 = vld [vmem:[%s1332_s11 + $0x1] sm:$0x1]  ;;  %v2320_v50 = vld [vmem:[%s1332_s11 + $0x9] sm:$0x1]  ;;  %v2321_v51 = vld [vmem:[%s1332_s11 + $0x11] sm:$0x1] }
 0x40a   : >> { %v2322_v52 = vld [vmem:[%s1332_s11 + $0x19] sm:$0x1]  ;;  %v1455_v53 = vrot.slane %v2320_v50, 7  ;;  %v1457_v54 = vrot.slane %v2321_v51, 6  ;;  %v1333_v33 = vld [vmem:[%s1332_s11] sm:$0x1] }
 0x40b   : >> { %v1459_v55 = vrot.slane %v2322_v52, 5  ;;  %v1334_v56 = vld [vmem:[%s1332_s11 + $0x8] sm:$0x1]  ;;  %v1335_v57 = vld [vmem:[%s1332_s11 + $0x10] sm:$0x1] }
 0x40c   : >> { %v1456_v58 = vsel %vm301_vm0, %v1455_v53, %v2319_v49  ;;  %v1336_v59 = vld [vmem:[%s1332_s11 + $0x18] sm:$0x1]  ;;  %v1341_v60 = vrot.slane %v1334_v56, 7  ;;  %v1344_v61 = vrot.slane %v1335_v57, 6  ;;  %v2332_v62 = vld [vmem:[%s1332_s11 + $0x2] sm:$0x1] }
 0x40d   : >> { %v1458_v63 = vsel %vm304_vm1, %v1457_v54, %v1456_v58  ;;  %v1347_v1 = vrot.slane %v1336_v59, 5  ;;  %v2333_v2 = vld [vmem:[%s1332_s11 + $0xa] sm:$0x1]  ;;  %v2334_v3 = vld [vmem:[%s1332_s11 + $0x12] sm:$0x1] }
 0x40e   : >> { %v1460_v4 = vsel %vm307_vm2, %v1459_v55, %v1458_v63  ;;  %v1343_v5 = vsel %vm301_vm0, %v1341_v60, %v1333_v33  ;;  %v2335_v6 = vld [vmem:[%s1332_s11 + $0x1a] sm:$0x1]  ;;  %v1559_v7 = vrot.slane %v2333_v2, 7  ;;  %v1561_v8 = vrot.slane %v2334_v3, 6 }
 0x40f   : >> { %1489 = vrot.lane.b32.xlu1 %v1460_v4, %s2510_s26  ;;  %v1346_v9 = vsel %vm304_vm1, %v1344_v61, %v1343_v5  ;;  %1519 = vrot.lane.b32.xlu2 %v1460_v4, %s2511_s14  ;;  %v1563_v12 = vrot.slane %v2335_v6, 5 }
 0x410   : >> { %v1349_v10 = vsel %vm307_vm2, %v1347_v1, %v1346_v9  ;;  %v1560_v11 = vsel %vm301_vm0, %v1559_v7, %v2332_v62  ;;  %2323 = vmatpush.msk.msra.mxu3 %vm364_vm4, %v1460_v4 }
 0x411   : >> { %1415 = vrot.lane.b32.xlu0 %v1349_v10, %s2511_s14  ;;  %v1562_v13 = vsel %vm304_vm1, %v1561_v8, %v1560_v11  ;;  %2310 = vmatpush.msk.msra.mxu0 %vm364_vm4, %v1349_v10 }
 0x412   : >> { %v1564_v14 = vsel %vm307_vm2, %v1563_v12, %v1562_v13  ;;  %2324 = vmatmul.msk.f32.vlgmr.msra.gmra.mxu3 %vm360_vm5, %v2318_v15  ;;  %2311 = vmatmul.msk.f32.vlgmr.msra.gmra.mxu0 %vm360_vm5, %v2309_v16 }
 0x417   : >> { %1593 = vrot.lane.b32.xlu1 %v1564_v14, %s2510_s26  ;;  %1623 = vrot.lane.b32.xlu2 %v1564_v14, %s2511_s14  ;;  %s2114_s14 = scalar_lea.vmem [#allocation3], %s2498_s10  ;;  %s1329_s10 = sadd.s32 1, %s2498_s10  }
 0x418   : >> { %p1326_p7 = scmp.ge.s32.totalorder %s1329_s10, 3  }
 0x419   : >> { %1385 = vrot.lane.b32.xlu0 %v1349_v10, %s2510_s26  ;;  %s2513_s26 = smov 1   ;;  %v2939_v62 = vld [vmem:[%s3022_s6] sm:$0x7] (%p1326_p7)  ;;  %v2944_v63 = vld [vmem:[%s3021_s5 + $0x8] sm:$0xf] (%p1326_p7)  ;;  %s2946_s19 = smov (%p1326_p7), 0  }
 0x421   : >> { %1379 = vperm.xlu0 %2454, %v2865_v48  }
 0x469   : >> { %v1520_v18 = vpop.permute.xlu2 %1519 }
 0x471   : >> { %v1624_v21 = vpop.permute.xlu2 %1623 }
 0x481   : >> { %v1490_v20 = vpop.permute.xlu1 %1489 }
 0x482   : >> { %2326 = vmatpush.msk.msrb.mxu0 %vm364_vm4, %v1490_v20 }
 0x483   : >> { %v1416_v22 = vpop.permute.xlu0 %1415  ;;  %2327 = vmatmul.msk.f32.vlgmr.msrb.gmra.mxu0 %vm360_vm5, %v2325_v19 }
 0x484   : >> { %2316 = vmatpush.msk.msra.mxu2 %vm364_vm4, %v1416_v22  ;;  %2342 = vmatpush.msk.msra.mxu0 %vm364_vm4, %v1624_v21 }
 0x485   : >> { %2317 = vmatmul.msk.f32.vlgmr.msra.gmra.mxu2 %vm360_vm5, %v2315_v0 }
 0x486   : >> { %2336 = vmatpush.msk.msrb.mxu2 %vm364_vm4, %v1564_v14 }
 0x489   : >> { %v1594_v25 = vpop.permute.xlu1 %1593 }
 0x48a   : >> { %2339 = vmatpush.msk.msrb.mxu3 %vm364_vm4, %v1594_v25 }
 0x48b   : >> { %v1386_v28 = vpop.permute.xlu0 %1385  ;;  %2340 = vmatmul.msk.f32.vlgmr.msrb.gmra.mxu3 %vm360_vm5, %v2338_v23  ;;  %2343 = vmatmul.msk.f32.vlgmr.msra.gmra.mxu0 %vm360_vm5, %v2341_v24 }
 0x48c   : >> { %2313 = vmatpush.msk.msra.mxu1 %vm364_vm4, %v1386_v28 }
 0x48d   : >> { %2314 = vmatmul.msk.f32.vlgmr.msra.gmra.mxu1 %vm360_vm5, %v2312_v26  ;;  %2337 = vmatmul.msk.f32.vlgmr.msrb.gmra.mxu2 %vm360_vm5, %v2331_v27 }
 0x48e   : >> { %2329 = vmatpush.msk.msrb.mxu1 %vm364_vm4, %v1520_v18 }
 0x48f   : >> { %v1374_v30 = vpop.f32.mrf.mxu0 }
 0x493   : >> { %v1380_v31 = vpop.permute.xlu0 %1379 }
 0x494   : >> { %v1382_v32 = vadd.f32 %v1380_v31, %v1374_v30 }
 0x495   : >> { %2330 = vmatmul.msk.f32.vlgmr.msrb.gmra.mxu1 %vm360_vm5, %v2328_v29  ;;  %v1483_v36 = vpop.f32.mrf.mxu3 }
 0x500   : >> { %v1513_v38 = vpop.f32.mrf.mxu0 }
 0x508   : >> { %v1439_v34 = vpop.f32.mrf.mxu2  ;;  %v1647_v47 = vpop.f32.mrf.mxu0 }
 0x50a   : >> { %v1409_v35 = vpop.f32.mrf.mxu1 }
 0x50b   : >> { %v1412_v37 = vadd.f32 %v1409_v35, %v1382_v32 }
 0x50d   : >> { %v1442_v39 = vadd.f32 %v1439_v34, %v1412_v37 }
 0x50e   : >> { %v1617_v45 = vpop.f32.mrf.mxu3 }
 0x50f   : >> { %v1486_v40 = vadd.f32 %v1483_v36, %v1442_v39 }
 0x510   : >> { %v1587_v43 = vpop.f32.mrf.mxu2 }
 0x511   : >> { %v1516_v41 = vadd.f32 %v1513_v38, %v1486_v40 }
 0x512   : >> { %v1543_v42 = vpop.f32.mrf.mxu1 }
 0x513   : >> { %v1546_v44 = vadd.f32 %v1543_v42, %v1516_v41 }
 0x515   : >> { %v1590_v46 = vadd.f32 %v1587_v43, %v1546_v44 }
 0x517   : >> { %v1620_v49 = vadd.f32 %v1617_v45, %v1590_v46 }
 0x519   : >> { %v1650_v50 = vadd.f32 %v1647_v47, %v1620_v49 }
 0x51b   : >> { %v1651_v51 = vmax.f32 %v1650_v50, 0.0 }
 0x51d   : >> { %v1656_v52 = vperm.slane %v1651_v51, 0  ;;  %v1653_v53 = vrot.slane %v1651_v51, 1  ;;  %v1654_v33 = vrot.slane %v1651_v51, 2  ;;  %v1655_v55 = vrot.slane %v1651_v51, 3 }
 0x51f   : >> { %1660 = vrot.lane.b32.xlu1 %v1656_v52, %s2513_s26  ;;  %v1657_v54 = vperm.slane %v1653_v53, 0  ;;  %v1658_v56 = vperm.slane %v1654_v33, 0  ;;  %v1659_v57 = vperm.slane %v1655_v55, 0 }
 0x521   : >> { %1662 = vrot.lane.b32.xlu2 %v1657_v54, %s2513_s26 }
 0x527   : >> { %1664 = vrot.lane.b32.xlu1 %v1658_v56, %s2513_s26 }
 0x529   : >> { %1666 = vrot.lane.b32.xlu2 %v1659_v57, %s2513_s26 }
 0x57b   : >> { %v1663_v58 = vpop.permute.xlu2 %1662 }
 0x57c   : >> { %2345 = vst.msk [vmem:[%s2114_s14 + $0x9] sm:$0x1] %vm1317_vm14, %v1663_v58 }
 0x583   : >> { %v1667_v59 = vpop.permute.xlu2 %1666 }
 0x584   : >> { %2347 = vst.msk [vmem:[%s2114_s14 + $0x19] sm:$0x1] %vm1317_vm14, %v1667_v59 }
 0x591   : >> { %v1661_v60 = vpop.permute.xlu1 %1660 }
 0x592   : >> { %2344 = vst.msk [vmem:[%s2114_s14 + $0x1] sm:$0x1] %vm1317_vm14, %v1661_v60 }
 0x596   : > { %1328 = sbr.rel (!%p1326_p7) target bundleno = 1027 (0x403), region = 208 }
 0x599   : >> { %v1665_v61 = vpop.permute.xlu1 %1664 }
 0x59a   : >> { %2346 = vst.msk [vmem:[%s2114_s14 + $0x11] sm:$0x1] %vm1317_vm14, %v1665_v61 }
 0x59b LB: >> { %s1689_s10 = scalar_lea.vmem [#allocation3], %s2502_s19  ;;  %s2514_s20 = smov 127   ;;  %v2349_v29 = vld [vmem:[%s3020_s4 + $0x48] sm:$0xf]  ;;  %v2358_v30 = vld [vmem:[%s3020_s4 + $0x54] sm:$0xf]  ;;  %s2502_s19 = sphi %s2946_s19, %s1686_s19  }
 0x59c   : >> { %s2515_s21 = smov 126   ;;  %v2516_v31 = vmov 0   ;;  %v2365_v34 = vld [vmem:[%s3020_s4 + $0x58] sm:$0xf]  ;;  %v2355_v37 = vld [vmem:[%s3020_s4 + $0x50] sm:$0xf] }
 0x59d   : >> { %2455 = vset.pattern.permute.xlu0 %v2516_v31  ;;  %v2378_v39 = vld [vmem:[%s3020_s4 + $0x64] sm:$0xf]  ;;  %v2381_v40 = vld [vmem:[%s3020_s4 + $0x68] sm:$0xf]  ;;  %v2371_v42 = vld [vmem:[%s3020_s4 + $0x60] sm:$0xf] }
 0x59e   : >> { %v2352_v44 = vld [vmem:[%s3020_s4 + $0x4c] sm:$0xf]  ;;  %v2368_v45 = vld [vmem:[%s3020_s4 + $0x5c] sm:$0xf]  ;;  %vm2012_vm15 = vcmask 1042432   ;;  %vm2008_vm3 = vcmask 23552  }
 0x59f   : >> { %vm2038_vm6 = vcmask 257024  }
 0x5a1   : >> { %v2359_v1 = vld [vmem:[%s1689_s10 + $0x1] sm:$0x1]  ;;  %v2360_v48 = vld [vmem:[%s1689_s10 + $0x9] sm:$0x1]  ;;  %v2361_v2 = vld [vmem:[%s1689_s10 + $0x11] sm:$0x1] }
 0x5a2   : >> { %v2362_v3 = vld [vmem:[%s1689_s10 + $0x19] sm:$0x1]  ;;  %v1812_v4 = vrot.slane %v2360_v48, 7  ;;  %v1814_v5 = vrot.slane %v2361_v2, 6  ;;  %v1690_v6 = vld [vmem:[%s1689_s10] sm:$0x1] }
 0x5a3   : >> { %v1816_v7 = vrot.slane %v2362_v3, 5  ;;  %v1691_v8 = vld [vmem:[%s1689_s10 + $0x8] sm:$0x1]  ;;  %v1692_v9 = vld [vmem:[%s1689_s10 + $0x10] sm:$0x1] }
 0x5a4   : >> { %v1813_v10 = vsel %vm301_vm0, %v1812_v4, %v2359_v1  ;;  %v1693_v11 = vld [vmem:[%s1689_s10 + $0x18] sm:$0x1]  ;;  %v1698_v12 = vrot.slane %v1691_v8, 7  ;;  %v1701_v13 = vrot.slane %v1692_v9, 6  ;;  %v2372_v14 = vld [vmem:[%s1689_s10 + $0x2] sm:$0x1] }
 0x5a5   : >> { %v1815_v15 = vsel %vm304_vm1, %v1814_v5, %v1813_v10  ;;  %v1704_v16 = vrot.slane %v1693_v11, 5  ;;  %v2373_v17 = vld [vmem:[%s1689_s10 + $0xa] sm:$0x1]  ;;  %v2374_v18 = vld [vmem:[%s1689_s10 + $0x12] sm:$0x1] }
 0x5a6   : >> { %v1817_v19 = vsel %vm307_vm2, %v1816_v7, %v1815_v15  ;;  %v1700_v20 = vsel %vm301_vm0, %v1698_v12, %v1690_v6  ;;  %v2375_v21 = vld [vmem:[%s1689_s10 + $0x1a] sm:$0x1]  ;;  %v1916_v0 = vrot.slane %v2373_v17, 7  ;;  %v1918_v22 = vrot.slane %v2374_v18, 6 }
 0x5a7   : >> { %1846 = vrot.lane.b32.xlu1 %v1817_v19, %s2514_s20  ;;  %v1703_v23 = vsel %vm304_vm1, %v1701_v13, %v1700_v20  ;;  %1876 = vrot.lane.b32.xlu2 %v1817_v19, %s2515_s21  ;;  %v1920_v26 = vrot.slane %v2375_v21, 5 }
 0x5a8   : >> { %v1706_v24 = vsel %vm307_vm2, %v1704_v16, %v1703_v23  ;;  %v1917_v25 = vsel %vm301_vm0, %v1916_v0, %v2372_v14  ;;  %2363 = vmatpush.msk.msra.mxu3 %vm364_vm4, %v1817_v19 }
 0x5a9   : >> { %1772 = vrot.lane.b32.xlu0 %v1706_v24, %s2515_s21  ;;  %v1919_v27 = vsel %vm304_vm1, %v1918_v22, %v1917_v25  ;;  %2350 = vmatpush.msk.msra.mxu0 %vm364_vm4, %v1706_v24 }
 0x5aa   : >> { %v1921_v28 = vsel %vm307_vm2, %v1920_v26, %v1919_v27  ;;  %2351 = vmatmul.msk.f32.vlgmr.msra.gmra.mxu0 %vm360_vm5, %v2349_v29  ;;  %2364 = vmatmul.msk.f32.vlgmr.msra.gmra.mxu3 %vm360_vm5, %v2358_v30 }
 0x5af   : >> { %1950 = vrot.lane.b32.xlu1 %v1921_v28, %s2514_s20  ;;  %1980 = vrot.lane.b32.xlu2 %v1921_v28, %s2515_s21 }
 0x5b1   : >> { %1742 = vrot.lane.b32.xlu0 %v1706_v24, %s2514_s20  ;;  %s2386_s20 = sshll.u32 %s2502_s19, 2  ;;  %s1686_s19 = sadd.s32 1, %s2502_s19  }
 0x5b2   : >> { %s2037_s21 = scalar_lea.vmem %s2578_s12, %s2386_s20  ;;  %p1683_p8 = scmp.ge.s32.totalorder %s1686_s19, 3  }
 0x5b9   : >> { %1736 = vperm.xlu0 %2455, %v2944_v63  }
 0x601   : >> { %v1877_v32 = vpop.permute.xlu2 %1876 }
 0x609   : >> { %v1981_v36 = vpop.permute.xlu2 %1980 }
 0x619   : >> { %v1847_v35 = vpop.permute.xlu1 %1846 }
 0x61a   : >> { %2366 = vmatpush.msk.msrb.mxu0 %vm364_vm4, %v1847_v35 }
 0x61b   : >> { %v1773_v38 = vpop.permute.xlu0 %1772  ;;  %2367 = vmatmul.msk.f32.vlgmr.msrb.gmra.mxu0 %vm360_vm5, %v2365_v34 }
 0x61c   : >> { %2356 = vmatpush.msk.msra.mxu2 %vm364_vm4, %v1773_v38  ;;  %2382 = vmatpush.msk.msra.mxu0 %vm364_vm4, %v1981_v36 }
 0x61d   : >> { %2357 = vmatmul.msk.f32.vlgmr.msra.gmra.mxu2 %vm360_vm5, %v2355_v37 }
 0x61e   : >> { %2376 = vmatpush.msk.msrb.mxu2 %vm364_vm4, %v1921_v28 }
 0x621   : >> { %v1951_v41 = vpop.permute.xlu1 %1950 }
 0x622   : >> { %2379 = vmatpush.msk.msrb.mxu3 %vm364_vm4, %v1951_v41 }
 0x623   : >> { %v1743_v43 = vpop.permute.xlu0 %1742  ;;  %2380 = vmatmul.msk.f32.vlgmr.msrb.gmra.mxu3 %vm360_vm5, %v2378_v39  ;;  %2383 = vmatmul.msk.f32.vlgmr.msra.gmra.mxu0 %vm360_vm5, %v2381_v40 }
 0x624   : >> { %2353 = vmatpush.msk.msra.mxu1 %vm364_vm4, %v1743_v43 }
 0x625   : >> { %2377 = vmatmul.msk.f32.vlgmr.msrb.gmra.mxu2 %vm360_vm5, %v2371_v42  ;;  %2354 = vmatmul.msk.f32.vlgmr.msra.gmra.mxu1 %vm360_vm5, %v2352_v44 }
 0x626   : >> { %2369 = vmatpush.msk.msrb.mxu1 %vm364_vm4, %v1877_v32 }
 0x627   : >> { %v1731_v46 = vpop.f32.mrf.mxu0 }
 0x628   : >> { %2384 = vmatpush.msk.msra.mxu1 %vm2012_vm15, %v2939_v62 }
 0x62b   : >> { %v1737_v47 = vpop.permute.xlu0 %1736 }
 0x62c   : >> { %v1739_v49 = vadd.f32 %v1737_v47, %v1731_v46 }
 0x62d   : >> { %2370 = vmatmul.msk.f32.vlgmr.msrb.gmra.mxu1 %vm360_vm5, %v2368_v45  ;;  %v1840_v52 = vpop.f32.mrf.mxu3 }
 0x698   : >> { %v1870_v54 = vpop.f32.mrf.mxu0 }
 0x6a0   : >> { %v1796_v50 = vpop.f32.mrf.mxu2  ;;  %v2004_v1 = vpop.f32.mrf.mxu0 }
 0x6a2   : >> { %v1766_v51 = vpop.f32.mrf.mxu1 }
 0x6a3   : >> { %v1769_v53 = vadd.f32 %v1766_v51, %v1739_v49 }
 0x6a5   : >> { %v1799_v33 = vadd.f32 %v1796_v50, %v1769_v53 }
 0x6a6   : >> { %v1974_v60 = vpop.f32.mrf.mxu3 }
 0x6a7   : >> { %v1843_v55 = vadd.f32 %v1840_v52, %v1799_v33 }
 0x6a8   : >> { %v1944_v58 = vpop.f32.mrf.mxu2 }
 0x6a9   : >> { %v1873_v56 = vadd.f32 %v1870_v54, %v1843_v55 }
 0x6aa   : >> { %v1900_v57 = vpop.f32.mrf.mxu1 }
 0x6ab   : >> { %v1903_v59 = vadd.f32 %v1900_v57, %v1873_v56 }
 0x6ad   : >> { %v1947_v61 = vadd.f32 %v1944_v58, %v1903_v59 }
 0x6af   : >> { %v1977_v48 = vadd.f32 %v1974_v60, %v1947_v61 }
 0x6b1   : >> { %v2007_v2 = vadd.f32 %v2004_v1, %v1977_v48 }
 0x6b3   : >> { %2385 = vmatmul.msk.f32.vlgmr.msra.gmra.mxu1 %vm2008_vm3, %v2007_v2 }
 0x72d   : > { %1685 = sbr.rel (!%p1683_p8) target bundleno = 1435 (0x59b), region = 219 }
 0x730   : >> { %v2033_v3 = vpop.f32.mrf.mxu1 }
 0x731   : >> { %2039 = vst.msk [vmem:[%s2037_s21] sm:$0xf] %vm2038_vm6, %v2033_v3 }
 0x732 PF: > { %s17_s24 = sadd.s32 1, %s2482_s24  }
 0x733   : > { %p14_p9 = scmp.ge.s32.totalorder %s17_s24, 4  }
 0x735   :  { %16 = sbr.rel (!%p14_p9) target bundleno = 1 (0x1), region = 230 }

// kernel: esa_forward.5
= control target key start
LH: loop header
LB: loop body
LE: loop exit
PB: predicated region body
PF: predicated region fallthrough
CT: control target
= control target key end

     0   :  { %s2726_s27 = smov 0   ;;  %s2728_s28 = smov 0   ;;  %s3757_s0 = inlined_call_operand.vmem [shape: f32[32,3], index: 0, kind: input, shape index: {}]   ;;  %s3758_s1 = inlined_call_operand.vmem [shape: f32[2,3,4,32], index: 1, kind: input, shape index: {}]   ;;  %s3759_s2 = inlined_call_operand.vmem [shape: f32[2,16,1024], index: 2, kind: input, shape index: {}]   ;;  %s3760_s3 = inlined_call_operand.vmem [shape: f32[2,4,1024], index: 3, kind: input, shape index: {}]   ;;  %s3761_s4 = inlined_call_operand.vmem [shape: f32[4,4], index: 4, kind: input, shape index: {}]   ;;  %s3762_s5 = inlined_call_operand.vmem [shape: f32[4,1], index: 5, kind: input, shape index: {}]   ;;  %s3763_s6 = inlined_call_operand.vmem [shape: f32[16,4], index: 6, kind: input, shape index: {}]   ;;  %s3764_s7 = inlined_call_operand.vmem [shape: f32[16,1], index: 7, kind: input, shape index: {}]   ;;  %s3765_s8 = inlined_call_operand.vmem [shape: f32[2,16,1024], index: 8, kind: output, shape index: {}]  }
   0x1   :  { %3772 = sst [smem:[#allocation3_spill]] %s3757_s0  ;;  %s2730_s29 = smov 0  }
   0x2   :  { %3773 = sst [smem:[#allocation4_spill]] %s3758_s1 }
   0x3   :  { %3774 = sst [smem:[#allocation5_spill]] %s3760_s3 }
   0x4   :  { %3775 = sst [smem:[#allocation6_spill]] %s3761_s4 }
   0x5   :  { %3776 = sst [smem:[#allocation7_spill]] %s3762_s5 }
   0x6 LB: > { %s30_s30 = sadd.s32 1, %s2669_s28  ;;  %p2228_p0 = scmp.ge.s32.totalorder %s2673_s29, 1  ;;  %s2673_s29 = sphi %s2730_s29, %s18_s29   ;;  %s2669_s28 = sphi %s2728_s28, %s3820_s28   ;;  %s2665_s27 = sphi %s2726_s27, %s3819_s27  }
   0x7   : > { %p32_p1 = scmp.ge.s32.totalorder %s30_s30, 2  ;;  %p321_p2 = scmp.lt.s32.totalorder %s2673_s29, 3 }
   0x9   : > { %s3822_s30 = smov (%p32_p1, %s30_s30), 0  ;;  %p322_p3 = pnand %p2228_p0, %p321_p2 }
   0xa   : > { %s3777_s0 = sld [smem:[#allocation3_spill]] (!%p322_p3)  ;;  %s2675_s13 = smov (!%p322_p3), 127  }
   0xb   : > { %325 = sbr.rel (%p322_p3) target bundleno = 676 (0x2a4), region = 52  ;;  %s2676_s16 = smov (!%p322_p3), 126  }
   0xc   : > { %p388_p4 = scmp.lt.s32.totalorder (!%p322_p3), %s2665_s27, 1  ;;  %s3778_s1 = sld [smem:[#allocation4_spill]] (!%p322_p3) }
   0xd   : > { %s3779_s3 = sld [smem:[#allocation5_spill]] (!%p322_p3) }
   0xe   : > { %s3780_s4 = sld [smem:[#allocation6_spill]] (!%p322_p3) }
   0xf   : > { %s3783_s5 = sld [smem:[#allocation7_spill]] (!%p322_p3) }
  0x10   : > { %v2749_v0 = vld [vmem:[%s3777_s0 + $0x1] sm:$0x1]  ;;  %v423_v1 = vld [vmem:[%s3777_s0] sm:$0x1]  ;;  %v2760_v2 = vld [vmem:[%s3777_s0 + $0x2] sm:$0x1] }
  0x11   : > { %455 = vrot.lane.b32.xlu1 %v2749_v0, %s2675_s13  ;;  %429 = vrot.lane.b32.xlu0 %v423_v1, %s2675_s13  ;;  %2362 = vpush %v423_v1  ;;  %v2772_v3 = vld [vmem:[%s3777_s0 + $0x3] sm:$0x1]  ;;  %v2781_v4 = vld [vmem:[%s3777_s0 + $0x4] sm:$0x1]  ;;  %s3824_s27 = smov (!%p388_p4, %s2665_s27), 1  ;;  %vm447_vm0 = vcmask 257024  }
  0x12   : > { %483 = vrot.lane.b32.xlu2 %v2760_v2, %s2675_s13  ;;  %v2788_v5 = vld [vmem:[%s3777_s0 + $0x5] sm:$0x1]  ;;  %v2799_v6 = vld [vmem:[%s3777_s0 + $0x6] sm:$0x1]  ;;  %v2808_v7 = vld [vmem:[%s3777_s0 + $0x7] sm:$0x1] }
  0x13   : > { %v2815_v8 = vld [vmem:[%s3777_s0 + $0x8] sm:$0x1]  ;;  %v2826_v9 = vld [vmem:[%s3777_s0 + $0x9] sm:$0x1]  ;;  %v2835_v10 = vld [vmem:[%s3777_s0 + $0xa] sm:$0x1] }
  0x14   : > { %v2842_v11 = vld [vmem:[%s3777_s0 + $0xb] sm:$0x1]  ;;  %v2853_v12 = vld [vmem:[%s3777_s0 + $0xc] sm:$0x1]  ;;  %v2862_v13 = vld [vmem:[%s3777_s0 + $0xd] sm:$0x1] }
  0x15   : > { %v2869_v14 = vld [vmem:[%s3777_s0 + $0xe] sm:$0x1]  ;;  %v2880_v15 = vld [vmem:[%s3777_s0 + $0xf] sm:$0x1]  ;;  %v2889_v16 = vld [vmem:[%s3777_s0 + $0x10] sm:$0x1] }
  0x16   : > { %v2896_v17 = vld [vmem:[%s3777_s0 + $0x11] sm:$0x1]  ;;  %v2907_v19 = vld [vmem:[%s3777_s0 + $0x12] sm:$0x1]  ;;  %v2916_v20 = vld [vmem:[%s3777_s0 + $0x13] sm:$0x1] }
  0x17   : > { %v2923_v22 = vld [vmem:[%s3777_s0 + $0x14] sm:$0x1]  ;;  %v2934_v24 = vld [vmem:[%s3777_s0 + $0x15] sm:$0x1]  ;;  %v2943_v25 = vld [vmem:[%s3777_s0 + $0x16] sm:$0x1] }
  0x18   : > { %v2950_v29 = vld [vmem:[%s3777_s0 + $0x17] sm:$0x1]  ;;  %v2962_v33 = vld [vmem:[%s3777_s0 + $0x18] sm:$0x1]  ;;  %v2972_v34 = vld [vmem:[%s3777_s0 + $0x19] sm:$0x1] }
  0x19   : > { %463 = vrot.lane.b32.xlu1 %v2749_v0, %s2676_s16  ;;  %438 = vrot.lane.b32.xlu0 %v423_v1, %s2676_s16  ;;  %v2980_v38 = vld [vmem:[%s3777_s0 + $0x1a] sm:$0x1]  ;;  %v2993_v42 = vld [vmem:[%s3777_s0 + $0x1b] sm:$0x1]  ;;  %s2361_s25 = smul.u32 12, %s3824_s27  ;;  %s2359_s12 = sshll.u32 %s3824_s27, 5 }
  0x1a   : > { %491 = vrot.lane.b32.xlu2 %v2760_v2, %s2676_s16  ;;  %v3003_v43 = vld [vmem:[%s3777_s0 + $0x1c] sm:$0x1]  ;;  %v3010_v47 = vld [vmem:[%s3777_s0 + $0x1d] sm:$0x1]  ;;  %v3027_v50 = vld [vmem:[%s3777_s0 + $0x1e] sm:$0x1] }
  0x1b   : > { %v3040_v52 = vld [vmem:[%s3777_s0 + $0x1f] sm:$0x1]  ;;  %s3047_s14 = scalar_lea.vmem %s3778_s1, %s2361_s25  ;;  %vm1295_vm1 = vcmask 1043456   ;;  %vm1291_vm2 = vcmask 31744   ;;  %vm475_vm3 = vcmask 519424   ;;  %vm503_vm4 = vcmask 781824  }
  0x1c   : > { %v425_v55 = vld [vmem:[%s3047_s14] sm:$0xf]  ;;  %v2236_v57 = vld [vmem:[%s3047_s14 + $0x4] sm:$0xf]  ;;  %vm531_vm5 = vcmask 1044224  }
  0x1d   : > { %v451_v1 = vld [vmem:[%s3047_s14] sm:$0xf] }
  0x21   : > { %519 = vrot.lane.b32.xlu1 %v2772_v3, %s2676_s16  ;;  %511 = vrot.lane.b32.xlu0 %v2772_v3, %s2675_s13 }
  0x22   : > { %539 = vrot.lane.b32.xlu2 %v2781_v4, %s2675_s13 }
  0x29   : > { %562 = vrot.lane.b32.xlu1 %v2788_v5, %s2675_s13  ;;  %547 = vrot.lane.b32.xlu0 %v2781_v4, %s2676_s16 }
  0x2a   : > { %570 = vrot.lane.b32.xlu2 %v2788_v5, %s2676_s16 }
  0x31   : > { %597 = vrot.lane.b32.xlu1 %v2799_v6, %s2676_s16  ;;  %589 = vrot.lane.b32.xlu0 %v2799_v6, %s2675_s13 }
  0x32   : > { %616 = vrot.lane.b32.xlu2 %v2808_v7, %s2675_s13 }
  0x39   : > { %643 = vrot.lane.b32.xlu1 %v2815_v8, %s2675_s13  ;;  %624 = vrot.lane.b32.xlu0 %v2808_v7, %s2676_s16 }
  0x3a   : > { %651 = vrot.lane.b32.xlu2 %v2815_v8, %s2676_s16 }
  0x41   : > { %674 = vrot.lane.b32.xlu1 %v2826_v9, %s2676_s16  ;;  %666 = vrot.lane.b32.xlu0 %v2826_v9, %s2675_s13 }
  0x42   : > { %693 = vrot.lane.b32.xlu2 %v2835_v10, %s2675_s13  ;;  %s2363_s10 = spop %2362 }
  0x43   : > { %v426_v56 = vstv %s2363_s10 }
  0x44   : > { %v427_v60 = vmul.f32 %v426_v56, %v425_v55  ;;  %v535_v55 = vld [vmem:[%s3047_s14] sm:$0xf] }
  0x49   : > { %720 = vrot.lane.b32.xlu1 %v2842_v11, %s2675_s13  ;;  %701 = vrot.lane.b32.xlu0 %v2835_v10, %s2676_s16 }
  0x4a   : > { %728 = vrot.lane.b32.xlu2 %v2842_v11, %s2676_s16 }
  0x51   : > { %755 = vrot.lane.b32.xlu1 %v2853_v12, %s2676_s16  ;;  %747 = vrot.lane.b32.xlu0 %v2853_v12, %s2675_s13 }
  0x52   : > { %770 = vrot.lane.b32.xlu2 %v2862_v13, %s2675_s13 }
  0x59   : > { %797 = vrot.lane.b32.xlu1 %v2869_v14, %s2675_s13  ;;  %778 = vrot.lane.b32.xlu0 %v2862_v13, %s2676_s16 }
  0x5a   : > { %805 = vrot.lane.b32.xlu2 %v2869_v14, %s2676_s16 }
  0x61   : > { %832 = vrot.lane.b32.xlu1 %v2880_v15, %s2676_s16  ;;  %824 = vrot.lane.b32.xlu0 %v2880_v15, %s2675_s13 }
  0x62   : > { %851 = vrot.lane.b32.xlu2 %v2889_v16, %s2675_s13 }
  0x69   : > { %874 = vrot.lane.b32.xlu1 %v2896_v17, %s2675_s13  ;;  %859 = vrot.lane.b32.xlu0 %v2889_v16, %s2676_s16 }
  0x6a   : > { %882 = vrot.lane.b32.xlu2 %v2896_v17, %s2676_s16 }
  0x6c   : > { %v484_v18 = vpop.permute.xlu2 %483 }
  0x71   : > { %909 = vrot.lane.b32.xlu1 %v2907_v19, %s2676_s16  ;;  %901 = vrot.lane.b32.xlu0 %v2907_v19, %s2675_s13 }
  0x72   : > { %928 = vrot.lane.b32.xlu2 %v2916_v20, %s2675_s13 }
  0x74   : > { %v492_v21 = vpop.permute.xlu2 %491 }
  0x79   : > { %955 = vrot.lane.b32.xlu1 %v2923_v22, %s2675_s13  ;;  %936 = vrot.lane.b32.xlu0 %v2916_v20, %s2676_s16 }
  0x7a   : > { %963 = vrot.lane.b32.xlu2 %v2923_v22, %s2676_s16 }
  0x7c   : > { %v540_v23 = vpop.permute.xlu2 %539 }
  0x81   : > { %986 = vrot.lane.b32.xlu1 %v2934_v24, %s2676_s16  ;;  %978 = vrot.lane.b32.xlu0 %v2934_v24, %s2675_s13 }
  0x82   : > { %1005 = vrot.lane.b32.xlu2 %v2943_v25, %s2675_s13 }
  0x83   : > { %v456_v26 = vpop.permute.xlu1 %455  ;;  %v430_v27 = vpop.permute.xlu0 %429 }
  0x84   : > { %2364 = vpush %v430_v27  ;;  %v571_v28 = vpop.permute.xlu2 %570 }
  0x89   : > { %1032 = vrot.lane.b32.xlu1 %v2950_v29, %s2675_s13  ;;  %1013 = vrot.lane.b32.xlu0 %v2943_v25, %s2676_s16 }
  0x8a   : > { %1040 = vrot.lane.b32.xlu2 %v2950_v29, %s2676_s16 }
  0x8b   : > { %v464_v30 = vpop.permute.xlu1 %463  ;;  %v439_v31 = vpop.permute.xlu0 %438 }
  0x8c   : > { %2366 = vpush %v439_v31  ;;  %v617_v32 = vpop.permute.xlu2 %616 }
  0x8d   : > { %2368 = vpush %v2749_v0  ;;  %v2237_v0 = vld [vmem:[%s3047_s14 + $0x8] sm:$0xf] }
  0x8e   : > { %2370 = vpush %v456_v26 }
  0x8f   : > { %2372 = vpush %v464_v30 }
  0x90   : > { %2374 = vpush %v2760_v2 }
  0x91   : > { %2376 = vpush %v484_v18  ;;  %1067 = vrot.lane.b32.xlu1 %v2962_v33, %s2676_s16  ;;  %1059 = vrot.lane.b32.xlu0 %v2962_v33, %s2675_s13 }
  0x92   : > { %2378 = vpush %v492_v21  ;;  %1082 = vrot.lane.b32.xlu2 %v2972_v34, %s2675_s13 }
  0x93   : > { %v520_v35 = vpop.permute.xlu1 %519  ;;  %v512_v36 = vpop.permute.xlu0 %511  ;;  %2380 = vpush %v2772_v3  ;;  %v2238_v3 = vld [vmem:[%s3047_s14 + $0x4] sm:$0xf] }
  0x94   : > { %2382 = vpush %v512_v36  ;;  %v652_v37 = vpop.permute.xlu2 %651 }
  0x95   : > { %2384 = vpush %v520_v35 }
  0x96   : > { %2386 = vpush %v2781_v4 }
  0x97   : > { %2388 = vpush %v540_v23  ;;  %v2240_v23 = vld [vmem:[%s3047_s14 + $0x4] sm:$0xf] }
  0x99   : > { %1109 = vrot.lane.b32.xlu1 %v2980_v38, %s2675_s13  ;;  %1090 = vrot.lane.b32.xlu0 %v2972_v34, %s2676_s16 }
  0x9a   : > { %1117 = vrot.lane.b32.xlu2 %v2980_v38, %s2676_s16 }
  0x9b   : > { %v563_v39 = vpop.permute.xlu1 %562  ;;  %v548_v40 = vpop.permute.xlu0 %547 }
  0x9c   : > { %2390 = vpush %v548_v40  ;;  %v694_v41 = vpop.permute.xlu2 %693 }
  0x9d   : > { %2392 = vpush %v2788_v5 }
  0x9e   : > { %2394 = vpush %v563_v39 }
  0x9f   : > { %2396 = vpush %v571_v28  ;;  %v2241_v28 = vld [vmem:[%s3047_s14 + $0x8] sm:$0xf] }
  0xa0   : > { %2398 = vpush %v2799_v6 }
  0xa1   : > { %1144 = vrot.lane.b32.xlu1 %v2993_v42, %s2676_s16  ;;  %1136 = vrot.lane.b32.xlu0 %v2993_v42, %s2675_s13 }
  0xa2   : > { %1163 = vrot.lane.b32.xlu2 %v3003_v43, %s2675_s13 }
  0xa3   : > { %v598_v44 = vpop.permute.xlu1 %597  ;;  %v590_v45 = vpop.permute.xlu0 %589 }
  0xa4   : > { %2400 = vpush %v590_v45  ;;  %v729_v46 = vpop.permute.xlu2 %728 }
  0xa5   : > { %2402 = vpush %v598_v44 }
  0xa6   : > { %2404 = vpush %v2808_v7  ;;  %v2239_v7 = vld [vmem:[%s3047_s14 + $0x8] sm:$0xf] }
  0xa7   : > { %2406 = vpush %v617_v32 }
  0xa9   : > { %1186 = vrot.lane.b32.xlu1 %v3010_v47, %s2675_s13  ;;  %1171 = vrot.lane.b32.xlu0 %v3003_v43, %s2676_s16 }
  0xaa   : > { %1194 = vrot.lane.b32.xlu2 %v3010_v47, %s2676_s16 }
  0xab   : > { %v644_v48 = vpop.permute.xlu1 %643  ;;  %v625_v49 = vpop.permute.xlu0 %624 }
  0xac   : > { %2408 = vpush %v625_v49  ;;  %v3029_v51 = vpop.permute.xlu2 %770 }
  0xad   : > { %2410 = vpush %v2815_v8 }
  0xae   : > { %2412 = vpush %v644_v48  ;;  %v2243_v48 = vld [vmem:[%s3047_s14 + $0x8] sm:$0xf] }
  0xaf   : > { %2414 = vpush %v652_v37  ;;  %v507_v37 = vld [vmem:[%s3047_s14] sm:$0xf] }
  0xb0   : > { %2416 = vpush %v2826_v9 }
  0xb1   : > { %1213 = vrot.lane.b32.xlu0 %v3027_v50, %s2675_s13  ;;  %1221 = vrot.lane.b32.xlu1 %v3027_v50, %s2676_s16 }
  0xb2   : > { %1240 = vrot.lane.b32.xlu2 %v3040_v52, %s2675_s13 }
  0xb3   : > { %v675_v53 = vpop.permute.xlu1 %674  ;;  %v667_v54 = vpop.permute.xlu0 %666 }
  0xb4   : > { %2418 = vpush %v667_v54  ;;  %v3052_v59 = vpop.permute.xlu2 %805 }
  0xb5   : > { %s2365_s15 = spop %2364  ;;  %2420 = vpush %v675_v53 }
  0xb6   : > { %2422 = vpush %v2835_v10  ;;  %v435_v58 = vstv %s2365_s15  ;;  %v479_v10 = vld [vmem:[%s3047_s14] sm:$0xf] }
  0xb7   : > { %2424 = vpush %v694_v41  ;;  %v436_v61 = vmul.f32 %v2236_v57, %v435_v58  ;;  %v2242_v41 = vld [vmem:[%s3047_s14 + $0x4] sm:$0xf] }
  0xb8   : > { %v2244_v58 = vld [vmem:[%s3047_s14 + $0x4] sm:$0xf] }
  0xb9   : > { %1248 = vrot.lane.b32.xlu0 %v3040_v52, %s2676_s16  ;;  %v437_v4 = vadd.f32 %v436_v61, %v427_v60 }
  0xbb   : > { %v721_v62 = vpop.permute.xlu1 %720  ;;  %v702_v63 = vpop.permute.xlu0 %701 }
  0xbc   : > { %2426 = vpush %v702_v63  ;;  %v3065_v30 = vpop.permute.xlu2 %851 }
  0xbd   : > { %s2367_s13 = spop %2366  ;;  %2428 = vpush %v2842_v11 }
  0xbe   : > { %v444_v2 = vstv %s2367_s13  ;;  %s2369_s17 = spop %2368  ;;  %2430 = vpush %v721_v62 }
  0xbf   : > { %v445_v5 = vmul.f32 %v2237_v0, %v444_v2  ;;  %v452_v6 = vstv %s2369_s17  ;;  %s2371_s16 = spop %2370  ;;  %2432 = vpush %v729_v46 }
  0xc0   : > { %v453_v8 = vmul.f32 %v452_v6, %v451_v1  ;;  %v460_v9 = vstv %s2371_s16  ;;  %s2373_s18 = spop %2372  ;;  %2434 = vpush %v2853_v12 }
  0xc1   : > { %v446_v11 = vadd.f32 %v445_v5, %v437_v4  ;;  %v461_v18 = vmul.f32 %v2238_v3, %v460_v9  ;;  %v468_v21 = vstv %s2373_s18  ;;  %s2375_s19 = spop %2374  ;;  %v2245_v5 = vld [vmem:[%s3047_s14 + $0x8] sm:$0xf]  ;;  %s3100_s18 = scalar_lea.vmem %s3779_s3, %s2359_s12 }
  0xc2   : > { %v469_v26 = vmul.f32 %v2239_v7, %v468_v21  ;;  %v480_v27 = vstv %s2375_s19  ;;  %s2377_s20 = spop %2376  ;;  %v2252_v21 = vld [vmem:[%s3047_s14 + $0x4] sm:$0xf]  ;;  %s3766_s12 = smov 32  }
  0xc3   : > { %v462_v31 = vadd.f32 %v461_v18, %v453_v8  ;;  %v481_v32 = vmul.f32 %v480_v27, %v479_v10  ;;  %v488_v35 = vstv %s2377_s20  ;;  %s2379_s21 = spop %2378  ;;  %v756_v12 = vpop.permute.xlu1 %755  ;;  %v748_v36 = vpop.permute.xlu0 %747  ;;  %448 = vst.msk [vmem:[#allocation2] sm:$0xf] %vm447_vm0, %v446_v11  ;;  %v639_v18 = vld [vmem:[%s3047_s14] sm:$0xf] }
  0xc4   : > { %v489_v39 = vmul.f32 %v2240_v23, %v488_v35  ;;  %v496_v40 = vstv %s2379_s21  ;;  %2436 = vpush %v748_v36  ;;  %s2381_s22 = spop %2380  ;;  %v883_v6 = vpop.permute.xlu2 %882  ;;  %v662_v35 = vld [vmem:[%s3047_s14] sm:$0xf] }
  0xc5   : > { %v3070_v44 = vadd.f32 %v469_v26, %v462_v31  ;;  %v497_v45 = vmul.f32 %v2241_v28, %v496_v40  ;;  %v508_v46 = vstv %s2381_s22  ;;  %s2383_s23 = spop %2382  ;;  %2438 = vpush %v756_v12  ;;  %v2253_v26 = vld [vmem:[%s3047_s14 + $0x8] sm:$0xf] }
  0xc6   : > { %v490_v49 = vadd.f32 %v489_v39, %v481_v32  ;;  %v509_v53 = vmul.f32 %v508_v46, %v507_v37  ;;  %v516_v54 = vstv %s2383_s23  ;;  %s2385_s24 = spop %2384  ;;  %2440 = vpush %v2862_v13 }
  0xc7   : > { %v517_v56 = vmul.f32 %v2242_v41, %v516_v54  ;;  %v524_v57 = vstv %s2385_s24  ;;  %2442 = vpush %v3029_v51  ;;  %s2387_s25 = spop %2386  ;;  %v2254_v41 = vld [vmem:[%s3047_s14 + $0x4] sm:$0xf]  ;;  %v689_v54 = vld [vmem:[%s3047_s14] sm:$0xf] }
  0xc8   : > { %v3077_v60 = vadd.f32 %v497_v45, %v490_v49  ;;  %v525_v61 = vmul.f32 %v2243_v48, %v524_v57  ;;  %v536_v62 = vstv %s2387_s25  ;;  %s2389_s26 = spop %2388  ;;  %v2255_v49 = vld [vmem:[%s3047_s14 + $0x8] sm:$0xf]  ;;  %v2256_v57 = vld [vmem:[%s3047_s14 + $0x4] sm:$0xf] }
  0xc9   : > { %v518_v63 = vadd.f32 %v517_v56, %v509_v53  ;;  %v537_v0 = vmul.f32 %v536_v62, %v535_v55  ;;  %v544_v1 = vstv %s2389_s26 }
  0xca   : > { %v545_v2 = vmul.f32 %v2244_v58, %v544_v1 }
  0xcb   : > { %v3079_v3 = vadd.f32 %v525_v61, %v518_v63  ;;  %v798_v13 = vpop.permute.xlu1 %797  ;;  %v779_v4 = vpop.permute.xlu0 %778 }
  0xcc   : > { %2444 = vpush %v779_v4  ;;  %v546_v51 = vadd.f32 %v545_v2, %v537_v0 }
  0xcd   : > { %2446 = vpush %v2869_v14  ;;  %s2391_s9 = spop %2390  ;;  %v929_v14 = vpop.permute.xlu2 %928 }
  0xce   : > { %2448 = vpush %v798_v13  ;;  %v552_v7 = vstv %s2391_s9  ;;  %s3085_s10 = spop %2392 }
  0xcf   : > { %v553_v8 = vmul.f32 %v2245_v5, %v552_v7  ;;  %2450 = vpush %v3052_v59  ;;  %s3088_s11 = spop %2394  ;;  %v2257_v5 = vld [vmem:[%s3047_s14 + $0x8] sm:$0xf] }
  0xd0   : > { %2452 = vpush %v2880_v15  ;;  %s3091_s15 = spop %2396  ;;  %v1263_v15 = vld [vmem:[%s3100_s18 + $0x8] sm:$0xff] }
  0xd1   : > { %v554_v9 = vadd.f32 %v553_v8, %v546_v51  ;;  %s3093_s13 = spop %2398  ;;  %1278 = vst [vmem:[#allocation1 + $0x10] ss:$2 sm:$0xff] %v1263_v15  ;;  %v2678_v51 = vmov 0  }
  0xd2   : > { %2586 = vset.pattern.permute.xlu0 %v2678_v51  ;;  %2584 = vset.pattern.permute.xlu1 %v2678_v51 }
  0xd3   : > { %v833_v10 = vpop.permute.xlu1 %832  ;;  %v825_v11 = vpop.permute.xlu0 %824  ;;  %555 = vst.msk [vmem:[#allocation2 + $0x4] sm:$0xf] %vm447_vm0, %v554_v9  ;;  %2585 = vset.pattern.permute.xlu2 %v2678_v51  ;;  %v1262_v9 = vld [vmem:[%s3100_s18] sm:$0xff] }
  0xd4   : > { %2454 = vpush %v825_v11  ;;  %v820_v51 = vld [vmem:[%s3047_s14] sm:$0xf] }
  0xd5   : > { %2456 = vpush %v833_v10  ;;  %s3102_s19 = spop %2400  ;;  %v743_v10 = vld [vmem:[%s3047_s14] sm:$0xf] }
  0xd6   : > { %2458 = vpush %v2889_v16  ;;  %s3104_s20 = spop %2402 }
  0xd7   : > { %2460 = vpush %v3065_v30  ;;  %s3106_s21 = spop %2404  ;;  %v964_v30 = vpop.permute.xlu2 %963 }
  0xd8   : > { %s3109_s22 = spop %2406  ;;  %v1286_v36 = vld.sshfl [vmem:[#allocation1 + $0x18] sm:$0xff pattern:$0x75316420]  ;;  %v1285_v45 = vld.sshfl [vmem:[#allocation1 + $0x10] sm:$0xff pattern:$0x75316420] }
  0xd9   : > { %2306 = vmatpush.msk.msra.mxu3 %vm1295_vm1, %v1286_v36  ;;  %2304 = vmatpush.msk.msra.mxu2 %vm1295_vm1, %v1285_v45  ;;  %1276 = vst [vmem:[#allocation1] ss:$2 sm:$0xff] %v1262_v9 }
  0xdb   : > { %v875_v59 = vpop.permute.xlu1 %874  ;;  %v860_v16 = vpop.permute.xlu0 %859 }
  0xdc   : > { %2462 = vpush %v860_v16 }
  0xdd   : > { %s3111_s23 = spop %2408  ;;  %2464 = vpush %v2896_v17 }
  0xde   : > { %2466 = vpush %v875_v59  ;;  %s2411_s24 = spop %2410  ;;  %v2260_v59 = vld [vmem:[%s3047_s14 + $0x4] sm:$0xf] }
  0xdf   : > { %v640_v23 = vstv %s2411_s24  ;;  %s2413_s25 = spop %2412  ;;  %2468 = vpush %v883_v6 }
  0xe0   : > { %v641_v27 = vmul.f32 %v640_v23, %v639_v18  ;;  %v648_v28 = vstv %s2413_s25  ;;  %s2415_s26 = spop %2414  ;;  %2470 = vpush %v2907_v19  ;;  %v3123_v19 = vld [vmem:[%s3780_s4] sm:$0xf] }
  0xe1   : > { %v649_v31 = vmul.f32 %v2252_v21, %v648_v28  ;;  %v656_v32 = vstv %s2415_s26  ;;  %s2417_s9 = spop %2416  ;;  %2307 = vmatmul.msk.f32.vlgmr.msra.gmra.mxu3 %vm1291_vm2, %v3123_v19  ;;  %2305 = vmatmul.msk.f32.vlgmr.msra.gmra.mxu2 %vm1291_vm2, %v3123_v19  ;;  %v2261_v21 = vld [vmem:[%s3047_s14 + $0x8] sm:$0xf]  ;;  %v766_v23 = vld [vmem:[%s3047_s14] sm:$0xf]  ;;  %v2262_v28 = vld [vmem:[%s3047_s14 + $0x4] sm:$0xf] }
  0xe2   : > { %v657_v17 = vmul.f32 %v2253_v26, %v656_v32  ;;  %v663_v12 = vstv %s2417_s9  ;;  %v1283_v36 = vld.sshfl [vmem:[#allocation1] sm:$0xff pattern:$0x75316420] }
  0xe3   : > { %v650_v37 = vadd.f32 %v649_v31, %v641_v27  ;;  %v910_v39 = vpop.permute.xlu1 %909  ;;  %v902_v40 = vpop.permute.xlu0 %901  ;;  %v664_v48 = vmul.f32 %v663_v12, %v662_v35  ;;  %v1284_v12 = vld.sshfl [vmem:[#allocation1 + $0x8] sm:$0xff pattern:$0x75316420]  ;;  %2300 = vmatpush.msk.msra.mxu0 %vm1295_vm1, %v1283_v36 }
  0xe4   : > { %2472 = vpush %v902_v40  ;;  %2302 = vmatpush.msk.msra.mxu1 %vm1295_vm1, %v1284_v12  ;;  %2301 = vmatmul.msk.f32.vlgmr.msra.gmra.mxu0 %vm1291_vm2, %v3123_v19  ;;  %v2263_v40 = vld [vmem:[%s3047_s14 + $0x8] sm:$0xf] }
  0xe5   : > { %v658_v46 = vadd.f32 %v657_v17, %v650_v37  ;;  %s2419_s16 = spop %2418  ;;  %2474 = vpush %v910_v39  ;;  %2303 = vmatmul.msk.f32.vlgmr.msra.gmra.mxu1 %vm1291_vm2, %v3123_v19 }
  0xe6   : > { %v671_v53 = vstv %s2419_s16  ;;  %s2421_s24 = spop %2420  ;;  %2476 = vpush %v2916_v20  ;;  %v1006_v20 = vpop.permute.xlu2 %1005 }
  0xe7   : > { %v672_v55 = vmul.f32 %v2254_v41, %v671_v53  ;;  %v679_v56 = vstv %s2421_s24  ;;  %2478 = vpush %v929_v14  ;;  %s2423_s25 = spop %2422  ;;  %v716_v41 = vld [vmem:[%s3047_s14] sm:$0xf]  ;;  %v2258_v53 = vld [vmem:[%s3047_s14 + $0x4] sm:$0xf] }
  0xe8   : > { %v680_v58 = vmul.f32 %v2255_v49, %v679_v56  ;;  %v690_v61 = vstv %s2423_s25  ;;  %s2425_s26 = spop %2424  ;;  %659 = vst.msk [vmem:[#allocation2 + $0x8] sm:$0xf] %vm447_vm0, %v658_v46  ;;  %v793_v49 = vld [vmem:[%s3047_s14] sm:$0xf]  ;;  %v2264_v56 = vld [vmem:[%s3047_s14 + $0x4] sm:$0xf] }
  0xe9   : > { %v673_v62 = vadd.f32 %v672_v55, %v664_v48  ;;  %v691_v63 = vmul.f32 %v690_v61, %v689_v54  ;;  %v698_v0 = vstv %s2425_s26  ;;  %s3768_s26 = smov 64  }
  0xea   : > { %v699_v1 = vmul.f32 %v2256_v57, %v698_v0 }
  0xeb   : > { %v681_v2 = vadd.f32 %v680_v58, %v673_v62  ;;  %v956_v13 = vpop.permute.xlu1 %955  ;;  %v937_v4 = vpop.permute.xlu0 %936  ;;  %v2265_v62 = vld [vmem:[%s3047_s14 + $0x8] sm:$0xf] }
  0xec   : > { %2480 = vpush %v937_v4  ;;  %v700_v6 = vadd.f32 %v699_v1, %v691_v63  ;;  %v2259_v4 = vld [vmem:[%s3047_s14 + $0x8] sm:$0xf] }
  0xed   : > { %s2427_s9 = spop %2426  ;;  %683 = vrot.lane.b32.xlu1 %v681_v2, %s3766_s12  ;;  %2482 = vpush %v2923_v22 }
  0xee   : > { %v706_v7 = vstv %s2427_s9  ;;  %2484 = vpush %v956_v13  ;;  %s3139_s17 = spop %2428  ;;  %v1041_v16 = vpop.permute.xlu2 %1040 }
  0xef   : > { %v707_v8 = vmul.f32 %v2257_v5, %v706_v7  ;;  %s3141_s16 = spop %2430  ;;  %2486 = vpush %v964_v30  ;;  %v717_v45 = vstv %s3139_s17 }
  0xf0   : > { %s3143_s24 = spop %2432  ;;  %2488 = vpush %v2934_v24  ;;  %v725_v54 = vstv %s3141_s16  ;;  %v718_v63 = vmul.f32 %v717_v45, %v716_v41 }
  0xf1   : > { %v708_v22 = vadd.f32 %v707_v8, %v700_v6  ;;  %s2435_s25 = spop %2434  ;;  %v733_v5 = vstv %s3143_s24 }
  0xf2   : > { %v744_v11 = vstv %s2435_s25 }
  0xf3   : > { %v987_v14 = vpop.permute.xlu1 %986  ;;  %v979_v15 = vpop.permute.xlu0 %978  ;;  %710 = vrot.lane.b32.xlu0 %v708_v22, %s3768_s26  ;;  %v745_v18 = vmul.f32 %v744_v11, %v743_v10  ;;  %v734_v11 = vmul.f32 %v2259_v4, %v733_v5  ;;  %v621_v4 = vstv %s3109_s22 }
  0xf4   : > { %2490 = vpush %v979_v15 }
  0xf5   : > { %s2437_s9 = spop %2436  ;;  %2492 = vpush %v987_v14 }
  0xf6   : > { %v752_v24 = vstv %s2437_s9  ;;  %s2439_s12 = spop %2438  ;;  %2494 = vpush %v2943_v25  ;;  %v1083_v57 = vpop.permute.xlu2 %1082 }
  0xf7   : > { %v753_v26 = vmul.f32 %v2260_v59, %v752_v24  ;;  %v760_v27 = vstv %s2439_s12  ;;  %2496 = vpush %v1006_v20  ;;  %s2441_s25 = spop %2440  ;;  %v2267_v59 = vld [vmem:[%s3047_s14 + $0x8] sm:$0xf] }
  0xf8   : > { %v767_v30 = vstv %s2441_s25  ;;  %s2443_s26 = spop %2442  ;;  %v761_v32 = vmul.f32 %v2261_v21, %v760_v27  ;;  %s3781_s25 = smov 32   ;;  %v558_v21 = vld [vmem:[%s3047_s14] sm:$0xf]  ;;  %v567_v27 = vstv %s3088_s11 }
  0xf9   : > { %v754_v31 = vadd.f32 %v753_v26, %v745_v18  ;;  %v768_v17 = vmul.f32 %v767_v30, %v766_v23  ;;  %v775_v35 = vstv %s2443_s26  ;;  %v559_v23 = vstv %s3085_s10  ;;  %v2246_v26 = vld [vmem:[%s3047_s14 + $0x4] sm:$0xf]  ;;  %s3770_s10 = smov 96  }
  0xfa   : > { %v776_v37 = vmul.f32 %v2262_v28, %v775_v35  ;;  %v2268_v35 = vld [vmem:[%s3047_s14 + $0x4] sm:$0xf]  ;;  %v560_v36 = vmul.f32 %v559_v23, %v558_v21  ;;  %v2273_v23 = vld [vmem:[%s3047_s14 + $0x8] sm:$0xf] }
  0xfb   : > { %v1033_v25 = vpop.permute.xlu1 %1032  ;;  %v1014_v39 = vpop.permute.xlu0 %1013  ;;  %v762_v46 = vadd.f32 %v761_v32, %v754_v31  ;;  %v847_v32 = vld [vmem:[%s3047_s14] sm:$0xf] }
  0xfc   : > { %2498 = vpush %v1014_v39  ;;  %v777_v48 = vadd.f32 %v776_v37, %v768_v17  ;;  %v568_v37 = vmul.f32 %v2246_v26, %v567_v27  ;;  %v575_v39 = vstv %s3091_s15 }
  0xfd   : > { %s2445_s12 = spop %2444  ;;  %2500 = vpush %v2950_v29  ;;  %v726_v29 = vmul.f32 %v2258_v53, %v725_v54  ;;  %v594_v53 = vstv %s3102_s19  ;;  %v1266_v54 = vld [vmem:[%s3783_s5] sm:$0xf] }
  0xfe   : > { %v783_v55 = vstv %s2445_s12  ;;  %s2447_s26 = spop %2446  ;;  %2502 = vpush %v1033_v25  ;;  %v1118_v30 = vpop.permute.xlu2 %1117  ;;  %v2247_v25 = vld [vmem:[%s3047_s14 + $0x8] sm:$0xf] }
  0xff   : > { %v784_v58 = vmul.f32 %v2263_v40, %v783_v55  ;;  %v794_v61 = vstv %s2447_s26  ;;  %s2449_s9 = spop %2448  ;;  %2504 = vpush %v1041_v16  ;;  %v727_v10 = vadd.f32 %v726_v29, %v718_v63  ;;  %s3782_s26 = smov 64   ;;  %v585_v40 = vld [vmem:[%s3047_s14] sm:$0xf]  ;;  %v569_v63 = vadd.f32 %v568_v37, %v560_v36 }
 0x100   : > { %v795_v0 = vmul.f32 %v794_v61, %v793_v49  ;;  %v802_v1 = vstv %s2449_s9  ;;  %s2451_s17 = spop %2450  ;;  %2506 = vpush %v2962_v33  ;;  %v2266_v33 = vld [vmem:[%s3047_s14 + $0x4] sm:$0xf]  ;;  %v602_v29 = vstv %s3104_s20 }
 0x101   : > { %v785_v20 = vadd.f32 %v784_v58, %v777_v48  ;;  %v803_v2 = vmul.f32 %v2264_v56, %v802_v1  ;;  %v810_v13 = vstv %s2451_s17  ;;  %s2453_s16 = spop %2452  ;;  %763 = vst.msk [vmem:[#allocation2 + $0xc] sm:$0xf] %vm447_vm0, %v762_v46  ;;  %v735_v31 = vadd.f32 %v734_v11, %v727_v10  ;;  %v2248_v49 = vld [vmem:[%s3047_s14 + $0x4] sm:$0xf]  ;;  %v2269_v58 = vld [vmem:[%s3047_s14 + $0x8] sm:$0xf] }
 0x102   : > { %v811_v6 = vmul.f32 %v2265_v62, %v810_v13  ;;  %v821_v7 = vstv %s2453_s16  ;;  %v586_v48 = vstv %s3093_s13  ;;  %v1265_v62 = vld [vmem:[%s3100_s18 + $0x18] sm:$0xff]  ;;  %v595_v1 = vmul.f32 %v2248_v49, %v594_v53  ;;  %v2250_v13 = vld [vmem:[%s3047_s14 + $0x4] sm:$0xf] }
 0x103   : > { %v804_v8 = vadd.f32 %v803_v2, %v795_v0  ;;  %v1068_v9 = vpop.permute.xlu1 %1067  ;;  %v1060_v22 = vpop.permute.xlu0 %1059  ;;  %787 = vrot.lane.b32.xlu2 %v785_v20, %s3781_s25  ;;  %v822_v15 = vmul.f32 %v821_v7, %v820_v51  ;;  %v587_v0 = vmul.f32 %v586_v48, %v585_v40  ;;  %v612_v20 = vld [vmem:[%s3047_s14] sm:$0xf]  ;;  %v613_v2 = vstv %s3106_s21  ;;  %1282 = vst [vmem:[#allocation1 + $0x30] ss:$2 sm:$0xff] %v1265_v62  ;;  %v2275_v53 = vld [vmem:[%s3047_s14 + $0x8] sm:$0xf] }
 0x104   : > { %2508 = vpush %v1060_v22  ;;  %v897_v7 = vld [vmem:[%s3047_s14] sm:$0xf]  ;;  %v2277_v62 = vld [vmem:[%s3047_s14 + $0x8] sm:$0xf] }
 0x105   : > { %v812_v14 = vadd.f32 %v811_v6, %v804_v8  ;;  %s2455_s24 = spop %2454  ;;  %2510 = vpush %v1068_v9  ;;  %v1264_v9 = vld [vmem:[%s3100_s18 + $0x10] sm:$0xff] }
 0x106   : > { %v829_v16 = vstv %s2455_s24  ;;  %s2457_s12 = spop %2456  ;;  %2512 = vpush %v2972_v34  ;;  %v1164_v51 = vpop.permute.xlu2 %1163 }
 0x107   : > { %v830_v18 = vmul.f32 %v2266_v33, %v829_v16  ;;  %814 = vrot.lane.b32.xlu1 %v812_v14, %s3782_s26  ;;  %v837_v24 = vstv %s2457_s12  ;;  %2514 = vpush %v1083_v57  ;;  %s2459_s9 = spop %2458  ;;  %v576_v57 = vmul.f32 %v2247_v25, %v575_v39  ;;  %v596_v33 = vadd.f32 %v595_v1, %v587_v0  ;;  %v2251_v16 = vld [vmem:[%s3047_s14 + $0x8] sm:$0xf] }
 0x108   : > { %v838_v28 = vmul.f32 %v2267_v59, %v837_v24  ;;  %s2461_s17 = spop %2460  ;;  %v848_v17 = vstv %s2459_s9  ;;  %1280 = vst [vmem:[#allocation1 + $0x20] ss:$2 sm:$0xff] %v1264_v9  ;;  %v614_v14 = vmul.f32 %v613_v2, %v612_v20  ;;  %v2272_v59 = vld [vmem:[%s3047_s14 + $0x4] sm:$0xf] }
 0x109   : > { %v831_v34 = vadd.f32 %v830_v18, %v822_v15  ;;  %v856_v12 = vstv %s2461_s17  ;;  %v849_v55 = vmul.f32 %v848_v17, %v847_v32  ;;  %v577_v22 = vadd.f32 %v576_v57, %v569_v63  ;;  %v2276_v57 = vld [vmem:[%s3047_s14 + $0x4] sm:$0xf] }
 0x10a   : > { %v857_v56 = vmul.f32 %v2268_v35, %v856_v12  ;;  %v622_v15 = vmul.f32 %v2250_v13, %v621_v4  ;;  %v629_v18 = vstv %s3111_s23  ;;  %v1290_v12 = vld.sshfl [vmem:[#allocation1 + $0x38] sm:$0xff pattern:$0x75316420]  ;;  %v1289_v36 = vld.sshfl [vmem:[#allocation1 + $0x30] sm:$0xff pattern:$0x75316420] }
 0x10b   : > { %v839_v41 = vadd.f32 %v838_v28, %v831_v34  ;;  %v1110_v45 = vpop.permute.xlu1 %1109  ;;  %v1091_v46 = vpop.permute.xlu0 %1090  ;;  %737 = vrot.lane.b32.xlu2 %v735_v31, %s3770_s10  ;;  %v2274_v31 = vld [vmem:[%s3047_s14 + $0x4] sm:$0xf]  ;;  %v630_v32 = vmul.f32 %v2251_v16, %v629_v18  ;;  %2314 = vmatpush.msk.msrb.mxu3 %vm1295_vm1, %v1290_v12  ;;  %v2287_v18 = vld [vmem:[%s3047_s14 + $0x8] sm:$0xf] }
 0x10c   : > { %2516 = vpush %v1091_v46  ;;  %v858_v5 = vadd.f32 %v857_v56, %v849_v55  ;;  %v623_v34 = vadd.f32 %v622_v15, %v614_v14  ;;  %2312 = vmatpush.msk.msrb.mxu2 %vm1295_vm1, %v1289_v36  ;;  %2315 = vmatmul.msk.f32.vlgmr.msrb.gmra.mxu3 %vm1291_vm2, %v3123_v19  ;;  %v951_v55 = vld [vmem:[%s3047_s14] sm:$0xf] }
 0x10d   : > { %s2463_s15 = spop %2462  ;;  %841 = vrot.lane.b32.xlu0 %v839_v41, %s3770_s10  ;;  %2518 = vpush %v2980_v38  ;;  %v2249_v38 = vld [vmem:[%s3047_s14 + $0x8] sm:$0xf]  ;;  %2313 = vmatmul.msk.f32.vlgmr.msrb.gmra.mxu2 %vm1291_vm2, %v3123_v19 }
 0x10e   : > { %v864_v61 = vstv %s2463_s15  ;;  %2520 = vpush %v1110_v45  ;;  %s3198_s13 = spop %2464  ;;  %v603_v10 = vmul.f32 %v2249_v38, %v602_v29  ;;  %v1195_v49 = vpop.permute.xlu2 %1194 }
 0x10f   : > { %1269 = vperm.xlu1 %2584, %v1266_v54   ;;  %s3201_s19 = spop %2466  ;;  %2522 = vpush %v1118_v30  ;;  %v865_v6 = vmul.f32 %v2269_v58, %v864_v61  ;;  %v1288_v39 = vld.sshfl [vmem:[#allocation1 + $0x28] sm:$0xff pattern:$0x75316420]  ;;  %v1287_v46 = vld.sshfl [vmem:[#allocation1 + $0x20] sm:$0xff pattern:$0x75316420]  ;;  %v631_v54 = vadd.f32 %v630_v32, %v623_v34 }
 0x110   : > { %s3205_s24 = spop %2468  ;;  %2524 = vpush %v2993_v42  ;;  %v604_v27 = vadd.f32 %v603_v10, %v596_v33  ;;  %2310 = vmatpush.msk.msrb.mxu1 %vm1295_vm1, %v1288_v39  ;;  %2308 = vmatpush.msk.msrb.mxu0 %vm1295_vm1, %v1287_v46  ;;  %v2286_v33 = vld [vmem:[%s3047_s14 + $0x4] sm:$0xf] }
 0x111   : > { %s2471_s12 = spop %2470  ;;  %v866_v24 = vadd.f32 %v865_v6, %v858_v5  ;;  %2311 = vmatmul.msk.f32.vlgmr.msrb.gmra.mxu1 %vm1291_vm2, %v3123_v19  ;;  %2309 = vmatmul.msk.f32.vlgmr.msrb.gmra.mxu0 %vm1291_vm2, %v3123_v19  ;;  %v2284_v5 = vld [vmem:[%s3047_s14 + $0x4] sm:$0xf] }
 0x112   : > { %v898_v8 = vstv %s2471_s12 }
 0x113   : > { %v1145_v42 = vpop.permute.xlu1 %1144  ;;  %v1137_v11 = vpop.permute.xlu0 %1136  ;;  %472 = vrot.lane.b32.xlu2 %v3070_v44, %s3781_s25  ;;  %v899_v21 = vmul.f32 %v898_v8, %v897_v7  ;;  %v924_v44 = vld [vmem:[%s3047_s14] sm:$0xf]  ;;  %867 = vst.msk [vmem:[#allocation2 + $0x10] sm:$0xf] %vm447_vm0, %v866_v24 }
 0x114   : > { %2526 = vpush %v1137_v11  ;;  %v1078_v8 = vld [vmem:[%s3047_s14] sm:$0xf] }
 0x115   : > { %s2473_s18 = spop %2472  ;;  %579 = vrot.lane.b32.xlu0 %v577_v22, %s3781_s25  ;;  %2528 = vpush %v1145_v42 }
 0x116   : > { %v906_v26 = vstv %s2473_s18  ;;  %s2475_s20 = spop %2474  ;;  %2530 = vpush %v3003_v43  ;;  %v1241_v2 = vpop.permute.xlu2 %1240 }
 0x117   : > { %v907_v28 = vmul.f32 %v2272_v59, %v906_v26  ;;  %500 = vrot.lane.b32.xlu1 %v3077_v60, %s3782_s26  ;;  %v914_v30 = vstv %s2475_s20  ;;  %2532 = vpush %v1164_v51  ;;  %s2477_s21 = spop %2476  ;;  %v2285_v51 = vld [vmem:[%s3047_s14 + $0x8] sm:$0xf]  ;;  %v2288_v26 = vld [vmem:[%s3047_s14 + $0x4] sm:$0xf] }
 0x118   : > { %v915_v17 = vmul.f32 %v2273_v23, %v914_v30  ;;  %v925_v35 = vstv %s2477_s21  ;;  %s2479_s22 = spop %2478 }
 0x119   : > { %v908_v37 = vadd.f32 %v907_v28, %v899_v21  ;;  %v926_v25 = vmul.f32 %v925_v35, %v924_v44  ;;  %v933_v43 = vstv %s2479_s22  ;;  %v1105_v21 = vld [vmem:[%s3047_s14] sm:$0xf]  ;;  %v2289_v28 = vld [vmem:[%s3047_s14 + $0x8] sm:$0xf] }
 0x11a   : > { %v934_v60 = vmul.f32 %v2274_v31, %v933_v43 }
 0x11b   : > { %v3233_v40 = vadd.f32 %v915_v17, %v908_v37  ;;  %v1187_v41 = vpop.permute.xlu1 %1186  ;;  %v1172_v45 = vpop.permute.xlu0 %1171  ;;  %606 = vrot.lane.b32.xlu2 %v604_v27, %s3782_s26  ;;  %v1159_v37 = vld [vmem:[%s3047_s14] sm:$0xf] }
 0x11c   : > { %v935_v48 = vadd.f32 %v934_v60, %v926_v25  ;;  %2534 = vpush %v1172_v45  ;;  %v2292_v25 = vld [vmem:[%s3047_s14 + $0x4] sm:$0xf]  ;;  %v2293_v45 = vld [vmem:[%s3047_s14 + $0x8] sm:$0xf] }
 0x11d   : > { %2536 = vpush %v3010_v47  ;;  %s2481_s23 = spop %2480  ;;  %528 = vrot.lane.b32.xlu0 %v3079_v3, %s3770_s10 }
 0x11e   : > { %2538 = vpush %v1187_v41  ;;  %v941_v56 = vstv %s2481_s23  ;;  %s2483_s9 = spop %2482 }
 0x11f   : > { %v942_v58 = vmul.f32 %v2275_v53, %v941_v56  ;;  %633 = vrot.lane.b32.xlu1 %v631_v54, %s3770_s10  ;;  %2540 = vpush %v1195_v49  ;;  %v952_v61 = vstv %s2483_s9  ;;  %s2485_s17 = spop %2484  ;;  %v2294_v53 = vld [vmem:[%s3047_s14 + $0x4] sm:$0xf]  ;;  %v2295_v56 = vld [vmem:[%s3047_s14 + $0x8] sm:$0xf] }
 0x120   : > { %v953_v47 = vmul.f32 %v952_v61, %v951_v55  ;;  %v960_v63 = vstv %s2485_s17  ;;  %s2487_s11 = spop %2486  ;;  %2542 = vpush %v3027_v50  ;;  %v1132_v61 = vld [vmem:[%s3047_s14] sm:$0xf] }
 0x121   : > { %v3251_v3 = vadd.f32 %v942_v58, %v935_v48  ;;  %v961_v0 = vmul.f32 %v2276_v57, %v960_v63  ;;  %v968_v19 = vstv %s2487_s11  ;;  %s3253_s16 = spop %2488  ;;  %v1182_v48 = vld [vmem:[%s3047_s14] sm:$0xf] }
 0x122   : > { %v969_v1 = vmul.f32 %v2277_v62, %v968_v19  ;;  %v2290_v19 = vld [vmem:[%s3047_s14 + $0x4] sm:$0xf] }
 0x123   : > { %v962_v38 = vadd.f32 %v961_v0, %v953_v47  ;;  %v1214_v29 = vpop.permute.xlu0 %1213  ;;  %v1222_v20 = vpop.permute.xlu1 %1221 }
 0x124   : > { %2544 = vpush %v1214_v29  ;;  %v1209_v29 = vld [vmem:[%s3047_s14] sm:$0xf] }
 0x125   : > { %v970_v13 = vadd.f32 %v969_v1, %v962_v38  ;;  %2546 = vpush %v1222_v20  ;;  %s3256_s15 = spop %2490 }
 0x126   : > { %2548 = vpush %v3040_v52  ;;  %s3259_s12 = spop %2492  ;;  %v1055_v52 = vld [vmem:[%s3047_s14] sm:$0xf] }
 0x127   : > { %2550 = vpush %v1241_v2  ;;  %s3261_s18 = spop %2494 }
 0x128   : > { %971 = vst.msk [vmem:[#allocation2 + $0x14] sm:$0xf] %vm447_vm0, %v970_v13  ;;  %s3263_s20 = spop %2496 }
 0x12b   : > { %v1249_v50 = vpop.permute.xlu0 %1248 }
 0x12c   : > { %2552 = vpush %v1249_v50  ;;  %v2296_v50 = vld [vmem:[%s3047_s14 + $0x4] sm:$0xf] }
 0x12d   : > { %s3265_s21 = spop %2498 }
 0x12e   : > { %s3267_s22 = spop %2500 }
 0x12f   : > { %s3269_s23 = spop %2502 }
 0x130   : > { %s3271_s9 = spop %2504 }
 0x131   : > { %s2507_s17 = spop %2506 }
 0x132   : > { %v1056_v4 = vstv %s2507_s17 }
 0x133   : > { %v1057_v6 = vmul.f32 %v1056_v4, %v1055_v52  ;;  %v2291_v4 = vld [vmem:[%s3047_s14 + $0x8] sm:$0xf] }
 0x135   : > { %s2509_s11 = spop %2508 }
 0x136   : > { %v1064_v7 = vstv %s2509_s11  ;;  %s2511_s10 = spop %2510 }
 0x137   : > { %v1065_v9 = vmul.f32 %v2284_v5, %v1064_v7  ;;  %v1072_v22 = vstv %s2511_s10  ;;  %s2513_s0 = spop %2512  ;;  %v2297_v7 = vld [vmem:[%s3047_s14 + $0x8] sm:$0xf] }
 0x138   : > { %v1073_v10 = vmul.f32 %v2285_v51, %v1072_v22  ;;  %v1079_v42 = vstv %s2513_s0  ;;  %s2515_s1 = spop %2514  ;;  %v871_v22 = vstv %s3198_s13 }
 0x139   : > { %v1066_v11 = vadd.f32 %v1065_v9, %v1057_v6  ;;  %v1080_v14 = vmul.f32 %v1079_v42, %v1078_v8  ;;  %v1087_v15 = vstv %s2515_s1  ;;  %v1236_v9 = vld [vmem:[%s3047_s14] sm:$0xf]  ;;  %v2298_v42 = vld [vmem:[%s3047_s14 + $0x4] sm:$0xf] }
 0x13a   : > { %v1088_v59 = vmul.f32 %v2286_v33, %v1087_v15  ;;  %v879_v15 = vstv %s3201_s19  ;;  %s3784_s19 = smov 96  }
 0x13b   : > { %v1074_v16 = vadd.f32 %v1073_v10, %v1066_v11  ;;  %v870_v11 = vld [vmem:[%s3047_s14] sm:$0xf] }
 0x13c   : > { %v1089_v24 = vadd.f32 %v1088_v59, %v1080_v14  ;;  %v2270_v14 = vld [vmem:[%s3047_s14 + $0x4] sm:$0xf] }
 0x13d   : > { %s2517_s17 = spop %2516  ;;  %1075 = vst.msk [vmem:[#allocation2 + $0x18] sm:$0xf] %vm447_vm0, %v1074_v16 }
 0x13e   : > { %v1095_v23 = vstv %s2517_s17  ;;  %s2519_s10 = spop %2518 }
 0x13f   : > { %v1096_v44 = vmul.f32 %v2287_v18, %v1095_v23  ;;  %v1106_v27 = vstv %s2519_s10  ;;  %s2521_s0 = spop %2520 }
 0x140   : > { %v1107_v30 = vmul.f32 %v1106_v27, %v1105_v21  ;;  %v1114_v31 = vstv %s2521_s0  ;;  %s2523_s1 = spop %2522  ;;  %v975_v27 = vstv %s3253_s16 }
 0x141   : > { %v1097_v34 = vadd.f32 %v1096_v44, %v1089_v24  ;;  %v1115_v32 = vmul.f32 %v2288_v26, %v1114_v31  ;;  %v1122_v17 = vstv %s2523_s1  ;;  %s3284_s11 = spop %2524  ;;  %v974_v44 = vld [vmem:[%s3047_s14] sm:$0xf] }
 0x142   : > { %v1123_v35 = vmul.f32 %v2289_v28, %v1122_v17  ;;  %v1133_v62 = vstv %s3284_s11  ;;  %v2278_v28 = vld [vmem:[%s3047_s14 + $0x4] sm:$0xf] }
 0x143   : > { %v1116_v12 = vadd.f32 %v1115_v32, %v1107_v30  ;;  %1099 = vrot.lane.b32.xlu2 %v1097_v34, %s3781_s25  ;;  %v1134_v13 = vmul.f32 %v1133_v62, %v1132_v61  ;;  %v983_v30 = vstv %s3256_s15  ;;  %v872_v34 = vmul.f32 %v871_v22, %v870_v11 }
 0x144   : > { %v880_v32 = vmul.f32 %v2270_v14, %v879_v15 }
 0x145   : > { %v1124_v36 = vadd.f32 %v1123_v35, %v1116_v12  ;;  %s3286_s17 = spop %2526  ;;  %v2271_v35 = vld [vmem:[%s3047_s14 + $0x8] sm:$0xf]  ;;  %v887_v12 = vstv %s3205_s24 }
 0x146   : > { %s3288_s10 = spop %2528  ;;  %v1141_v1 = vstv %s3286_s17 }
 0x147   : > { %1126 = vrot.lane.b32.xlu1 %v1124_v36, %s3782_s26  ;;  %s2531_s0 = spop %2530  ;;  %v1142_v52 = vmul.f32 %v2290_v19, %v1141_v1  ;;  %v1149_v5 = vstv %s3288_s10  ;;  %v2299_v36 = vld [vmem:[%s3047_s14 + $0x8] sm:$0xf] }
 0x148   : > { %v1160_v43 = vstv %s2531_s0  ;;  %s2533_s1 = spop %2532  ;;  %v1150_v59 = vmul.f32 %v2291_v4, %v1149_v5  ;;  %v2281_v1 = vld [vmem:[%s3047_s14 + $0x8] sm:$0xf]  ;;  %v1037_v4 = vstv %s3269_s23 }
 0x149   : > { %v1161_v60 = vmul.f32 %v1160_v43, %v1159_v37  ;;  %v1168_v39 = vstv %s2533_s1  ;;  %v1143_v24 = vadd.f32 %v1142_v52, %v1134_v13  ;;  %v976_v37 = vmul.f32 %v975_v27, %v974_v44  ;;  %v1028_v13 = vld [vmem:[%s3047_s14] sm:$0xf]  ;;  %v2282_v52 = vld [vmem:[%s3047_s14 + $0x4] sm:$0xf] }
 0x14a   : > { %v1169_v41 = vmul.f32 %v2292_v25, %v1168_v39  ;;  %v984_v25 = vmul.f32 %v2278_v28, %v983_v30 }
 0x14b   : > { %v1151_v43 = vadd.f32 %v1150_v59, %v1143_v24 }
 0x14c   : > { %v1170_v46 = vadd.f32 %v1169_v41, %v1161_v60  ;;  %v2279_v41 = vld [vmem:[%s3047_s14 + $0x8] sm:$0xf]  ;;  %v985_v61 = vadd.f32 %v984_v25, %v976_v37 }
 0x14d   : > { %s2535_s3 = spop %2534 }
 0x14e   : > { %v1176_v49 = vstv %s2535_s3  ;;  %s2537_s4 = spop %2536 }
 0x14f   : > { %v1177_v54 = vmul.f32 %v2293_v45, %v1176_v49  ;;  %v1183_v55 = vstv %s2537_s4  ;;  %s2539_s5 = spop %2538  ;;  %v991_v45 = vstv %s3259_s12  ;;  %v888_v49 = vmul.f32 %v2271_v35, %v887_v12 }
 0x150   : > { %v1184_v57 = vmul.f32 %v1183_v55, %v1182_v48  ;;  %v1191_v58 = vstv %s2539_s5  ;;  %s2541_s0 = spop %2540  ;;  %v881_v48 = vadd.f32 %v880_v32, %v872_v34  ;;  %v1001_v55 = vld [vmem:[%s3047_s14] sm:$0xf]  ;;  %v992_v62 = vmul.f32 %v2279_v41, %v991_v45 }
 0x151   : > { %v1178_v47 = vadd.f32 %v1177_v54, %v1170_v46  ;;  %v1192_v63 = vmul.f32 %v2294_v53, %v1191_v58  ;;  %v1199_v0 = vstv %s2541_s0  ;;  %s2543_s3 = spop %2542  ;;  %v1010_v58 = vstv %s3263_s20  ;;  %s2358_s20 = sshll.u32 %s3824_s27, 7 }
 0x152   : > { %v1200_v38 = vmul.f32 %v2295_v56, %v1199_v0  ;;  %v1210_v20 = vstv %s2543_s3  ;;  %v1002_v56 = vstv %s3261_s18  ;;  %s3467_s23 = scalar_lea.vmem %s3759_s2, %s2358_s20  ;;  %s3503_s1 = scalar_lea.vmem %s3765_s8, %s2358_s20 }
 0x153   : > { %v1193_v2 = vadd.f32 %v1192_v63, %v1184_v57  ;;  %1179 = vst.msk [vmem:[#allocation2 + $0x1c] sm:$0xf] %vm447_vm0, %v1178_v47  ;;  %v1211_v51 = vmul.f32 %v1210_v20, %v1209_v29  ;;  %v2280_v57 = vld [vmem:[%s3047_s14 + $0x4] sm:$0xf]  ;;  %v889_v63 = vadd.f32 %v888_v49, %v881_v48  ;;  %v1003_v0 = vmul.f32 %v1002_v56, %v1001_v55 }
 0x154   : > { %v1011_v19 = vmul.f32 %v2280_v57, %v1010_v58  ;;  %v993_v29 = vadd.f32 %v992_v62, %v985_v61  ;;  %v3375_v49 = vld [vmem:[%s3763_s6] sm:$0xff]  ;;  %v1503_v58 = vld [vmem:[%s3764_s7 + $0x8] sm:$0xff] }
 0x155   : > { %v1201_v6 = vadd.f32 %v1200_v38, %v1193_v2  ;;  %s2545_s4 = spop %2544  ;;  %v1018_v38 = vstv %s3265_s21 }
 0x156   : > { %v1218_v8 = vstv %s2545_s4  ;;  %s2547_s5 = spop %2546  ;;  %v1012_v5 = vadd.f32 %v1011_v19, %v1003_v0 }
 0x157   : > { %v1219_v33 = vmul.f32 %v2296_v50, %v1218_v8  ;;  %1203 = vrot.lane.b32.xlu0 %v1201_v6, %s3781_s25  ;;  %v1226_v10 = vstv %s2547_s5  ;;  %s2549_s11 = spop %2548  ;;  %v1029_v50 = vstv %s3267_s22  ;;  %v1019_v6 = vmul.f32 %v2281_v1, %v1018_v38  ;;  %v2283_v8 = vld [vmem:[%s3047_s14 + $0x8] sm:$0xf] }
 0x158   : > { %v1227_v16 = vmul.f32 %v2297_v7, %v1226_v10  ;;  %v1237_v18 = vstv %s2549_s11  ;;  %s2551_s17 = spop %2550  ;;  %v1038_v7 = vmul.f32 %v2282_v52, %v1037_v4 }
 0x159   : > { %v1220_v21 = vadd.f32 %v1219_v33, %v1211_v51  ;;  %v1238_v23 = vmul.f32 %v1237_v18, %v1236_v9  ;;  %v1245_v26 = vstv %s2551_s17  ;;  %v1030_v51 = vmul.f32 %v1029_v50, %v1028_v13  ;;  %v1502_v50 = vld [vmem:[%s3764_s7] sm:$0xff] }
 0x15a   : > { %v1246_v31 = vmul.f32 %v2298_v42, %v1245_v26  ;;  %v1045_v9 = vstv %s3271_s9  ;;  %v1020_v22 = vadd.f32 %v1019_v6, %v1012_v5 }
 0x15b   : > { %v1228_v17 = vadd.f32 %v1227_v16, %v1220_v21  ;;  %v1039_v33 = vadd.f32 %v1038_v7, %v1030_v51  ;;  %v1046_v10 = vmul.f32 %v2283_v8, %v1045_v9 }
 0x15c   : > { %v1247_v60 = vadd.f32 %v1246_v31, %v1238_v23 }
 0x15d   : > { %s2553_s13 = spop %2552  ;;  %v788_v39 = vpop.permute.xlu2 %787  ;;  %1230 = vrot.lane.b32.xlu2 %v1228_v17, %s3782_s26  ;;  %v1047_v11 = vadd.f32 %v1046_v10, %v1039_v33 }
 0x15e   : > { %v1253_v46 = vstv %s2553_s13  ;;  %790 = vst.msk [vmem:[#allocation2 + $0xc] sm:$0xf] %vm475_vm3, %v788_v39 }
 0x15f   : > { %v1254_v53 = vmul.f32 %v2299_v36, %v1253_v46  ;;  %1153 = vrot.lane.b32.xlu0 %v1151_v43, %s3784_s19  ;;  %v684_v54 = vpop.permute.xlu1 %683 }
 0x160   : > { %686 = vst.msk [vmem:[#allocation2 + $0x8] sm:$0xf] %vm475_vm3, %v684_v54  ;;  %v1501_v54 = vld [vmem:[%s3763_s6 + $0x8] sm:$0xff] }
 0x161   : > { %v1255_v47 = vadd.f32 %v1254_v53, %v1247_v60  ;;  %v1329_v32 = vpop.f32.mrf.mxu0 }
 0x162   : > { %v1349_v30 = vpop.f32.mrf.mxu1 }
 0x163   : > { %1257 = vrot.lane.b32.xlu1 %v1255_v47, %s3784_s19 }
 0x164   : > { %v1389_v15 = vpop.f32.mrf.mxu3  ;;  %v1369_v16 = vpop.f32.mrf.mxu2 }
 0x165   : > { %v738_v20 = vpop.permute.xlu2 %737  ;;  %v711_v2 = vpop.permute.xlu0 %710  ;;  %891 = vrot.lane.b32.xlu2 %v889_v63, %s3781_s25 }
 0x166   : > { %713 = vst.msk [vmem:[#allocation2 + $0x8] sm:$0xf] %vm503_vm4, %v711_v2 }
 0x167   : > { %740 = vst.msk [vmem:[#allocation2 + $0x8] sm:$0xf] %vm531_vm5, %v738_v20  ;;  %995 = vrot.lane.b32.xlu0 %v993_v29, %s3781_s25 }
 0x16b   : > { %918 = vrot.lane.b32.xlu1 %v3233_v40, %s3782_s26 }
 0x16d   : > { %1022 = vrot.lane.b32.xlu2 %v1020_v22, %s3782_s26  ;;  %v473_v42 = vpop.permute.xlu2 %472 }
 0x16e   : > { %476 = vst.msk [vmem:[#allocation2] sm:$0xf] %vm475_vm3, %v473_v42 }
 0x16f   : > { %945 = vrot.lane.b32.xlu0 %v3251_v3, %s3784_s19 }
 0x173   : > { %1049 = vrot.lane.b32.xlu1 %v1047_v11, %s3784_s19 }
 0x175   : > { %v607_v44 = vpop.permute.xlu2 %606  ;;  %1506 = vperm.xlu2 %2585, %v1502_v50  }
 0x177   : > { %1511 = vperm.xlu0 %2586, %v1503_v58  }
 0x179   : > { %v815_v14 = vpop.permute.xlu1 %814 }
 0x17a   : > { %817 = vst.msk [vmem:[#allocation2 + $0xc] sm:$0xf] %vm503_vm4, %v815_v14 }
 0x17f   : > { %v842_v59 = vpop.permute.xlu0 %841 }
 0x180   : > { %844 = vst.msk [vmem:[#allocation2 + $0xc] sm:$0xf] %vm531_vm5, %v842_v59 }
 0x181   : > { %v3353_v40 = vpop.permute.xlu1 %1269 }
 0x182   : > { %v1390_v18 = vadd.f32 %v1389_v15, %v3353_v40  ;;  %v1370_v24 = vadd.f32 %v1369_v16, %v3353_v40  ;;  %v1350_v34 = vadd.f32 %v1349_v30, %v3353_v40  ;;  %v1330_v37 = vadd.f32 %v1329_v32, %v3353_v40 }
 0x184   : > { %v1485_v21 = vrot.slane %v1390_v18, 4  ;;  %v1484_v36 = vrot.slane %v1350_v34, 4 }
 0x186   : > { %v1489_v3 = vsel %vm1295_vm1, %v1370_v24, %v1485_v21  ;;  %v1488_v25 = vsel %vm1295_vm1, %v1330_v37, %v1484_v36 }
 0x187   : > { %v1473_v23 = vld [vmem:[#allocation2 + $0x8] sm:$0xff]  ;;  %v580_v26 = vpop.permute.xlu0 %579 }
 0x188   : > { %v1497_v27 = vadd.f32 %v1489_v3, %v1473_v23  ;;  %582 = vst.msk [vmem:[#allocation2 + $0x4] sm:$0xf] %vm475_vm3, %v580_v26 }
 0x189   : > { %609 = vst.msk [vmem:[#allocation2 + $0x4] sm:$0xf] %vm503_vm4, %v607_v44  ;;  %v501_v28 = vpop.permute.xlu1 %500 }
 0x18a   : > { %1520 = vst [vmem:[#allocation1 + $0x10] ss:$2 sm:$0xff] %v1497_v27 }
 0x18b   : > { %504 = vst.msk [vmem:[#allocation2] sm:$0xf] %vm503_vm4, %v501_v28 }
 0x18e   : > { %v1429_v52 = vpop.f32.mrf.mxu1  ;;  %v1409_v6 = vpop.f32.mrf.mxu0 }
 0x18f   : > { %v529_v31 = vpop.permute.xlu0 %528  ;;  %v1469_v57 = vpop.f32.mrf.mxu3  ;;  %v1430_v4 = vadd.f32 %v1429_v52, %v3353_v40  ;;  %v1410_v9 = vadd.f32 %v1409_v6, %v3353_v40 }
 0x190   : > { %532 = vst.msk [vmem:[#allocation2] sm:$0xf] %vm531_vm5, %v529_v31  ;;  %v1470_v61 = vadd.f32 %v1469_v57, %v3353_v40  ;;  %v1449_v47 = vpop.f32.mrf.mxu2 }
 0x191   : > { %v634_v17 = vpop.permute.xlu1 %633  ;;  %v1527_v35 = vld.sshfl [vmem:[#allocation1 + $0x10] sm:$0xff pattern:$0x75316420]  ;;  %v1528_v12 = vld.sshfl [vmem:[#allocation1 + $0x18] sm:$0xff pattern:$0x75316420]  ;;  %v1450_v0 = vadd.f32 %v1449_v47, %v3353_v40 }
 0x192   : > { %636 = vst.msk [vmem:[#allocation2 + $0x4] sm:$0xf] %vm531_vm5, %v634_v17  ;;  %2322 = vmatpush.msk.msra.mxu2 %vm1295_vm1, %v1527_v35  ;;  %2325 = vmatpush.msk.msra.mxu3 %vm1295_vm1, %v1528_v12  ;;  %v1487_v63 = vrot.slane %v1470_v61, 4  ;;  %v1486_v8 = vrot.slane %v1430_v4, 4 }
 0x193   : > { %2323 = vmatmul.msk.f32.vlgmr.msra.gmra.mxu2 %vm1291_vm2, %v3375_v49  ;;  %2326 = vmatmul.msk.f32.vlgmr.msra.gmra.mxu3 %vm1291_vm2, %v3375_v49 }
 0x194   : > { %v1491_v38 = vsel %vm1295_vm1, %v1450_v0, %v1487_v63  ;;  %v1490_v22 = vsel %vm1295_vm1, %v1410_v9, %v1486_v8 }
 0x199   : > { %v1472_v43 = vld [vmem:[#allocation2] sm:$0xff] }
 0x19a   : > { %v1496_v60 = vadd.f32 %v1488_v25, %v1472_v43 }
 0x19b   : > { %2324 = vmatmul.msk.f32.gmra.mxu2 %vm1291_vm2, %v1501_v54  ;;  %2327 = vmatmul.msk.f32.gmra.mxu3 %vm1291_vm2, %v1501_v54 }
 0x19c   : > { %1518 = vst [vmem:[#allocation1] ss:$2 sm:$0xff] %v1496_v60 }
 0x19d   : > { %v1100_v39 = vpop.permute.xlu2 %1099 }
 0x19e   : > { %1102 = vst.msk [vmem:[#allocation2 + $0x18] sm:$0xf] %vm475_vm3, %v1100_v39 }
 0x1a3   : > { %v1525_v41 = vld.sshfl [vmem:[#allocation1] sm:$0xff pattern:$0x75316420]  ;;  %v1526_v45 = vld.sshfl [vmem:[#allocation1 + $0x8] sm:$0xff pattern:$0x75316420] }
 0x1a4   : > { %2316 = vmatpush.msk.msra.mxu0 %vm1295_vm1, %v1525_v41  ;;  %2319 = vmatpush.msk.msra.mxu1 %vm1295_vm1, %v1526_v45 }
 0x1a5   : > { %2317 = vmatmul.msk.f32.vlgmr.msra.gmra.mxu0 %vm1291_vm2, %v3375_v49  ;;  %2320 = vmatmul.msk.f32.vlgmr.msra.gmra.mxu1 %vm1291_vm2, %v3375_v49 }
 0x1ad   : > { %2318 = vmatmul.msk.f32.gmra.mxu0 %vm1291_vm2, %v1501_v54  ;;  %2321 = vmatmul.msk.f32.gmra.mxu1 %vm1291_vm2, %v1501_v54 }
 0x1b7   : > { %v1231_v46 = vpop.permute.xlu2 %1230 }
 0x1b9   : > { %v1127_v48 = vpop.permute.xlu1 %1126 }
 0x1ba   : > { %1129 = vst.msk [vmem:[#allocation2 + $0x18] sm:$0xf] %vm503_vm4, %v1127_v48 }
 0x1bf   : > { %v892_v53 = vpop.permute.xlu2 %891 }
 0x1c0   : > { %894 = vst.msk [vmem:[#allocation2 + $0x10] sm:$0xf] %vm475_vm3, %v892_v53 }
 0x1c7   : > { %v1023_v1 = vpop.permute.xlu2 %1022 }
 0x1c9   : > { %v1204_v55 = vpop.permute.xlu0 %1203 }
 0x1ca   : > { %1206 = vst.msk [vmem:[#allocation2 + $0x1c] sm:$0xf] %vm475_vm3, %v1204_v55 }
 0x1cb   : > { %1233 = vst.msk [vmem:[#allocation2 + $0x1c] sm:$0xf] %vm503_vm4, %v1231_v46 }
 0x1cf   : > { %v3430_v14 = vpop.permute.xlu2 %1506 }
 0x1d1   : > { %v1154_v56 = vpop.permute.xlu0 %1153 }
 0x1d2   : > { %1156 = vst.msk [vmem:[#allocation2 + $0x18] sm:$0xf] %vm531_vm5, %v1154_v56 }
 0x1d5   : > { %v1258_v62 = vpop.permute.xlu1 %1257 }
 0x1d6   : > { %1260 = vst.msk [vmem:[#allocation2 + $0x1c] sm:$0xf] %vm531_vm5, %v1258_v62 }
 0x1d9   : > { %v996_v19 = vpop.permute.xlu0 %995 }
 0x1da   : > { %998 = vst.msk [vmem:[#allocation2 + $0x14] sm:$0xf] %vm475_vm3, %v996_v19 }
 0x1db   : > { %1025 = vst.msk [vmem:[#allocation2 + $0x14] sm:$0xf] %vm503_vm4, %v1023_v1 }
 0x1dd   : > { %v1475_v29 = vld [vmem:[#allocation2 + $0x18] sm:$0xff]  ;;  %v919_v20 = vpop.permute.xlu1 %918 }
 0x1de   : > { %v1499_v2 = vadd.f32 %v1491_v38, %v1475_v29  ;;  %921 = vst.msk [vmem:[#allocation2 + $0x10] sm:$0xf] %vm503_vm4, %v919_v20 }
 0x1e0   : > { %1524 = vst [vmem:[#allocation1 + $0x30] ss:$2 sm:$0xff] %v1499_v2 }
 0x1e1   : > { %v946_v13 = vpop.permute.xlu0 %945 }
 0x1e2   : > { %948 = vst.msk [vmem:[#allocation2 + $0x10] sm:$0xf] %vm531_vm5, %v946_v13 }
 0x1e5   : > { %v1050_v5 = vpop.permute.xlu1 %1049 }
 0x1e6   : > { %1052 = vst.msk [vmem:[#allocation2 + $0x14] sm:$0xf] %vm531_vm5, %v1050_v5 }
 0x1e7   : > { %v1531_v51 = vld.sshfl [vmem:[#allocation1 + $0x30] sm:$0xff pattern:$0x75316420]  ;;  %v1532_v7 = vld.sshfl [vmem:[#allocation1 + $0x38] sm:$0xff pattern:$0x75316420] }
 0x1e8   : > { %2334 = vmatpush.msk.msrb.mxu2 %vm1295_vm1, %v1531_v51  ;;  %2337 = vmatpush.msk.msrb.mxu3 %vm1295_vm1, %v1532_v7 }
 0x1e9   : > { %2335 = vmatmul.msk.f32.vlgmr.msrb.gmra.mxu2 %vm1291_vm2, %v3375_v49  ;;  %2338 = vmatmul.msk.f32.vlgmr.msrb.gmra.mxu3 %vm1291_vm2, %v3375_v49  ;;  %v3436_v31 = vpop.permute.xlu0 %1511 }
 0x1ed   : > { %v1474_v33 = vld [vmem:[#allocation2 + $0x10] sm:$0xff] }
 0x1ee   : > { %v1498_v10 = vadd.f32 %v1490_v22, %v1474_v33 }
 0x1f0   : > { %1522 = vst [vmem:[#allocation1 + $0x20] ss:$2 sm:$0xff] %v1498_v10 }
 0x1f1   : > { %2336 = vmatmul.msk.f32.gmra.mxu2 %vm1291_vm2, %v1501_v54  ;;  %2339 = vmatmul.msk.f32.gmra.mxu3 %vm1291_vm2, %v1501_v54 }
 0x1f7   : > { %v1529_v42 = vld.sshfl [vmem:[#allocation1 + $0x20] sm:$0xff pattern:$0x75316420]  ;;  %v1530_v11 = vld.sshfl [vmem:[#allocation1 + $0x28] sm:$0xff pattern:$0x75316420] }
 0x1f8   : > { %2328 = vmatpush.msk.msrb.mxu0 %vm1295_vm1, %v1529_v42  ;;  %2331 = vmatpush.msk.msrb.mxu1 %vm1295_vm1, %v1530_v11 }
 0x1f9   : > { %2329 = vmatmul.msk.f32.vlgmr.msrb.gmra.mxu0 %vm1291_vm2, %v3375_v49  ;;  %2332 = vmatmul.msk.f32.vlgmr.msrb.gmra.mxu1 %vm1291_vm2, %v3375_v49 }
 0x201   : > { %2330 = vmatmul.msk.f32.gmra.mxu0 %vm1291_vm2, %v1501_v54  ;;  %2333 = vmatmul.msk.f32.gmra.mxu1 %vm1291_vm2, %v1501_v54 }
 0x216   : > { %v1618_v15 = vpop.f32.mrf.mxu2  ;;  %v1641_v59 = vpop.f32.mrf.mxu3 }
 0x217   : > { %v1619_v16 = vadd.f32 %v1618_v15, %v3430_v14  ;;  %v1642_v40 = vadd.f32 %v1641_v59, %v3430_v14 }
 0x219   : > { %v2342_v23 = vmul.f32 -1.442695, %v1619_v16  ;;  %v2343_v26 = vmul.f32 -1.442695, %v1642_v40  ;;  %v1741_v16 = vld [vmem:[%s3467_s23 + $0x10] sm:$0xff] }
 0x21b   : > { %2587 = vpow2.f32 %v2342_v23 }
 0x21c   : > { %2589 = vpow2.f32 %v2343_v26 }
 0x21e   : > { %v1621_v28 = vpop.f32.mrf.mxu2  ;;  %v1644_v30 = vpop.f32.mrf.mxu3 }
 0x21f   : > { %v1622_v34 = vadd.f32 %v1621_v28, %v3436_v31  ;;  %v1645_v12 = vadd.f32 %v1644_v30, %v3436_v31 }
 0x221   : > { %v2588_v32 = vpop.eup %2587  ;;  %v2350_v43 = vmul.f32 -1.442695, %v1622_v34  ;;  %v2351_v48 = vmul.f32 -1.442695, %v1645_v12 }
 0x222   : > { %v1572_v18 = vpop.f32.mrf.mxu0  ;;  %v1595_v24 = vpop.f32.mrf.mxu1  ;;  %v1805_v35 = vadd.f32 1.0, %v2588_v32 }
 0x223   : > { %v1573_v21 = vadd.f32 %v1572_v18, %v3430_v14  ;;  %v1596_v3 = vadd.f32 %v1595_v24, %v3430_v14  ;;  %v2590_v17 = vpop.eup %2589  ;;  %v1742_v24 = vld [vmem:[%s3467_s23 + $0x18] sm:$0xff] }
 0x224   : > { %v1806_v25 = vadd.f32 1.0, %v2590_v17  ;;  %v1858_v53 = vand.u32 2147483647, %v1805_v35  ;;  %v1860_v54 = vand.u32 2147483648, %v1805_v35  ;;  %vm1854_vm6 = vweird.f32 %v1805_v35 }
 0x225   : > { %v2340_v44 = vmul.f32 -1.442695, %v1573_v21  ;;  %v2341_v27 = vmul.f32 -1.442695, %v1596_v3 }
 0x226   : > { %v1873_v55 = vand.u32 2147483647, %v1806_v25  ;;  %v1875_v56 = vand.u32 2147483648, %v1806_v25  ;;  %vm3448_vm7 = vcmp.eq.f32.partialorder %v1858_v53, 8.507059e+37  ;;  %v1861_v0 = vor.u32 1.1754944e-38, %v1860_v54 }
 0x227   : > { %2591 = vpow2.f32 %v2340_v44  ;;  %vm1869_vm8 = vweird.f32 %v1806_v25 }
 0x228   : > { %2593 = vpow2.f32 %v2341_v27  ;;  %vm3453_vm9 = vcmp.eq.f32.partialorder %v1873_v55, 8.507059e+37  ;;  %v1876_v38 = vor.u32 1.1754944e-38, %v1875_v56 }
 0x229   : > { %2595 = vrcp.f32 %v1805_v35 }
 0x22a   : > { %v1575_v36 = vpop.f32.mrf.mxu0  ;;  %v1598_v60 = vpop.f32.mrf.mxu1  ;;  %2597 = vrcp.f32 %v1806_v25 }
 0x22b   : > { %v1576_v41 = vadd.f32 %v1575_v36, %v3436_v31  ;;  %v1599_v49 = vadd.f32 %v1598_v60, %v3436_v31  ;;  %2599 = vpow2.f32 %v2350_v43  ;;  %v1739_v43 = vld [vmem:[%s3467_s23] sm:$0xff] }
 0x22d   : > { %v2592_v37 = vpop.eup %2591  ;;  %v2348_v58 = vmul.f32 -1.442695, %v1576_v41  ;;  %v2349_v61 = vmul.f32 -1.442695, %v1599_v49 }
 0x22e   : > { %v2594_v39 = vpop.eup %2593  ;;  %v3441_v45 = vadd.f32 1.0, %v2592_v37 }
 0x22f   : > { %v3443_v46 = vadd.f32 1.0, %v2594_v39  ;;  %v2596_v57 = vpop.eup %2595 }
 0x230   : > { %2601 = vrcp.f32 %v3441_v45  ;;  %v2598_v62 = vpop.eup %2597  ;;  %v1850_v47 = vmul.f32 %v2596_v57, %v1805_v35  ;;  %vm1824_vm10 = vweird.f32 %v3441_v45  ;;  %vm1855_vm11 = vweird.f32 %v2596_v57 }
 0x231   : > { %2603 = vrcp.f32 %v3443_v46  ;;  %v1865_v19 = vmul.f32 %v2598_v62, %v1806_v25  ;;  %v2600_v29 = vpop.eup %2599  ;;  %v1828_v2 = vand.u32 2147483647, %v3441_v45  ;;  %v1830_v13 = vand.u32 2147483648, %v3441_v45  ;;  %vm3474_vm14 = vmor %vm1854_vm6, %vm1855_vm11 }
 0x232   : > { %2605 = vpow2.f32 %v2351_v48  ;;  %v1851_v20 = vsub.f32 1.0, %v1850_v47  ;;  %vm1870_vm12 = vweird.f32 %v2598_v62  ;;  %v3460_v4 = vadd.f32 1.0, %v2600_v29 }
 0x233   : > { %v1866_v52 = vsub.f32 1.0, %v1865_v19  ;;  %2607 = vpow2.f32 %v2348_v58  ;;  %vm1839_vm13 = vweird.f32 %v3443_v46  ;;  %v1843_v7 = vand.u32 2147483647, %v3443_v46  ;;  %vm3483_vm15 = vmor %vm1869_vm8, %vm1870_vm12 }
 0x234   : > { %v1852_v6 = vmul.f32 %v2596_v57, %v1851_v20  ;;  %v1845_v10 = vand.u32 2147483648, %v3443_v46  ;;  %2609 = vrcp.f32 %v3460_v4  ;;  %vm3493_vm2 = vcmp.eq.f32.partialorder %v1828_v2, 8.507059e+37 }
 0x235   : > { %v1867_v22 = vmul.f32 %v2598_v62, %v1866_v52  ;;  %2611 = vpow2.f32 %v2349_v61  ;;  %v1831_v30 = vor.u32 1.1754944e-38, %v1830_v13  ;;  %vm3526_vm5 = vcmp.eq.f32.partialorder %v1843_v7, 8.507059e+37 }
 0x236   : > { %v2602_v50 = vpop.eup %2601  ;;  %v1853_v42 = vadd.f32 %v2596_v57, %v1852_v6  ;;  %v1846_v36 = vor.u32 1.1754944e-38, %v1845_v10  ;;  %vm1974_vm6 = vweird.f32 %v3460_v4  ;;  %v1978_v48 = vand.u32 2147483647, %v3460_v4  ;;  %v1750_v10 = vld [vmem:[%s3467_s23 + $0x58] sm:$0xff] }
 0x237   : > { %v2604_v5 = vpop.eup %2603  ;;  %v1820_v51 = vmul.f32 %v2602_v50, %v3441_v45  ;;  %vm1825_vm0 = vweird.f32 %v2602_v50  ;;  %v1868_v40 = vadd.f32 %v2598_v62, %v1867_v22  ;;  %v1740_v45 = vld [vmem:[%s3467_s23 + $0x8] sm:$0xff]  ;;  %v1980_v56 = vand.u32 2147483648, %v3460_v4 }
 0x238   : > { %v2606_v8 = vpop.eup %2605  ;;  %v1835_v33 = vmul.f32 %v2604_v5, %v3443_v46  ;;  %vm1840_vm1 = vweird.f32 %v2604_v5  ;;  %v1857_v21 = vsel %vm3474_vm14, %v2596_v57, %v1853_v42  ;;  %vm3512_vm3 = vmor %vm1824_vm10, %vm1825_vm0  ;;  %vm1979_vm11 = vcmp.eq.f32.partialorder %v1978_v48, 8.507059e+37 }
 0x239   : > { %v1821_v15 = vsub.f32 1.0, %v1820_v51  ;;  %v3487_v59 = vadd.f32 1.0, %v2606_v8  ;;  %v2608_v26 = vpop.eup %2607  ;;  %v1862_v44 = vsel %vm3448_vm7, %v1861_v0, %v1857_v21  ;;  %v1872_v27 = vsel %vm3483_vm15, %v2598_v62, %v1868_v40  ;;  %vm3521_vm4 = vmor %vm1839_vm13, %vm1840_vm1  ;;  %v1753_v40 = vld [vmem:[%s3467_s23 + $0x70] sm:$0xff] }
 0x23a   : > { %v1836_v18 = vsub.f32 1.0, %v1835_v33  ;;  %v1877_v32 = vsel %vm3453_vm9, %v1876_v38, %v1872_v27  ;;  %v2061_v17 = vmul.f32 %v1862_v44, %v1741_v16  ;;  %v2610_v37 = vpop.eup %2609  ;;  %v1811_v49 = vadd.f32 1.0, %v2608_v26 }
 0x23b   : > { %v1822_v3 = vmul.f32 %v2602_v50, %v1821_v15  ;;  %2613 = vrcp.f32 %v3487_v59  ;;  %v2062_v25 = vmul.f32 %v1877_v32, %v1742_v24  ;;  %v1970_v46 = vmul.f32 %v2610_v37, %v3460_v4  ;;  %v2612_v53 = vpop.eup %2611 }
 0x23c   : > { %v1837_v34 = vmul.f32 %v2604_v5, %v1836_v18  ;;  %2077 = vst [vmem:[%s3503_s1 + $0x10] sm:$0xff] %v2061_v17  ;;  %vm1975_vm7 = vweird.f32 %v2610_v37  ;;  %2615 = vrcp.f32 %v1811_v49  ;;  %v1993_v19 = vand.u32 2147483647, %v3487_v59 }
 0x23d   : > { %v1823_v35 = vadd.f32 %v2602_v50, %v1822_v3  ;;  %2078 = vst [vmem:[%s3503_s1 + $0x18] sm:$0xff] %v2062_v25  ;;  %v1971_v62 = vsub.f32 1.0, %v1970_v46  ;;  %v1995_v1 = vand.u32 2147483648, %v3487_v59  ;;  %v1812_v38 = vadd.f32 1.0, %v2612_v53  ;;  %vm3553_vm8 = vmor %vm1974_vm6, %vm1975_vm7 }
 0x23e   : > { %v1838_v60 = vadd.f32 %v2604_v5, %v1837_v34  ;;  %v1981_v20 = vor.u32 1.1754944e-38, %v1980_v56  ;;  %vm1989_vm9 = vweird.f32 %v3487_v59  ;;  %vm1994_vm13 = vcmp.eq.f32.partialorder %v1993_v19, 8.507059e+37 }
 0x23f   : > { %v1827_v41 = vsel %vm3512_vm3, %v2602_v50, %v1823_v35  ;;  %v1972_v0 = vmul.f32 %v2610_v37, %v1971_v62  ;;  %2617 = vrcp.f32 %v1812_v38  ;;  %v1749_v50 = vld [vmem:[%s3467_s23 + $0x50] sm:$0xff]  ;;  %v1996_v51 = vor.u32 1.1754944e-38, %v1995_v1  ;;  %v1747_v35 = vld [vmem:[%s3467_s23 + $0x40] sm:$0xff] }
 0x240   : > { %v1832_v54 = vsel %vm3493_vm2, %v1831_v30, %v1827_v41  ;;  %v1842_v55 = vsel %vm3521_vm4, %v2604_v5, %v1838_v60  ;;  %v1948_v7 = vand.u32 2147483647, %v1811_v49  ;;  %v1950_v33 = vand.u32 2147483648, %v1811_v49 }
 0x241   : > { %v2614_v57 = vpop.eup %2613  ;;  %v2059_v58 = vmul.f32 %v1832_v54, %v1739_v43  ;;  %v1847_v61 = vsel %vm3526_vm5, %v1846_v36, %v1842_v55  ;;  %v1973_v13 = vadd.f32 %v2610_v37, %v1972_v0  ;;  %vm1944_vm14 = vweird.f32 %v1811_v49 }
 0x242   : > { %v2060_v47 = vmul.f32 %v1847_v61, %v1740_v45  ;;  %v1985_v63 = vmul.f32 %v2614_v57, %v3487_v59  ;;  %vm1990_vm10 = vweird.f32 %v2614_v57  ;;  %v2616_v5 = vpop.eup %2615  ;;  %vm3569_vm0 = vcmp.eq.f32.partialorder %v1948_v7, 8.507059e+37  ;;  %v1748_v45 = vld [vmem:[%s3467_s23 + $0x48] sm:$0xff] }
 0x243   : > { %2075 = vst [vmem:[%s3503_s1] sm:$0xff] %v2059_v58  ;;  %v1977_v6 = vsel %vm3553_vm8, %v2610_v37, %v1973_v13  ;;  %vm3561_vm12 = vmor %vm1989_vm9, %vm1990_vm10  ;;  %v1940_v22 = vmul.f32 %v2616_v5, %v1811_v49  ;;  %vm1945_vm15 = vweird.f32 %v2616_v5  ;;  %v1951_v23 = vor.u32 1.1754944e-38, %v1950_v33 }
 0x244   : > { %2076 = vst [vmem:[%s3503_s1 + $0x8] sm:$0xff] %v2060_v47  ;;  %v1986_v2 = vsub.f32 1.0, %v1985_v63  ;;  %v1982_v8 = vsel %vm1979_vm11, %v1981_v20, %v1977_v6  ;;  %vm3573_vm1 = vmor %vm1944_vm14, %vm1945_vm15  ;;  %vm1959_vm2 = vweird.f32 %v1812_v38  ;;  %v1965_v27 = vand.u32 2147483648, %v1812_v38 }
 0x245   : > { %v2069_v42 = vmul.f32 %v1982_v8, %v1749_v50  ;;  %v1941_v15 = vsub.f32 1.0, %v1940_v22  ;;  %v2618_v59 = vpop.eup %2617  ;;  %v1963_v17 = vand.u32 2147483647, %v1812_v38 }
 0x246   : > { %v1987_v52 = vmul.f32 %v2614_v57, %v1986_v2  ;;  %v1955_v26 = vmul.f32 %v2618_v59, %v1812_v38  ;;  %vm1960_vm3 = vweird.f32 %v2618_v59  ;;  %v1966_v60 = vor.u32 1.1754944e-38, %v1965_v27 }
 0x247   : > { %2085 = vst [vmem:[%s3503_s1 + $0x50] sm:$0xff] %v2069_v42  ;;  %v1942_v3 = vmul.f32 %v2616_v5, %v1941_v15  ;;  %vm1961_vm4 = vmor %vm1959_vm2, %vm1960_vm3  ;;  %vm1964_vm5 = vcmp.eq.f32.partialorder %v1963_v17, 8.507059e+37 }
 0x248   : > { %v1988_v9 = vadd.f32 %v2614_v57, %v1987_v52  ;;  %v1956_v32 = vsub.f32 1.0, %v1955_v26 }
 0x249   : > { %v1943_v34 = vadd.f32 %v2616_v5, %v1942_v3 }
 0x24a   : > { %v1992_v11 = vsel %vm3561_vm12, %v2614_v57, %v1988_v9  ;;  %v1957_v25 = vmul.f32 %v2618_v59, %v1956_v32 }
 0x24b   : > { %v1997_v16 = vsel %vm1994_vm13, %v1996_v51, %v1992_v11  ;;  %v1947_v37 = vsel %vm3573_vm1, %v2616_v5, %v1943_v34 }
 0x24c   : > { %v2070_v21 = vmul.f32 %v1997_v16, %v1750_v10  ;;  %v1952_v43 = vsel %vm3569_vm0, %v1951_v23, %v1947_v37  ;;  %v1958_v41 = vadd.f32 %v2618_v59, %v1957_v25 }
 0x24d   : > { %v2067_v39 = vmul.f32 %v1952_v43, %v1747_v35 }
 0x24e   : > { %2086 = vst [vmem:[%s3503_s1 + $0x58] sm:$0xff] %v2070_v21  ;;  %v1962_v49 = vsel %vm1961_vm4, %v2618_v59, %v1958_v41 }
 0x24f   : > { %2083 = vst [vmem:[%s3503_s1 + $0x40] sm:$0xff] %v2067_v39  ;;  %v1967_v55 = vsel %vm1964_vm5, %v1966_v60, %v1962_v49 }
 0x250   : > { %v2068_v58 = vmul.f32 %v1967_v55, %v1748_v45 }
 0x252   : > { %2084 = vst [vmem:[%s3503_s1 + $0x48] sm:$0xff] %v2068_v58 }
 0x26c   : > { %v1710_v18 = vpop.f32.mrf.mxu2  ;;  %v1733_v24 = vpop.f32.mrf.mxu3 }
 0x26d   : > { %v1711_v28 = vadd.f32 %v1710_v18, %v3430_v14  ;;  %v1734_v30 = vadd.f32 %v1733_v24, %v3430_v14 }
 0x26f   : > { %v2346_v12 = vmul.f32 -1.442695, %v1711_v28  ;;  %v2347_v36 = vmul.f32 -1.442695, %v1734_v30 }
 0x271   : > { %2619 = vpow2.f32 %v2346_v12 }
 0x272   : > { %2621 = vpow2.f32 %v2347_v36 }
 0x274   : > { %v1713_v46 = vpop.f32.mrf.mxu2  ;;  %v1736_v48 = vpop.f32.mrf.mxu3 }
 0x275   : > { %v1714_v53 = vadd.f32 %v1713_v46, %v3436_v31  ;;  %v1737_v54 = vadd.f32 %v1736_v48, %v3436_v31 }
 0x276   : > { %v1664_v56 = vpop.f32.mrf.mxu0  ;;  %v1687_v57 = vpop.f32.mrf.mxu1 }
 0x277   : > { %v1665_v61 = vadd.f32 %v1664_v56, %v3430_v14  ;;  %v1688_v62 = vadd.f32 %v1687_v57, %v3430_v14  ;;  %v2354_v47 = vmul.f32 -1.442695, %v1714_v53  ;;  %v2620_v63 = vpop.eup %2619  ;;  %v2355_v0 = vmul.f32 -1.442695, %v1737_v54  ;;  %v1745_v53 = vld [vmem:[%s3467_s23 + $0x30] sm:$0xff] }
 0x278   : > { %v2622_v19 = vpop.eup %2621  ;;  %v3593_v29 = vadd.f32 1.0, %v2620_v63 }
 0x279   : > { %v2344_v1 = vmul.f32 -1.442695, %v1665_v61  ;;  %v2345_v38 = vmul.f32 -1.442695, %v1688_v62  ;;  %2623 = vpow2.f32 %v2354_v47  ;;  %v3595_v20 = vadd.f32 1.0, %v2622_v19  ;;  %v1746_v61 = vld [vmem:[%s3467_s23 + $0x38] sm:$0xff] }
 0x27a   : > { %2625 = vpow2.f32 %v2355_v0  ;;  %v1918_v9 = vand.u32 2147483647, %v3593_v29  ;;  %v1920_v22 = vand.u32 2147483648, %v3593_v29  ;;  %vm1914_vm6 = vweird.f32 %v3593_v29 }
 0x27b   : > { %2627 = vpow2.f32 %v2344_v1  ;;  %v1933_v42 = vand.u32 2147483647, %v3595_v20  ;;  %vm1929_vm8 = vweird.f32 %v3595_v20 }
 0x27c   : > { %2629 = vpow2.f32 %v2345_v38  ;;  %vm3623_vm7 = vcmp.eq.f32.partialorder %v1918_v9, 8.507059e+37  ;;  %v1921_v18 = vor.u32 1.1754944e-38, %v1920_v22  ;;  %v1744_v9 = vld [vmem:[%s3467_s23 + $0x28] sm:$0xff] }
 0x27d   : > { %2631 = vrcp.f32 %v3593_v29  ;;  %vm3630_vm9 = vcmp.eq.f32.partialorder %v1933_v42, 8.507059e+37 }
 0x27e   : > { %2633 = vrcp.f32 %v3595_v20  ;;  %v1667_v14 = vpop.f32.mrf.mxu0  ;;  %v1690_v2 = vpop.f32.mrf.mxu1 }
 0x27f   : > { %v2624_v13 = vpop.eup %2623  ;;  %v1668_v50 = vadd.f32 %v1667_v14, %v3436_v31  ;;  %v1691_v5 = vadd.f32 %v1690_v2, %v3436_v31  ;;  %v1935_v31 = vand.u32 2147483648, %v3595_v20 }
 0x280   : > { %v2626_v52 = vpop.eup %2625  ;;  %v3601_v6 = vadd.f32 1.0, %v2624_v13 }
 0x281   : > { %v2628_v4 = vpop.eup %2627  ;;  %v2352_v51 = vmul.f32 -1.442695, %v1668_v50  ;;  %v2353_v15 = vmul.f32 -1.442695, %v1691_v5  ;;  %v3619_v59 = vadd.f32 1.0, %v2626_v52  ;;  %v1936_v3 = vor.u32 1.1754944e-38, %v1935_v31 }
 0x282   : > { %v2630_v7 = vpop.eup %2629  ;;  %v3603_v8 = vadd.f32 1.0, %v2628_v4  ;;  %2635 = vrcp.f32 %v3601_v6  ;;  %v2038_v23 = vand.u32 2147483647, %v3601_v6  ;;  %v2040_v28 = vand.u32 2147483648, %v3601_v6  ;;  %v1743_v52 = vld [vmem:[%s3467_s23 + $0x20] sm:$0xff] }
 0x283   : > { %v3608_v33 = vpop.eup %2631  ;;  %v3610_v10 = vadd.f32 1.0, %v2630_v7  ;;  %2637 = vpow2.f32 %v2352_v51  ;;  %vm2034_vm13 = vweird.f32 %v3601_v6  ;;  %vm2049_vm4 = vweird.f32 %v3619_v59 }
 0x284   : > { %v3614_v11 = vpop.eup %2633  ;;  %2639 = vrcp.f32 %v3603_v8  ;;  %v1910_v16 = vmul.f32 %v3608_v33, %v3593_v29  ;;  %v1888_v44 = vand.u32 2147483647, %v3603_v8  ;;  %vm1884_vm10 = vweird.f32 %v3603_v8 }
 0x285   : > { %2641 = vrcp.f32 %v3610_v10  ;;  %v1925_v24 = vmul.f32 %v3614_v11, %v3595_v20  ;;  %v1890_v34 = vand.u32 2147483648, %v3603_v8  ;;  %vm1899_vm11 = vweird.f32 %v3610_v10 }
 0x286   : > { %v1911_v27 = vsub.f32 1.0, %v1910_v16  ;;  %2643 = vpow2.f32 %v2353_v15  ;;  %vm1915_vm12 = vweird.f32 %v3608_v33  ;;  %vm1930_vm14 = vweird.f32 %v3614_v11 }
 0x287   : > { %v1926_v32 = vsub.f32 1.0, %v1925_v24  ;;  %2645 = vrcp.f32 %v3619_v59  ;;  %v1903_v41 = vand.u32 2147483647, %v3610_v10  ;;  %vm3657_vm15 = vcmp.eq.f32.partialorder %v1888_v44, 8.507059e+37  ;;  %vm1916_vm0 = vmor %vm1914_vm6, %vm1915_vm12 }
 0x288   : > { %v3635_v26 = vpop.eup %2635  ;;  %v1912_v12 = vmul.f32 %v3608_v33, %v1911_v27  ;;  %v1905_v49 = vand.u32 2147483648, %v3610_v10  ;;  %v1891_v56 = vor.u32 1.1754944e-38, %v1890_v34  ;;  %vm1931_vm1 = vmor %vm1929_vm8, %vm1930_vm14  ;;  %v2053_v34 = vand.u32 2147483647, %v3619_v59 }
 0x289   : > { %v2638_v30 = vpop.eup %2637  ;;  %v2030_v17 = vmul.f32 %v3635_v26, %v3601_v6  ;;  %v1927_v43 = vmul.f32 %v3614_v11, %v1926_v32  ;;  %vm3683_vm5 = vcmp.eq.f32.partialorder %v1903_v41, 8.507059e+37 }
 0x28a   : > { %v2640_v35 = vpop.eup %2639  ;;  %v3647_v36 = vadd.f32 1.0, %v2638_v30  ;;  %v1913_v45 = vadd.f32 %v3608_v33, %v1912_v12  ;;  %v1906_v22 = vor.u32 1.1754944e-38, %v1905_v49 }
 0x28b   : > { %v2642_v37 = vpop.eup %2641  ;;  %v1880_v25 = vmul.f32 %v2640_v35, %v3603_v8  ;;  %v2031_v60 = vsub.f32 1.0, %v2030_v17  ;;  %v1928_v54 = vadd.f32 %v3614_v11, %v1927_v43  ;;  %vm1885_vm2 = vweird.f32 %v2640_v35  ;;  %v1751_v17 = vld [vmem:[%s3467_s23 + $0x60] sm:$0xff]  ;;  %v1754_v43 = vld [vmem:[%s3467_s23 + $0x78] sm:$0xff] }
 0x28c   : > { %v1895_v39 = vmul.f32 %v2642_v37, %v3610_v10  ;;  %2647 = vrcp.f32 %v3647_v36  ;;  %v2644_v55 = vpop.eup %2643  ;;  %v1917_v58 = vsel %vm1916_vm0, %v3608_v33, %v1913_v45  ;;  %vm1900_vm3 = vweird.f32 %v2642_v37  ;;  %vm1886_vm6 = vmor %vm1884_vm10, %vm1885_vm2 }
 0x28d   : > { %v1881_v46 = vsub.f32 1.0, %v1880_v25  ;;  %v2032_v62 = vmul.f32 %v3635_v26, %v2031_v60  ;;  %v3675_v47 = vpop.eup %2645  ;;  %v1922_v0 = vsel %vm3623_vm7, %v1921_v18, %v1917_v58  ;;  %v1932_v19 = vsel %vm1931_vm1, %v3614_v11, %v1928_v54  ;;  %vm1901_vm8 = vmor %vm1899_vm11, %vm1900_vm3 }
 0x28e   : > { %v1896_v57 = vsub.f32 1.0, %v1895_v39  ;;  %v2065_v38 = vmul.f32 %v1922_v0, %v1745_v53  ;;  %v1937_v29 = vsel %vm3630_vm9, %v1936_v3, %v1932_v19  ;;  %v3687_v13 = vadd.f32 1.0, %v2644_v55  ;;  %v1752_v55 = vld [vmem:[%s3467_s23 + $0x68] sm:$0xff] }
 0x28f   : > { %v1882_v63 = vmul.f32 %v2640_v35, %v1881_v46  ;;  %v2066_v2 = vmul.f32 %v1937_v29, %v1746_v61  ;;  %v2033_v4 = vadd.f32 %v3635_v26, %v2032_v62  ;;  %vm2035_vm7 = vweird.f32 %v3635_v26 }
 0x290   : > { %v1897_v1 = vmul.f32 %v2642_v37, %v1896_v57  ;;  %2081 = vst [vmem:[%s3503_s1 + $0x30] sm:$0xff] %v2065_v38  ;;  %v2045_v51 = vmul.f32 %v3675_v47, %v3619_v59  ;;  %2649 = vrcp.f32 %v3687_v13  ;;  %vm3708_vm9 = vcmp.eq.f32.partialorder %v2038_v23, 8.507059e+37  ;;  %vm2036_vm10 = vmor %vm2034_vm13, %vm2035_vm7 }
 0x291   : > { %v1883_v20 = vadd.f32 %v2640_v35, %v1882_v63  ;;  %2082 = vst [vmem:[%s3503_s1 + $0x38] sm:$0xff] %v2066_v2  ;;  %v2041_v10 = vor.u32 1.1754944e-38, %v2040_v28  ;;  %v2055_v18 = vand.u32 2147483648, %v3619_v59  ;;  %v2010_v21 = vand.u32 2147483648, %v3647_v36 }
 0x292   : > { %v2648_v50 = vpop.eup %2647  ;;  %v1898_v5 = vadd.f32 %v2642_v37, %v1897_v1  ;;  %v2037_v3 = vsel %vm2036_vm10, %v3635_v26, %v2033_v4  ;;  %v2046_v23 = vsub.f32 1.0, %v2045_v51  ;;  %v2008_v27 = vand.u32 2147483647, %v3647_v36 }
 0x293   : > { %v1887_v7 = vsel %vm1886_vm6, %v2640_v35, %v1883_v20  ;;  %v2000_v8 = vmul.f32 %v2648_v50, %v3647_v36  ;;  %vm2005_vm11 = vweird.f32 %v2648_v50  ;;  %v2042_v28 = vsel %vm3708_vm9, %v2041_v10, %v2037_v3 }
 0x294   : > { %v1892_v33 = vsel %vm3657_vm15, %v1891_v56, %v1887_v7  ;;  %v1902_v42 = vsel %vm1901_vm8, %v2642_v37, %v1898_v5  ;;  %v2073_v6 = vmul.f32 %v2042_v28, %v1753_v40  ;;  %v2047_v30 = vmul.f32 %v3675_v47, %v2046_v23 }
 0x295   : > { %v2063_v11 = vmul.f32 %v1892_v33, %v1743_v52  ;;  %v1907_v15 = vsel %vm3683_vm5, %v1906_v22, %v1902_v42  ;;  %v2001_v16 = vsub.f32 1.0, %v2000_v8  ;;  %vm2050_vm12 = vweird.f32 %v3675_v47 }
 0x296   : > { %v2064_v24 = vmul.f32 %v1907_v15, %v1744_v9  ;;  %v2650_v26 = vpop.eup %2649  ;;  %vm2004_vm13 = vweird.f32 %v3647_v36  ;;  %v2011_v35 = vor.u32 1.1754944e-38, %v2010_v21  ;;  %2089 = vst [vmem:[%s3503_s1 + $0x70] sm:$0xff] %v2073_v6  ;;  %v2048_v37 = vadd.f32 %v3675_v47, %v2047_v30  ;;  %vm2051_vm0 = vmor %vm2049_vm4, %vm2050_vm12 }
 0x297   : > { %2079 = vst [vmem:[%s3503_s1 + $0x20] sm:$0xff] %v2063_v11  ;;  %v2002_v44 = vmul.f32 %v2648_v50, %v2001_v16  ;;  %vm2006_vm14 = vmor %vm2004_vm13, %vm2005_vm11  ;;  %v2015_v12 = vmul.f32 %v2650_v26, %v3687_v13  ;;  %vm2009_vm15 = vcmp.eq.f32.partialorder %v2008_v27, 8.507059e+37  ;;  %v2056_v60 = vor.u32 1.1754944e-38, %v2055_v18 }
 0x298   : > { %2080 = vst [vmem:[%s3503_s1 + $0x28] sm:$0xff] %v2064_v24  ;;  %v2052_v41 = vsel %vm2051_vm0, %v3675_v47, %v2048_v37  ;;  %vm2054_vm1 = vcmp.eq.f32.partialorder %v2053_v34, 8.507059e+37  ;;  %v2025_v46 = vand.u32 2147483648, %v3687_v13  ;;  %vm2020_vm2 = vweird.f32 %v2650_v26 }
 0x299   : > { %v2003_v32 = vadd.f32 %v2648_v50, %v2002_v44  ;;  %v2016_v36 = vsub.f32 1.0, %v2015_v12  ;;  %v2057_v48 = vsel %vm2054_vm1, %v2056_v60, %v2052_v41  ;;  %v2023_v53 = vand.u32 2147483647, %v3687_v13 }
 0x29a   : > { %v2074_v54 = vmul.f32 %v2057_v48, %v1754_v43  ;;  %vm2019_vm3 = vweird.f32 %v3687_v13  ;;  %v2026_v56 = vor.u32 1.1754944e-38, %v2025_v46 }
 0x29b   : > { %v2007_v25 = vsel %vm2006_vm14, %v2648_v50, %v2003_v32  ;;  %v2017_v49 = vmul.f32 %v2650_v26, %v2016_v36  ;;  %vm2021_vm4 = vmor %vm2019_vm3, %vm2020_vm2  ;;  %vm2024_vm5 = vcmp.eq.f32.partialorder %v2023_v53, 8.507059e+37 }
 0x29c   : > { %v2012_v39 = vsel %vm2009_vm15, %v2011_v35, %v2007_v25  ;;  %2090 = vst [vmem:[%s3503_s1 + $0x78] sm:$0xff] %v2074_v54 }
 0x29d   : > { %v2071_v45 = vmul.f32 %v2012_v39, %v1751_v17  ;;  %v2018_v59 = vadd.f32 %v2650_v26, %v2017_v49 }
 0x29f   : > { %2087 = vst [vmem:[%s3503_s1 + $0x60] sm:$0xff] %v2071_v45  ;;  %v2022_v57 = vsel %vm2021_vm4, %v2650_v26, %v2018_v59 }
 0x2a0   : > { %v2027_v58 = vsel %vm2024_vm5, %v2026_v56, %v2022_v57 }
 0x2a1   : > { %v2072_v61 = vmul.f32 %v2027_v58, %v1752_v55 }
 0x2a3   : > { %2088 = vst [vmem:[%s3503_s1 + $0x68] sm:$0xff] %v2072_v61 }
 0x2a4 PF: > { %s18_s29 = sadd.s32 1, %s2673_s29   ;;  %s3819_s27 = smov %s2669_s28 }
 0x2a5   : > { %p15_p5 = scmp.ge.s32.totalorder %s18_s29, 4   ;;  %s3820_s28 = smov %s3822_s30 }
 0x2a7   :  { %17 = sbr.rel (!%p15_p5) target bundleno = 6 (0x6), region = 99 }

</bundles_post_ra>
